<compile_context>
chip_gen: v5e
topology: v5e:2x2
jax: 0.10.0
libtpu: 0.0.40
codegen_flags: <defaults>
</compile_context>

<pallas_src>
import functools

import jax
import jax.numpy as jnp
import numpy as np
from jax.experimental import pallas as pl
from jax.experimental.pallas import tpu as pltpu


# ---------------------------------------------------------------------------
# Fused kernel: QKV conv -> attention over V (batched over T) -> output conv
# ---------------------------------------------------------------------------
def _vattn_kernel(cq, c1, V, T, Cin, x_ref, wqkv_ref, wout_ref, o_ref,
                  xp_scr, avp_scr):
    """One batch element per grid step.  In-kernel layouts (channels-last,
    time-major spatial):

      x_ref    : (1, T, V, Cin)     bf16  input slice
      wqkv_ref : (9, Cin, 2cq+c1)   bf16  fused q/k/v 3x3 weights, tap = kw*3+kh
      wout_ref : (9, c1, Cin)       bf16  output 3x3 weights,      tap = kw*3+kh
      o_ref    : (1, T, V, Cin)     f32   conv(attention) output
      xp_scr   : (T+2, V+2, Cin)    bf16  zero-padded x    (VMEM scratch)
      avp_scr  : (T+2, V+2, c1)     bf16  zero-padded attn (VMEM scratch)
    """
    Cqkv = 2 * cq + c1

    # ---- stage 1: fused Q/K/V 3x3 conv as 9 shifted matmuls (f32 accum) ----
    xp_scr[...] = jnp.zeros_like(xp_scr)
    xp_scr[pl.ds(1, T), pl.ds(1, V), :] = x_ref[0]
    acc = jnp.zeros((T * V, Cqkv), jnp.float32)
    for kw in range(3):
        for kh in range(3):
            tap = xp_scr[pl.ds(kw, T), pl.ds(kh, V), :].reshape(T * V, Cin)
            acc = acc + jnp.dot(tap, wqkv_ref[kw * 3 + kh],
                                preferred_element_type=jnp.float32)
    qkv = acc.reshape(T, V, Cqkv)                        # (T, V, 2cq+c1) f32

    # ---- stage 2: attention over the V axis, batched over the T axis -------
    q = qkv[:, :, :cq]
    k = qkv[:, :, cq:2 * cq]
    v = qkv[:, :, 2 * cq:]
    s = jnp.einsum("tqd,tkd->tqk", q, k,
                   preferred_element_type=jnp.float32)   # (T, V, V) f32
    m = jnp.max(s, axis=-1, keepdims=True)
    p = jnp.exp(s - m)
    l = jnp.sum(p, axis=-1, keepdims=True)
    av = jnp.einsum("tqk,tkd->tqd", p, v,
                    preferred_element_type=jnp.float32)  # (T, V, c1) f32
    av = av * pl.reciprocal(l, approx=True)              # EUP, not a VPU divide

    # ---- stage 3: output 3x3 conv, same 9-tap scheme ------------------------
    avp_scr[...] = jnp.zeros_like(avp_scr)
    avp_scr[pl.ds(1, T), pl.ds(1, V), :] = av.astype(avp_scr.dtype)
    acc2 = jnp.zeros((T * V, Cin), jnp.float32)
    for kw in range(3):
        for kh in range(3):
            tap = avp_scr[pl.ds(kw, T), pl.ds(kh, V), :].reshape(T * V, c1)
            acc2 = acc2 + jnp.dot(tap, wout_ref[kw * 3 + kh],
                                  preferred_element_type=jnp.float32)
    o_ref[0] = acc2.reshape(T, V, Cin).astype(o_ref.dtype)


# ---------------------------------------------------------------------------
# Wrapper
# ---------------------------------------------------------------------------
def _prep_conv_weight(w_oihw):
    """(Cout, Cin, KH, KW) -> (KW*3 + KH, Cin, Cout) bf16.

    Tap index kw*3+kh pairs with the xp[kw:kw+T, kh:kh+V, :] shifted view used
    in the kernel (the in-kernel spatial layout is (T, V), i.e. width-major).
    """
    cout, cin = w_oihw.shape[0], w_oihw.shape[1]
    return (jnp.transpose(w_oihw, (3, 2, 1, 0))          # (KW, KH, Cin, Cout)
            .reshape(9, cin, cout)
            .astype(jnp.bfloat16))


def vattn_forward(x, params):
    B, Cin, V, T = x.shape
    cq = params["query_w"].shape[0]        # Cin // 8
    c1 = params["value_w"].shape[0]        # Cin // 2
    Cqkv = 2 * cq + c1

    # Fused Q/K/V weight slab (q | k | v along Cout) + output-conv weights.
    w_qkv = _prep_conv_weight(jnp.concatenate(
        [params["query_w"], params["key_w"], params["value_w"]], axis=0))
    w_out = _prep_conv_weight(params["attn_value_w"])

    # NCHW (B, Cin, V, T) -> channels-last, time-major (B, T, V, Cin), bf16.
    x_tvc = jnp.transpose(x, (0, 3, 2, 1)).astype(jnp.bfloat16)

    cost = pl.CostEstimate(
        flops=int(B * (2 * T * V * 9 * Cin * Cqkv
                       + 2 * T * V * V * (cq + c1)
                       + 2 * T * V * 9 * c1 * Cin)),
        transcendentals=int(B * (T * V * V + T * V)),
        bytes_accessed=int(B * T * V * Cin * (2 + 4)
                           + 9 * Cin * Cqkv * 2 + 9 * c1 * Cin * 2),
    )

    kernel = functools.partial(_vattn_kernel, cq, c1, V, T, Cin)
    y = pl.pallas_call(
        kernel,
        out_shape=jax.ShapeDtypeStruct((B, T, V, Cin), jnp.float32),
        grid_spec=pltpu.PrefetchScalarGridSpec(
            num_scalar_prefetch=0,
            grid=(B,),
            in_specs=[
                pl.BlockSpec((1, T, V, Cin), lambda b: (b, 0, 0, 0)),
                pl.BlockSpec((9, Cin, Cqkv), lambda b: (0, 0, 0)),
                pl.BlockSpec((9, c1, Cin), lambda b: (0, 0, 0)),
            ],
            out_specs=pl.BlockSpec((1, T, V, Cin), lambda b: (b, 0, 0, 0)),
            scratch_shapes=[
                pltpu.VMEM((T + 2, V + 2, Cin), jnp.bfloat16),
                pltpu.VMEM((T + 2, V + 2, c1), jnp.bfloat16),
            ],
        ),
        compiler_params=pltpu.CompilerParams(
            dimension_semantics=("parallel",)),
        cost_estimate=cost,
    )(x_tvc, w_qkv, w_out)

    # (B, T, V, Cin) -> NCHW (B, Cin, V, T); residual add in f32.
    out = jnp.transpose(y, (0, 3, 2, 1))
    return x + params["sigma"] * out


# ---------------------------------------------------------------------------
# Pure-JAX f32 reference (validation only)
# ---------------------------------------------------------------------------
def _ref_conv3x3(x, w):
    return jax.lax.conv_general_dilated(
        x, w, window_strides=(1, 1), padding="SAME",
        dimension_numbers=("NCHW", "OIHW", "NCHW"))


def vattn_reference(x, params):
    B, Cin, H, W = x.shape
    V, T = H, W
    q = _ref_conv3x3(x, params["query_w"])
    k = _ref_conv3x3(x, params["key_w"])
    val = _ref_conv3x3(x, params["value_w"])
    C, C1 = q.shape[1], val.shape[1]
    qp = q.transpose(0, 3, 2, 1).reshape(B * T, V, C)
    kp = k.transpose(0, 3, 2, 1).reshape(B * T, V, C)
    vp = val.transpose(0, 3, 2, 1).reshape(B * T, V, C1)
    attn = jnp.einsum("bvc,bwc->bvw", qp, kp)
    attn = jax.nn.softmax(attn, axis=2)
    av = jnp.einsum("bvw,bwc->bvc", attn, vp)
    av = av.reshape(B, T, V, C1).transpose(0, 3, 2, 1)
    out = _ref_conv3x3(av, params["attn_value_w"])
    return x + params["sigma"] * out


if __name__ == "__main__":
    key = jax.random.PRNGKey(0)
    k1, k2, k3, k4, kx = jax.random.split(key, 5)

    Cin, B, H, W = 16, 2, 16, 16
    params = {
        "query_w": 0.1 * jax.random.normal(k1, (Cin // 8, Cin, 3, 3), jnp.float32),
        "key_w": 0.1 * jax.random.normal(k2, (Cin // 8, Cin, 3, 3), jnp.float32),
        "value_w": 0.1 * jax.random.normal(k3, (Cin // 2, Cin, 3, 3), jnp.float32),
        "attn_value_w": 0.1 * jax.random.normal(k4, (Cin, Cin // 2, 3, 3), jnp.float32),
        # nn.Parameter(torch.zeros(1)) -> sigma initialized to zero
        "sigma": jnp.zeros((1,), jnp.float32),
    }
    x = jax.random.normal(kx, (B, Cin, H, W), jnp.float32)

    fwd = jax.jit(vattn_forward)

    # Validation run with a nonzero sigma so the attention branch contributes.
    # Tolerance reflects bf16 MXU conv operands (f32 accumulation, f32 softmax)
    # vs the f32 reference.
    test_params = dict(params, sigma=jnp.full((1,), 0.5, jnp.float32))
    got = jax.block_until_ready(fwd(x, test_params))
    want = jax.block_until_ready(jax.jit(vattn_reference)(x, test_params))
    np.testing.assert_allclose(np.asarray(got), np.asarray(want),
                               rtol=5e-2, atol=5e-2)

    # Faithful run with the module's actual initialization (sigma = 0).
    out = jax.block_until_ready(fwd(x, params))
    assert out.shape == x.shape and out.dtype == x.dtype

    print("KERNEL_OK")
</pallas_src>

<mosaic_0001>
module attributes {stable_mosaic.version = 11 : i64} {
  func.func @_vattn_kernel(%arg0: i32, %arg1: memref<1x16x16x16xbf16, #tpu.memory_space<vmem>>, %arg2: memref<9x16x12xbf16, #tpu.memory_space<vmem>>, %arg3: memref<9x8x16xbf16, #tpu.memory_space<vmem>>, %arg4: memref<1x16x16x16xf32, #tpu.memory_space<vmem>>, %arg5: memref<18x18x16xbf16, #tpu.memory_space<vmem>>, %arg6: memref<18x18x8xbf16, #tpu.memory_space<vmem>>) attributes {dimension_semantics = [#tpu.dimension_semantics<parallel>], iteration_bounds = array<i64: 2>, scalar_prefetch = 0 : i64, scratch_operands = 2 : i64, tpu.core_type = #tpu.core_type<tc>, window_params = [{transform_indices = @transform_0, window_bounds = array<i64: 1, 16, 16, 16>}, {pipeline_mode = #tpu.pipeline_mode<synchronous>, transform_indices = @transform_1, window_bounds = array<i64: 9, 16, 12>}, {pipeline_mode = #tpu.pipeline_mode<synchronous>, transform_indices = @transform_2, window_bounds = array<i64: 9, 8, 16>}, {transform_indices = @transform_3, window_bounds = array<i64: 1, 16, 16, 16>}]} {
    %cst = arith.constant 0.000000e+00 : bf16
    %0 = vector.broadcast %cst : bf16 to vector<18x18x16xbf16>
    %c0 = arith.constant 0 : index
    %c0_0 = arith.constant 0 : index
    %c0_1 = arith.constant 0 : index
    %1 = vector.load %arg5[%c0, %c0_0, %c0_1] : memref<18x18x16xbf16, #tpu.memory_space<vmem>>, vector<18x18x16xbf16>
    tpu.vector_store %arg5[%c0, %c0_0, %c0_1], %0 {strides = array<i32>} : memref<18x18x16xbf16, #tpu.memory_space<vmem>>, vector<18x18x16xbf16>,
    %c0_2 = arith.constant 0 : index
    %c0_3 = arith.constant 0 : index
    %c0_4 = arith.constant 0 : index
    %c0_5 = arith.constant 0 : index
    %2 = vector.load %arg1[%c0_2, %c0_3, %c0_4, %c0_5] : memref<1x16x16x16xbf16, #tpu.memory_space<vmem>>, vector<1x16x16x16xbf16>
    %3 = vector.shape_cast %2 : vector<1x16x16x16xbf16> to vector<16x16x16xbf16>
    %c1 = arith.constant 1 : index
    %c1_6 = arith.constant 1 : index
    %c0_7 = arith.constant 0 : index
    %4 = vector.load %arg5[%c1, %c1_6, %c0_7] : memref<18x18x16xbf16, #tpu.memory_space<vmem>>, vector<16x16x16xbf16>
    tpu.vector_store %arg5[%c1, %c1_6, %c0_7], %3 {strides = array<i32>} : memref<18x18x16xbf16, #tpu.memory_space<vmem>>, vector<16x16x16xbf16>,
    %cst_8 = arith.constant 0.000000e+00 : f32
    %5 = vector.broadcast %cst_8 : f32 to vector<256x12xf32>
    %c0_9 = arith.constant 0 : index
    %c0_10 = arith.constant 0 : index
    %c0_11 = arith.constant 0 : index
    %6 = vector.load %arg5[%c0_9, %c0_10, %c0_11] : memref<18x18x16xbf16, #tpu.memory_space<vmem>>, vector<16x16x16xbf16>
    %7 = vector.shape_cast %6 : vector<16x16x16xbf16> to vector<256x16xbf16>
    %c0_12 = arith.constant 0 : index
    %c0_13 = arith.constant 0 : index
    %c0_14 = arith.constant 0 : index
    %8 = vector.load %arg2[%c0_12, %c0_13, %c0_14] : memref<9x16x12xbf16, #tpu.memory_space<vmem>>, vector<1x16x12xbf16>
    %9 = vector.shape_cast %8 : vector<1x16x12xbf16> to vector<16x12xbf16>
    %cst_15 = arith.constant dense<0.000000e+00> : vector<256x12xf32>
    %10 = tpu.matmul %7, %9, %cst_15 {dimension_numbers = #tpu.dot_dimension_numbers<[1], [0], [0], [1], [0, 0, 1, 1], [], []>} : vector<256x16xbf16>, vector<16x12xbf16>, vector<256x12xf32> -> vector<256x12xf32>
    %11 = arith.addf %5, %10 : vector<256x12xf32>
    %c0_16 = arith.constant 0 : index
    %c1_17 = arith.constant 1 : index
    %c0_18 = arith.constant 0 : index
    %12 = vector.load %arg5[%c0_16, %c1_17, %c0_18] : memref<18x18x16xbf16, #tpu.memory_space<vmem>>, vector<16x16x16xbf16>
    %13 = vector.shape_cast %12 : vector<16x16x16xbf16> to vector<256x16xbf16>
    %c1_19 = arith.constant 1 : index
    %c0_20 = arith.constant 0 : index
    %c0_21 = arith.constant 0 : index
    %14 = vector.load %arg2[%c1_19, %c0_20, %c0_21] : memref<9x16x12xbf16, #tpu.memory_space<vmem>>, vector<1x16x12xbf16>
    %15 = vector.shape_cast %14 : vector<1x16x12xbf16> to vector<16x12xbf16>
    %cst_22 = arith.constant dense<0.000000e+00> : vector<256x12xf32>
    %16 = tpu.matmul %13, %15, %cst_22 {dimension_numbers = #tpu.dot_dimension_numbers<[1], [0], [0], [1], [0, 0, 1, 1], [], []>} : vector<256x16xbf16>, vector<16x12xbf16>, vector<256x12xf32> -> vector<256x12xf32>
    %17 = arith.addf %11, %16 : vector<256x12xf32>
    %c0_23 = arith.constant 0 : index
    %c2 = arith.constant 2 : index
    %c0_24 = arith.constant 0 : index
    %18 = vector.load %arg5[%c0_23, %c2, %c0_24] : memref<18x18x16xbf16, #tpu.memory_space<vmem>>, vector<16x16x16xbf16>
    %19 = vector.shape_cast %18 : vector<16x16x16xbf16> to vector<256x16xbf16>
    %c2_25 = arith.constant 2 : index
    %c0_26 = arith.constant 0 : index
    %c0_27 = arith.constant 0 : index
    %20 = vector.load %arg2[%c2_25, %c0_26, %c0_27] : memref<9x16x12xbf16, #tpu.memory_space<vmem>>, vector<1x16x12xbf16>
    %21 = vector.shape_cast %20 : vector<1x16x12xbf16> to vector<16x12xbf16>
    %cst_28 = arith.constant dense<0.000000e+00> : vector<256x12xf32>
    %22 = tpu.matmul %19, %21, %cst_28 {dimension_numbers = #tpu.dot_dimension_numbers<[1], [0], [0], [1], [0, 0, 1, 1], [], []>} : vector<256x16xbf16>, vector<16x12xbf16>, vector<256x12xf32> -> vector<256x12xf32>
    %23 = arith.addf %17, %22 : vector<256x12xf32>
    %c1_29 = arith.constant 1 : index
    %c0_30 = arith.constant 0 : index
    %c0_31 = arith.constant 0 : index
    %24 = vector.load %arg5[%c1_29, %c0_30, %c0_31] : memref<18x18x16xbf16, #tpu.memory_space<vmem>>, vector<16x16x16xbf16>
    %25 = vector.shape_cast %24 : vector<16x16x16xbf16> to vector<256x16xbf16>
    %c3 = arith.constant 3 : index
    %c0_32 = arith.constant 0 : index
    %c0_33 = arith.constant 0 : index
    %26 = vector.load %arg2[%c3, %c0_32, %c0_33] : memref<9x16x12xbf16, #tpu.memory_space<vmem>>, vector<1x16x12xbf16>
    %27 = vector.shape_cast %26 : vector<1x16x12xbf16> to vector<16x12xbf16>
    %cst_34 = arith.constant dense<0.000000e+00> : vector<256x12xf32>
    %28 = tpu.matmul %25, %27, %cst_34 {dimension_numbers = #tpu.dot_dimension_numbers<[1], [0], [0], [1], [0, 0, 1, 1], [], []>} : vector<256x16xbf16>, vector<16x12xbf16>, vector<256x12xf32> -> vector<256x12xf32>
    %29 = arith.addf %23, %28 : vector<256x12xf32>
    %c1_35 = arith.constant 1 : index
    %c1_36 = arith.constant 1 : index
    %c0_37 = arith.constant 0 : index
    %30 = vector.load %arg5[%c1_35, %c1_36, %c0_37] : memref<18x18x16xbf16, #tpu.memory_space<vmem>>, vector<16x16x16xbf16>
    %31 = vector.shape_cast %30 : vector<16x16x16xbf16> to vector<256x16xbf16>
    %c4 = arith.constant 4 : index
    %c0_38 = arith.constant 0 : index
    %c0_39 = arith.constant 0 : index
    %32 = vector.load %arg2[%c4, %c0_38, %c0_39] : memref<9x16x12xbf16, #tpu.memory_space<vmem>>, vector<1x16x12xbf16>
    %33 = vector.shape_cast %32 : vector<1x16x12xbf16> to vector<16x12xbf16>
    %cst_40 = arith.constant dense<0.000000e+00> : vector<256x12xf32>
    %34 = tpu.matmul %31, %33, %cst_40 {dimension_numbers = #tpu.dot_dimension_numbers<[1], [0], [0], [1], [0, 0, 1, 1], [], []>} : vector<256x16xbf16>, vector<16x12xbf16>, vector<256x12xf32> -> vector<256x12xf32>
    %35 = arith.addf %29, %34 : vector<256x12xf32>
    %c1_41 = arith.constant 1 : index
    %c2_42 = arith.constant 2 : index
    %c0_43 = arith.constant 0 : index
    %36 = vector.load %arg5[%c1_41, %c2_42, %c0_43] : memref<18x18x16xbf16, #tpu.memory_space<vmem>>, vector<16x16x16xbf16>
    %37 = vector.shape_cast %36 : vector<16x16x16xbf16> to vector<256x16xbf16>
    %c5 = arith.constant 5 : index
    %c0_44 = arith.constant 0 : index
    %c0_45 = arith.constant 0 : index
    %38 = vector.load %arg2[%c5, %c0_44, %c0_45] : memref<9x16x12xbf16, #tpu.memory_space<vmem>>, vector<1x16x12xbf16>
    %39 = vector.shape_cast %38 : vector<1x16x12xbf16> to vector<16x12xbf16>
    %cst_46 = arith.constant dense<0.000000e+00> : vector<256x12xf32>
    %40 = tpu.matmul %37, %39, %cst_46 {dimension_numbers = #tpu.dot_dimension_numbers<[1], [0], [0], [1], [0, 0, 1, 1], [], []>} : vector<256x16xbf16>, vector<16x12xbf16>, vector<256x12xf32> -> vector<256x12xf32>
    %41 = arith.addf %35, %40 : vector<256x12xf32>
    %c2_47 = arith.constant 2 : index
    %c0_48 = arith.constant 0 : index
    %c0_49 = arith.constant 0 : index
    %42 = vector.load %arg5[%c2_47, %c0_48, %c0_49] : memref<18x18x16xbf16, #tpu.memory_space<vmem>>, vector<16x16x16xbf16>
    %43 = vector.shape_cast %42 : vector<16x16x16xbf16> to vector<256x16xbf16>
    %c6 = arith.constant 6 : index
    %c0_50 = arith.constant 0 : index
    %c0_51 = arith.constant 0 : index
    %44 = vector.load %arg2[%c6, %c0_50, %c0_51] : memref<9x16x12xbf16, #tpu.memory_space<vmem>>, vector<1x16x12xbf16>
    %45 = vector.shape_cast %44 : vector<1x16x12xbf16> to vector<16x12xbf16>
    %cst_52 = arith.constant dense<0.000000e+00> : vector<256x12xf32>
    %46 = tpu.matmul %43, %45, %cst_52 {dimension_numbers = #tpu.dot_dimension_numbers<[1], [0], [0], [1], [0, 0, 1, 1], [], []>} : vector<256x16xbf16>, vector<16x12xbf16>, vector<256x12xf32> -> vector<256x12xf32>
    %47 = arith.addf %41, %46 : vector<256x12xf32>
    %c2_53 = arith.constant 2 : index
    %c1_54 = arith.constant 1 : index
    %c0_55 = arith.constant 0 : index
    %48 = vector.load %arg5[%c2_53, %c1_54, %c0_55] : memref<18x18x16xbf16, #tpu.memory_space<vmem>>, vector<16x16x16xbf16>
    %49 = vector.shape_cast %48 : vector<16x16x16xbf16> to vector<256x16xbf16>
    %c7 = arith.constant 7 : index
    %c0_56 = arith.constant 0 : index
    %c0_57 = arith.constant 0 : index
    %50 = vector.load %arg2[%c7, %c0_56, %c0_57] : memref<9x16x12xbf16, #tpu.memory_space<vmem>>, vector<1x16x12xbf16>
    %51 = vector.shape_cast %50 : vector<1x16x12xbf16> to vector<16x12xbf16>
    %cst_58 = arith.constant dense<0.000000e+00> : vector<256x12xf32>
    %52 = tpu.matmul %49, %51, %cst_58 {dimension_numbers = #tpu.dot_dimension_numbers<[1], [0], [0], [1], [0, 0, 1, 1], [], []>} : vector<256x16xbf16>, vector<16x12xbf16>, vector<256x12xf32> -> vector<256x12xf32>
    %53 = arith.addf %47, %52 : vector<256x12xf32>
    %c2_59 = arith.constant 2 : index
    %c2_60 = arith.constant 2 : index
    %c0_61 = arith.constant 0 : index
    %54 = vector.load %arg5[%c2_59, %c2_60, %c0_61] : memref<18x18x16xbf16, #tpu.memory_space<vmem>>, vector<16x16x16xbf16>
    %55 = vector.shape_cast %54 : vector<16x16x16xbf16> to vector<256x16xbf16>
    %c8 = arith.constant 8 : index
    %c0_62 = arith.constant 0 : index
    %c0_63 = arith.constant 0 : index
    %56 = vector.load %arg2[%c8, %c0_62, %c0_63] : memref<9x16x12xbf16, #tpu.memory_space<vmem>>, vector<1x16x12xbf16>
    %57 = vector.shape_cast %56 : vector<1x16x12xbf16> to vector<16x12xbf16>
    %cst_64 = arith.constant dense<0.000000e+00> : vector<256x12xf32>
    %58 = tpu.matmul %55, %57, %cst_64 {dimension_numbers = #tpu.dot_dimension_numbers<[1], [0], [0], [1], [0, 0, 1, 1], [], []>} : vector<256x16xbf16>, vector<16x12xbf16>, vector<256x12xf32> -> vector<256x12xf32>
    %59 = arith.addf %53, %58 : vector<256x12xf32>
    %60 = vector.shape_cast %59 : vector<256x12xf32> to vector<16x16x12xf32>
    %61 = vector.extract_strided_slice %60 {offsets = [0, 0, 0], sizes = [16, 16, 2], strides = [1, 1, 1]} : vector<16x16x12xf32> to vector<16x16x2xf32>
    %62 = vector.extract_strided_slice %60 {offsets = [0, 0, 2], sizes = [16, 16, 2], strides = [1, 1, 1]} : vector<16x16x12xf32> to vector<16x16x2xf32>
    %63 = vector.extract_strided_slice %60 {offsets = [0, 0, 4], sizes = [16, 16, 8], strides = [1, 1, 1]} : vector<16x16x12xf32> to vector<16x16x8xf32>
    "tpu.trace_start"() <{level = 10 : i32, message = "tqd,tkd->tqk"}> : () -> ()
    %cst_65 = arith.constant dense<0.000000e+00> : vector<16x16x16xf32>
    %64 = tpu.matmul %61, %62, %cst_65 {dimension_numbers = #tpu.dot_dimension_numbers<[2], [2], [1], [1], [0, 0, 0, 1, 1, 1], [0], [0]>} : vector<16x16x2xf32>, vector<16x16x2xf32>, vector<16x16x16xf32> -> vector<16x16x16xf32>
    "tpu.trace_stop"() : () -> ()
    %cst_66 = arith.constant dense<0xFF800000> : vector<16x16xf32>
    %65 = vector.multi_reduction <maximumf>, %64, %cst_66 [2] : vector<16x16x16xf32> to vector<16x16xf32>
    %66 = vector.shape_cast %65 : vector<16x16xf32> to vector<16x16x1xf32>
    %67 = vector.broadcast %66 : vector<16x16x1xf32> to vector<16x16x16xf32>
    %68 = arith.subf %64, %67 : vector<16x16x16xf32>
    %69 = math.exp %68 : vector<16x16x16xf32>
    %cst_67 = arith.constant dense<0.000000e+00> : vector<16x16xf32>
    %70 = vector.multi_reduction <add>, %69, %cst_67 [2] : vector<16x16x16xf32> to vector<16x16xf32>
    %71 = vector.shape_cast %70 : vector<16x16xf32> to vector<16x16x1xf32>
    "tpu.trace_start"() <{level = 10 : i32, message = "tqk,tkd->tqd"}> : () -> ()
    %cst_68 = arith.constant dense<0.000000e+00> : vector<16x16x8xf32>
    %72 = tpu.matmul %69, %63, %cst_68 {dimension_numbers = #tpu.dot_dimension_numbers<[2], [1], [1], [2], [0, 0, 0, 1, 1, 2], [0], [0]>} : vector<16x16x16xf32>, vector<16x16x8xf32>, vector<16x16x8xf32> -> vector<16x16x8xf32>
    "tpu.trace_stop"() : () -> ()
    %73 = tpu.reciprocal %71 {approx = true} : vector<16x16x1xf32> -> vector<16x16x1xf32>
    %74 = vector.broadcast %73 : vector<16x16x1xf32> to vector<16x16x8xf32>
    %75 = arith.mulf %72, %74 : vector<16x16x8xf32>
    %cst_69 = arith.constant 0.000000e+00 : bf16
    %76 = vector.broadcast %cst_69 : bf16 to vector<18x18x8xbf16>
    %c0_70 = arith.constant 0 : index
    %c0_71 = arith.constant 0 : index
    %c0_72 = arith.constant 0 : index
    %77 = vector.load %arg6[%c0_70, %c0_71, %c0_72] : memref<18x18x8xbf16, #tpu.memory_space<vmem>>, vector<18x18x8xbf16>
    tpu.vector_store %arg6[%c0_70, %c0_71, %c0_72], %76 {strides = array<i32>} : memref<18x18x8xbf16, #tpu.memory_space<vmem>>, vector<18x18x8xbf16>,
    %78 = arith.truncf %75 : vector<16x16x8xf32> to vector<16x16x8xbf16>
    %c1_73 = arith.constant 1 : index
    %c1_74 = arith.constant 1 : index
    %c0_75 = arith.constant 0 : index
    %79 = vector.load %arg6[%c1_73, %c1_74, %c0_75] : memref<18x18x8xbf16, #tpu.memory_space<vmem>>, vector<16x16x8xbf16>
    tpu.vector_store %arg6[%c1_73, %c1_74, %c0_75], %78 {strides = array<i32>} : memref<18x18x8xbf16, #tpu.memory_space<vmem>>, vector<16x16x8xbf16>,
    %cst_76 = arith.constant 0.000000e+00 : f32
    %80 = vector.broadcast %cst_76 : f32 to vector<256x16xf32>
    %c0_77 = arith.constant 0 : index
    %c0_78 = arith.constant 0 : index
    %c0_79 = arith.constant 0 : index
    %81 = vector.load %arg6[%c0_77, %c0_78, %c0_79] : memref<18x18x8xbf16, #tpu.memory_space<vmem>>, vector<16x16x8xbf16>
    %82 = vector.shape_cast %81 : vector<16x16x8xbf16> to vector<256x8xbf16>
    %c0_80 = arith.constant 0 : index
    %c0_81 = arith.constant 0 : index
    %c0_82 = arith.constant 0 : index
    %83 = vector.load %arg3[%c0_80, %c0_81, %c0_82] : memref<9x8x16xbf16, #tpu.memory_space<vmem>>, vector<1x8x16xbf16>
    %84 = vector.shape_cast %83 : vector<1x8x16xbf16> to vector<8x16xbf16>
    %cst_83 = arith.constant dense<0.000000e+00> : vector<256x16xf32>
    %85 = tpu.matmul %82, %84, %cst_83 {dimension_numbers = #tpu.dot_dimension_numbers<[1], [0], [0], [1], [0, 0, 1, 1], [], []>} : vector<256x8xbf16>, vector<8x16xbf16>, vector<256x16xf32> -> vector<256x16xf32>
    %86 = arith.addf %80, %85 : vector<256x16xf32>
    %c0_84 = arith.constant 0 : index
    %c1_85 = arith.constant 1 : index
    %c0_86 = arith.constant 0 : index
    %87 = vector.load %arg6[%c0_84, %c1_85, %c0_86] : memref<18x18x8xbf16, #tpu.memory_space<vmem>>, vector<16x16x8xbf16>
    %88 = vector.shape_cast %87 : vector<16x16x8xbf16> to vector<256x8xbf16>
    %c1_87 = arith.constant 1 : index
    %c0_88 = arith.constant 0 : index
    %c0_89 = arith.constant 0 : index
    %89 = vector.load %arg3[%c1_87, %c0_88, %c0_89] : memref<9x8x16xbf16, #tpu.memory_space<vmem>>, vector<1x8x16xbf16>
    %90 = vector.shape_cast %89 : vector<1x8x16xbf16> to vector<8x16xbf16>
    %cst_90 = arith.constant dense<0.000000e+00> : vector<256x16xf32>
    %91 = tpu.matmul %88, %90, %cst_90 {dimension_numbers = #tpu.dot_dimension_numbers<[1], [0], [0], [1], [0, 0, 1, 1], [], []>} : vector<256x8xbf16>, vector<8x16xbf16>, vector<256x16xf32> -> vector<256x16xf32>
    %92 = arith.addf %86, %91 : vector<256x16xf32>
    %c0_91 = arith.constant 0 : index
    %c2_92 = arith.constant 2 : index
    %c0_93 = arith.constant 0 : index
    %93 = vector.load %arg6[%c0_91, %c2_92, %c0_93] : memref<18x18x8xbf16, #tpu.memory_space<vmem>>, vector<16x16x8xbf16>
    %94 = vector.shape_cast %93 : vector<16x16x8xbf16> to vector<256x8xbf16>
    %c2_94 = arith.constant 2 : index
    %c0_95 = arith.constant 0 : index
    %c0_96 = arith.constant 0 : index
    %95 = vector.load %arg3[%c2_94, %c0_95, %c0_96] : memref<9x8x16xbf16, #tpu.memory_space<vmem>>, vector<1x8x16xbf16>
    %96 = vector.shape_cast %95 : vector<1x8x16xbf16> to vector<8x16xbf16>
    %cst_97 = arith.constant dense<0.000000e+00> : vector<256x16xf32>
    %97 = tpu.matmul %94, %96, %cst_97 {dimension_numbers = #tpu.dot_dimension_numbers<[1], [0], [0], [1], [0, 0, 1, 1], [], []>} : vector<256x8xbf16>, vector<8x16xbf16>, vector<256x16xf32> -> vector<256x16xf32>
    %98 = arith.addf %92, %97 : vector<256x16xf32>
    %c1_98 = arith.constant 1 : index
    %c0_99 = arith.constant 0 : index
    %c0_100 = arith.constant 0 : index
    %99 = vector.load %arg6[%c1_98, %c0_99, %c0_100] : memref<18x18x8xbf16, #tpu.memory_space<vmem>>, vector<16x16x8xbf16>
    %100 = vector.shape_cast %99 : vector<16x16x8xbf16> to vector<256x8xbf16>
    %c3_101 = arith.constant 3 : index
    %c0_102 = arith.constant 0 : index
    %c0_103 = arith.constant 0 : index
    %101 = vector.load %arg3[%c3_101, %c0_102, %c0_103] : memref<9x8x16xbf16, #tpu.memory_space<vmem>>, vector<1x8x16xbf16>
    %102 = vector.shape_cast %101 : vector<1x8x16xbf16> to vector<8x16xbf16>
    %cst_104 = arith.constant dense<0.000000e+00> : vector<256x16xf32>
    %103 = tpu.matmul %100, %102, %cst_104 {dimension_numbers = #tpu.dot_dimension_numbers<[1], [0], [0], [1], [0, 0, 1, 1], [], []>} : vector<256x8xbf16>, vector<8x16xbf16>, vector<256x16xf32> -> vector<256x16xf32>
    %104 = arith.addf %98, %103 : vector<256x16xf32>
    %c1_105 = arith.constant 1 : index
    %c1_106 = arith.constant 1 : index
    %c0_107 = arith.constant 0 : index
    %105 = vector.load %arg6[%c1_105, %c1_106, %c0_107] : memref<18x18x8xbf16, #tpu.memory_space<vmem>>, vector<16x16x8xbf16>
    %106 = vector.shape_cast %105 : vector<16x16x8xbf16> to vector<256x8xbf16>
    %c4_108 = arith.constant 4 : index
    %c0_109 = arith.constant 0 : index
    %c0_110 = arith.constant 0 : index
    %107 = vector.load %arg3[%c4_108, %c0_109, %c0_110] : memref<9x8x16xbf16, #tpu.memory_space<vmem>>, vector<1x8x16xbf16>
    %108 = vector.shape_cast %107 : vector<1x8x16xbf16> to vector<8x16xbf16>
    %cst_111 = arith.constant dense<0.000000e+00> : vector<256x16xf32>
    %109 = tpu.matmul %106, %108, %cst_111 {dimension_numbers = #tpu.dot_dimension_numbers<[1], [0], [0], [1], [0, 0, 1, 1], [], []>} : vector<256x8xbf16>, vector<8x16xbf16>, vector<256x16xf32> -> vector<256x16xf32>
    %110 = arith.addf %104, %109 : vector<256x16xf32>
    %c1_112 = arith.constant 1 : index
    %c2_113 = arith.constant 2 : index
    %c0_114 = arith.constant 0 : index
    %111 = vector.load %arg6[%c1_112, %c2_113, %c0_114] : memref<18x18x8xbf16, #tpu.memory_space<vmem>>, vector<16x16x8xbf16>
    %112 = vector.shape_cast %111 : vector<16x16x8xbf16> to vector<256x8xbf16>
    %c5_115 = arith.constant 5 : index
    %c0_116 = arith.constant 0 : index
    %c0_117 = arith.constant 0 : index
    %113 = vector.load %arg3[%c5_115, %c0_116, %c0_117] : memref<9x8x16xbf16, #tpu.memory_space<vmem>>, vector<1x8x16xbf16>
    %114 = vector.shape_cast %113 : vector<1x8x16xbf16> to vector<8x16xbf16>
    %cst_118 = arith.constant dense<0.000000e+00> : vector<256x16xf32>
    %115 = tpu.matmul %112, %114, %cst_118 {dimension_numbers = #tpu.dot_dimension_numbers<[1], [0], [0], [1], [0, 0, 1, 1], [], []>} : vector<256x8xbf16>, vector<8x16xbf16>, vector<256x16xf32> -> vector<256x16xf32>
    %116 = arith.addf %110, %115 : vector<256x16xf32>
    %c2_119 = arith.constant 2 : index
    %c0_120 = arith.constant 0 : index
    %c0_121 = arith.constant 0 : index
    %117 = vector.load %arg6[%c2_119, %c0_120, %c0_121] : memref<18x18x8xbf16, #tpu.memory_space<vmem>>, vector<16x16x8xbf16>
    %118 = vector.shape_cast %117 : vector<16x16x8xbf16> to vector<256x8xbf16>
    %c6_122 = arith.constant 6 : index
    %c0_123 = arith.constant 0 : index
    %c0_124 = arith.constant 0 : index
    %119 = vector.load %arg3[%c6_122, %c0_123, %c0_124] : memref<9x8x16xbf16, #tpu.memory_space<vmem>>, vector<1x8x16xbf16>
    %120 = vector.shape_cast %119 : vector<1x8x16xbf16> to vector<8x16xbf16>
    %cst_125 = arith.constant dense<0.000000e+00> : vector<256x16xf32>
    %121 = tpu.matmul %118, %120, %cst_125 {dimension_numbers = #tpu.dot_dimension_numbers<[1], [0], [0], [1], [0, 0, 1, 1], [], []>} : vector<256x8xbf16>, vector<8x16xbf16>, vector<256x16xf32> -> vector<256x16xf32>
    %122 = arith.addf %116, %121 : vector<256x16xf32>
    %c2_126 = arith.constant 2 : index
    %c1_127 = arith.constant 1 : index
    %c0_128 = arith.constant 0 : index
    %123 = vector.load %arg6[%c2_126, %c1_127, %c0_128] : memref<18x18x8xbf16, #tpu.memory_space<vmem>>, vector<16x16x8xbf16>
    %124 = vector.shape_cast %123 : vector<16x16x8xbf16> to vector<256x8xbf16>
    %c7_129 = arith.constant 7 : index
    %c0_130 = arith.constant 0 : index
    %c0_131 = arith.constant 0 : index
    %125 = vector.load %arg3[%c7_129, %c0_130, %c0_131] : memref<9x8x16xbf16, #tpu.memory_space<vmem>>, vector<1x8x16xbf16>
    %126 = vector.shape_cast %125 : vector<1x8x16xbf16> to vector<8x16xbf16>
    %cst_132 = arith.constant dense<0.000000e+00> : vector<256x16xf32>
    %127 = tpu.matmul %124, %126, %cst_132 {dimension_numbers = #tpu.dot_dimension_numbers<[1], [0], [0], [1], [0, 0, 1, 1], [], []>} : vector<256x8xbf16>, vector<8x16xbf16>, vector<256x16xf32> -> vector<256x16xf32>
    %128 = arith.addf %122, %127 : vector<256x16xf32>
    %c2_133 = arith.constant 2 : index
    %c2_134 = arith.constant 2 : index
    %c0_135 = arith.constant 0 : index
    %129 = vector.load %arg6[%c2_133, %c2_134, %c0_135] : memref<18x18x8xbf16, #tpu.memory_space<vmem>>, vector<16x16x8xbf16>
    %130 = vector.shape_cast %129 : vector<16x16x8xbf16> to vector<256x8xbf16>
    %c8_136 = arith.constant 8 : index
    %c0_137 = arith.constant 0 : index
    %c0_138 = arith.constant 0 : index
    %131 = vector.load %arg3[%c8_136, %c0_137, %c0_138] : memref<9x8x16xbf16, #tpu.memory_space<vmem>>, vector<1x8x16xbf16>
    %132 = vector.shape_cast %131 : vector<1x8x16xbf16> to vector<8x16xbf16>
    %cst_139 = arith.constant dense<0.000000e+00> : vector<256x16xf32>
    %133 = tpu.matmul %130, %132, %cst_139 {dimension_numbers = #tpu.dot_dimension_numbers<[1], [0], [0], [1], [0, 0, 1, 1], [], []>} : vector<256x8xbf16>, vector<8x16xbf16>, vector<256x16xf32> -> vector<256x16xf32>
    %134 = arith.addf %128, %133 : vector<256x16xf32>
    %135 = vector.shape_cast %134 : vector<256x16xf32> to vector<16x16x16xf32>
    %c0_140 = arith.constant 0 : index
    %c0_141 = arith.constant 0 : index
    %c0_142 = arith.constant 0 : index
    %c0_143 = arith.constant 0 : index
    %136 = vector.load %arg4[%c0_140, %c0_141, %c0_142, %c0_143] : memref<1x16x16x16xf32, #tpu.memory_space<vmem>>, vector<1x16x16x16xf32>
    %137 = vector.shape_cast %136 : vector<1x16x16x16xf32> to vector<16x16x16xf32>
    %138 = vector.shape_cast %135 : vector<16x16x16xf32> to vector<1x16x16x16xf32>
    tpu.vector_store %arg4[%c0_140, %c0_141, %c0_142, %c0_143], %138 {strides = array<i32>} : memref<1x16x16x16xf32, #tpu.memory_space<vmem>>, vector<1x16x16x16xf32>,
    return
  }
  func.func @transform_0(%arg0: i32) -> (i32, i32, i32, i32) {
    %c0_i32 = arith.constant 0 : i32
    %c0_i32_0 = arith.constant 0 : i32
    %c0_i32_1 = arith.constant 0 : i32
    %c0_i32_2 = arith.constant 0 : i32
    return %arg0, %c0_i32, %c0_i32_0, %c0_i32_1 : i32, i32, i32, i32
  }
  func.func @transform_1(%arg0: i32) -> (i32, i32, i32) {
    %c0_i32 = arith.constant 0 : i32
    %c0_i32_0 = arith.constant 0 : i32
    %c0_i32_1 = arith.constant 0 : i32
    %c0_i32_2 = arith.constant 0 : i32
    return %c0_i32, %c0_i32_0, %c0_i32_1 : i32, i32, i32
  }
  func.func @transform_2(%arg0: i32) -> (i32, i32, i32) {
    %c0_i32 = arith.constant 0 : i32
    %c0_i32_0 = arith.constant 0 : i32
    %c0_i32_1 = arith.constant 0 : i32
    %c0_i32_2 = arith.constant 0 : i32
    return %c0_i32, %c0_i32_0, %c0_i32_1 : i32, i32, i32
  }
  func.func @transform_3(%arg0: i32) -> (i32, i32, i32, i32) {
    %c0_i32 = arith.constant 0 : i32
    %c0_i32_0 = arith.constant 0 : i32
    %c0_i32_1 = arith.constant 0 : i32
    %c0_i32_2 = arith.constant 0 : i32
    return %arg0, %c0_i32, %c0_i32_0, %c0_i32_1 : i32, i32, i32, i32
  }
}

</mosaic_0001>

<bundles_post_ra>
// kernel: vattn_forward.1
= control target key start
LH: loop header
LB: loop body
LE: loop exit
PB: predicated region body
PF: predicated region fallthrough
CT: control target
= control target key end

     0   :  { %s12008_s12 = smov 0   ;;  %s16594_s0 = inlined_call_operand.vmem [shape: bf16[2,16,16,16], index: 0, kind: input, shape index: {}]   ;;  %s16595_s1 = inlined_call_operand.vmem [shape: bf16[9,16,12], index: 1, kind: input, shape index: {}]   ;;  %s16596_s2 = inlined_call_operand.vmem [shape: bf16[9,8,16], index: 2, kind: input, shape index: {}]   ;;  %s16597_s3 = inlined_call_operand.vmem [shape: f32[2,16,16,16], index: 3, kind: output, shape index: {}]  }
   0x1 LB: > { %s10667_s13 = sadd.s32 4294967295, %s11983_s12   ;;  %p10671_p0 = scmp.ge.s32.totalorder %s11983_s12, 1  ;;  %s11983_s12 = sphi %s12008_s12, %s13_s12  }
   0x2   : > { %p137_p1 = scmp.lt.s32.totalorder %s11983_s12, 3 }
   0x4   : > { %p138_p2 = pnand %p10671_p0, %p137_p1 }
   0x6   : > { %141 = sbr.rel (%p138_p2) target bundleno = 2278 (0x8e6), region = 32 }
   0xb   : > { %v11620_v0 = vld [vmem:[%s16595_s1] sm:$0xff]  ;;  %vm172_vm0 = vcmask 125952   ;;  %v16598_v1 = vmov 0   ;;  %v11621_v2 = vld [vmem:[%s16595_s1 + $0x8] sm:$0xff]  ;;  %vm1195_vm1 = vcmask 130048   ;;  %p161_p3 = scmp.lt.s32.totalorder %s10667_s13, 1 }
   0xc   : > { %173 = vst.msk [vmem:[#allocation2] sm:$0xf] %vm172_vm0, %v16598_v1  ;;  %1474 = vmatpush.bf16.msra.mxu1 %v11620_v0  ;;  %11709 = vmatpush.bf16.msra.mxu2 %v11620_v0  ;;  %vm175_vm2 = vcmask 122880   ;;  %vm751_vm3 = vsmask.f32 3328  ;;  %v16614_v32 = vmov 0 }
   0xd   : > { %174 = vst.msk [vmem:[#allocation2 + $0x4] sm:$0xf] %vm172_vm0, %v16598_v1  ;;  %1251 = vmatpush.bf16.msra.mxu0 %v11621_v2  ;;  %s16860_s13 = smov (!%p161_p3, %s10667_s13), 1  ;;  %vm752_vm4 = vsmask.f32 7440  ;;  %v16619_v2 = vmov 0 }
   0xe   : > { %177 = vst.msk [vmem:[#allocation2 + $0xc] sm:$0xf] %vm172_vm0, %v16598_v1  ;;  %s11602_s18 = sshll.u32 %s16860_s13, 7  ;;  %vm260_vm5 = vsmask.f32 256  ;;  %vm12141_vm8 = vmor %vm751_vm3, %vm752_vm4  ;;  %vm1604_vm12 = vcmask 1042432  }
   0xf   : > { %178 = vst.msk [vmem:[#allocation2 + $0x10] sm:$0xf] %vm172_vm0, %v16598_v1  ;;  %s12083_s21 = scalar_lea.vmem %s16594_s0, %s11602_s18  ;;  %vm261_vm6 = vsmask.f32 4368  ;;  %vm585_vm7 = vsmask.f32 7938  ;;  %vm12230_vm11 = vmand %vm175_vm2, %vm260_vm5 }
  0x10   : > { %180 = vst.msk [vmem:[#allocation2 + $0x18] sm:$0xf] %vm172_vm0, %v16598_v1  ;;  %v12094_v6 = vld [vmem:[%s12083_s21 + $0x50] sm:$0xf]  ;;  %v12107_v11 = vld [vmem:[%s12083_s21 + $0x54] sm:$0xf]  ;;  %vm12196_vm9 = vmand %vm172_vm0, %vm585_vm7 }
  0x11   : > { %181 = vst.msk [vmem:[#allocation2 + $0x1c] sm:$0xf] %vm172_vm0, %v16598_v1  ;;  %v434_v12 = vshrl.u32 %v12094_v6, 16  ;;  %v228_v17 = vld [vmem:[%s12083_s21] sm:$0xf]  ;;  %v442_v18 = vshrl.u32 %v12107_v11, 16  ;;  %vm12206_vm10 = vmor %vm260_vm5, %vm261_vm6 }
  0x12   : > { %183 = vst.msk [vmem:[#allocation2 + $0x24] sm:$0xf] %vm172_vm0, %v16598_v1  ;;  %v229_v19 = vld [vmem:[%s12083_s21 + $0x4] sm:$0xf]  ;;  %v264_v23 = vshrl.u32 %v228_v17, 16  ;;  %v437_v24 = vshll.u32 %v12094_v6, 16 }
  0x13   : > { %184 = vst.msk [vmem:[#allocation2 + $0x28] sm:$0xf] %vm172_vm0, %v16598_v1  ;;  %v701_v4 = vld [vmem:[#allocation2] sm:$0xf]  ;;  %v12123_v22 = vrot.slane %v434_v12, 7  ;;  %v272_v25 = vshrl.u32 %v229_v19, 16 }
  0x14   : > { %v11604_v3 = vld [vmem:[#allocation2] sm:$0xff]  ;;  %186 = vst.msk [vmem:[#allocation2 + $0x30] sm:$0xf] %vm172_vm0, %v16598_v1  ;;  %v755_v7 = vshrl.u32 %v701_v4, 16  ;;  %v758_v8 = vshll.u32 %v701_v4, 16  ;;  %v12132_v26 = vrot.slane %v442_v18, 7 }
  0x15   : > { %187 = vst.msk [vmem:[#allocation2 + $0x34] sm:$0xf] %vm172_vm0, %v16598_v1  ;;  %10766 = vmatmul.msk.bf16.vlgmr.msra.gmra.mxu1 %vm1195_vm1, %v11604_v3  ;;  %v12087_v5 = vld [vmem:[#allocation2 + $0x4] sm:$0xf]  ;;  %v445_v27 = vshll.u32 %v12107_v11, 16  ;;  %v12137_v30 = vrot.slane %v264_v23, 7  ;;  %v439_v49 = vor.u32 %v437_v24, %v12123_v22 }
  0x16   : > { %189 = vst.msk [vmem:[#allocation2 + $0x3c] sm:$0xf] %vm172_vm0, %v16598_v1  ;;  %v764_v9 = vshll.u32 %v12087_v5, 16  ;;  %v768_v10 = vshrl.u32 %v12087_v5, 16  ;;  %v757_v13 = vrot.slane %v755_v7, 4  ;;  %v760_v14 = vrot.slane %v758_v8, 5 }
  0x17   : > { %190 = vst.msk [vmem:[#allocation2 + $0x40] sm:$0xf] %vm172_vm0, %v16598_v1  ;;  %v267_v31 = vshll.u32 %v228_v17, 16  ;;  %v16615_v32 = vsel %vm12141_vm8, 4294967295, %v16614_v32  ;;  %v250_v33 = vld [vmem:[%s12083_s21 + $0x58] sm:$0xf]  ;;  %v447_v53 = vor.u32 %v445_v27, %v12132_v26 }
  0x18   : > { %192 = vst.msk [vmem:[#allocation2 + $0x48] sm:$0xf] %vm172_vm0, %v16598_v1  ;;  %v766_v15 = vrot.slane %v764_v9, 5  ;;  %v770_v16 = vrot.slane %v768_v10, 4  ;;  %v761_v20 = vor.u32 %v760_v14, %v757_v13  ;;  %v12149_v34 = vld [vmem:[%s12083_s21 + $0x5c] sm:$0xf] }
  0x19   : > { %193 = vst.msk [vmem:[#allocation2 + $0x4c] sm:$0xf] %vm172_vm0, %v16598_v1  ;;  %v12153_v35 = vrot.slane %v272_v25, 7  ;;  %v275_v36 = vshll.u32 %v229_v19, 16  ;;  %v12156_v37 = vld [vmem:[%s12083_s21 + $0x8] sm:$0xf]  ;;  %v269_v54 = vor.u32 %v267_v31, %v12137_v30 }
  0x1a   : > { %195 = vst.msk [vmem:[#allocation2 + $0x54] sm:$0xf] %vm172_vm0, %v16598_v1  ;;  %v771_v21 = vor.u32 %v770_v16, %v766_v15  ;;  %v762_v28 = vrot.slane %v761_v20, 4  ;;  %v12163_v39 = vld [vmem:[%s12083_s21 + $0xc] sm:$0xf]  ;;  %v451_v42 = vshrl.u32 %v250_v33, 16 }
  0x1b   : > { %196 = vst.msk [vmem:[#allocation2 + $0x58] sm:$0xf] %vm172_vm0, %v16598_v1  ;;  %v459_v43 = vshrl.u32 %v12149_v34, 16  ;;  %v440_v44 = vrot.slane %v12123_v22, 4  ;;  %v270_v45 = vrot.slane %v12137_v30, 4  ;;  %v279_v46 = vrot.slane %v12153_v35, 4 }
  0x1c   : > { %198 = vst.msk [vmem:[#allocation2 + $0x60] sm:$0xf] %vm172_vm0, %v16598_v1  ;;  %v772_v29 = vrot.slane %v771_v21, 4  ;;  %v767_v40 = vsel %vm12141_vm8, %v762_v28, %v766_v15  ;;  %v281_v47 = vshrl.u32 %v12156_v37, 16  ;;  %v289_v51 = vshrl.u32 %v12163_v39, 16  ;;  %s11986_s9 = smov 126  }
  0x1d   : > { %199 = vst.msk [vmem:[#allocation2 + $0x64] sm:$0xf] %vm172_vm0, %v16598_v1  ;;  %v1141_v52 = vunpack.c.l.b16 %v767_v40  ;;  %v277_v55 = vor.u32 %v275_v36, %v12153_v35  ;;  %v587_v56 = vld [vmem:[#allocation2 + $0xc] sm:$0xf]  ;;  %v252_v57 = vld [vmem:[%s12083_s21 + $0x60] sm:$0xf]  ;;  %v448_v15 = vsel %vm12206_vm10, %v440_v44, %v447_v53 }
  0x1e   : > { %201 = vst.msk [vmem:[#allocation2 + $0x6c] sm:$0xf] %vm172_vm0, %v16598_v1  ;;  %v12188_v58 = vld [vmem:[%s12083_s21 + $0x64] sm:$0xf]  ;;  %v453_v61 = vrot.slane %v451_v42, 7  ;;  %v454_v62 = vshll.u32 %v250_v33, 16  ;;  %v588_v16 = vsel %vm12196_vm9, %v269_v54, %v587_v56 }
  0x1f   : > { %202 = vst.msk [vmem:[#allocation2 + $0x70] sm:$0xf] %vm172_vm0, %v16598_v1  ;;  %v12200_v63 = vrot.slane %v459_v43, 7  ;;  %v16620_v2 = vsel %vm12206_vm10, 4294967295, %v16619_v2  ;;  %v462_v3 = vshll.u32 %v12149_v34, 16  ;;  %v283_v4 = vrot.slane %v281_v47, 7 }
  0x20   : > { %204 = vst.msk [vmem:[#allocation2 + $0x78] sm:$0xf] %vm172_vm0, %v16598_v1  ;;  %v284_v6 = vshll.u32 %v12156_v37, 16  ;;  %v291_v7 = vrot.slane %v289_v51, 7  ;;  %v292_v8 = vshll.u32 %v12163_v39, 16  ;;  %v468_v9 = vshrl.u32 %v252_v57, 16 }
  0x21   : > { %205 = vst.msk [vmem:[#allocation2 + $0x7c] sm:$0xf] %vm172_vm0, %v16598_v1  ;;  %v476_v10 = vshrl.u32 %v12188_v58, 16  ;;  %v232_v13 = vld [vmem:[%s12083_s21 + $0x10] sm:$0xf]  ;;  %v16622_v17 = vmov 0  ;;  %v456_v19 = vor.u32 %v454_v62, %v453_v61  ;;  %v278_v21 = vsel %vm12206_vm10, %v270_v45, %v277_v55 }
  0x22   : > { %207 = vst.msk [vmem:[#allocation2 + $0x84] sm:$0xf] %vm172_vm0, %v16598_v1  ;;  %v233_v14 = vld [vmem:[%s12083_s21 + $0x14] sm:$0xf]  ;;  %v16623_v17 = vsel %vm12230_vm11, 4294967295, %v16622_v17  ;;  %v298_v20 = vshrl.u32 %v232_v13, 16  ;;  %v464_v23 = vor.u32 %v462_v3, %v12200_v63  ;;  %v286_v27 = vor.u32 %v284_v6, %v283_v4 }
  0x23   : > { %208 = vst.msk [vmem:[#allocation2 + $0x88] sm:$0xf] %vm172_vm0, %v16598_v1  ;;  %v457_v22 = vrot.slane %v453_v61, 4  ;;  %v306_v25 = vshrl.u32 %v233_v14, 16  ;;  %v287_v28 = vrot.slane %v283_v4, 4  ;;  %v471_v30 = vshll.u32 %v252_v57, 16 }
  0x24   : > { %210 = vst.msk [vmem:[#allocation2 + $0x90] sm:$0xf] %vm172_vm0, %v16598_v1  ;;  %v294_v33 = vor.u32 %v292_v8, %v291_v7  ;;  %v596_v34 = vld [vmem:[#allocation2 + $0x18] sm:$0xf]  ;;  %v12243_v35 = vrot.slane %v476_v10, 7  ;;  %v479_v36 = vshll.u32 %v12188_v58, 16 }
  0x25   : > { %211 = vst.msk [vmem:[#allocation2 + $0x94] sm:$0xf] %vm172_vm0, %v16598_v1  ;;  %v296_v39 = vrot.slane %v291_v7, 4  ;;  %v300_v40 = vrot.slane %v298_v20, 7  ;;  %v465_v42 = vsel %vm12206_vm10, %v457_v22, %v464_v23  ;;  %v308_v44 = vrot.slane %v306_v25, 7  ;;  %s11987_s10 = smov 124  }
  0x26   : > { %213 = vst.msk [vmem:[#allocation2 + $0x9c] sm:$0xf] %vm172_vm0, %v16598_v1  ;;  %v309_v45 = vshll.u32 %v233_v14, 16  ;;  %v603_v56 = vld [vmem:[#allocation2 + $0x24] sm:$0xf]  ;;  %vm1605_vm13 = vcmask 1046532  }
  0x27   : > { %214 = vst.msk [vmem:[#allocation2 + $0xa0] sm:$0xf] %vm172_vm0, %v16598_v1  ;;  %v304_v54 = vrot.slane %v300_v40, 4  ;;  %v254_v3 = vld [vmem:[%s12083_s21 + $0x68] sm:$0xf]  ;;  %vm12401_vm14 = vmor %vm1604_vm12, %vm1605_vm13  ;;  %vm4652_vm15 = vcmask 15360  }
  0x28   : > { %216 = vst.msk [vmem:[#allocation2 + $0xa8] sm:$0xf] %vm172_vm0, %v16598_v1  ;;  %v311_v55 = vor.u32 %v309_v45, %v308_v44  ;;  %v485_v10 = vshrl.u32 %v254_v3, 16  ;;  %v488_v22 = vshll.u32 %v254_v3, 16  ;;  %vm6154_vm3 = vcmask 57344   ;;  %s11603_s4 = sshll.u32 %s16860_s13, 8 }
  0x29   : > { %217 = vst.msk [vmem:[#allocation2 + $0xac] sm:$0xf] %vm172_vm0, %v16598_v1  ;;  %v659_v50 = vld [vmem:[#allocation2 + $0x84] sm:$0xf]  ;;  %vm14491_vm6 = vmand %vm6154_vm3, %vm260_vm5  ;;  %vm7159_vm5 = vcmask 64512   ;;  %s16430_s7 = scalar_lea.vmem %s16597_s3, %s11603_s4 }
  0x2a   : > { %219 = vst.msk [vmem:[#allocation2 + $0xb4] sm:$0xf] %vm172_vm0, %v16598_v1  ;;  %v660_v12 = vsel %vm12196_vm9, %v439_v49, %v659_v50  ;;  %v481_v50 = vor.u32 %v479_v36, %v12243_v35  ;;  %v312_v14 = vsel %vm12206_vm10, %v304_v54, %v311_v55 }
  0x2b   : > { %220 = vst.msk [vmem:[#allocation2 + $0xb8] sm:$0xf] %vm172_vm0, %v16598_v1  ;;  %v666_v24 = vld [vmem:[#allocation2 + $0x90] sm:$0xf] }
  0x2c   : > { %222 = vst.msk [vmem:[#allocation2 + $0xc0] sm:$0xf] %vm172_vm0, %v16598_v1  ;;  %v667_v37 = vsel %vm12196_vm9, %v456_v19, %v666_v24  ;;  %v12279_v19 = vrot.slane %v485_v10, 7 }
  0x2d   : > { %223 = vst.msk [vmem:[#allocation2 + $0xc4] sm:$0xf] %vm172_vm0, %v16598_v1  ;;  %v673_v51 = vld [vmem:[#allocation2 + $0x9c] sm:$0xf] }
  0x2e   : > { %225 = vst.msk [vmem:[#allocation2 + $0xcc] sm:$0xf] %vm172_vm0, %v16598_v1 }
  0x2f   : > { %226 = vst.msk [vmem:[#allocation2 + $0xd0] sm:$0xf] %vm172_vm0, %v16598_v1 }
  0x30   : > { %176 = vst.msk [vmem:[#allocation2 + $0x8] sm:$0x1] %vm175_vm2, %v16598_v1 }
  0x31   : > { %179 = vst.msk [vmem:[#allocation2 + $0x14] sm:$0x1] %vm175_vm2, %v16598_v1 }
  0x32   : > { %182 = vst.msk [vmem:[#allocation2 + $0x20] sm:$0x1] %vm175_vm2, %v16598_v1 }
  0x33   : > { %185 = vst.msk [vmem:[#allocation2 + $0x2c] sm:$0x1] %vm175_vm2, %v16598_v1 }
  0x34   : > { %188 = vst.msk [vmem:[#allocation2 + $0x38] sm:$0x1] %vm175_vm2, %v16598_v1 }
  0x35   : > { %16616 = vst [vmem:[#allocation4_spill] sm:$0xff] %v16615_v32 }
  0x36   : > { %191 = vst.msk [vmem:[#allocation2 + $0x44] sm:$0x1] %vm175_vm2, %v16598_v1 }
  0x37   : > { %194 = vst.msk [vmem:[#allocation2 + $0x50] sm:$0x1] %vm175_vm2, %v16598_v1  ;;  %v12158_v38 = vld [vmem:[#allocation2 + $0x8] sm:$0x1] }
  0x38   : > { %197 = vst.msk [vmem:[#allocation2 + $0x5c] sm:$0x1] %vm175_vm2, %v16598_v1  ;;  %v774_v41 = vshll.u32 %v12158_v38, 16  ;;  %v593_v18 = vld [vmem:[#allocation2 + $0x14] sm:$0x1] }
  0x39   : > { %200 = vst.msk [vmem:[#allocation2 + $0x68] sm:$0x1] %vm175_vm2, %v16598_v1  ;;  %v594_v31 = vsel %vm12230_vm11, %v279_v46, %v593_v18  ;;  %v600_v43 = vld [vmem:[#allocation2 + $0x20] sm:$0x1]  ;;  %v597_v46 = vsel %vm12196_vm9, %v286_v27, %v596_v34 }
  0x3a   : > { %203 = vst.msk [vmem:[#allocation2 + $0x74] sm:$0x1] %vm175_vm2, %v16598_v1  ;;  %v776_v48 = vrot.slane %v774_v41, 5  ;;  %v301_v41 = vshll.u32 %v232_v13, 16 }
  0x3b   : > { %206 = vst.msk [vmem:[#allocation2 + $0x80] sm:$0x1] %vm175_vm2, %v16598_v1 }
  0x3c   : > { %209 = vst.msk [vmem:[#allocation2 + $0x8c] sm:$0x1] %vm175_vm2, %v16598_v1  ;;  %v777_v59 = vsel %vm12141_vm8, %v772_v29, %v776_v48  ;;  %v470_v29 = vrot.slane %v468_v9, 7  ;;  %v295_v48 = vsel %vm12206_vm10, %v287_v28, %v294_v33  ;;  %v303_v53 = vor.u32 %v301_v41, %v300_v40 }
  0x3d   : > { %212 = vst.msk [vmem:[#allocation2 + $0x98] sm:$0x1] %vm175_vm2, %v16598_v1  ;;  %v1142_v0 = vunpack.c.l.b16 %v777_v59  ;;  %v313_v59 = vrot.slane %v308_v44, 4 }
  0x3e   : > { %215 = vst.msk [vmem:[#allocation2 + $0xa4] sm:$0x1] %vm175_vm2, %v16598_v1  ;;  %v473_v47 = vor.u32 %v471_v30, %v470_v29  ;;  %v474_v49 = vrot.slane %v470_v29, 4  ;;  %v604_v9 = vsel %vm12196_vm9, %v303_v53, %v603_v56 }
  0x3f   : > { %16621 = vst [vmem:[#allocation5_spill] sm:$0xff] %v16620_v2  ;;  %v1173_v11 = vpack.c.b16 %v1142_v0, %v1141_v52  ;;  %v601_v52 = vsel %vm12230_vm11, %v296_v39, %v600_v43  ;;  %v607_v0 = vld [vmem:[#allocation2 + $0x2c] sm:$0x1]  ;;  %v490_v39 = vor.u32 %v488_v22, %v12279_v19  ;;  %v256_v22 = vld [vmem:[%s12083_s21 + $0x70] sm:$0xf] }
  0x40   : > { %218 = vst.msk [vmem:[#allocation2 + $0xb0] sm:$0x1] %vm175_vm2, %v16598_v1  ;;  %v674_v58 = vsel %vm12196_vm9, %v473_v47, %v673_v51  ;;  %v482_v62 = vsel %vm12206_vm10, %v474_v49, %v481_v50  ;;  %v608_v25 = vsel %vm12230_vm11, %v313_v59, %v607_v0  ;;  %v255_v47 = vld [vmem:[%s12083_s21 + $0x6c] sm:$0xf] }
  0x41   : > { %221 = vst.msk [vmem:[#allocation2 + $0xbc] sm:$0x1] %vm175_vm2, %v16598_v1  ;;  %10682 = vmatmul.msk.bf16.vlgmr.msra.gmra.mxu0 %vm1195_vm1, %v1173_v11  ;;  %v493_v55 = vshrl.u32 %v255_v47, 16  ;;  %v496_v59 = vshll.u32 %v255_v47, 16 }
  0x42   : > { %224 = vst.msk [vmem:[#allocation2 + $0xc8] sm:$0x1] %vm175_vm2, %v16598_v1 }
  0x43   : > { %16624 = vst [vmem:[#allocation6_spill] sm:$0xff] %v16623_v17 }
  0x44   : > { %227 = vst.msk [vmem:[#allocation2 + $0xd4] sm:$0x1] %vm175_vm2, %v16598_v1  ;;  %vm7208_vm2 = vcmask 1043456  }
  0x45   : > { %661 = vst [vmem:[#allocation2 + $0x84] sm:$0xf] %v660_v12 }
  0x46   : > { %662 = vst.msk [vmem:[#allocation2 + $0x88] sm:$0xf] %vm172_vm0, %v448_v15 }
  0x47   : > { %589 = vst [vmem:[#allocation2 + $0xc] sm:$0xf] %v588_v16 }
  0x48   : > { %590 = vst.msk [vmem:[#allocation2 + $0x10] sm:$0xf] %vm172_vm0, %v278_v21 }
  0x49   : > { %595 = vst [vmem:[#allocation2 + $0x14] sm:$0x1] %v594_v31 }
  0x4a   : > { %668 = vst [vmem:[#allocation2 + $0x90] sm:$0xf] %v667_v37 }
  0x4b   : > { %669 = vst.msk [vmem:[#allocation2 + $0x94] sm:$0xf] %vm172_vm0, %v465_v42 }
  0x4c   : > { %598 = vst [vmem:[#allocation2 + $0x18] sm:$0xf] %v597_v46 }
  0x4d   : > { %v11615_v57 = vld [vmem:[#allocation2 + $0x84] sm:$0xff]  ;;  %599 = vst.msk [vmem:[#allocation2 + $0x1c] sm:$0xf] %vm172_vm0, %v295_v48 }
  0x4e   : > { %v703_v61 = vld [vmem:[#allocation2 + $0xc] sm:$0xf]  ;;  %602 = vst [vmem:[#allocation2 + $0x20] sm:$0x1] %v601_v52  ;;  %10777 = vmatmul.msk.bf16.vlgmr.msra.gmra.mxu2 %vm1195_vm1, %v11615_v57  ;;  %v680_v48 = vld [vmem:[#allocation2 + $0xa8] sm:$0xf] }
  0x4f   : > { %v11605_v4 = vld [vmem:[#allocation2 + $0xc] sm:$0xff]  ;;  %v779_v7 = vshrl.u32 %v703_v61, 16  ;;  %v782_v8 = vshll.u32 %v703_v61, 16  ;;  %675 = vst [vmem:[#allocation2 + $0x9c] sm:$0xf] %v674_v58  ;;  %v681_v61 = vsel %vm12196_vm9, %v490_v39, %v680_v48  ;;  %v505_v39 = vshll.u32 %v256_v22, 16 }
  0x50   : > { %v12266_v6 = vld [vmem:[#allocation2 + $0x10] sm:$0xf]  ;;  %v12270_v11 = vld [vmem:[#allocation2 + $0x14] sm:$0x1]  ;;  %10767 = vmatmul.msk.bf16.gmra.mxu1 %vm1195_vm1, %v11605_v4  ;;  %676 = vst.msk [vmem:[#allocation2 + $0xa0] sm:$0xf] %vm172_vm0, %v482_v62 }
  0x51   : > { %v788_v12 = vshll.u32 %v12266_v6, 16  ;;  %v792_v13 = vshrl.u32 %v12266_v6, 16  ;;  %v781_v15 = vrot.slane %v779_v7, 4  ;;  %v784_v16 = vrot.slane %v782_v8, 5  ;;  %605 = vst [vmem:[#allocation2 + $0x24] sm:$0xf] %v604_v9 }
  0x52   : > { %v798_v18 = vshll.u32 %v12270_v11, 16  ;;  %606 = vst.msk [vmem:[#allocation2 + $0x28] sm:$0xf] %vm172_vm0, %v312_v14  ;;  %v11616_v0 = vld [vmem:[#allocation2 + $0x90] sm:$0xff]  ;;  %v491_v7 = vrot.slane %v12279_v19, 4  ;;  %v12302_v8 = vrot.slane %v493_v55, 7 }
  0x53   : > { %v790_v20 = vrot.slane %v788_v12, 5  ;;  %v794_v21 = vrot.slane %v792_v13, 4  ;;  %v785_v23 = vor.u32 %v784_v16, %v781_v15  ;;  %v705_v24 = vld [vmem:[#allocation2 + $0x18] sm:$0xf]  ;;  %609 = vst [vmem:[#allocation2 + $0x2c] sm:$0x1] %v608_v25 }
  0x54   : > { %v800_v28 = vrot.slane %v798_v18, 5  ;;  %v12284_v29 = vld [vmem:[#allocation2 + $0x1c] sm:$0xf]  ;;  %v803_v30 = vshrl.u32 %v705_v24, 16  ;;  %v806_v31 = vshll.u32 %v705_v24, 16  ;;  %v498_v18 = vor.u32 %v496_v59, %v12302_v8 }
  0x55   : > { %v795_v27 = vor.u32 %v794_v21, %v790_v20  ;;  %v786_v33 = vrot.slane %v785_v23, 4  ;;  %v12286_v34 = vld [vmem:[#allocation2 + $0x20] sm:$0x1]  ;;  %v812_v36 = vshll.u32 %v12284_v29, 16  ;;  %v816_v37 = vshrl.u32 %v12284_v29, 16  ;;  %v11606_v10 = vld [vmem:[#allocation2 + $0x18] sm:$0xff] }
  0x56   : > { %v805_v41 = vrot.slane %v803_v30, 4  ;;  %v808_v42 = vrot.slane %v806_v31, 5  ;;  %v822_v43 = vshll.u32 %v12286_v34, 16  ;;  %682 = vst [vmem:[#allocation2 + $0xa8] sm:$0xf] %v681_v61  ;;  %v499_v25 = vsel %vm12206_vm10, %v491_v7, %v498_v18 }
  0x57   : > { %v796_v40 = vrot.slane %v795_v27, 4  ;;  %v791_v44 = vsel %vm12141_vm8, %v786_v33, %v790_v20  ;;  %v814_v45 = vrot.slane %v812_v36, 5  ;;  %v818_v46 = vrot.slane %v816_v37, 4  ;;  %v234_v9 = vld [vmem:[%s12083_s21 + $0x18] sm:$0xf] }
  0x58   : > { %v1143_v50 = vunpack.c.l.b16 %v791_v44  ;;  %v809_v51 = vor.u32 %v808_v42, %v805_v41  ;;  %v707_v54 = vld [vmem:[#allocation2 + $0x24] sm:$0xf]  ;;  %v824_v57 = vrot.slane %v822_v43, 5  ;;  %v235_v19 = vld [vmem:[%s12083_s21 + $0x1c] sm:$0xf]  ;;  %v315_v20 = vshrl.u32 %v234_v9, 16 }
  0x59   : > { %v801_v49 = vsel %vm12141_vm8, %v796_v40, %v800_v28  ;;  %v819_v53 = vor.u32 %v818_v46, %v814_v45  ;;  %v12297_v58 = vld [vmem:[#allocation2 + $0x28] sm:$0xf]  ;;  %v827_v4 = vshrl.u32 %v707_v54, 16  ;;  %v830_v12 = vshll.u32 %v707_v54, 16  ;;  %v257_v23 = vld [vmem:[%s12083_s21 + $0x74] sm:$0xf] }
  0x5a   : > { %v1144_v52 = vunpack.c.l.b16 %v801_v49  ;;  %v810_v56 = vrot.slane %v809_v51, 4  ;;  %v836_v13 = vshll.u32 %v12297_v58, 16  ;;  %v840_v16 = vshrl.u32 %v12297_v58, 16  ;;  %683 = vst.msk [vmem:[#allocation2 + $0xac] sm:$0xf] %vm172_vm0, %v499_v25  ;;  %v11617_v25 = vld [vmem:[#allocation2 + $0x9c] sm:$0xff] }
  0x5b   : > { %v820_v3 = vrot.slane %v819_v53, 4  ;;  %v318_v21 = vshll.u32 %v234_v9, 16  ;;  %v12317_v24 = vrot.slane %v827_v4, 4  ;;  %v317_v30 = vrot.slane %v315_v20, 7  ;;  %v610_v33 = vld [vmem:[#allocation2 + $0x30] sm:$0xf] }
  0x5c   : > { %v1174_v62 = vpack.c.b16 %v1144_v52, %v1143_v50  ;;  %v815_v14 = vsel %vm12141_vm8, %v810_v56, %v814_v45  ;;  %v323_v31 = vshrl.u32 %v235_v19, 16  ;;  %v326_v36 = vshll.u32 %v235_v19, 16  ;;  %v236_v41 = vld [vmem:[%s12083_s21 + $0x20] sm:$0xf]  ;;  %v614_v46 = vld [vmem:[#allocation2 + $0x38] sm:$0x1] }
  0x5d   : > { %v825_v15 = vsel %vm12141_vm8, %v820_v3, %v824_v57  ;;  %v1145_v27 = vunpack.c.l.b16 %v815_v14  ;;  %v502_v37 = vshrl.u32 %v256_v22, 16  ;;  %v510_v40 = vshrl.u32 %v257_v23, 16  ;;  %v237_v51 = vld [vmem:[%s12083_s21 + $0x24] sm:$0xf]  ;;  %v687_v54 = vld [vmem:[#allocation2 + $0xb4] sm:$0xf] }
  0x5e   : > { %10683 = vmatmul.msk.bf16.gmra.mxu0 %vm1195_vm1, %v1174_v62  ;;  %10778 = vmatmul.msk.bf16.gmra.mxu2 %vm1195_vm1, %v11616_v0  ;;  %v1146_v28 = vunpack.c.l.b16 %v825_v15  ;;  %v832_v42 = vrot.slane %v830_v12, 5  ;;  %v12324_v43 = vrot.slane %v836_v13, 5  ;;  %v842_v44 = vrot.slane %v840_v16, 4  ;;  %v12331_v0 = vld [vmem:[#allocation2 + $0x2c] sm:$0x1] }
  0x5f   : > { %v320_v45 = vor.u32 %v318_v21, %v317_v30  ;;  %v321_v47 = vrot.slane %v317_v30, 4  ;;  %v325_v48 = vrot.slane %v323_v31, 7  ;;  %v504_v49 = vrot.slane %v502_v37, 7  ;;  %v617_v15 = vld [vmem:[#allocation2 + $0x3c] sm:$0xf] }
  0x60   : > { %10768 = vmatmul.msk.bf16.gmra.mxu1 %vm1195_vm1, %v11606_v10  ;;  %v12326_v50 = vrot.slane %v510_v40, 7  ;;  %v513_v53 = vshll.u32 %v257_v23, 16  ;;  %v332_v55 = vshrl.u32 %v236_v41, 16  ;;  %v335_v56 = vshll.u32 %v236_v41, 16  ;;  %v621_v31 = vld [vmem:[#allocation2 + $0x44] sm:$0x1] }
  0x61   : > { %v611_v52 = vsel %vm12196_vm9, %v320_v45, %v610_v33  ;;  %v1175_v57 = vpack.c.b16 %v1146_v28, %v1145_v27  ;;  %v328_v59 = vor.u32 %v326_v36, %v325_v48  ;;  %v330_v61 = vrot.slane %v325_v48, 4  ;;  %v11607_v33 = vld [vmem:[#allocation2 + $0x24] sm:$0xff] }
  0x62   : > { %612 = vst [vmem:[#allocation2 + $0x30] sm:$0xf] %v611_v52  ;;  %v507_v62 = vor.u32 %v505_v39, %v504_v49  ;;  %v508_v3 = vrot.slane %v504_v49, 4  ;;  %v515_v4 = vor.u32 %v513_v53, %v12326_v50  ;;  %v334_v7 = vrot.slane %v332_v55, 7  ;;  %v238_v52 = vld [vmem:[%s12083_s21 + $0x28] sm:$0xf] }
  0x63   : > { %v340_v9 = vshrl.u32 %v237_v51, 16  ;;  %v329_v10 = vsel %vm12206_vm10, %v321_v47, %v328_v59  ;;  %v615_v12 = vsel %vm12230_vm11, %v330_v61, %v614_v46  ;;  %v343_v14 = vshll.u32 %v237_v51, 16  ;;  %v11622_v46 = vld [vmem:[%s16595_s1 + $0x10] sm:$0xff] }
  0x64   : > { %v688_v13 = vsel %vm12196_vm9, %v507_v62, %v687_v54  ;;  %613 = vst.msk [vmem:[#allocation2 + $0x34] sm:$0xf] %vm172_vm0, %v329_v10  ;;  %v516_v16 = vsel %vm12206_vm10, %v508_v3, %v515_v4  ;;  %v337_v18 = vor.u32 %v335_v56, %v334_v7  ;;  %v338_v19 = vrot.slane %v334_v7, 4  ;;  %1831 = vmatpush.bf16.msrb.mxu2 %v11622_v46  ;;  %v239_v3 = vld [vmem:[%s12083_s21 + $0x2c] sm:$0xf] }
  0x65   : > { %v342_v20 = vrot.slane %v340_v9, 7  ;;  %v833_v21 = vor.u32 %v832_v42, %v12317_v24  ;;  %v843_v22 = vor.u32 %v842_v44, %v12324_v43  ;;  %v846_v23 = vshll.u32 %v12331_v0, 16  ;;  %616 = vst [vmem:[#allocation2 + $0x38] sm:$0x1] %v615_v12  ;;  %v241_v46 = vld [vmem:[%s12083_s21 + $0x34] sm:$0xf] }
  0x66   : > { %689 = vst [vmem:[#allocation2 + $0xb4] sm:$0xf] %v688_v13  ;;  %v618_v30 = vsel %vm12196_vm9, %v337_v18, %v617_v15  ;;  %v349_v53 = vshrl.u32 %v238_v52, 16  ;;  %v352_v4 = vshll.u32 %v238_v52, 16  ;;  %v357_v12 = vshrl.u32 %v239_v3, 16 }
  0x67   : > { %v345_v27 = vor.u32 %v343_v14, %v342_v20  ;;  %v347_v28 = vrot.slane %v342_v20, 4  ;;  %690 = vst.msk [vmem:[#allocation2 + $0xb8] sm:$0xf] %vm172_vm0, %v516_v16  ;;  %v834_v39 = vrot.slane %v833_v21, 4  ;;  %v844_v40 = vrot.slane %v843_v22, 4  ;;  %v11618_v16 = vld [vmem:[#allocation2 + $0xa8] sm:$0xff] }
  0x68   : > { %619 = vst [vmem:[#allocation2 + $0x3c] sm:$0xf] %v618_v30  ;;  %v848_v41 = vrot.slane %v846_v23, 5  ;;  %v624_v15 = vld [vmem:[#allocation2 + $0x48] sm:$0xf] }
  0x69   : > { %v709_v36 = vld [vmem:[#allocation2 + $0x30] sm:$0xf]  ;;  %v346_v24 = vsel %vm12206_vm10, %v338_v19, %v345_v27  ;;  %v622_v37 = vsel %vm12230_vm11, %v347_v28, %v621_v31  ;;  %v839_v47 = vsel %vm12141_vm8, %v834_v39, %v12324_v43  ;;  %v351_v43 = vrot.slane %v349_v53, 7 }
  0x6a   : > { %620 = vst.msk [vmem:[#allocation2 + $0x40] sm:$0xf] %vm172_vm0, %v346_v24  ;;  %v851_v44 = vshrl.u32 %v709_v36, 16  ;;  %v854_v45 = vshll.u32 %v709_v36, 16  ;;  %v849_v48 = vsel %vm12141_vm8, %v844_v40, %v848_v41  ;;  %v1147_v56 = vunpack.c.l.b16 %v839_v47  ;;  %v628_v36 = vld [vmem:[#allocation2 + $0x50] sm:$0x1] }
  0x6b   : > { %623 = vst [vmem:[#allocation2 + $0x44] sm:$0x1] %v622_v37  ;;  %v12356_v42 = vld [vmem:[#allocation2 + $0x34] sm:$0xf]  ;;  %v354_v18 = vor.u32 %v352_v4, %v351_v43  ;;  %v360_v19 = vshll.u32 %v239_v3, 16  ;;  %v355_v27 = vrot.slane %v351_v43, 4 }
  0x6c   : > { %v860_v49 = vshll.u32 %v12356_v42, 16  ;;  %v864_v51 = vshrl.u32 %v12356_v42, 16  ;;  %v853_v54 = vrot.slane %v851_v44, 4  ;;  %v856_v55 = vrot.slane %v854_v45, 5  ;;  %v12370_v59 = vld [vmem:[#allocation2 + $0x38] sm:$0x1] }
  0x6d   : > { %v870_v9 = vshll.u32 %v12370_v59, 16  ;;  %v11608_v23 = vld [vmem:[#allocation2 + $0x30] sm:$0xff]  ;;  %v359_v28 = vrot.slane %v357_v12, 7  ;;  %v625_v30 = vsel %vm12196_vm9, %v354_v18, %v624_v15  ;;  %v377_v43 = vshll.u32 %v241_v46, 16  ;;  %v1557_v12 = vld [vmem:[#allocation2 + $0xc] sm:$0xe] }
  0x6e   : > { %10684 = vmatmul.msk.bf16.gmra.mxu0 %vm1195_vm1, %v1175_v57  ;;  %10779 = vmatmul.msk.bf16.gmra.mxu2 %vm1195_vm1, %v11617_v25  ;;  %v1148_v57 = vunpack.c.l.b16 %v849_v48  ;;  %v862_v61 = vrot.slane %v860_v49, 5  ;;  %v866_v62 = vrot.slane %v864_v51, 4  ;;  %v857_v7 = vor.u32 %v856_v55, %v853_v54  ;;  %626 = vst [vmem:[#allocation2 + $0x48] sm:$0xf] %v625_v30  ;;  %v240_v45 = vld [vmem:[%s12083_s21 + $0x30] sm:$0xf] }
  0x6f   : > { %v711_v14 = vld [vmem:[#allocation2 + $0x3c] sm:$0xf]  ;;  %v872_v21 = vrot.slane %v870_v9, 5  ;;  %v362_v39 = vor.u32 %v360_v19, %v359_v28  ;;  %v364_v40 = vrot.slane %v359_v28, 4  ;;  %v366_v49 = vshrl.u32 %v240_v45, 16  ;;  %v11619_v28 = vld [vmem:[#allocation2 + $0xb4] sm:$0xff] }
  0x70   : > { %10769 = vmatmul.msk.bf16.gmra.mxu1 %vm1195_vm1, %v11607_v33  ;;  %v1176_v10 = vpack.c.b16 %v1148_v57, %v1147_v56  ;;  %v867_v13 = vor.u32 %v866_v62, %v862_v61  ;;  %v858_v20 = vrot.slane %v857_v7, 4  ;;  %v875_v25 = vshrl.u32 %v711_v14, 16  ;;  %v631_v15 = vld [vmem:[#allocation2 + $0x54] sm:$0xf]  ;;  %v1556_v30 = vld [vmem:[#allocation2] sm:$0xe] }
  0x71   : > { %v12374_v22 = vld [vmem:[#allocation2 + $0x40] sm:$0xf]  ;;  %v878_v33 = vshll.u32 %v711_v14, 16  ;;  %v363_v41 = vsel %vm12206_vm10, %v355_v27, %v362_v39  ;;  %v629_v44 = vsel %vm12230_vm11, %v364_v40, %v628_v36  ;;  %v374_v51 = vshrl.u32 %v241_v46, 16 }
  0x72   : > { %v868_v31 = vrot.slane %v867_v13, 4  ;;  %v884_v24 = vshll.u32 %v12374_v22, 16  ;;  %v888_v37 = vshrl.u32 %v12374_v22, 16  ;;  %v863_v47 = vsel %vm12141_vm8, %v858_v20, %v862_v61  ;;  %627 = vst.msk [vmem:[#allocation2 + $0x4c] sm:$0xf] %vm172_vm0, %v363_v41 }
  0x73   : > { %v877_v52 = vrot.slane %v875_v25, 4  ;;  %v880_v53 = vrot.slane %v878_v33, 5  ;;  %630 = vst [vmem:[#allocation2 + $0x50] sm:$0x1] %v629_v44  ;;  %v12396_v56 = vld [vmem:[#allocation2 + $0x44] sm:$0x1]  ;;  %v1149_v61 = vunpack.c.l.b16 %v863_v47 }
  0x74   : > { %v873_v48 = vsel %vm12141_vm8, %v868_v31, %v872_v21  ;;  %v12394_v54 = vrot.slane %v884_v24, 5  ;;  %v890_v55 = vrot.slane %v888_v37, 4  ;;  %v368_v57 = vrot.slane %v366_v49, 7 }
  0x75   : > { %v369_v62 = vshll.u32 %v240_v45, 16  ;;  %v376_v3 = vrot.slane %v374_v51, 7  ;;  %v1150_v4 = vunpack.c.l.b16 %v873_v48  ;;  %v1616_v7 = vrot.slane %v12266_v6, 5  ;;  %v11609_v45 = vld [vmem:[#allocation2 + $0x3c] sm:$0xff]  ;;  %v713_v46 = vld [vmem:[#allocation2 + $0x48] sm:$0xf] }
  0x76   : > { %v372_v13 = vrot.slane %v368_v57, 4  ;;  %v891_v18 = vor.u32 %v890_v55, %v12394_v54  ;;  %v10783_v19 = vrot.slane %v1557_v12, 9  ;;  %v1619_v25 = vrot.slane %v12270_v11, 5  ;;  %v635_v11 = vld [vmem:[#allocation2 + $0x5c] sm:$0x1] }
  0x77   : > { %v371_v9 = vor.u32 %v369_v62, %v368_v57  ;;  %v379_v14 = vor.u32 %v377_v43, %v376_v3  ;;  %v1618_v20 = vrot.slane %v1616_v7, 4  ;;  %v1177_v21 = vpack.c.b16 %v1150_v4, %v1149_v61  ;;  %v242_v61 = vld [vmem:[%s12083_s21 + $0x38] sm:$0xf] }
  0x78   : > { %v1617_v31 = vsel %vm12401_vm14, %v10783_v19, %v1616_v7  ;;  %v1609_v33 = vrot.slane %v12087_v5, 5  ;;  %v381_v37 = vrot.slane %v376_v3, 4  ;;  %v892_v40 = vrot.slane %v891_v18, 4 }
  0x79   : > { %v380_v6 = vsel %vm12206_vm10, %v372_v13, %v379_v14  ;;  %v632_v27 = vsel %vm12196_vm9, %v371_v9, %v631_v15  ;;  %v1620_v36 = vsel %vm12401_vm14, %v1618_v20, %v1619_v25  ;;  %v1724_v24 = vunpack.c.l.b16 %v1617_v31  ;;  %v12419_v48 = vld [vmem:[#allocation2 + $0x4c] sm:$0xf] }
  0x7a   : > { %633 = vst [vmem:[#allocation2 + $0x54] sm:$0xf] %v632_v27  ;;  %v1725_v44 = vunpack.c.l.b16 %v1620_v36  ;;  %v636_v5 = vsel %vm12230_vm11, %v381_v37, %v635_v11  ;;  %v10782_v47 = vrot.slane %v1556_v30, 9  ;;  %v1612_v51 = vrot.slane %v12158_v38, 5  ;;  %v243_v38 = vld [vmem:[%s12083_s21 + $0x3c] sm:$0xf] }
  0x7b   : > { %634 = vst.msk [vmem:[#allocation2 + $0x58] sm:$0xf] %vm172_vm0, %v380_v6  ;;  %v899_v57 = vshrl.u32 %v713_v46, 16  ;;  %v902_v62 = vshll.u32 %v713_v46, 16  ;;  %v908_v3 = vshll.u32 %v12419_v48, 16  ;;  %v912_v43 = vshrl.u32 %v12419_v48, 16 }
  0x7c   : > { %v12421_v49 = vpack.c.b16 %v1725_v44, %v1724_v24  ;;  %637 = vst [vmem:[#allocation2 + $0x5c] sm:$0x1] %v636_v5  ;;  %v1610_v4 = vsel %vm12401_vm14, %v10782_v47, %v1609_v33  ;;  %v383_v7 = vshrl.u32 %v242_v61, 16  ;;  %v391_v12 = vshrl.u32 %v243_v38, 16  ;;  %v638_v30 = vld [vmem:[#allocation2 + $0x60] sm:$0xf] }
  0x7d   : > { %v901_v13 = vrot.slane %v899_v57, 4  ;;  %v904_v14 = vrot.slane %v902_v62, 5  ;;  %v910_v18 = vrot.slane %v908_v3, 5  ;;  %v914_v19 = vrot.slane %v912_v43, 4  ;;  %v642_v44 = vld [vmem:[#allocation2 + $0x68] sm:$0x1] }
  0x7e   : > { %10685 = vmatmul.msk.bf16.gmra.mxu0 %vm1195_vm1, %v1176_v10  ;;  %10780 = vmatmul.msk.bf16.gmra.mxu2 %vm1195_vm1, %v11618_v16  ;;  %v894_v10 = vshll.u32 %v12396_v56, 16  ;;  %v881_v16 = vor.u32 %v880_v53, %v877_v52  ;;  %v1611_v52 = vrot.slane %v1609_v33, 4  ;;  %v385_v15 = vrot.slane %v383_v7, 7  ;;  %v11610_v5 = vld [vmem:[#allocation2 + $0x48] sm:$0xff] }
  0x7f   : > { %v393_v20 = vrot.slane %v391_v12, 7  ;;  %v1722_v6 = vunpack.c.l.b16 %v1610_v4  ;;  %v905_v33 = vor.u32 %v904_v14, %v901_v13  ;;  %v915_v24 = vor.u32 %v914_v19, %v910_v18 }
  0x80   : > { %10770 = vmatmul.msk.bf16.gmra.mxu1 %vm1195_vm1, %v11608_v23  ;;  %v882_v39 = vrot.slane %v881_v16, 4  ;;  %v896_v41 = vrot.slane %v894_v10, 5  ;;  %v386_v16 = vshll.u32 %v242_v61, 16  ;;  %v389_v36 = vrot.slane %v385_v15, 4  ;;  %v244_v61 = vld [vmem:[%s12083_s21 + $0x40] sm:$0xf] }
  0x81   : > { %v906_v47 = vrot.slane %v905_v33, 4  ;;  %v403_v14 = vshll.u32 %v244_v61, 16 }
  0x82   : > { %v887_v53 = vsel %vm12141_vm8, %v882_v39, %v12394_v54  ;;  %v897_v55 = vsel %vm12141_vm8, %v892_v40, %v896_v41  ;;  %v1613_v54 = vsel %vm12401_vm14, %v1611_v52, %v1612_v51  ;;  %v388_v25 = vor.u32 %v386_v16, %v385_v15 }
  0x83   : > { %v1151_v9 = vunpack.c.l.b16 %v887_v53  ;;  %v1152_v10 = vunpack.c.l.b16 %v897_v55  ;;  %v1723_v27 = vunpack.c.l.b16 %v1613_v54  ;;  %v398_v40 = vrot.slane %v393_v20, 4  ;;  %v715_v53 = vld [vmem:[#allocation2 + $0x54] sm:$0xf]  ;;  %v12451_v55 = vld [vmem:[#allocation2 + $0x58] sm:$0xf] }
  0x84   : > { %v639_v39 = vsel %vm12196_vm9, %v388_v25, %v638_v30  ;;  %v916_v51 = vrot.slane %v915_v24, 4  ;;  %v911_v57 = vsel %vm12141_vm8, %v906_v47, %v910_v18  ;;  %v923_v3 = vshrl.u32 %v715_v53, 16  ;;  %v12462_v25 = vld [vmem:[#allocation2 + $0x5c] sm:$0x1]  ;;  %v645_v30 = vld [vmem:[#allocation2 + $0x6c] sm:$0xf] }
  0x85   : > { %v1178_v31 = vpack.c.b16 %v1152_v10, %v1151_v9  ;;  %640 = vst [vmem:[#allocation2 + $0x60] sm:$0xf] %v639_v39  ;;  %v1754_v41 = vpack.c.b16 %v1723_v27, %v1722_v6  ;;  %v643_v46 = vsel %vm12230_vm11, %v398_v40, %v642_v44  ;;  %v926_v43 = vshll.u32 %v715_v53, 16  ;;  %v649_v40 = vld [vmem:[#allocation2 + $0x74] sm:$0x1] }
  0x86   : > { %644 = vst [vmem:[#allocation2 + $0x68] sm:$0x1] %v643_v46  ;;  %v932_v4 = vshll.u32 %v12451_v55, 16  ;;  %v936_v7 = vshrl.u32 %v12451_v55, 16  ;;  %v400_v9 = vshrl.u32 %v244_v61, 16  ;;  %v1153_v12 = vunpack.c.l.b16 %v911_v57  ;;  %v11611_v47 = vld [vmem:[#allocation2 + $0x54] sm:$0xff] }
  0x87   : > { %v925_v16 = vrot.slane %v923_v3, 4  ;;  %v928_v18 = vrot.slane %v926_v43, 5  ;;  %v1623_v44 = vrot.slane %v12284_v29, 5  ;;  %v1626_v61 = vrot.slane %v12286_v34, 5 }
  0x88   : > { %v402_v54 = vrot.slane %v400_v9, 7  ;;  %v934_v19 = vrot.slane %v932_v4, 5  ;;  %v247_v9 = vld [vmem:[%s12083_s21 + $0x4c] sm:$0xf] }
  0x89   : > { %v929_v24 = vor.u32 %v928_v18, %v925_v16  ;;  %v1625_v43 = vrot.slane %v1623_v44, 4 }
  0x8a   : > { %v405_v6 = vor.u32 %v403_v14, %v402_v54 }
  0x8e   : > { %10686 = vmatmul.msk.bf16.gmra.mxu0 %vm1195_vm1, %v1177_v21  ;;  %10781 = vmatmul.msk.bf16.gmra.mxu2 %vm1195_vm1, %v11619_v28  ;;  %v12439_v21 = vld [vmem:[#allocation2 + $0x50] sm:$0x1]  ;;  %v394_v28 = vshll.u32 %v243_v38, 16  ;;  %v245_v38 = vld [vmem:[%s12083_s21 + $0x44] sm:$0xf] }
  0x8f   : > { %v918_v37 = vshll.u32 %v12439_v21, 16  ;;  %v408_v10 = vshrl.u32 %v245_v38, 16  ;;  %v411_v27 = vshll.u32 %v245_v38, 16 }
  0x90   : > { %10771 = vmatmul.msk.bf16.gmra.mxu1 %vm1195_vm1, %v11609_v45  ;;  %v396_v11 = vor.u32 %v394_v28, %v393_v20  ;;  %v938_v20 = vrot.slane %v936_v7, 4  ;;  %v406_v28 = vrot.slane %v402_v54, 4  ;;  %v246_v7 = vld [vmem:[%s12083_s21 + $0x48] sm:$0xf] }
  0x91   : > { %v920_v52 = vrot.slane %v918_v37, 5  ;;  %v410_v15 = vrot.slane %v408_v10, 7  ;;  %v417_v54 = vshrl.u32 %v246_v7, 16 }
  0x92   : > { %v397_v45 = vsel %vm12206_vm10, %v389_v36, %v396_v11  ;;  %v646_v36 = vsel %vm12196_vm9, %v405_v6, %v645_v30  ;;  %v939_v37 = vor.u32 %v938_v20, %v934_v19  ;;  %v942_v11 = vshll.u32 %v12462_v25, 16 }
  0x93   : > { %641 = vst.msk [vmem:[#allocation2 + $0x64] sm:$0xf] %vm172_vm0, %v397_v45  ;;  %v921_v62 = vsel %vm12141_vm8, %v916_v51, %v920_v52  ;;  %v413_v33 = vor.u32 %v411_v27, %v410_v15  ;;  %v415_v39 = vrot.slane %v410_v15, 4  ;;  %v717_v45 = vld [vmem:[#allocation2 + $0x60] sm:$0xf]  ;;  %v930_v52 = vrot.slane %v929_v24, 4 }
  0x94   : > { %v1154_v13 = vunpack.c.l.b16 %v921_v62  ;;  %647 = vst [vmem:[#allocation2 + $0x6c] sm:$0xf] %v646_v36  ;;  %v940_v53 = vrot.slane %v939_v37, 4  ;;  %v944_v57 = vrot.slane %v942_v11, 5  ;;  %v947_v62 = vshrl.u32 %v717_v45, 16 }
  0x95   : > { %v414_v46 = vsel %vm12206_vm10, %v406_v28, %v413_v33  ;;  %v950_v3 = vshll.u32 %v717_v45, 16  ;;  %v935_v10 = vsel %vm12141_vm8, %v930_v52, %v934_v19  ;;  %v1627_v15 = vsel %vm12401_vm14, %v1625_v43, %v1626_v61  ;;  %v12492_v28 = vld [vmem:[#allocation2 + $0x68] sm:$0x1]  ;;  %v1559_v43 = vld [vmem:[#allocation2 + $0x24] sm:$0xe] }
  0x96   : > { %648 = vst.msk [vmem:[#allocation2 + $0x70] sm:$0xf] %vm172_vm0, %v414_v46  ;;  %v949_v34 = vrot.slane %v947_v62, 4  ;;  %v419_v20 = vrot.slane %v417_v54, 7  ;;  %v1155_v6 = vunpack.c.l.b16 %v935_v10  ;;  %v420_v19 = vshll.u32 %v246_v7, 16 }
  0x97   : > { %v952_v14 = vrot.slane %v950_v3, 5  ;;  %v1727_v33 = vunpack.c.l.b16 %v1627_v15  ;;  %v428_v37 = vshll.u32 %v247_v9, 16 }
  0x98   : > { %v422_v24 = vor.u32 %v420_v19, %v419_v20 }
  0x99   : > { %v953_v36 = vor.u32 %v952_v14, %v949_v34 }
  0x9a   : > { %v12473_v51 = vld [vmem:[#allocation2 + $0x64] sm:$0xf] }
  0x9b   : > { %v956_v38 = vshll.u32 %v12473_v51, 16  ;;  %v960_v4 = vshrl.u32 %v12473_v51, 16  ;;  %v719_v7 = vld [vmem:[#allocation2 + $0x6c] sm:$0xf] }
  0x9c   : > { %v971_v34 = vshrl.u32 %v719_v7, 16  ;;  %v974_v14 = vshll.u32 %v719_v7, 16 }
  0x9d   : > { %v958_v16 = vrot.slane %v956_v38, 5  ;;  %v962_v18 = vrot.slane %v960_v4, 4  ;;  %v11612_v4 = vld [vmem:[#allocation2 + $0x60] sm:$0xff] }
  0x9e   : > { %10687 = vmatmul.msk.bf16.gmra.mxu0 %vm1195_vm1, %v1178_v31  ;;  %10804 = vmatmul.msk.bf16.vlgmr.msrb.gmra.mxu2 %vm1195_vm1, %v1754_v41  ;;  %v1179_v31 = vpack.c.b16 %v1154_v13, %v1153_v12  ;;  %v1558_v41 = vld [vmem:[#allocation2 + $0x18] sm:$0xe]  ;;  %v425_v12 = vshrl.u32 %v247_v9, 16  ;;  %v12504_v9 = vld [vmem:[#allocation2 + $0x70] sm:$0xf] }
  0x9f   : > { %v10784_v29 = vrot.slane %v1558_v41, 9  ;;  %v963_v11 = vor.u32 %v962_v18, %v958_v16  ;;  %v652_v41 = vld [vmem:[#allocation2 + $0x78] sm:$0xf]  ;;  %v980_v15 = vshll.u32 %v12504_v9, 16  ;;  %v984_v18 = vshrl.u32 %v12504_v9, 16 }
  0xa0   : > { %10772 = vmatmul.msk.bf16.gmra.mxu1 %vm1195_vm1, %v11610_v5  ;;  %v650_v5 = vsel %vm12230_vm11, %v415_v39, %v649_v40  ;;  %v427_v30 = vrot.slane %v425_v12, 7  ;;  %v966_v39 = vshll.u32 %v12492_v28, 16  ;;  %v423_v40 = vrot.slane %v419_v20, 4 }
  0xa1   : > { %651 = vst [vmem:[#allocation2 + $0x74] sm:$0x1] %v650_v5  ;;  %v1624_v13 = vsel %vm12401_vm14, %v10784_v29, %v1623_v44  ;;  %v653_v46 = vsel %vm12196_vm9, %v422_v24, %v652_v41  ;;  %v1476_v5 = vpop.f32.mrf.mxu1  ;;  %v656_v29 = vld [vmem:[#allocation2 + $0x80] sm:$0x1]  ;;  %v964_v62 = vrot.slane %v963_v11, 4  ;;  %v1633_v12 = vrot.slane %v12331_v0, 5 }
  0xa2   : > { %v430_v45 = vor.u32 %v428_v37, %v427_v30  ;;  %654 = vst [vmem:[#allocation2 + $0x78] sm:$0xf] %v653_v46  ;;  %v968_v3 = vrot.slane %v966_v39, 5  ;;  %v449_v39 = vrot.slane %v12132_v26, 4  ;;  %v11639_v26 = vld [vmem:[%s16595_s1 + $0x18] sm:$0xff] }
  0xa3   : > { %2121 = vmatpush.bf16.msrb.mxu1 %v11639_v26  ;;  %11710 = vmatpush.bf16.msra.mxu3 %v11639_v26 }
  0xa4   : > { %v431_v61 = vsel %vm12206_vm10, %v423_v40, %v430_v45 }
  0xa5   : > { %655 = vst.msk [vmem:[#allocation2 + $0x7c] sm:$0xf] %vm172_vm0, %v431_v61 }
  0xa8   : > { %v12523_v24 = vld [vmem:[#allocation2 + $0x74] sm:$0x1] }
  0xa9   : > { %v990_v45 = vshll.u32 %v12523_v24, 16  ;;  %v721_v61 = vld [vmem:[#allocation2 + $0x78] sm:$0xf] }
  0xae   : > { %10688 = vmatmul.msk.bf16.gmra.mxu0 %vm1195_vm1, %v1179_v31  ;;  %10805 = vmatmul.msk.bf16.gmra.mxu2 %vm1195_vm1, %v12421_v49  ;;  %v945_v49 = vsel %vm12141_vm8, %v940_v53, %v944_v57  ;;  %v1726_v31 = vunpack.c.l.b16 %v1624_v13  ;;  %v954_v53 = vrot.slane %v953_v36, 4  ;;  %v1630_v57 = vrot.slane %v12297_v58, 5 }
  0xaf   : > { %v1156_v27 = vunpack.c.l.b16 %v945_v49  ;;  %v10785_v58 = vrot.slane %v1559_v43, 9  ;;  %v969_v49 = vsel %vm12141_vm8, %v964_v62, %v968_v3  ;;  %v986_v36 = vrot.slane %v984_v18, 4 }
  0xb0   : > { %10773 = vmatmul.msk.bf16.gmra.mxu1 %vm1195_vm1, %v11611_v47  ;;  %v432_v47 = vrot.slane %v427_v30, 4  ;;  %v1756_v52 = vpack.c.b16 %v1727_v33, %v1726_v31  ;;  %v959_v10 = vsel %vm12141_vm8, %v954_v53, %v958_v16  ;;  %v1632_v54 = vrot.slane %v1630_v57, 4 }
  0xb1   : > { %v1180_v44 = vpack.c.b16 %v1156_v27, %v1155_v6  ;;  %v12517_v6 = vpop.f32.mrf.mxu1  ;;  %v1157_v16 = vunpack.c.l.b16 %v959_v10  ;;  %v1158_v27 = vunpack.c.l.b16 %v969_v49  ;;  %v1631_v19 = vsel %vm12401_vm14, %v10785_v58, %v1630_v57 }
  0xb2   : > { %v657_v38 = vsel %vm12230_vm11, %v432_v47, %v656_v29  ;;  %v1634_v0 = vsel %vm12401_vm14, %v1632_v54, %v1633_v12  ;;  %v973_v30 = vrot.slane %v971_v34, 4  ;;  %v976_v31 = vrot.slane %v974_v14, 5  ;;  %v11613_v47 = vld [vmem:[#allocation2 + $0x6c] sm:$0xff] }
  0xb3   : > { %658 = vst [vmem:[#allocation2 + $0x80] sm:$0x1] %v657_v38  ;;  %v982_v33 = vrot.slane %v980_v15, 5  ;;  %v1728_v37 = vunpack.c.l.b16 %v1631_v19  ;;  %v1729_v11 = vunpack.c.l.b16 %v1634_v0  ;;  %v1181_v40 = vpack.c.b16 %v1158_v27, %v1157_v16  ;;  %v12535_v38 = vld [vmem:[#allocation2 + $0x7c] sm:$0xf] }
  0xb4   : > { %v977_v41 = vor.u32 %v976_v31, %v973_v30  ;;  %v1637_v53 = vrot.slane %v12356_v42, 5  ;;  %v992_v3 = vrot.slane %v990_v45, 5  ;;  %v1640_v58 = vrot.slane %v12370_v59, 5 }
  0xb5   : > { %v1757_v46 = vpack.c.b16 %v1729_v11, %v1728_v37  ;;  %v995_v12 = vshrl.u32 %v721_v61, 16  ;;  %v1004_v34 = vshll.u32 %v12535_v38, 16  ;;  %v1008_v14 = vshrl.u32 %v12535_v38, 16 }
  0xb6   : > { %v978_v29 = vrot.slane %v977_v41, 4  ;;  %v1639_v7 = vrot.slane %v1637_v53, 4  ;;  %v466_v11 = vrot.slane %v12200_v63, 4  ;;  %v11614_v63 = vld [vmem:[#allocation2 + $0x78] sm:$0xff] }
  0xb7   : > { %v997_v19 = vrot.slane %v995_v12, 4  ;;  %v1006_v30 = vrot.slane %v1004_v34, 5  ;;  %v1010_v31 = vrot.slane %v1008_v14, 4 }
  0xb8   : > { %v983_v10 = vsel %vm12141_vm8, %v978_v29, %v982_v33  ;;  %v1641_v15 = vsel %vm12401_vm14, %v1639_v7, %v1640_v58  ;;  %v12565_v7 = vld [vmem:[#allocation2 + $0x88] sm:$0xf] }
  0xb9   : > { %v1159_v18 = vunpack.c.l.b16 %v983_v10  ;;  %v1011_v45 = vor.u32 %v1010_v31, %v1006_v30  ;;  %v1028_v12 = vshll.u32 %v12565_v7, 16 }
  0xba   : > { %v12553_v37 = vld [vmem:[#allocation2 + $0x80] sm:$0x1] }
  0xbe   : > { %10689 = vmatmul.msk.bf16.gmra.mxu0 %vm1195_vm1, %v1180_v44  ;;  %10806 = vmatmul.msk.bf16.gmra.mxu2 %vm1195_vm1, %v1756_v52  ;;  %v1253_v13 = vpop.f32.mrf.mxu0  ;;  %v987_v44 = vor.u32 %v986_v36, %v982_v33  ;;  %v1560_v52 = vld [vmem:[#allocation2 + $0x30] sm:$0xe]  ;;  %v1731_v36 = vunpack.c.l.b16 %v1641_v15 }
  0xbf   : > { %v12515_v20 = vadd.f32 %v1476_v5, %v1253_v13  ;;  %v663_v5 = vld [vmem:[#allocation2 + $0x8c] sm:$0x1]  ;;  %v998_v13 = vshll.u32 %v721_v61, 16  ;;  %v1012_v61 = vrot.slane %v1011_v45, 4 }
  0xc0   : > { %10774 = vmatmul.msk.bf16.gmra.mxu1 %vm1195_vm1, %v11612_v4  ;;  %v664_v57 = vsel %vm12230_vm11, %v449_v39, %v663_v5  ;;  %v988_v62 = vrot.slane %v987_v44, 4  ;;  %v10786_v4 = vrot.slane %v1560_v52, 9  ;;  %v670_v52 = vld [vmem:[#allocation2 + $0x98] sm:$0x1] }
  0xc1   : > { %665 = vst [vmem:[#allocation2 + $0x8c] sm:$0x1] %v664_v57  ;;  %v1000_v0 = vrot.slane %v998_v13, 5  ;;  %v1644_v57 = vrot.slane %v12374_v22, 5  ;;  %v671_v29 = vsel %vm12230_vm11, %v466_v11, %v670_v52  ;;  %v1647_v22 = vrot.slane %v12396_v56, 5 }
  0xc2   : > { %v993_v49 = vsel %vm12141_vm8, %v988_v62, %v992_v3  ;;  %v1638_v59 = vsel %vm12401_vm14, %v10786_v4, %v1637_v53  ;;  %v1561_v53 = vld [vmem:[#allocation2 + $0x3c] sm:$0xe]  ;;  %v723_v62 = vld [vmem:[#allocation2 + $0x84] sm:$0xf]  ;;  %672 = vst [vmem:[#allocation2 + $0x98] sm:$0x1] %v671_v29 }
  0xc3   : > { %v1160_v16 = vunpack.c.l.b16 %v993_v49  ;;  %v1730_v33 = vunpack.c.l.b16 %v1638_v59  ;;  %v1001_v44 = vor.u32 %v1000_v0, %v997_v19  ;;  %v1646_v58 = vrot.slane %v1644_v57, 4 }
  0xc4   : > { %v1019_v10 = vshrl.u32 %v723_v62, 16  ;;  %v1022_v49 = vshll.u32 %v723_v62, 16  ;;  %v1032_v13 = vshrl.u32 %v12565_v7, 16  ;;  %v677_v62 = vld [vmem:[#allocation2 + $0xa4] sm:$0x1] }
  0xc5   : > { %v1182_v39 = vpack.c.b16 %v1160_v16, %v1159_v18  ;;  %v1002_v26 = vrot.slane %v1001_v44, 4  ;;  %v1648_v16 = vsel %vm12401_vm14, %v1646_v58, %v1647_v22  ;;  %v1562_v22 = vld [vmem:[#allocation2 + $0x48] sm:$0xe] }
  0xc6   : > { %v12537_v42 = vpop.f32.mrf.mxu0  ;;  %v1021_v19 = vrot.slane %v1019_v10, 4  ;;  %v1024_v0 = vrot.slane %v1022_v49, 5  ;;  %v1034_v11 = vrot.slane %v1032_v13, 4  ;;  %v1733_v44 = vunpack.c.l.b16 %v1648_v16  ;;  %v12597_v49 = vld [vmem:[#allocation2 + $0x94] sm:$0xf] }
  0xc7   : > { %v1007_v59 = vsel %vm12141_vm8, %v1002_v26, %v1006_v30  ;;  %v11623_v26 = vld [vmem:[#allocation2 + $0xc] sm:$0xff] }
  0xc8   : > { %v1161_v31 = vunpack.c.l.b16 %v1007_v59  ;;  %v1025_v45 = vor.u32 %v1024_v0, %v1021_v19  ;;  %v1052_v0 = vshll.u32 %v12597_v49, 16 }
  0xcd   : > { %v1481_v43 = vpop.f32.mrf.mxu1 }
  0xce   : > { %10690 = vmatmul.msk.bf16.gmra.mxu0 %vm1195_vm1, %v1181_v40  ;;  %10807 = vmatmul.msk.bf16.gmra.mxu2 %vm1195_vm1, %v1757_v46  ;;  %v1014_v46 = vshll.u32 %v12553_v37, 16 }
  0xd0   : > { %10775 = vmatmul.msk.bf16.gmra.mxu1 %vm1195_vm1, %v11613_v47  ;;  %v1758_v47 = vpack.c.b16 %v1731_v36, %v1730_v33  ;;  %v1016_v4 = vrot.slane %v1014_v46, 5  ;;  %v1030_v36 = vrot.slane %v1028_v12, 5  ;;  %v10788_v12 = vrot.slane %v1562_v22, 9 }
  0xd1   : > { %v12545_v54 = vpop.f32.mrf.mxu2 }
  0xd2   : > { %16627 = vst [vmem:[#allocation7_spill] sm:$0xff] %v12545_v54  ;;  %v1017_v15 = vsel %vm12141_vm8, %v1012_v61, %v1016_v4  ;;  %v1026_v61 = vrot.slane %v1025_v45, 4  ;;  %v1651_v4 = vrot.slane %v12419_v48, 5 }
  0xd3   : > { %v1162_v33 = vunpack.c.l.b16 %v1017_v15 }
  0xd4   : > { %v1653_v13 = vrot.slane %v1651_v4, 4  ;;  %v1031_v48 = vsel %vm12141_vm8, %v1026_v61, %v1030_v36 }
  0xd5   : > { %v1483_v27 = vpop.f32.mrf.mxu1  ;;  %v1183_v46 = vpack.c.b16 %v1162_v33, %v1161_v31  ;;  %v1056_v31 = vshrl.u32 %v12597_v49, 16 }
  0xd9   : > { %v12556_v41 = vpop.f32.mrf.mxu2 }
  0xda   : > { %16628 = vst [vmem:[#allocation8_spill] sm:$0xff] %v12556_v41 }
  0xdb   : > { %v1258_v40 = vpop.f32.mrf.mxu0 }
  0xdc   : > { %v12559_v5 = vadd.f32 %v1481_v43, %v1258_v40  ;;  %v10787_v43 = vrot.slane %v1561_v53, 9  ;;  %v12584_v40 = vld [vmem:[#allocation2 + $0x8c] sm:$0x1] }
  0xdd   : > { %v1486_v3 = vpop.f32.mrf.mxu1  ;;  %v1038_v52 = vshll.u32 %v12584_v40, 16 }
  0xde   : > { %10691 = vmatmul.msk.bf16.gmra.mxu0 %vm1195_vm1, %v1182_v39  ;;  %10808 = vmatmul.msk.bf16.gmra.mxu2 %vm1195_vm1, %v1758_v47  ;;  %v1645_v56 = vsel %vm12401_vm14, %v10787_v43, %v1644_v57  ;;  %v1035_v47 = vor.u32 %v1034_v11, %v1030_v36  ;;  %v1652_v36 = vsel %vm12401_vm14, %v10788_v12, %v1651_v4  ;;  %v684_v12 = vld [vmem:[#allocation2 + $0xb0] sm:$0x1] }
  0xdf   : > { %v1732_v30 = vunpack.c.l.b16 %v1645_v56  ;;  %v1040_v58 = vrot.slane %v1038_v52, 5  ;;  %v1058_v52 = vrot.slane %v1056_v31, 4  ;;  %v12630_v31 = vld [vmem:[#allocation2 + $0xa0] sm:$0xf] }
  0xe0   : > { %10776 = vmatmul.msk.bf16.gmra.mxu1 %vm1195_vm1, %v11614_v63 }
  0xe1   : > { %v12572_v14 = vpop.f32.mrf.mxu2  ;;  %v1759_v63 = vpack.c.b16 %v1733_v44, %v1732_v30  ;;  %v1163_v30 = vunpack.c.l.b16 %v1031_v48 }
  0xe2   : > { %16629 = vst [vmem:[#allocation9_spill] sm:$0xff] %v12572_v14 }
  0xe3   : > { %v1260_v34 = vpop.f32.mrf.mxu0 }
  0xe4   : > { %v12578_v18 = vadd.f32 %v1483_v27, %v1260_v34  ;;  %v483_v27 = vrot.slane %v12243_v35, 4  ;;  %v1036_v35 = vrot.slane %v1035_v47, 4  ;;  %v1654_v34 = vrot.slane %v12439_v21, 5  ;;  %v11640_v21 = vld [vmem:[%s16595_s1 + $0x20] sm:$0xff] }
  0xe5   : > { %v1488_v39 = vpop.f32.mrf.mxu1  ;;  %2779 = vmatpush.bf16.msrb.mxu0 %v11640_v21  ;;  %v1054_v47 = vrot.slane %v1052_v0, 5 }
  0xe6   : > { %v678_v43 = vsel %vm12230_vm11, %v483_v27, %v677_v62  ;;  %v1041_v59 = vsel %vm12141_vm8, %v1036_v35, %v1040_v58  ;;  %v1655_v11 = vsel %vm12401_vm14, %v1653_v13, %v1654_v34  ;;  %v500_v62 = vrot.slane %v12302_v8, 4  ;;  %v11624_v13 = vld [vmem:[#allocation2 + $0x18] sm:$0xff]  ;;  %v1563_v8 = vld [vmem:[#allocation2 + $0x54] sm:$0xe] }
  0xe7   : > { %679 = vst [vmem:[#allocation2 + $0xa4] sm:$0x1] %v678_v43  ;;  %v1164_v44 = vunpack.c.l.b16 %v1041_v59  ;;  %v1059_v35 = vor.u32 %v1058_v52, %v1054_v47  ;;  %v1658_v34 = vrot.slane %v12451_v55, 5  ;;  %v727_v59 = vld [vmem:[#allocation2 + $0x9c] sm:$0xf]  ;;  %v10789_v21 = vrot.slane %v1563_v8, 9 }
  0xe8   : > { %v685_v48 = vsel %vm12230_vm11, %v500_v62, %v684_v12 }
  0xe9   : > { %v12588_v57 = vpop.f32.mrf.mxu2  ;;  %686 = vst [vmem:[#allocation2 + $0xb0] sm:$0x1] %v685_v48  ;;  %v1660_v55 = vrot.slane %v1658_v34, 4 }
  0xea   : > { %16630 = vst [vmem:[#allocation10_spill] sm:$0xff] %v12588_v57 }
  0xeb   : > { %v1263_v53 = vpop.f32.mrf.mxu0 }
  0xec   : > { %v12590_v29 = vadd.f32 %v1486_v3, %v1263_v53  ;;  %v725_v3 = vld [vmem:[#allocation2 + $0x90] sm:$0xf]  ;;  %v1735_v53 = vunpack.c.l.b16 %v1655_v11  ;;  %v1070_v11 = vshll.u32 %v727_v59, 16 }
  0xed   : > { %v1491_v10 = vpop.f32.mrf.mxu1  ;;  %v1043_v16 = vshrl.u32 %v725_v3, 16  ;;  %v1046_v19 = vshll.u32 %v725_v3, 16 }
  0xee   : > { %10692 = vmatmul.msk.bf16.gmra.mxu0 %vm1195_vm1, %v1183_v46  ;;  %10809 = vmatmul.msk.bf16.gmra.mxu2 %vm1195_vm1, %v1759_v63  ;;  %v12618_v63 = vld [vmem:[#allocation2 + $0x98] sm:$0x1] }
  0xef   : > { %v1045_v45 = vrot.slane %v1043_v16, 4  ;;  %v1048_v46 = vrot.slane %v1046_v19, 5  ;;  %v1062_v58 = vshll.u32 %v12618_v63, 16  ;;  %v1060_v19 = vrot.slane %v1059_v35, 4 }
  0xf0   : > { %10890 = vmatmul.msk.bf16.vlgmr.msrb.gmra.mxu1 %vm1195_vm1, %v11623_v26  ;;  %v1184_v26 = vpack.c.b16 %v1164_v44, %v1163_v30  ;;  %v1076_v30 = vshll.u32 %v12630_v31, 16  ;;  %v1080_v44 = vshrl.u32 %v12630_v31, 16 }
  0xf1   : > { %v12605_v56 = vpop.f32.mrf.mxu2  ;;  %v1049_v43 = vor.u32 %v1048_v46, %v1045_v45  ;;  %v1064_v0 = vrot.slane %v1062_v58, 5 }
  0xf2   : > { %16631 = vst [vmem:[#allocation11_spill] sm:$0xff] %v12605_v56  ;;  %v1078_v58 = vrot.slane %v1076_v30, 5  ;;  %v1665_v30 = vrot.slane %v12473_v51, 5 }
  0xf3   : > { %v1265_v15 = vpop.f32.mrf.mxu0  ;;  %v1050_v16 = vrot.slane %v1049_v43, 4 }
  0xf4   : > { %v12609_v33 = vadd.f32 %v1488_v39, %v1265_v15  ;;  %v1734_v39 = vunpack.c.l.b16 %v1652_v36  ;;  %v1067_v36 = vshrl.u32 %v727_v59, 16 }
  0xf5   : > { %v1493_v27 = vpop.f32.mrf.mxu1  ;;  %v1055_v52 = vsel %vm12141_vm8, %v1050_v16, %v1054_v47 }
  0xf6   : > { %v1760_v3 = vpack.c.b16 %v1735_v53, %v1734_v39  ;;  %v1659_v53 = vsel %vm12401_vm14, %v10789_v21, %v1658_v34  ;;  %v1165_v43 = vunpack.c.l.b16 %v1055_v52  ;;  %v1564_v52 = vld [vmem:[#allocation2 + $0x60] sm:$0xe] }
  0xf7   : > { %v1736_v47 = vunpack.c.l.b16 %v1659_v53  ;;  %v12662_v53 = vld [vmem:[#allocation2 + $0xac] sm:$0xf] }
  0xf9   : > { %v12621_v4 = vpop.f32.mrf.mxu2 }
  0xfa   : > { %16632 = vst [vmem:[#allocation12_spill] sm:$0xff] %v12621_v4 }
  0xfb   : > { %v1268_v61 = vpop.f32.mrf.mxu0 }
  0xfc   : > { %v12624_v22 = vadd.f32 %v1491_v10, %v1268_v61  ;;  %v1661_v10 = vrot.slane %v12462_v25, 5  ;;  %v1065_v25 = vsel %vm12141_vm8, %v1060_v19, %v1064_v0  ;;  %v1072_v61 = vrot.slane %v1070_v11, 5 }
  0xfd   : > { %v1496_v15 = vpop.f32.mrf.mxu1  ;;  %v1166_v35 = vunpack.c.l.b16 %v1065_v25 }
  0xfe   : > { %10693 = vmatmul.msk.bf16.gmra.mxu0 %vm1195_vm1, %v1184_v26  ;;  %10810 = vmatmul.msk.bf16.gmra.mxu2 %vm1195_vm1, %v1760_v3  ;;  %v1662_v62 = vsel %vm12401_vm14, %v1660_v55, %v1661_v10  ;;  %v1069_v26 = vrot.slane %v1067_v36, 4  ;;  %v1082_v3 = vrot.slane %v1080_v44, 4  ;;  %v691_v55 = vld [vmem:[#allocation2 + $0xbc] sm:$0x1]  ;;  %v11625_v36 = vld [vmem:[#allocation2 + $0x24] sm:$0xff] }
  0xff   : > { %v1737_v48 = vunpack.c.l.b16 %v1662_v62  ;;  %v1185_v59 = vpack.c.b16 %v1166_v35, %v1165_v43  ;;  %v1668_v62 = vrot.slane %v12492_v28, 5 }
 0x100   : > { %10891 = vmatmul.msk.bf16.gmra.mxu1 %vm1195_vm1, %v11624_v13  ;;  %v12649_v13 = vld [vmem:[#allocation2 + $0xa4] sm:$0x1]  ;;  %v1073_v8 = vor.u32 %v1072_v61, %v1069_v26  ;;  %v1083_v16 = vor.u32 %v1082_v3, %v1078_v58  ;;  %v10790_v26 = vrot.slane %v1564_v52, 9  ;;  %v1667_v61 = vrot.slane %v1665_v30, 4 }
 0x101   : > { %v12637_v46 = vpop.f32.mrf.mxu2  ;;  %v1086_v34 = vshll.u32 %v12649_v13, 16  ;;  %v1761_v21 = vpack.c.b16 %v1737_v48, %v1736_v47 }
 0x102   : > { %16633 = vst [vmem:[#allocation13_spill] sm:$0xff] %v12637_v46  ;;  %v1074_v11 = vrot.slane %v1073_v8, 4  ;;  %v1104_v8 = vshrl.u32 %v12662_v53, 16 }
 0x103   : > { %v1270_v45 = vpop.f32.mrf.mxu0 }
 0x104   : > { %v12643_v39 = vadd.f32 %v1493_v27, %v1270_v45  ;;  %v517_v27 = vrot.slane %v12326_v50, 4  ;;  %v1084_v50 = vrot.slane %v1083_v16, 4  ;;  %v1088_v45 = vrot.slane %v1086_v34, 5 }
 0x105   : > { %v1498_v12 = vpop.f32.mrf.mxu1  ;;  %v1079_v51 = vsel %vm12141_vm8, %v1074_v11, %v1078_v58  ;;  %v1669_v58 = vsel %vm12401_vm14, %v1667_v61, %v1668_v62  ;;  %v1106_v11 = vrot.slane %v1104_v8, 4 }
 0x106   : > { %v692_v44 = vsel %vm12230_vm11, %v517_v27, %v691_v55  ;;  %v1089_v43 = vsel %vm12141_vm8, %v1084_v50, %v1088_v45  ;;  %v1100_v27 = vshll.u32 %v12662_v53, 16  ;;  %v1167_v16 = vunpack.c.l.b16 %v1079_v51  ;;  %v12680_v45 = vld [vmem:[#allocation2 + $0xb0] sm:$0x1] }
 0x107   : > { %693 = vst [vmem:[#allocation2 + $0xbc] sm:$0x1] %v692_v44  ;;  %v1168_v34 = vunpack.c.l.b16 %v1089_v43  ;;  %v1739_v50 = vunpack.c.l.b16 %v1669_v58  ;;  %v1672_v51 = vrot.slane %v12504_v9, 5  ;;  %v1565_v43 = vld [vmem:[#allocation2 + $0x6c] sm:$0xe] }
 0x109   : > { %v12653_v0 = vpop.f32.mrf.mxu2  ;;  %v1186_v52 = vpack.c.b16 %v1168_v34, %v1167_v16  ;;  %v1675_v34 = vrot.slane %v12523_v24, 5 }
 0x10a   : > { %16634 = vst [vmem:[#allocation14_spill] sm:$0xff] %v12653_v0 }
 0x10b   : > { %v1273_v19 = vpop.f32.mrf.mxu0 }
 0x10c   : > { %v12655_v10 = vadd.f32 %v1496_v15, %v1273_v19  ;;  %v729_v15 = vld [vmem:[#allocation2 + $0xa8] sm:$0xf] }
 0x10d   : > { %v1501_v25 = vpop.f32.mrf.mxu1  ;;  %v1091_v47 = vshrl.u32 %v729_v15, 16  ;;  %v1094_v48 = vshll.u32 %v729_v15, 16 }
 0x10e   : > { %10694 = vmatmul.msk.bf16.gmra.mxu0 %vm1195_vm1, %v1185_v59  ;;  %10811 = vmatmul.msk.bf16.gmra.mxu2 %vm1195_vm1, %v1761_v21  ;;  %v1666_v59 = vsel %vm12401_vm14, %v10790_v26, %v1665_v30  ;;  %v1110_v26 = vshll.u32 %v12680_v45, 16 }
 0x10f   : > { %v1093_v21 = vrot.slane %v1091_v47, 4  ;;  %v1096_v55 = vrot.slane %v1094_v48, 5  ;;  %v1738_v44 = vunpack.c.l.b16 %v1666_v59  ;;  %v11626_v47 = vld [vmem:[#allocation2 + $0x30] sm:$0xff] }
 0x110   : > { %10892 = vmatmul.msk.bf16.gmra.mxu1 %vm1195_vm1, %v11625_v36  ;;  %v1102_v36 = vrot.slane %v1100_v27, 5  ;;  %v731_v48 = vld [vmem:[#allocation2 + $0xb4] sm:$0xf]  ;;  %v12689_v27 = vld [vmem:[#allocation2 + $0xb8] sm:$0xf]  ;;  %v1112_v16 = vrot.slane %v1110_v26, 5 }
 0x111   : > { %v12670_v3 = vpop.f32.mrf.mxu2  ;;  %v1762_v61 = vpack.c.b16 %v1739_v50, %v1738_v44  ;;  %v1118_v9 = vshll.u32 %v731_v48, 16  ;;  %v1124_v44 = vshll.u32 %v12689_v27, 16  ;;  %v1128_v50 = vshrl.u32 %v12689_v27, 16 }
 0x112   : > { %16635 = vst [vmem:[#allocation15_spill] sm:$0xff] %v12670_v3  ;;  %v1107_v30 = vor.u32 %v1106_v11, %v1102_v36  ;;  %v1115_v11 = vshrl.u32 %v731_v48, 16 }
 0x113   : > { %v1275_v35 = vpop.f32.mrf.mxu0  ;;  %v1120_v48 = vrot.slane %v1118_v9, 5  ;;  %v1130_v1 = vrot.slane %v1128_v50, 4 }
 0x114   : > { %v12674_v28 = vadd.f32 %v1498_v12, %v1275_v35  ;;  %v1097_v35 = vor.u32 %v1096_v55, %v1093_v21  ;;  %v1108_v58 = vrot.slane %v1107_v30, 4  ;;  %v1674_v21 = vrot.slane %v1672_v51, 4  ;;  %v11633_v55 = vld [vmem:[#allocation2 + $0x84] sm:$0xff] }
 0x115   : > { %v1503_v19 = vpop.f32.mrf.mxu1  ;;  %10900 = vmatmul.msk.bf16.vlgmr.msra.gmra.mxu3 %vm1195_vm1, %v11633_v55  ;;  %v1126_v55 = vrot.slane %v1124_v44, 5 }
 0x116   : > { %v1098_v59 = vrot.slane %v1097_v35, 4  ;;  %v1113_v35 = vsel %vm12141_vm8, %v1108_v58, %v1112_v16 }
 0x118   : > { %v1103_v24 = vsel %vm12141_vm8, %v1098_v59, %v1102_v36  ;;  %v1170_v36 = vunpack.c.l.b16 %v1113_v35  ;;  %v12710_v59 = vld [vmem:[#allocation2 + $0xbc] sm:$0x1] }
 0x119   : > { %v12682_v15 = vpop.f32.mrf.mxu2 }
 0x11a   : > { %16636 = vst [vmem:[#allocation16_spill] sm:$0xff] %v12682_v15  ;;  %v1169_v15 = vunpack.c.l.b16 %v1103_v24 }
 0x11b   : > { %v1278_v12 = vpop.f32.mrf.mxu0 }
 0x11c   : > { %v12685_v62 = vadd.f32 %v1501_v25, %v1278_v12  ;;  %v10791_v25 = vrot.slane %v1565_v43, 9  ;;  %v1676_v43 = vsel %vm12401_vm14, %v1674_v21, %v1675_v34 }
 0x11d   : > { %v1506_v8 = vpop.f32.mrf.mxu1  ;;  %v1741_v16 = vunpack.c.l.b16 %v1676_v43  ;;  %v1566_v43 = vld [vmem:[#allocation2 + $0x78] sm:$0xe] }
 0x11e   : > { %10695 = vmatmul.msk.bf16.gmra.mxu0 %vm1195_vm1, %v1186_v52  ;;  %10812 = vmatmul.msk.bf16.gmra.mxu2 %vm1195_vm1, %v1762_v61  ;;  %v1673_v61 = vsel %vm12401_vm14, %v10791_v25, %v1672_v51  ;;  %v1479_v51 = vadd.f32 %v12517_v6, %v12537_v42  ;;  %v1187_v25 = vpack.c.b16 %v1170_v36, %v1169_v15  ;;  %v12721_v6 = vld [vmem:[#allocation2 + $0x10] sm:$0xf]  ;;  %v1682_v42 = vrot.slane %v12553_v37, 5 }
 0x11f   : > { %v11634_v15 = vld [vmem:[#allocation2 + $0x90] sm:$0xff] }
 0x120   : > { %10893 = vmatmul.msk.bf16.gmra.mxu1 %vm1195_vm1, %v11626_v47  ;;  %v1117_v47 = vrot.slane %v1115_v11, 4 }
 0x121   : > { %v1833_v12 = vpop.f32.mrf.mxu2 }
 0x122   : > { %v12704_v26 = vadd.f32 %v1833_v12, %v12515_v20  ;;  %v1131_v20 = vor.u32 %v1130_v1, %v1126_v55  ;;  %v1134_v12 = vshll.u32 %v12710_v59, 16  ;;  %v11627_v1 = vld [vmem:[#allocation2 + $0x3c] sm:$0xff] }
 0x123   : > { %v1280_v52 = vpop.f32.mrf.mxu0 }
 0x124   : > { %v12701_v30 = vadd.f32 %v1503_v19, %v1280_v52  ;;  %v1740_v19 = vunpack.c.l.b16 %v1673_v61  ;;  %v1121_v52 = vor.u32 %v1120_v48, %v1117_v47  ;;  %v1132_v24 = vrot.slane %v1131_v20, 4  ;;  %v2235_v48 = vld [vmem:[#allocation2 + $0xc] sm:$0xf] }
 0x125   : > { %v1508_v58 = vpop.f32.mrf.mxu1  ;;  %v1136_v35 = vrot.slane %v1134_v12, 5  ;;  %v1679_v61 = vrot.slane %v12535_v38, 5  ;;  %v10792_v38 = vrot.slane %v1566_v43, 9  ;;  %v2293_v20 = vshll.u32 %v12721_v6, 16  ;;  %10901 = vmatmul.msk.bf16.gmra.mxu3 %vm1195_vm1, %v11634_v15  ;;  %v12742_v15 = vld [vmem:[#allocation2 + $0x14] sm:$0x1] }
 0x126   : > { %v1763_v44 = vpack.c.b16 %v1741_v16, %v1740_v19  ;;  %v1122_v50 = vrot.slane %v1121_v52, 4  ;;  %v2284_v16 = vshrl.u32 %v2235_v48, 16  ;;  %v2287_v52 = vshll.u32 %v2235_v48, 16 }
 0x127   : > { %v1137_v36 = vsel %vm12141_vm8, %v1132_v24, %v1136_v35  ;;  %v1681_v19 = vrot.slane %v1679_v61, 4  ;;  %v2297_v12 = vshrl.u32 %v12721_v6, 16 }
 0x128   : > { %v2286_v24 = vrot.slane %v2284_v16, 4  ;;  %v2289_v35 = vrot.slane %v2287_v52, 5  ;;  %v11628_v16 = vld [vmem:[#allocation2 + $0x48] sm:$0xff] }
 0x129   : > { %v1835_v21 = vpop.f32.mrf.mxu2  ;;  %v2299_v43 = vrot.slane %v2297_v12, 4 }
 0x12a   : > { %v12717_v9 = vadd.f32 %v1835_v21, %v1479_v51  ;;  %v1172_v21 = vunpack.c.l.b16 %v1137_v36 }
 0x12b   : > { %v1283_v34 = vpop.f32.mrf.mxu0 }
 0x12c   : > { %v12715_v11 = vadd.f32 %v1506_v8, %v1283_v34  ;;  %v1127_v8 = vsel %vm12141_vm8, %v1122_v50, %v1126_v55  ;;  %v1683_v50 = vsel %vm12401_vm14, %v1681_v19, %v1682_v42  ;;  %v1686_v19 = vrot.slane %v12565_v7, 5 }
 0x12d   : > { %v1511_v47 = vpop.f32.mrf.mxu1  ;;  %v1171_v34 = vunpack.c.l.b16 %v1127_v8  ;;  %v2303_v8 = vshll.u32 %v12742_v15, 16 }
 0x12e   : > { %10696 = vmatmul.msk.bf16.gmra.mxu0 %vm1195_vm1, %v1187_v25  ;;  %10813 = vmatmul.msk.bf16.gmra.mxu2 %vm1195_vm1, %v1763_v44  ;;  %v1680_v44 = vsel %vm12401_vm14, %v10792_v38, %v1679_v61 }
 0x12f   : > { %v1188_v3 = vpack.c.b16 %v1172_v21, %v1171_v34  ;;  %v2305_v12 = vrot.slane %v2303_v8, 5  ;;  %v1567_v34 = vld [vmem:[#allocation2 + $0x84] sm:$0xe] }
 0x130   : > { %10894 = vmatmul.msk.bf16.gmra.mxu1 %vm1195_vm1, %v11627_v1  ;;  %v2295_v1 = vrot.slane %v2293_v20, 5 }
 0x131   : > { %v1838_v51 = vpop.f32.mrf.mxu2 }
 0x132   : > { %v12736_v55 = vadd.f32 %v1838_v51, %v12559_v5  ;;  %v2290_v5 = vor.u32 %v2289_v35, %v2286_v24  ;;  %v2300_v51 = vor.u32 %v2299_v43, %v2295_v1  ;;  %v1688_v24 = vrot.slane %v1686_v19, 4 }
 0x133   : > { %v1285_v37 = vpop.f32.mrf.mxu0 }
 0x134   : > { %v12733_v25 = vadd.f32 %v1508_v58, %v1285_v37  ;;  %v1742_v58 = vunpack.c.l.b16 %v1680_v44  ;;  %v1743_v37 = vunpack.c.l.b16 %v1683_v50  ;;  %v2291_v52 = vrot.slane %v2290_v5, 4  ;;  %v2238_v44 = vld [vmem:[#allocation2 + $0x18] sm:$0xf]  ;;  %v12753_v50 = vld [vmem:[#allocation2 + $0x1c] sm:$0xf] }
 0x135   : > { %v1513_v48 = vpop.f32.mrf.mxu1  ;;  %v2301_v20 = vrot.slane %v2300_v51, 4  ;;  %v2317_v5 = vshll.u32 %v12753_v50, 16 }
 0x136   : > { %v1764_v38 = vpack.c.b16 %v1743_v37, %v1742_v58  ;;  %v2296_v7 = vsel %vm12141_vm8, %v2291_v52, %v2295_v1  ;;  %v2308_v58 = vshrl.u32 %v2238_v44, 16  ;;  %v2311_v37 = vshll.u32 %v2238_v44, 16 }
 0x139   : > { %v1840_v17 = vpop.f32.mrf.mxu2 }
 0x13a   : > { %v12748_v42 = vadd.f32 %v1840_v17, %v12578_v18  ;;  %v1689_v17 = vrot.slane %v12584_v40, 5  ;;  %v10793_v18 = vrot.slane %v1567_v34, 9  ;;  %v2321_v40 = vshrl.u32 %v12753_v50, 16 }
 0x13b   : > { %v1288_v36 = vpop.f32.mrf.mxu0  ;;  %v2319_v34 = vrot.slane %v2317_v5, 5 }
 0x13c   : > { %v12745_v61 = vadd.f32 %v1511_v47, %v1288_v36  ;;  %v11635_v47 = vld [vmem:[#allocation2 + $0x9c] sm:$0xff]  ;;  %v1687_v1 = vsel %vm12401_vm14, %v10793_v18, %v1686_v19  ;;  %v1690_v36 = vsel %vm12401_vm14, %v1688_v24, %v1689_v17  ;;  %v2323_v44 = vrot.slane %v2321_v40, 4 }
 0x13d   : > { %v1516_v21 = vpop.f32.mrf.mxu1  ;;  %10902 = vmatmul.msk.bf16.gmra.mxu3 %vm1195_vm1, %v11635_v47  ;;  %v1744_v47 = vunpack.c.l.b16 %v1687_v1  ;;  %v1745_v0 = vunpack.c.l.b16 %v1690_v36  ;;  %v2241_v36 = vld [vmem:[#allocation2 + $0x24] sm:$0xf] }
 0x13e   : > { %10697 = vmatmul.msk.bf16.gmra.mxu0 %vm1195_vm1, %v1188_v3  ;;  %10814 = vmatmul.msk.bf16.gmra.mxu2 %vm1195_vm1, %v1764_v38  ;;  %v2306_v3 = vsel %vm12141_vm8, %v2301_v20, %v2305_v12  ;;  %v2670_v38 = vunpack.c.l.b16 %v2296_v7  ;;  %v2310_v20 = vrot.slane %v2308_v58, 4  ;;  %v2313_v12 = vrot.slane %v2311_v37, 5  ;;  %v1568_v58 = vld [vmem:[#allocation2 + $0x90] sm:$0xe] }
 0x13f   : > { %v2324_v4 = vor.u32 %v2323_v44, %v2319_v34  ;;  %v1765_v24 = vpack.c.b16 %v1745_v0, %v1744_v47  ;;  %v1693_v7 = vrot.slane %v12597_v49, 5  ;;  %v1696_v0 = vrot.slane %v12618_v63, 5 }
 0x140   : > { %10895 = vmatmul.msk.bf16.gmra.mxu1 %vm1195_vm1, %v11628_v16  ;;  %v2671_v16 = vunpack.c.l.b16 %v2306_v3  ;;  %v2314_v46 = vor.u32 %v2313_v12, %v2310_v20  ;;  %v11629_v3 = vld [vmem:[#allocation2 + $0x54] sm:$0xff]  ;;  %v2332_v49 = vshrl.u32 %v2241_v36, 16  ;;  %v2335_v20 = vshll.u32 %v2241_v36, 16 }
 0x141   : > { %v1843_v43 = vpop.f32.mrf.mxu2  ;;  %v2325_v40 = vrot.slane %v2324_v4, 4 }
 0x142   : > { %v12767_v8 = vadd.f32 %v1843_v43, %v12590_v29  ;;  %v2315_v5 = vrot.slane %v2314_v46, 4 }
 0x143   : > { %v1290_v35 = vpop.f32.mrf.mxu0 }
 0x144   : > { %v12764_v51 = vadd.f32 %v1513_v48, %v1290_v35  ;;  %v12773_v48 = vld [vmem:[#allocation2 + $0x20] sm:$0x1]  ;;  %v2702_v35 = vpack.c.b16 %v2671_v16, %v2670_v38  ;;  %v12784_v38 = vld [vmem:[#allocation2 + $0x28] sm:$0xf]  ;;  %v10794_v16 = vrot.slane %v1568_v58, 9  ;;  %v2320_v4 = vsel %vm12141_vm8, %v2315_v5, %v2319_v34 }
 0x145   : > { %v1518_v52 = vpop.f32.mrf.mxu1  ;;  %v2327_v19 = vshll.u32 %v12773_v48, 16  ;;  %v2341_v47 = vshll.u32 %v12784_v38, 16  ;;  %v2337_v58 = vrot.slane %v2335_v20, 5 }
 0x147   : > { %v2329_v1 = vrot.slane %v2327_v19, 5 }
 0x149   : > { %v1845_v43 = vpop.f32.mrf.mxu2  ;;  %v2330_v44 = vsel %vm12141_vm8, %v2325_v40, %v2329_v1  ;;  %v12804_v40 = vld [vmem:[#allocation2 + $0x2c] sm:$0x1]  ;;  %v2343_v1 = vrot.slane %v2341_v47, 5  ;;  %v11630_v47 = vld [vmem:[#allocation2 + $0x60] sm:$0xff] }
 0x14a   : > { %v12779_v17 = vadd.f32 %v1845_v43, %v12609_v33  ;;  %v1695_v33 = vrot.slane %v1693_v7, 4  ;;  %v1694_v43 = vsel %vm12401_vm14, %v10794_v16, %v1693_v7  ;;  %v2673_v34 = vunpack.c.l.b16 %v2330_v44  ;;  %v2244_v44 = vld [vmem:[#allocation2 + $0x30] sm:$0xf] }
 0x14b   : > { %v1293_v29 = vpop.f32.mrf.mxu0 }
 0x14c   : > { %v12776_v18 = vadd.f32 %v1516_v21, %v1293_v29  ;;  %v11636_v21 = vld [vmem:[#allocation2 + $0xa8] sm:$0xff]  ;;  %v1697_v19 = vsel %vm12401_vm14, %v1695_v33, %v1696_v0  ;;  %v1700_v33 = vrot.slane %v12630_v31, 5 }
 0x14d   : > { %v1521_v37 = vpop.f32.mrf.mxu1  ;;  %10903 = vmatmul.msk.bf16.gmra.mxu3 %vm1195_vm1, %v11636_v21  ;;  %v1747_v21 = vunpack.c.l.b16 %v1697_v19  ;;  %v12814_v19 = vld [vmem:[#allocation2 + $0x34] sm:$0xf] }
 0x14e   : > { %10912 = vmatmul.msk.bf16.vlgmr.msrb.gmra.mxu0 %vm1195_vm1, %v2702_v35  ;;  %10815 = vmatmul.msk.bf16.gmra.mxu2 %vm1195_vm1, %v1765_v24  ;;  %v2345_v35 = vshrl.u32 %v12784_v38, 16  ;;  %v2672_v24 = vunpack.c.l.b16 %v2320_v4  ;;  %v1569_v4 = vld [vmem:[#allocation2 + $0x9c] sm:$0xe]  ;;  %v1702_v31 = vrot.slane %v1700_v33, 4 }
 0x150   : > { %10896 = vmatmul.msk.bf16.gmra.mxu1 %vm1195_vm1, %v11629_v3  ;;  %v2334_v3 = vrot.slane %v2332_v49, 4  ;;  %v2347_v36 = vrot.slane %v2345_v35, 4 }
 0x151   : > { %v1848_v46 = vpop.f32.mrf.mxu2 }
 0x152   : > { %v12798_v63 = vadd.f32 %v1848_v46, %v12624_v22  ;;  %v2338_v22 = vor.u32 %v2337_v58, %v2334_v3  ;;  %v2351_v46 = vshll.u32 %v12804_v40, 16  ;;  %v2348_v16 = vor.u32 %v2347_v36, %v2343_v1  ;;  %v11637_v58 = vld [vmem:[#allocation2 + $0xb4] sm:$0xff] }
 0x153   : > { %v1295_v12 = vpop.f32.mrf.mxu0  ;;  %v10795_v3 = vrot.slane %v1569_v4, 9  ;;  %v2365_v36 = vshll.u32 %v12814_v19, 16 }
 0x154   : > { %v12795_v29 = vadd.f32 %v1518_v52, %v1295_v12  ;;  %v1746_v52 = vunpack.c.l.b16 %v1694_v43  ;;  %v2703_v12 = vpack.c.b16 %v2673_v34, %v2672_v24  ;;  %v2339_v35 = vrot.slane %v2338_v22, 4 }
 0x155   : > { %v1523_v5 = vpop.f32.mrf.mxu1  ;;  %v2353_v43 = vrot.slane %v2351_v46, 5  ;;  %v2349_v34 = vrot.slane %v2348_v16, 4  ;;  %v12839_v57 = vrot.slane %v2365_v36, 5  ;;  %v2959_v36 = vrot.slane %v12721_v6, 5 }
 0x156   : > { %v1766_v20 = vpack.c.b16 %v1747_v21, %v1746_v52  ;;  %v2369_v52 = vshrl.u32 %v12814_v19, 16  ;;  %v2344_v21 = vsel %vm12141_vm8, %v2339_v35, %v2343_v1 }
 0x157   : > { %v2354_v46 = vsel %vm12141_vm8, %v2349_v34, %v2353_v43 }
 0x158   : > { %v2371_v43 = vrot.slane %v2369_v52, 4  ;;  %v2962_v52 = vrot.slane %v12742_v15, 5 }
 0x159   : > { %v1850_v7 = vpop.f32.mrf.mxu2 }
 0x15a   : > { %v12811_v49 = vadd.f32 %v1850_v7, %v12643_v39  ;;  %v2356_v39 = vshrl.u32 %v2244_v44, 16  ;;  %v1701_v7 = vsel %vm12401_vm14, %v10795_v3, %v1700_v33  ;;  %v2674_v33 = vunpack.c.l.b16 %v2344_v21 }
 0x15b   : > { %v1298_v56 = vpop.f32.mrf.mxu0  ;;  %v2675_v3 = vunpack.c.l.b16 %v2354_v46  ;;  %v1748_v54 = vunpack.c.l.b16 %v1701_v7  ;;  %v1707_v46 = vrot.slane %v12662_v53, 5 }
 0x15c   : > { %v12808_v0 = vadd.f32 %v1521_v37, %v1298_v56  ;;  %v1703_v56 = vrot.slane %v12649_v13, 5  ;;  %v2359_v37 = vshll.u32 %v2244_v44, 16 }
 0x15d   : > { %v1526_v24 = vpop.f32.mrf.mxu1  ;;  %10904 = vmatmul.msk.bf16.gmra.mxu3 %vm1195_vm1, %v11637_v58  ;;  %v12837_v58 = vld [vmem:[#allocation2 + $0x38] sm:$0x1] }
 0x15e   : > { %10913 = vmatmul.msk.bf16.gmra.mxu0 %vm1195_vm1, %v2703_v12  ;;  %10816 = vmatmul.msk.bf16.gmra.mxu2 %vm1195_vm1, %v1766_v20  ;;  %v258_v12 = vld [vmem:[%s12083_s21 + $0x78] sm:$0xf]  ;;  %v1704_v16 = vsel %vm12401_vm14, %v1702_v31, %v1703_v56  ;;  %v259_v20 = vld [vmem:[%s12083_s21 + $0x7c] sm:$0xf]  ;;  %v2361_v35 = vrot.slane %v2359_v37, 5 }
 0x15f   : > { %v519_v4 = vshrl.u32 %v258_v12, 16  ;;  %v522_v14 = vshll.u32 %v258_v12, 16  ;;  %v527_v41 = vshrl.u32 %v259_v20, 16  ;;  %v530_v31 = vshll.u32 %v259_v20, 16 }
 0x160   : > { %10897 = vmatmul.msk.bf16.gmra.mxu1 %vm1195_vm1, %v11630_v47  ;;  %v2358_v47 = vrot.slane %v2356_v39, 4  ;;  %v2375_v39 = vshll.u32 %v12837_v58, 16  ;;  %v2372_v12 = vor.u32 %v2371_v43, %v12839_v57 }
 0x161   : > { %v1853_v13 = vpop.f32.mrf.mxu2  ;;  %v521_v34 = vrot.slane %v519_v4, 7  ;;  %v12842_v37 = vrot.slane %v527_v41, 7  ;;  %v1570_v41 = vld [vmem:[#allocation2 + $0xa8] sm:$0xe] }
 0x162   : > { %v12835_v1 = vadd.f32 %v1853_v13, %v12655_v10  ;;  %v2362_v10 = vor.u32 %v2361_v35, %v2358_v47  ;;  %v2704_v13 = vpack.c.b16 %v2675_v3, %v2674_v33  ;;  %v2893_v47 = vld [vmem:[#allocation2 + $0xc] sm:$0xe]  ;;  %v2377_v43 = vrot.slane %v2375_v39, 5  ;;  %v2247_v3 = vld [vmem:[#allocation2 + $0x3c] sm:$0xf] }
 0x163   : > { %v1300_v22 = vpop.f32.mrf.mxu0  ;;  %16638 = vst [vmem:[#allocation18_spill] sm:$0xff] %v12842_v37  ;;  %v525_v21 = vrot.slane %v521_v34, 4  ;;  %v532_v7 = vor.u32 %v530_v31, %v12842_v37  ;;  %v2373_v53 = vrot.slane %v2372_v12, 4  ;;  %v10928_v60 = vrot.slane %v2893_v47, 9 }
 0x164   : > { %v12832_v44 = vadd.f32 %v1523_v5, %v1300_v22  ;;  %v1749_v5 = vunpack.c.l.b16 %v1704_v16  ;;  %v524_v22 = vor.u32 %v522_v14, %v521_v34  ;;  %v2363_v35 = vrot.slane %v2362_v10, 4  ;;  %v11631_v34 = vld [vmem:[#allocation2 + $0x6c] sm:$0xff] }
 0x165   : > { %v1528_v56 = vpop.f32.mrf.mxu1  ;;  %v533_v33 = vsel %vm12206_vm10, %v525_v21, %v532_v7  ;;  %v1709_v31 = vrot.slane %v1707_v46, 4  ;;  %v2960_v10 = vsel %vm12401_vm14, %v10928_v60, %v2959_v36  ;;  %v2380_v7 = vshrl.u32 %v2247_v3, 16 }
 0x166   : > { %16637 = vst [vmem:[#allocation17_spill] sm:$0xff] %v12832_v44  ;;  %v694_v44 = vld [vmem:[#allocation2 + $0xc0] sm:$0xf]  ;;  %v1767_v4 = vpack.c.b16 %v1749_v5, %v1748_v54  ;;  %v10796_v54 = vrot.slane %v1570_v41, 9  ;;  %v1710_v5 = vrot.slane %v12680_v45, 5  ;;  %v2368_v21 = vsel %vm12141_vm8, %v2363_v35, %v12839_v57 }
 0x167   : > { %v695_v14 = vsel %vm12196_vm9, %v524_v22, %v694_v44  ;;  %v2961_v44 = vrot.slane %v2959_v36, 4  ;;  %697 = vst.msk [vmem:[#allocation2 + $0xc4] sm:$0xf] %vm172_vm0, %v533_v33  ;;  %v12864_v22 = vld [vmem:[#allocation2 + $0x40] sm:$0xf]  ;;  %v2378_v36 = vsel %vm12141_vm8, %v2373_v53, %v2377_v43  ;;  %v2676_v41 = vunpack.c.l.b16 %v2368_v21 }
 0x168   : > { %696 = vst [vmem:[#allocation2 + $0xc0] sm:$0xf] %v695_v14  ;;  %v2383_v14 = vshll.u32 %v2247_v3, 16  ;;  %v1708_v35 = vsel %vm12401_vm14, %v10796_v54, %v1707_v46  ;;  %v1711_v43 = vsel %vm12401_vm14, %v1709_v31, %v1710_v5  ;;  %v3587_v53 = vld [vmem:[#allocation2 + $0x1c] sm:$0xf]  ;;  %v2677_v33 = vunpack.c.l.b16 %v2378_v36 }
 0x169   : > { %v1855_v20 = vpop.f32.mrf.mxu2  ;;  %v2963_v39 = vsel %vm12401_vm14, %v2961_v44, %v2962_v52  ;;  %v2389_v52 = vshll.u32 %v12864_v22, 16  ;;  %v2382_v60 = vrot.slane %v2380_v7, 4  ;;  %v12895_v21 = vld [vmem:[#allocation2 + $0x44] sm:$0x1]  ;;  %v3648_v54 = vshrl.u32 %v3587_v53, 16 }
 0x16a   : > { %v12854_v15 = vadd.f32 %v1855_v20, %v12674_v28  ;;  %v3073_v45 = vunpack.c.l.b16 %v2963_v39  ;;  %v2385_v44 = vrot.slane %v2383_v14, 5  ;;  %v3644_v39 = vshll.u32 %v3587_v53, 16 }
 0x16b   : > { %v1303_v16 = vpop.f32.mrf.mxu0  ;;  %v1750_v5 = vunpack.c.l.b16 %v1708_v35  ;;  %v11658_v35 = vld [vmem:[%s16595_s1 + $0x30] sm:$0xff]  ;;  %vm6151_vm0 = vcmask 60416  }
 0x16c   : > { %v12851_v6 = vadd.f32 %v1526_v24, %v1303_v16  ;;  %v11641_v24 = vld [vmem:[%s16595_s1 + $0x28] sm:$0xff]  ;;  %v2393_v16 = vshrl.u32 %v12864_v22, 16  ;;  %v2386_v14 = vor.u32 %v2385_v44, %v2382_v60  ;;  %v3646_v36 = vrot.slane %v3644_v39, 5  ;;  %3472 = vmatpush.bf16.msra.mxu2 %v11658_v35  ;;  %v11659_v39 = vld [vmem:[%s16595_s1 + $0x38] sm:$0xff]  ;;  %vm14454_vm4 = vmand %vm6151_vm0, %vm585_vm7 }
 0x16d   : > { %v2123_v28 = vpop.f32.mrf.mxu1  ;;  %3181 = vmatpush.bf16.msra.mxu1 %v11641_v24  ;;  %4130 = vmatpush.bf16.msrb.mxu3 %v11659_v39 }
 0x16e   : > { %10914 = vmatmul.msk.bf16.gmra.mxu0 %vm1195_vm1, %v2704_v13  ;;  %10817 = vmatmul.msk.bf16.gmra.mxu2 %vm1195_vm1, %v1767_v4  ;;  %v12872_v12 = vadd.f32 %v2123_v28, %v12704_v26  ;;  %v3072_v13 = vunpack.c.l.b16 %v2960_v10  ;;  %v12893_v28 = vrot.slane %v2389_v52, 5  ;;  %v3650_v52 = vrot.slane %v3648_v54, 4 }
 0x16f   : > { %v11638_v3 = vld [vmem:[#allocation2 + $0xc0] sm:$0xff] }
 0x170   : > { %10898 = vmatmul.msk.bf16.gmra.mxu1 %vm1195_vm1, %v11631_v34  ;;  %v12882_v26 = vpack.c.b16 %v3073_v45, %v3072_v13  ;;  %v3586_v34 = vld [vmem:[#allocation2 + $0x18] sm:$0xf]  ;;  %10905 = vmatmul.msk.bf16.gmra.mxu3 %vm1195_vm1, %v11638_v3  ;;  %v1751_v13 = vunpack.c.l.b16 %v1711_v43  ;;  %v3588_v45 = vld [vmem:[#allocation2 + $0x20] sm:$0x1]  ;;  %v3651_v43 = vor.u32 %v3650_v52, %v3646_v36 }
 0x171   : > { %v1858_v4 = vpop.f32.mrf.mxu2  ;;  %v3635_v24 = vshrl.u32 %v3586_v34, 16  ;;  %v3638_v10 = vshll.u32 %v3586_v34, 16  ;;  %v2399_v34 = vshll.u32 %v12895_v21, 16 }
 0x172   : > { %v12887_v47 = vadd.f32 %v1858_v4, %v12685_v62 }
 0x173   : > { %v1305_v20 = vpop.f32.mrf.mxu0  ;;  %v3637_v46 = vrot.slane %v3635_v24, 4  ;;  %v3640_v7 = vrot.slane %v3638_v10, 5  ;;  %v1571_v24 = vld [vmem:[#allocation2 + $0xb4] sm:$0xe]  ;;  %v2250_v10 = vld [vmem:[#allocation2 + $0x48] sm:$0xf] }
 0x174   : > { %v12884_v57 = vadd.f32 %v1528_v56, %v1305_v20  ;;  %v2395_v56 = vrot.slane %v2393_v16, 4  ;;  %v3654_v16 = vshll.u32 %v3588_v45, 16  ;;  %v2705_v20 = vpack.c.b16 %v2677_v33, %v2676_v41 }
 0x175   : > { %v2125_v62 = vpop.f32.mrf.mxu1  ;;  %v3641_v2 = vor.u32 %v3640_v7, %v3637_v46  ;;  %v1768_v41 = vpack.c.b16 %v1751_v13, %v1750_v5  ;;  %v2401_v54 = vrot.slane %v2399_v34, 5  ;;  %v10797_v45 = vrot.slane %v1571_v24, 9  ;;  %v12916_v7 = vld [vmem:[#allocation2 + $0x4c] sm:$0xf] }
 0x176   : > { %v12899_v31 = vadd.f32 %v2125_v62, %v12717_v9  ;;  %v2396_v4 = vor.u32 %v2395_v56, %v12893_v28  ;;  %v1714_v9 = vrot.slane %v12689_v27, 5  ;;  %v3656_v60 = vrot.slane %v3654_v16, 5  ;;  %v11632_v27 = vld [vmem:[#allocation2 + $0x78] sm:$0xff] }
 0x177   : > { %v3642_v33 = vrot.slane %v3641_v2, 4  ;;  %v2387_v56 = vrot.slane %v2386_v14, 4  ;;  %v3652_v62 = vrot.slane %v3651_v43, 4  ;;  %v1717_v13 = vrot.slane %v12710_v59, 5 }
 0x178   : > { %v2397_v46 = vrot.slane %v2396_v4, 4  ;;  %v1716_v5 = vrot.slane %v1714_v9, 4  ;;  %v2407_v4 = vshll.u32 %v2250_v10, 16  ;;  %v1715_v43 = vsel %vm12401_vm14, %v10797_v45, %v1714_v9 }
 0x179   : > { %v1860_v53 = vpop.f32.mrf.mxu2  ;;  %v3657_v14 = vsel %vm12141_vm8, %v3652_v62, %v3656_v60  ;;  %v2392_v35 = vsel %vm12141_vm8, %v2387_v56, %v12893_v28  ;;  %v3589_v62 = vld [vmem:[#allocation2 + $0x24] sm:$0xf] }
 0x17a   : > { %v12910_v44 = vadd.f32 %v1860_v53, %v12701_v30  ;;  %v3647_v30 = vsel %vm12141_vm8, %v3642_v33, %v3646_v36  ;;  %v4022_v34 = vunpack.c.l.b16 %v3657_v14  ;;  %v2413_v53 = vshll.u32 %v12916_v7, 16 }
 0x17b   : > { %v12903_v3 = vpop.f32.mrf.mxu0  ;;  %v4021_v52 = vunpack.c.l.b16 %v3647_v30  ;;  %v2417_v36 = vshrl.u32 %v12916_v7, 16  ;;  %v1718_v33 = vsel %vm12401_vm14, %v1716_v5, %v1717_v13  ;;  %v2409_v39 = vrot.slane %v2407_v4, 5  ;;  %v12944_v30 = vld [vmem:[#allocation2 + $0x50] sm:$0x1] }
 0x17c   : > { %v2415_v28 = vrot.slane %v2413_v53, 5  ;;  %v2423_v53 = vshll.u32 %v12944_v30, 16 }
 0x17d   : > { %v2128_v2 = vpop.f32.mrf.mxu1  ;;  %v4053_v60 = vpack.c.b16 %v4022_v34, %v4021_v52  ;;  %v2419_v56 = vrot.slane %v2417_v36, 4  ;;  %v1753_v34 = vunpack.c.l.b16 %v1718_v33  ;;  %v3591_v36 = vld [vmem:[#allocation2 + $0x2c] sm:$0x1] }
 0x17e   : > { %10915 = vmatmul.msk.bf16.gmra.mxu0 %vm1195_vm1, %v2705_v20  ;;  %10818 = vmatmul.msk.bf16.gmra.mxu2 %vm1195_vm1, %v1768_v41  ;;  %v12925_v16 = vadd.f32 %v2128_v2, %v12736_v55  ;;  %v2404_v20 = vshrl.u32 %v2250_v10, 16  ;;  %v2402_v55 = vsel %vm12141_vm8, %v2397_v46, %v2401_v54  ;;  %v3659_v2 = vshrl.u32 %v3589_v62, 16 }
 0x17f   : > { %v3662_v46 = vshll.u32 %v3589_v62, 16  ;;  %v2678_v54 = vunpack.c.l.b16 %v2392_v35  ;;  %v2679_v14 = vunpack.c.l.b16 %v2402_v55  ;;  %v2420_v62 = vor.u32 %v2419_v56, %v2415_v28 }
 0x180   : > { %16639 = vst [vmem:[#allocation19_spill] sm:$0xff] %v12925_v16  ;;  %10899 = vmatmul.msk.bf16.gmra.mxu1 %vm1195_vm1, %v11632_v27  ;;  %v2406_v10 = vrot.slane %v2404_v20, 4  ;;  %v3590_v27 = vld [vmem:[#allocation2 + $0x28] sm:$0xf]  ;;  %11058 = vmatmul.msk.bf16.vlgmr.msrb.gmra.mxu3 %vm1195_vm1, %v4053_v60  ;;  %v3661_v5 = vrot.slane %v3659_v2, 4  ;;  %v3678_v37 = vshll.u32 %v3591_v36, 16 }
 0x181   : > { %v1863_v24 = vpop.f32.mrf.mxu2  ;;  %v3668_v9 = vshll.u32 %v3590_v27, 16  ;;  %v3672_v45 = vshrl.u32 %v3590_v27, 16  ;;  %v3664_v13 = vrot.slane %v3662_v46, 5  ;;  %v2706_v27 = vpack.c.b16 %v2679_v14, %v2678_v54  ;;  %v2253_v54 = vld [vmem:[#allocation2 + $0x54] sm:$0xf] }
 0x182   : > { %v12940_v41 = vadd.f32 %v1863_v24, %v12715_v11  ;;  %v1752_v11 = vunpack.c.l.b16 %v1715_v43  ;;  %v2410_v4 = vor.u32 %v2409_v39, %v2406_v10  ;;  %v3680_v10 = vrot.slane %v3678_v37, 5 }
 0x183   : > { %v12930_v59 = vpop.f32.mrf.mxu0  ;;  %v3670_v24 = vrot.slane %v3668_v9, 5  ;;  %v3665_v35 = vor.u32 %v3664_v13, %v3661_v5  ;;  %v3674_v55 = vrot.slane %v3672_v45, 4  ;;  %v2421_v39 = vrot.slane %v2420_v62, 4  ;;  %v12960_v5 = vld [vmem:[#allocation2 + $0x58] sm:$0xf] }
 0x184   : > { %v2411_v46 = vrot.slane %v2410_v4, 4  ;;  %v2966_v45 = vrot.slane %v12753_v50, 5  ;;  %v2428_v50 = vshrl.u32 %v2253_v54, 16  ;;  %v2431_v36 = vshll.u32 %v2253_v54, 16 }
 0x185   : > { %v2130_v52 = vpop.f32.mrf.mxu1  ;;  %v3666_v33 = vrot.slane %v3665_v35, 4  ;;  %v3675_v60 = vor.u32 %v3674_v55, %v3670_v24  ;;  %v2441_v62 = vshrl.u32 %v12960_v5, 16  ;;  %v2969_v55 = vrot.slane %v12773_v48, 5 }
 0x186   : > { %v12948_v20 = vadd.f32 %v2130_v52, %v12748_v42  ;;  %v1769_v42 = vpack.c.b16 %v1753_v34, %v1752_v11  ;;  %v2425_v52 = vrot.slane %v2423_v53, 5  ;;  %v2416_v4 = vsel %vm12141_vm8, %v2411_v46, %v2415_v28 }
 0x187   : > { %v3671_v56 = vsel %vm12141_vm8, %v3666_v33, %v3670_v24  ;;  %v3676_v9 = vrot.slane %v3675_v60, 4  ;;  %v2437_v24 = vshll.u32 %v12960_v5, 16  ;;  %v2430_v46 = vrot.slane %v2428_v50, 4 }
 0x188   : > { %16640 = vst [vmem:[#allocation20_spill] sm:$0xff] %v12948_v20  ;;  %v2894_v20 = vld [vmem:[#allocation2 + $0x18] sm:$0xe]  ;;  %v4023_v11 = vunpack.c.l.b16 %v3671_v56  ;;  %v2426_v53 = vsel %vm12141_vm8, %v2421_v39, %v2425_v52 }
 0x189   : > { %v1865_v43 = vpop.f32.mrf.mxu2  ;;  %v10929_v34 = vrot.slane %v2894_v20, 9  ;;  %v2968_v20 = vrot.slane %v2966_v45, 4  ;;  %v2681_v33 = vunpack.c.l.b16 %v2426_v53  ;;  %v12984_v56 = vrot.slane %v2437_v24, 5 }
 0x18a   : > { %v12954_v2 = vadd.f32 %v1865_v43, %v12733_v25  ;;  %v3681_v25 = vsel %vm12141_vm8, %v3676_v9, %v3680_v10  ;;  %v2680_v43 = vunpack.c.l.b16 %v2416_v4  ;;  %v2433_v10 = vrot.slane %v2431_v36, 5  ;;  %v3594_v4 = vld [vmem:[#allocation2 + $0x38] sm:$0x1] }
 0x18b   : > { %v12951_v16 = vpop.f32.mrf.mxu0  ;;  %v4024_v13 = vunpack.c.l.b16 %v3681_v25  ;;  %v2967_v60 = vsel %vm12401_vm14, %v10929_v34, %v2966_v45  ;;  %v2443_v9 = vrot.slane %v2441_v62, 4  ;;  %v12988_v25 = vld [vmem:[#allocation2 + $0x5c] sm:$0x1]  ;;  %v3702_v62 = vshll.u32 %v3594_v4, 16 }
 0x18c   : > { %v3074_v50 = vunpack.c.l.b16 %v2967_v60  ;;  %v2256_v60 = vld [vmem:[#allocation2 + $0x60] sm:$0xf] }
 0x18d   : > { %v2133_v14 = vpop.f32.mrf.mxu1 }
 0x18e   : > { %10916 = vmatmul.msk.bf16.gmra.mxu0 %vm1195_vm1, %v2706_v27  ;;  %10819 = vmatmul.msk.bf16.gmra.mxu2 %vm1195_vm1, %v1769_v42  ;;  %v12966_v37 = vadd.f32 %v2133_v14, %v12767_v8  ;;  %v4054_v27 = vpack.c.b16 %v4024_v13, %v4023_v11  ;;  %v3593_v42 = vld [vmem:[#allocation2 + $0x34] sm:$0xf]  ;;  %v2707_v13 = vpack.c.b16 %v2681_v33, %v2680_v43  ;;  %v11642_v43 = vld [vmem:[#allocation2 + $0x18] sm:$0xff]  ;;  %v3704_v33 = vrot.slane %v3702_v62, 5 }
 0x18f   : > { %v3692_v54 = vshll.u32 %v3593_v42, 16  ;;  %v3696_v48 = vshrl.u32 %v3593_v42, 16 }
 0x190   : > { %10950 = vmatmul.msk.bf16.vlgmr.msra.gmra.mxu1 %vm1195_vm1, %v12882_v26  ;;  %v3592_v26 = vld [vmem:[#allocation2 + $0x30] sm:$0xf]  ;;  %11059 = vmatmul.msk.bf16.gmra.mxu3 %vm1195_vm1, %v4054_v27 }
 0x191   : > { %v1868_v8 = vpop.f32.mrf.mxu2  ;;  %v3683_v39 = vshrl.u32 %v3592_v26, 16  ;;  %v3686_v52 = vshll.u32 %v3592_v26, 16  ;;  %v3694_v53 = vrot.slane %v3692_v54, 5  ;;  %v3698_v24 = vrot.slane %v3696_v48, 4 }
 0x192   : > { %v12980_v28 = vadd.f32 %v1868_v8, %v12745_v61  ;;  %v2970_v61 = vsel %vm12401_vm14, %v2968_v20, %v2969_v55  ;;  %v2434_v26 = vor.u32 %v2433_v10, %v2430_v46  ;;  %v2444_v20 = vor.u32 %v2443_v9, %v12984_v56 }
 0x193   : > { %v12976_v35 = vpop.f32.mrf.mxu0  ;;  %v3685_v45 = vrot.slane %v3683_v39, 4  ;;  %v3688_v11 = vrot.slane %v3686_v52, 5  ;;  %v3075_v8 = vunpack.c.l.b16 %v2970_v61  ;;  %v2447_v55 = vshll.u32 %v12988_v25, 16  ;;  %v13004_v61 = vld [vmem:[#allocation2 + $0x64] sm:$0xf] }
 0x194   : > { %v3699_v52 = vor.u32 %v3698_v24, %v3694_v53  ;;  %v2435_v10 = vrot.slane %v2434_v26, 4  ;;  %v2445_v9 = vrot.slane %v2444_v20, 4  ;;  %v2461_v62 = vshll.u32 %v13004_v61, 16 }
 0x195   : > { %v2135_v14 = vpop.f32.mrf.mxu1  ;;  %v3689_v36 = vor.u32 %v3688_v11, %v3685_v45  ;;  %v3105_v46 = vpack.c.b16 %v3075_v8, %v3074_v50  ;;  %v2973_v11 = vrot.slane %v12784_v38, 5  ;;  %v2455_v50 = vshll.u32 %v2256_v60, 16 }
 0x196   : > { %v12992_v34 = vadd.f32 %v2135_v14, %v12779_v17  ;;  %v3700_v48 = vrot.slane %v3699_v52, 4  ;;  %v2449_v14 = vrot.slane %v2447_v55, 5  ;;  %v2465_v8 = vshrl.u32 %v13004_v61, 16 }
 0x197   : > { %v3690_v39 = vrot.slane %v3689_v36, 4  ;;  %v2440_v38 = vsel %vm12141_vm8, %v2435_v10, %v12984_v56  ;;  %v13029_v56 = vrot.slane %v2461_v62, 5 }
 0x198   : > { %16641 = vst [vmem:[#allocation21_spill] sm:$0xff] %v12992_v34  ;;  %v2467_v10 = vrot.slane %v2465_v8, 4 }
 0x199   : > { %v1870_v27 = vpop.f32.mrf.mxu2  ;;  %v3695_v54 = vsel %vm12141_vm8, %v3690_v39, %v3694_v53  ;;  %v2895_v53 = vld [vmem:[#allocation2 + $0x24] sm:$0xe]  ;;  %v2976_v39 = vrot.slane %v12804_v40, 5 }
 0x19a   : > { %v12999_v17 = vadd.f32 %v1870_v27, %v12764_v51  ;;  %v3705_v51 = vsel %vm12141_vm8, %v3700_v48, %v3704_v33  ;;  %v4025_v4 = vunpack.c.l.b16 %v3695_v54  ;;  %v10930_v55 = vrot.slane %v2895_v53, 9  ;;  %v3595_v54 = vld [vmem:[#allocation2 + $0x3c] sm:$0xf]  ;;  %v3596_v48 = vld [vmem:[#allocation2 + $0x40] sm:$0xf] }
 0x19b   : > { %v12996_v42 = vpop.f32.mrf.mxu0  ;;  %v4026_v24 = vunpack.c.l.b16 %v3705_v51  ;;  %v2975_v27 = vrot.slane %v2973_v11, 4  ;;  %v2682_v51 = vunpack.c.l.b16 %v2440_v38  ;;  %v3716_v40 = vshll.u32 %v3596_v48, 16 }
 0x19d   : > { %v2138_v45 = vpop.f32.mrf.mxu1  ;;  %v4055_v52 = vpack.c.b16 %v4026_v24, %v4025_v4  ;;  %v3720_v4 = vshrl.u32 %v3596_v48, 16  ;;  %v2468_v48 = vor.u32 %v2467_v10, %v13029_v56 }
 0x19e   : > { %10917 = vmatmul.msk.bf16.gmra.mxu0 %vm1195_vm1, %v2707_v13  ;;  %v13010_v36 = vadd.f32 %v2138_v45, %v12798_v63  ;;  %11036 = vmatmul.msk.bf16.vlgmr.msra.gmra.mxu2 %vm1195_vm1, %v11642_v43  ;;  %v2452_v13 = vshrl.u32 %v2256_v60, 16  ;;  %v2450_v63 = vsel %vm12141_vm8, %v2445_v9, %v2449_v14  ;;  %v2457_v60 = vrot.slane %v2455_v50, 5  ;;  %v13031_v9 = vpop.f32.mrf.mxu3 }
 0x19f   : > { %v3707_v14 = vshrl.u32 %v3595_v54, 16  ;;  %v3710_v45 = vshll.u32 %v3595_v54, 16  ;;  %v2683_v53 = vunpack.c.l.b16 %v2450_v63  ;;  %v3597_v63 = vld [vmem:[#allocation2 + $0x44] sm:$0x1]  ;;  %v3718_v54 = vrot.slane %v3716_v40, 5 }
 0x1a0   : > { %16642 = vst [vmem:[#allocation22_spill] sm:$0xff] %v13010_v36  ;;  %10951 = vmatmul.msk.bf16.gmra.mxu1 %vm1195_vm1, %v3105_v46  ;;  %v2454_v33 = vrot.slane %v2452_v13, 4  ;;  %v13027_v46 = vld [vmem:[#allocation2 + $0x68] sm:$0x1]  ;;  %v2977_v13 = vsel %vm12401_vm14, %v2975_v27, %v2976_v39  ;;  %11060 = vmatmul.msk.bf16.gmra.mxu3 %vm1195_vm1, %v4055_v52  ;;  %v2469_v40 = vrot.slane %v2468_v48, 4 }
 0x1a1   : > { %v1873_v20 = vpop.f32.mrf.mxu2  ;;  %v3709_v50 = vrot.slane %v3707_v14, 4  ;;  %v3712_v62 = vrot.slane %v3710_v45, 5  ;;  %v2471_v38 = vshll.u32 %v13027_v46, 16  ;;  %v3077_v27 = vunpack.c.l.b16 %v2977_v13 }
 0x1a2   : > { %v13025_v43 = vadd.f32 %v1873_v20, %v12776_v18  ;;  %v2974_v18 = vsel %vm12401_vm14, %v10930_v55, %v2973_v11  ;;  %v2458_v20 = vor.u32 %v2457_v60, %v2454_v33  ;;  %v3726_v11 = vshll.u32 %v3597_v63, 16  ;;  %v11643_v33 = vld [vmem:[#allocation2 + $0x24] sm:$0xff] }
 0x1a3   : > { %v13021_v26 = vpop.f32.mrf.mxu0  ;;  %v3713_v36 = vor.u32 %v3712_v62, %v3709_v50  ;;  %v2708_v55 = vpack.c.b16 %v2683_v53, %v2682_v51  ;;  %v3076_v34 = vunpack.c.l.b16 %v2974_v18 }
 0x1a4   : > { %16643 = vst [vmem:[#allocation23_spill] sm:$0xff] %v13021_v26  ;;  %v3722_v26 = vrot.slane %v3720_v4, 4  ;;  %v2459_v60 = vrot.slane %v2458_v20, 4  ;;  %v13060_v20 = vld [vmem:[#allocation2 + $0x70] sm:$0xf] }
 0x1a5   : > { %v2140_v24 = vpop.f32.mrf.mxu1  ;;  %v3714_v14 = vrot.slane %v3713_v36, 4  ;;  %v3106_v4 = vpack.c.b16 %v3077_v27, %v3076_v34  ;;  %v2980_v36 = vrot.slane %v12814_v19, 5 }
 0x1a6   : > { %v13039_v8 = vadd.f32 %v2140_v24, %v12811_v49  ;;  %v3723_v45 = vor.u32 %v3722_v26, %v3718_v54  ;;  %v3728_v24 = vrot.slane %v3726_v11, 5  ;;  %v13048_v10 = vpop.f32.mrf.mxu3  ;;  %v2259_v26 = vld [vmem:[#allocation2 + $0x6c] sm:$0xf]  ;;  %v2464_v34 = vsel %vm12141_vm8, %v2459_v60, %v13029_v56  ;;  %v3598_v60 = vld [vmem:[#allocation2 + $0x48] sm:$0xf] }
 0x1a7   : > { %v3719_v51 = vsel %vm12141_vm8, %v3714_v14, %v3718_v54  ;;  %v2476_v63 = vshrl.u32 %v2259_v26, 16  ;;  %v2479_v54 = vshll.u32 %v2259_v26, 16  ;;  %v2982_v11 = vrot.slane %v2980_v36, 4 }
 0x1a8   : > { %16644 = vst [vmem:[#allocation24_spill] sm:$0xff] %v13039_v8  ;;  %v2473_v8 = vrot.slane %v2471_v38, 5  ;;  %v3724_v53 = vrot.slane %v3723_v45, 4  ;;  %v4027_v50 = vunpack.c.l.b16 %v3719_v51  ;;  %v2489_v14 = vshrl.u32 %v13060_v20, 16 }
 0x1a9   : > { %v1875_v52 = vpop.f32.mrf.mxu2  ;;  %v2481_v51 = vrot.slane %v2479_v54, 5 }
 0x1aa   : > { %v13046_v49 = vadd.f32 %v1875_v52, %v12795_v29  ;;  %v2896_v29 = vld [vmem:[#allocation2 + $0x30] sm:$0xe]  ;;  %v3729_v13 = vsel %vm12141_vm8, %v3724_v53, %v3728_v24  ;;  %v2474_v19 = vsel %vm12141_vm8, %v2469_v40, %v2473_v8  ;;  %v2485_v52 = vshll.u32 %v13060_v20, 16  ;;  %v3599_v24 = vld [vmem:[#allocation2 + $0x4c] sm:$0xf] }
 0x1ab   : > { %v13043_v39 = vpop.f32.mrf.mxu0  ;;  %v4028_v38 = vunpack.c.l.b16 %v3729_v13  ;;  %v10931_v48 = vrot.slane %v2896_v29, 9  ;;  %v2684_v8 = vunpack.c.l.b16 %v2464_v34  ;;  %v2478_v40 = vrot.slane %v2476_v63, 4 }
 0x1ac   : > { %16645 = vst [vmem:[#allocation25_spill] sm:$0xff] %v13043_v39  ;;  %v3740_v29 = vshll.u32 %v3599_v24, 16  ;;  %v3744_v13 = vshrl.u32 %v3599_v24, 16  ;;  %v2491_v34 = vrot.slane %v2489_v14, 4 }
 0x1ad   : > { %v2143_v18 = vpop.f32.mrf.mxu1  ;;  %v4056_v45 = vpack.c.b16 %v4028_v38, %v4027_v50  ;;  %v2981_v26 = vsel %vm12401_vm14, %v10931_v48, %v2980_v36  ;;  %v13082_v50 = vld [vmem:[#allocation2 + $0x74] sm:$0x1]  ;;  %v2487_v38 = vrot.slane %v2485_v52, 5  ;;  %v2482_v36 = vor.u32 %v2481_v51, %v2478_v40 }
 0x1ae   : > { %10918 = vmatmul.msk.bf16.gmra.mxu0 %vm1195_vm1, %v2708_v55  ;;  %v13057_v62 = vadd.f32 %v2143_v18, %v12835_v1  ;;  %11037 = vmatmul.msk.bf16.gmra.mxu2 %vm1195_vm1, %v11643_v33  ;;  %v2983_v1 = vrot.slane %v12837_v58, 5  ;;  %v2685_v33 = vunpack.c.l.b16 %v2474_v19  ;;  %v13076_v53 = vpop.f32.mrf.mxu3  ;;  %v3731_v58 = vshrl.u32 %v3598_v60, 16 }
 0x1af   : > { %v3078_v24 = vunpack.c.l.b16 %v2981_v26  ;;  %v2495_v39 = vshll.u32 %v13082_v50, 16  ;;  %v2483_v40 = vrot.slane %v2482_v36, 4 }
 0x1b0   : > { %16646 = vst [vmem:[#allocation26_spill] sm:$0xff] %v13057_v62  ;;  %10952 = vmatmul.msk.bf16.gmra.mxu1 %vm1195_vm1, %v3106_v4  ;;  %v3734_v4 = vshll.u32 %v3598_v60, 16  ;;  %v2984_v18 = vsel %vm12401_vm14, %v2982_v11, %v2983_v1  ;;  %11061 = vmatmul.msk.bf16.gmra.mxu3 %vm1195_vm1, %v4056_v45  ;;  %v3733_v19 = vrot.slane %v3731_v58, 4  ;;  %v3742_v60 = vrot.slane %v3740_v29, 5 }
 0x1b1   : > { %v1878_v27 = vpop.f32.mrf.mxu2  ;;  %v3746_v62 = vrot.slane %v3744_v13, 4  ;;  %v2709_v1 = vpack.c.b16 %v2685_v33, %v2684_v8  ;;  %v2492_v45 = vor.u32 %v2491_v34, %v2487_v38  ;;  %v2262_v13 = vld [vmem:[#allocation2 + $0x78] sm:$0xf]  ;;  %v13099_v34 = vld [vmem:[#allocation2 + $0x7c] sm:$0xf] }
 0x1b2   : > { %v13074_v56 = vadd.f32 %v1878_v27, %v12808_v0  ;;  %v3736_v63 = vrot.slane %v3734_v4, 5  ;;  %v3600_v27 = vld [vmem:[#allocation2 + $0x50] sm:$0x1] }
 0x1b3   : > { %v13069_v55 = vpop.f32.mrf.mxu0  ;;  %v3750_v11 = vshll.u32 %v3600_v27, 16  ;;  %v3747_v4 = vor.u32 %v3746_v62, %v3742_v60 }
 0x1b4   : > { %16647 = vst [vmem:[#allocation27_spill] sm:$0xff] %v13069_v55  ;;  %v3737_v48 = vor.u32 %v3736_v63, %v3733_v19  ;;  %v3079_v55 = vunpack.c.l.b16 %v2984_v18  ;;  %v2497_v18 = vrot.slane %v2495_v39, 5  ;;  %v2493_v19 = vrot.slane %v2492_v45, 4 }
 0x1b5   : > { %16648 = vst [vmem:[#allocation28_spill] sm:$0xff] %v13074_v56  ;;  %v2145_v0 = vpop.f32.mrf.mxu1  ;;  %v16649_v56 = vld [vmem:[#allocation17_spill] sm:$0xff]  ;;  %v3752_v29 = vrot.slane %v3750_v11, 5  ;;  %v3748_v33 = vrot.slane %v3747_v4, 4  ;;  %v2987_v63 = vrot.slane %v12864_v22, 5  ;;  %v2503_v11 = vshll.u32 %v2262_v13, 16 }
 0x1b6   : > { %v13086_v54 = vadd.f32 %v2145_v0, %v12854_v15  ;;  %v3738_v58 = vrot.slane %v3737_v48, 4  ;;  %v11644_v0 = vld [vmem:[#allocation2 + $0x30] sm:$0xff]  ;;  %v13094_v51 = vpop.f32.mrf.mxu3  ;;  %v3107_v26 = vpack.c.b16 %v3079_v55, %v3078_v24  ;;  %v2488_v39 = vsel %vm12141_vm8, %v2483_v40, %v2487_v38 }
 0x1b7   : > { %v3753_v27 = vsel %vm12141_vm8, %v3748_v33, %v3752_v29  ;;  %v2513_v24 = vshrl.u32 %v13099_v34, 16  ;;  %v2990_v4 = vrot.slane %v12895_v21, 5  ;;  %v2686_v38 = vunpack.c.l.b16 %v2488_v39  ;;  %v3602_v33 = vld [vmem:[#allocation2 + $0x58] sm:$0xf] }
 0x1b8   : > { %v3743_v8 = vsel %vm12141_vm8, %v3738_v58, %v3742_v60  ;;  %v2500_v60 = vshrl.u32 %v2262_v13, 16  ;;  %v4030_v55 = vunpack.c.l.b16 %v3753_v27  ;;  %v2989_v58 = vrot.slane %v2987_v63, 4 }
 0x1b9   : > { %v1880_v14 = vpop.f32.mrf.mxu2  ;;  %v4029_v36 = vunpack.c.l.b16 %v3743_v8  ;;  %v2505_v13 = vrot.slane %v2503_v11, 5  ;;  %v3601_v8 = vld [vmem:[#allocation2 + $0x54] sm:$0xf] }
 0x1ba   : > { %v13092_v15 = vadd.f32 %v1880_v14, %v16649_v56  ;;  %v2897_v56 = vld [vmem:[#allocation2 + $0x3c] sm:$0xe]  ;;  %v2502_v40 = vrot.slane %v2500_v60, 4  ;;  %v2991_v11 = vsel %vm12401_vm14, %v2989_v58, %v2990_v4 }
 0x1bb   : > { %v13089_v52 = vpop.f32.mrf.mxu0  ;;  %v10932_v22 = vrot.slane %v2897_v56, 9  ;;  %v2515_v56 = vrot.slane %v2513_v24, 4  ;;  %v3081_v4 = vunpack.c.l.b16 %v2991_v11 }
 0x1bd   : > { %v2148_v62 = vpop.f32.mrf.mxu1 }
 0x1be   : > { %10919 = vmatmul.msk.bf16.gmra.mxu0 %vm1195_vm1, %v2709_v1  ;;  %v13105_v48 = vadd.f32 %v2148_v62, %v12887_v47  ;;  %11038 = vmatmul.msk.bf16.gmra.mxu2 %vm1195_vm1, %v11644_v0  ;;  %v2509_v1 = vshll.u32 %v13099_v34, 16  ;;  %v2498_v47 = vsel %vm12141_vm8, %v2493_v19, %v2497_v18  ;;  %v4057_v0 = vpack.c.b16 %v4030_v55, %v4029_v36  ;;  %v13119_v62 = vld [vmem:[#allocation2 + $0x80] sm:$0x1] }
 0x1bf   : > { %v3758_v18 = vshll.u32 %v3601_v8, 16  ;;  %v2687_v21 = vunpack.c.l.b16 %v2498_v47  ;;  %v3764_v36 = vshll.u32 %v3602_v33, 16  ;;  %v3603_v47 = vld [vmem:[#allocation2 + $0x5c] sm:$0x1] }
 0x1c0   : > { %16650 = vst [vmem:[#allocation17_spill] sm:$0xff] %v13105_v48  ;;  %10953 = vmatmul.msk.bf16.gmra.mxu1 %vm1195_vm1, %v3107_v26  ;;  %v13121_v26 = vrot.slane %v2509_v1, 5  ;;  %v13123_v27 = vpop.f32.mrf.mxu3  ;;  %v3755_v48 = vshrl.u32 %v3601_v8, 16  ;;  %11062 = vmatmul.msk.bf16.gmra.mxu3 %vm1195_vm1, %v4057_v0  ;;  %v3768_v1 = vshrl.u32 %v3602_v33, 16 }
 0x1c1   : > { %v1883_v45 = vpop.f32.mrf.mxu2  ;;  %v3760_v39 = vrot.slane %v3758_v18, 5 }
 0x1c2   : > { %v1933_v29 = vadd.f32 %v1883_v45, %v12851_v6  ;;  %v2988_v6 = vsel %vm12401_vm14, %v10932_v22, %v2987_v63  ;;  %v3757_v55 = vrot.slane %v3755_v48, 4  ;;  %v2506_v45 = vor.u32 %v2505_v13, %v2502_v40  ;;  %v11645_v13 = vld [vmem:[#allocation2 + $0x3c] sm:$0xff] }
 0x1c3   : > { %v13113_v14 = vpop.f32.mrf.mxu0  ;;  %v2516_v63 = vor.u32 %v2515_v56, %v13121_v26  ;;  %v3770_v8 = vrot.slane %v3768_v1, 4  ;;  %v3080_v58 = vunpack.c.l.b16 %v2988_v6 }
 0x1c4   : > { %16651 = vst [vmem:[#allocation29_spill] sm:$0xff] %v13113_v14  ;;  %v13126_v19 = vadd.f32 %v13031_v9, %v1933_v29  ;;  %v2519_v9 = vshll.u32 %v13119_v62, 16  ;;  %v3766_v29 = vrot.slane %v3764_v36, 5  ;;  %v3761_v22 = vor.u32 %v3760_v39, %v3757_v55  ;;  %v2265_v36 = vld [vmem:[#allocation2 + $0x84] sm:$0xf] }
 0x1c5   : > { %v2150_v60 = vpop.f32.mrf.mxu1  ;;  %v2710_v14 = vpack.c.b16 %v2687_v21, %v2686_v38  ;;  %v2517_v56 = vrot.slane %v2516_v63, 4  ;;  %v3108_v11 = vpack.c.b16 %v3081_v4, %v3080_v58  ;;  %v13151_v39 = vld [vmem:[#allocation2 + $0x88] sm:$0xf] }
 0x1c6   : > { %16652 = vst [vmem:[#allocation30_spill] sm:$0xff] %v13126_v19  ;;  %v13134_v24 = vadd.f32 %v2150_v60, %v12910_v44  ;;  %v3774_v19 = vshll.u32 %v3603_v47, 16  ;;  %v3762_v18 = vrot.slane %v3761_v22, 4  ;;  %v3771_v33 = vor.u32 %v3770_v8, %v3766_v29 }
 0x1c7   : > { %v2507_v60 = vrot.slane %v2506_v45, 4  ;;  %v2521_v55 = vrot.slane %v2519_v9, 5  ;;  %v2524_v45 = vshrl.u32 %v2265_v36, 16  ;;  %v2527_v9 = vshll.u32 %v2265_v36, 16 }
 0x1c8   : > { %16653 = vst [vmem:[#allocation31_spill] sm:$0xff] %v13134_v24  ;;  %v3776_v24 = vrot.slane %v3774_v19, 5  ;;  %v3767_v38 = vsel %vm12141_vm8, %v3762_v18, %v3766_v29  ;;  %v3772_v21 = vrot.slane %v3771_v33, 4  ;;  %v2898_v19 = vld [vmem:[#allocation2 + $0x48] sm:$0xe]  ;;  %v2533_v22 = vshll.u32 %v13151_v39, 16 }
 0x1c9   : > { %v1885_v0 = vpop.f32.mrf.mxu2  ;;  %v4031_v29 = vunpack.c.l.b16 %v3767_v38  ;;  %v2522_v63 = vsel %vm12141_vm8, %v2517_v56, %v2521_v55  ;;  %v2537_v8 = vshrl.u32 %v13151_v39, 16  ;;  %v2526_v33 = vrot.slane %v2524_v45, 4  ;;  %v3604_v55 = vld [vmem:[#allocation2 + $0x60] sm:$0xf]  ;;  %v3605_v38 = vld [vmem:[#allocation2 + $0x64] sm:$0xf] }
 0x1ca   : > { %v1934_v44 = vadd.f32 %v1885_v0, %v12884_v57  ;;  %v2994_v57 = vrot.slane %v12916_v7, 5  ;;  %v3777_v47 = vsel %vm12141_vm8, %v3772_v21, %v3776_v24  ;;  %v2512_v7 = vsel %vm12141_vm8, %v2507_v60, %v13121_v26  ;;  %v16655_v24 = vld [vmem:[#allocation7_spill] sm:$0xff] }
 0x1cb   : > { %v2781_v48 = vpop.f32.mrf.mxu0  ;;  %v1532_v58 = vadd.f32 %v16655_v24, %v12903_v3  ;;  %v2997_v0 = vrot.slane %v12944_v30, 5  ;;  %v2529_v26 = vrot.slane %v2527_v9, 5  ;;  %v2688_v36 = vunpack.c.l.b16 %v2512_v7  ;;  %v13173_v3 = vld [vmem:[#allocation2 + $0x8c] sm:$0x1]  ;;  %v3606_v24 = vld [vmem:[#allocation2 + $0x68] sm:$0x1] }
 0x1cc   : > { %v13140_v40 = vadd.f32 %v2781_v48, %v12872_v12  ;;  %v13145_v6 = vadd.f32 %v13048_v10, %v1934_v44  ;;  %v13149_v12 = vpop.f32.mrf.mxu3  ;;  %v2996_v4 = vrot.slane %v2994_v57, 4  ;;  %v2689_v56 = vunpack.c.l.b16 %v2522_v63 }
 0x1cd   : > { %v2153_v1 = vpop.f32.mrf.mxu1  ;;  %v13175_v21 = vrot.slane %v2533_v22, 5  ;;  %v3782_v30 = vshll.u32 %v3604_v55, 16  ;;  %v3788_v9 = vshll.u32 %v3605_v38, 16  ;;  %v3792_v63 = vshrl.u32 %v3605_v38, 16  ;;  %v2268_v38 = vld [vmem:[#allocation2 + $0x90] sm:$0xf] }
 0x1ce   : > { %16654 = vst [vmem:[#allocation32_spill] sm:$0xff] %v13145_v6  ;;  %10920 = vmatmul.msk.bf16.gmra.mxu0 %vm1195_vm1, %v2710_v14  ;;  %v13156_v10 = vadd.f32 %v2153_v1, %v12940_v41  ;;  %11039 = vmatmul.msk.bf16.gmra.mxu2 %vm1195_vm1, %v11645_v13  ;;  %v4032_v14 = vunpack.c.l.b16 %v3777_v47  ;;  %v10933_v41 = vrot.slane %v2898_v19, 9  ;;  %v3779_v1 = vshrl.u32 %v3604_v55, 16 }
 0x1cf   : > { %v3784_v7 = vrot.slane %v3782_v30, 5 }
 0x1d0   : > { %10954 = vmatmul.msk.bf16.gmra.mxu1 %vm1195_vm1, %v3108_v11  ;;  %v4058_v44 = vpack.c.b16 %v4032_v14, %v4031_v29  ;;  %v2539_v11 = vrot.slane %v2537_v8, 4  ;;  %v2995_v45 = vsel %vm12401_vm14, %v10933_v41, %v2994_v57  ;;  %v2530_v29 = vor.u32 %v2529_v26, %v2526_v33 }
 0x1d1   : > { %v1888_v48 = vpop.f32.mrf.mxu2  ;;  %v3781_v14 = vrot.slane %v3779_v1, 4  ;;  %v3790_v57 = vrot.slane %v3788_v9, 5  ;;  %v2711_v33 = vpack.c.b16 %v2689_v56, %v2688_v36  ;;  %v3082_v26 = vunpack.c.l.b16 %v2995_v45 }
 0x1d2   : > { %v1935_v13 = vadd.f32 %v1888_v48, %v1532_v58  ;;  %11063 = vmatmul.msk.bf16.gmra.mxu3 %vm1195_vm1, %v4058_v44  ;;  %v2540_v58 = vor.u32 %v2539_v11, %v13175_v21  ;;  %v16657_v48 = vld [vmem:[#allocation8_spill] sm:$0xff]  ;;  %v2531_v55 = vrot.slane %v2530_v29, 4  ;;  %v11646_v11 = vld [vmem:[#allocation2 + $0x48] sm:$0xff]  ;;  %v2548_v29 = vshrl.u32 %v2268_v38, 16 }
 0x1d3   : > { %v2783_v18 = vpop.f32.mrf.mxu0  ;;  %v3785_v41 = vor.u32 %v3784_v7, %v3781_v14  ;;  %v13197_v7 = vld [vmem:[#allocation2 + $0x94] sm:$0xf] }
 0x1d4   : > { %v13171_v60 = vadd.f32 %v2783_v18, %v12899_v31  ;;  %v13178_v19 = vadd.f32 %v13076_v53, %v1935_v13  ;;  %v2998_v31 = vsel %vm12401_vm14, %v2996_v4, %v2997_v0  ;;  %v2543_v53 = vshll.u32 %v13173_v3, 16  ;;  %v13189_v8 = vpop.f32.mrf.mxu3 }
 0x1d5   : > { %v2155_v47 = vpop.f32.mrf.mxu1  ;;  %v3794_v4 = vrot.slane %v3792_v63, 4  ;;  %v3798_v0 = vshll.u32 %v3606_v24, 16  ;;  %v1534_v18 = vadd.f32 %v16657_v48, %v12930_v59  ;;  %v3083_v44 = vunpack.c.l.b16 %v2998_v31 }
 0x1d6   : > { %16656 = vst [vmem:[#allocation7_spill] sm:$0xff] %v13178_v19  ;;  %v13186_v22 = vadd.f32 %v2155_v47, %v12954_v2  ;;  %v3786_v1 = vrot.slane %v3785_v41, 4  ;;  %v16658_v19 = vld [vmem:[#allocation19_spill] sm:$0xff]  ;;  %v2545_v14 = vrot.slane %v2543_v53, 5  ;;  %v2541_v24 = vrot.slane %v2540_v58, 4 }
 0x1d7   : > { %v3795_v30 = vor.u32 %v3794_v4, %v3790_v57  ;;  %v3800_v63 = vrot.slane %v3798_v0, 5  ;;  %v3001_v59 = vrot.slane %v12960_v5, 5  ;;  %v3109_v31 = vpack.c.b16 %v3083_v44, %v3082_v26 }
 0x1d8   : > { %v3791_v36 = vsel %vm12141_vm8, %v3786_v1, %v3790_v57  ;;  %v2551_v41 = vshll.u32 %v2268_v38, 16  ;;  %v2557_v4 = vshll.u32 %v13197_v7, 16  ;;  %v2561_v58 = vshrl.u32 %v13197_v7, 16 }
 0x1d9   : > { %v1890_v13 = vpop.f32.mrf.mxu2  ;;  %v3796_v56 = vrot.slane %v3795_v30, 4  ;;  %v4033_v0 = vunpack.c.l.b16 %v3791_v36  ;;  %v3003_v26 = vrot.slane %v3001_v59, 4  ;;  %v3004_v44 = vrot.slane %v12988_v25, 5 }
 0x1da   : > { %v1936_v47 = vadd.f32 %v1890_v13, %v1534_v18  ;;  %v2546_v18 = vsel %vm12141_vm8, %v2541_v24, %v2545_v14  ;;  %v16660_v13 = vld [vmem:[#allocation9_spill] sm:$0xff]  ;;  %v2550_v38 = vrot.slane %v2548_v29, 4  ;;  %v2553_v1 = vrot.slane %v2551_v41, 5  ;;  %v16661_v24 = vld [vmem:[#allocation20_spill] sm:$0xff] }
 0x1db   : > { %v2786_v2 = vpop.f32.mrf.mxu0  ;;  %v3801_v5 = vsel %vm12141_vm8, %v3796_v56, %v3800_v63  ;;  %v3607_v56 = vld [vmem:[#allocation2 + $0x6c] sm:$0xf]  ;;  %v3005_v29 = vsel %vm12401_vm14, %v3003_v26, %v3004_v44 }
 0x1dc   : > { %v13195_v9 = vadd.f32 %v2786_v2, %v16658_v19  ;;  %v13203_v45 = vadd.f32 %v13094_v51, %v1936_v47  ;;  %v2899_v19 = vld [vmem:[#allocation2 + $0x54] sm:$0xe]  ;;  %v2536_v51 = vsel %vm12141_vm8, %v2531_v55, %v13175_v21  ;;  %v4034_v48 = vunpack.c.l.b16 %v3801_v5  ;;  %v13225_v21 = vld [vmem:[#allocation2 + $0x98] sm:$0x1] }
 0x1dd   : > { %v2158_v53 = vpop.f32.mrf.mxu1  ;;  %v1537_v2 = vadd.f32 %v16660_v13, %v12951_v16  ;;  %v13227_v55 = vrot.slane %v2557_v4, 5  ;;  %v2690_v36 = vunpack.c.l.b16 %v2536_v51  ;;  %v2691_v16 = vunpack.c.l.b16 %v2546_v18 }
 0x1de   : > { %16659 = vst [vmem:[#allocation8_spill] sm:$0xff] %v13203_v45  ;;  %10921 = vmatmul.msk.bf16.gmra.mxu0 %vm1195_vm1, %v2711_v33  ;;  %v13211_v57 = vadd.f32 %v2158_v53, %v12980_v28  ;;  %11040 = vmatmul.msk.bf16.gmra.mxu2 %vm1195_vm1, %v11646_v11  ;;  %v10934_v33 = vrot.slane %v2899_v19, 9  ;;  %v13223_v28 = vpop.f32.mrf.mxu3  ;;  %v2563_v11 = vrot.slane %v2561_v58, 4  ;;  %v4059_v14 = vpack.c.b16 %v4034_v48, %v4033_v0 }
 0x1df   : > { %v3803_v41 = vshrl.u32 %v3607_v56, 16  ;;  %v3806_v53 = vshll.u32 %v3607_v56, 16  ;;  %v2554_v58 = vor.u32 %v2553_v1, %v2550_v38  ;;  %v2567_v5 = vshll.u32 %v13225_v21, 16  ;;  %v2900_v56 = vld [vmem:[#allocation2 + $0x60] sm:$0xe] }
 0x1e0   : > { %10955 = vmatmul.msk.bf16.gmra.mxu1 %vm1195_vm1, %v3109_v31  ;;  %v3608_v31 = vld [vmem:[#allocation2 + $0x70] sm:$0xf]  ;;  %v3002_v19 = vsel %vm12401_vm14, %v10934_v33, %v3001_v59  ;;  %v2564_v51 = vor.u32 %v2563_v11, %v13227_v55  ;;  %v3085_v44 = vunpack.c.l.b16 %v3005_v29  ;;  %v3008_v38 = vrot.slane %v13004_v61, 5  ;;  %v11647_v61 = vld [vmem:[#allocation2 + $0x54] sm:$0xff] }
 0x1e1   : > { %v1893_v30 = vpop.f32.mrf.mxu2  ;;  %v3812_v0 = vshll.u32 %v3608_v31, 16  ;;  %v3805_v18 = vrot.slane %v3803_v41, 4  ;;  %v3808_v13 = vrot.slane %v3806_v53, 5  ;;  %v3816_v59 = vshrl.u32 %v3608_v31, 16 }
 0x1e2   : > { %v1937_v63 = vadd.f32 %v1893_v30, %v1537_v2  ;;  %11064 = vmatmul.msk.bf16.gmra.mxu3 %vm1195_vm1, %v4059_v14  ;;  %v3084_v26 = vunpack.c.l.b16 %v3002_v19  ;;  %v3609_v2 = vld [vmem:[#allocation2 + $0x74] sm:$0x1]  ;;  %v2555_v14 = vrot.slane %v2554_v58, 4  ;;  %v2565_v53 = vrot.slane %v2564_v51, 4 }
 0x1e3   : > { %v2788_v47 = vpop.f32.mrf.mxu0  ;;  %v3809_v1 = vor.u32 %v3808_v13, %v3805_v18  ;;  %v3818_v30 = vrot.slane %v3816_v59, 4 }
 0x1e4   : > { %v13230_v25 = vadd.f32 %v2788_v47, %v16661_v24  ;;  %v13237_v4 = vadd.f32 %v13123_v27, %v1937_v63  ;;  %v3814_v27 = vrot.slane %v3812_v0, 5  ;;  %v3822_v47 = vshll.u32 %v3609_v2, 16  ;;  %v16663_v63 = vld [vmem:[#allocation10_spill] sm:$0xff] }
 0x1e5   : > { %v2160_v48 = vpop.f32.mrf.mxu1  ;;  %v1539_v11 = vadd.f32 %v16663_v63, %v12976_v35  ;;  %v2712_v24 = vpack.c.b16 %v2691_v16, %v2690_v36  ;;  %v3810_v19 = vrot.slane %v3809_v1, 4  ;;  %v3110_v18 = vpack.c.b16 %v3085_v44, %v3084_v26  ;;  %v13253_v16 = vld [vmem:[#allocation2 + $0xa0] sm:$0xf] }
 0x1e6   : > { %16662 = vst [vmem:[#allocation19_spill] sm:$0xff] %v13237_v4  ;;  %v13243_v33 = vadd.f32 %v2160_v48, %v12999_v17  ;;  %v2569_v17 = vrot.slane %v2567_v5, 5  ;;  %v2271_v48 = vld [vmem:[#allocation2 + $0x9c] sm:$0xf]  ;;  %v3819_v29 = vor.u32 %v3818_v30, %v3814_v27  ;;  %v13251_v13 = vpop.f32.mrf.mxu3  ;;  %v3824_v59 = vrot.slane %v3822_v47, 5 }
 0x1e7   : > { %v10935_v35 = vrot.slane %v2900_v56, 9  ;;  %v3010_v36 = vrot.slane %v3008_v38, 4  ;;  %v3815_v58 = vsel %vm12141_vm8, %v3810_v19, %v3814_v27  ;;  %v2572_v2 = vshrl.u32 %v2271_v48, 16 }
 0x1e8   : > { %v3820_v5 = vrot.slane %v3819_v29, 4  ;;  %v2575_v26 = vshll.u32 %v2271_v48, 16  ;;  %v2560_v1 = vsel %vm12141_vm8, %v2555_v14, %v13227_v55  ;;  %v2570_v30 = vsel %vm12141_vm8, %v2565_v53, %v2569_v17  ;;  %v13282_v48 = vld [vmem:[#allocation2 + $0xa4] sm:$0x1] }
 0x1e9   : > { %v1895_v41 = vpop.f32.mrf.mxu2  ;;  %v4035_v47 = vunpack.c.l.b16 %v3815_v58  ;;  %v2692_v53 = vunpack.c.l.b16 %v2560_v1  ;;  %v2693_v17 = vunpack.c.l.b16 %v2570_v30  ;;  %v2591_v1 = vshll.u32 %v13282_v48, 16  ;;  %v11660_v30 = vld [vmem:[%s16595_s1 + $0x40] sm:$0xff] }
 0x1ea   : > { %v1938_v4 = vadd.f32 %v1895_v41, %v1539_v11  ;;  %v3825_v27 = vsel %vm12141_vm8, %v3820_v5, %v3824_v59  ;;  %v16665_v11 = vld [vmem:[#allocation11_spill] sm:$0xff]  ;;  %v2577_v56 = vrot.slane %v2575_v26, 5  ;;  %4532 = vmatpush.bf16.msra.mxu0 %v11660_v30 }
 0x1eb   : > { %v2791_v31 = vpop.f32.mrf.mxu0  ;;  %v4036_v63 = vunpack.c.l.b16 %v3825_v27  ;;  %v1542_v55 = vadd.f32 %v16665_v11, %v12996_v42  ;;  %v16668_v11 = vld [vmem:[#allocation23_spill] sm:$0xff] }
 0x1ec   : > { %v13249_v0 = vadd.f32 %v2791_v31, %v12966_v37  ;;  %v13258_v51 = vadd.f32 %v13149_v12, %v1938_v4  ;;  %v3011_v37 = vrot.slane %v13027_v46, 5  ;;  %v2581_v46 = vshll.u32 %v13253_v16, 16 }
 0x1ed   : > { %v2163_v44 = vpop.f32.mrf.mxu1  ;;  %v2585_v4 = vshrl.u32 %v13253_v16, 16  ;;  %v4060_v19 = vpack.c.b16 %v4036_v63, %v4035_v47 }
 0x1ee   : > { %16664 = vst [vmem:[#allocation9_spill] sm:$0xff] %v13258_v51  ;;  %10922 = vmatmul.msk.bf16.gmra.mxu0 %vm1195_vm1, %v2712_v24  ;;  %v13270_v12 = vadd.f32 %v2163_v44, %v13025_v43  ;;  %11041 = vmatmul.msk.bf16.gmra.mxu2 %vm1195_vm1, %v11647_v61  ;;  %v3009_v24 = vsel %vm12401_vm14, %v10935_v35, %v3008_v38  ;;  %v2574_v43 = vrot.slane %v2572_v2, 4  ;;  %v16666_v61 = vld [vmem:[#allocation21_spill] sm:$0xff]  ;;  %v13292_v26 = vpop.f32.mrf.mxu3 }
 0x1ef   : > { %v3012_v14 = vsel %vm12401_vm14, %v3010_v36, %v3011_v37  ;;  %v2587_v59 = vrot.slane %v2585_v4, 4  ;;  %v3610_v38 = vld [vmem:[#allocation2 + $0x78] sm:$0xf]  ;;  %v3611_v35 = vld [vmem:[#allocation2 + $0x7c] sm:$0xf]  ;;  %v3086_v58 = vunpack.c.l.b16 %v3009_v24 }
 0x1f0   : > { %10956 = vmatmul.msk.bf16.gmra.mxu1 %vm1195_vm1, %v3110_v18  ;;  %v13287_v18 = vrot.slane %v2581_v46, 5  ;;  %v3087_v36 = vunpack.c.l.b16 %v3012_v14  ;;  %v3827_v5 = vshrl.u32 %v3610_v38, 16  ;;  %v3830_v37 = vshll.u32 %v3610_v38, 16 }
 0x1f1   : > { %v1898_v41 = vpop.f32.mrf.mxu2  ;;  %v2578_v44 = vor.u32 %v2577_v56, %v2574_v43  ;;  %v3836_v27 = vshll.u32 %v3611_v35, 16  ;;  %v3840_v63 = vshrl.u32 %v3611_v35, 16  ;;  %v2274_v43 = vld [vmem:[#allocation2 + $0xa8] sm:$0xf]  ;;  %v3612_v56 = vld [vmem:[#allocation2 + $0x80] sm:$0x1]  ;;  %v2713_v38 = vpack.c.b16 %v2693_v17, %v2692_v53 }
 0x1f2   : > { %v1939_v29 = vadd.f32 %v1898_v41, %v1542_v55  ;;  %11065 = vmatmul.msk.bf16.gmra.mxu3 %vm1195_vm1, %v4060_v19  ;;  %v3829_v46 = vrot.slane %v3827_v5, 4  ;;  %v3832_v4 = vrot.slane %v3830_v37, 5  ;;  %v16669_v55 = vld [vmem:[#allocation12_spill] sm:$0xff]  ;;  %v2588_v14 = vor.u32 %v2587_v59, %v13287_v18 }
 0x1f3   : > { %v2793_v31 = vpop.f32.mrf.mxu0  ;;  %v3838_v41 = vrot.slane %v3836_v27, 5  ;;  %v3846_v19 = vshll.u32 %v3612_v56, 16  ;;  %v3111_v5 = vpack.c.b16 %v3087_v36, %v3086_v58  ;;  %v2579_v35 = vrot.slane %v2578_v44, 4  ;;  %v16670_v27 = vld [vmem:[#allocation22_spill] sm:$0xff] }
 0x1f4   : > { %v13285_v42 = vadd.f32 %v2793_v31, %v16666_v61  ;;  %v13290_v2 = vadd.f32 %v13189_v8, %v1939_v29  ;;  %v1544_v8 = vadd.f32 %v16669_v55, %v16668_v11  ;;  %v3015_v31 = vrot.slane %v13060_v20, 5  ;;  %v11648_v20 = vld [vmem:[#allocation2 + $0x60] sm:$0xff] }
 0x1f5   : > { %v2165_v47 = vpop.f32.mrf.mxu1  ;;  %v3833_v29 = vor.u32 %v3832_v4, %v3829_v46  ;;  %v3842_v61 = vrot.slane %v3840_v63, 4  ;;  %v2593_v37 = vrot.slane %v2591_v1, 5  ;;  %v2599_v59 = vshll.u32 %v2274_v43, 16 }
 0x1f6   : > { %16667 = vst [vmem:[#allocation20_spill] sm:$0xff] %v13290_v2  ;;  %v13302_v24 = vadd.f32 %v2165_v47, %v13046_v49  ;;  %v2901_v2 = vld [vmem:[#allocation2 + $0x6c] sm:$0xe]  ;;  %v2596_v47 = vshrl.u32 %v2274_v43, 16  ;;  %v2589_v46 = vrot.slane %v2588_v14, 4  ;;  %v3848_v4 = vrot.slane %v3846_v19, 5 }
 0x1f7   : > { %v13306_v49 = vld [vmem:[#allocation2 + $0xac] sm:$0xf]  ;;  %v3834_v30 = vrot.slane %v3833_v29, 4  ;;  %v3843_v51 = vor.u32 %v3842_v61, %v3838_v41  ;;  %v10936_v53 = vrot.slane %v2901_v2, 9  ;;  %v3017_v17 = vrot.slane %v3015_v31, 4  ;;  %v16674_v61 = vld [vmem:[#allocation13_spill] sm:$0xff] }
 0x1f8   : > { %v3018_v1 = vrot.slane %v13082_v50, 5  ;;  %v2605_v63 = vshll.u32 %v13306_v49, 16  ;;  %v2598_v14 = vrot.slane %v2596_v47, 4  ;;  %v2601_v56 = vrot.slane %v2599_v59, 5  ;;  %v16673_v50 = vld [vmem:[#allocation25_spill] sm:$0xff] }
 0x1f9   : > { %v1900_v11 = vpop.f32.mrf.mxu2  ;;  %v3839_v58 = vsel %vm12141_vm8, %v3834_v30, %v3838_v41  ;;  %v3844_v36 = vrot.slane %v3843_v51, 4  ;;  %v16672_v41 = vld [vmem:[#allocation28_spill] sm:$0xff]  ;;  %v1547_v19 = vadd.f32 %v16674_v61, %v16673_v50 }
 0x1fa   : > { %v1940_v45 = vadd.f32 %v1900_v11, %v1544_v8  ;;  %v2609_v8 = vshrl.u32 %v13306_v49, 16  ;;  %v4037_v29 = vunpack.c.l.b16 %v3839_v58  ;;  %v2594_v11 = vsel %vm12141_vm8, %v2589_v46, %v2593_v37 }
 0x1fb   : > { %v2796_v55 = vpop.f32.mrf.mxu0  ;;  %v3849_v2 = vsel %vm12141_vm8, %v3844_v36, %v3848_v4  ;;  %v3019_v47 = vsel %vm12401_vm14, %v3017_v17, %v3018_v1  ;;  %v13340_v59 = vrot.slane %v2605_v63, 5  ;;  %v13342_v4 = vld [vmem:[#allocation2 + $0xb0] sm:$0x1]  ;;  %v2602_v58 = vor.u32 %v2601_v56, %v2598_v14 }
 0x1fc   : > { %v13309_v6 = vadd.f32 %v2796_v55, %v16670_v27  ;;  %v13314_v44 = vadd.f32 %v13223_v28, %v1940_v45  ;;  %v13326_v45 = vpop.f32.mrf.mxu3  ;;  %v4038_v28 = vunpack.c.l.b16 %v3849_v2  ;;  %v3016_v55 = vsel %vm12401_vm14, %v10936_v53, %v3015_v31  ;;  %v16675_v36 = vld [vmem:[#allocation24_spill] sm:$0xff]  ;;  %v3614_v31 = vld [vmem:[#allocation2 + $0x88] sm:$0xf] }
 0x1fd   : > { %v2168_v43 = vpop.f32.mrf.mxu1  ;;  %v2611_v30 = vrot.slane %v2609_v8, 4  ;;  %v2695_v46 = vunpack.c.l.b16 %v2594_v11  ;;  %v3088_v53 = vunpack.c.l.b16 %v3016_v55  ;;  %v3089_v2 = vunpack.c.l.b16 %v3019_v47  ;;  %v16677_v55 = vld [vmem:[#allocation18_spill] sm:$0xff] }
 0x1fe   : > { %16671 = vst [vmem:[#allocation10_spill] sm:$0xff] %v13314_v44  ;;  %10923 = vmatmul.msk.bf16.gmra.mxu0 %vm1195_vm1, %v2713_v38  ;;  %v13323_v51 = vadd.f32 %v2168_v43, %v16672_v41  ;;  %11042 = vmatmul.msk.bf16.gmra.mxu2 %vm1195_vm1, %v11648_v20  ;;  %v2584_v38 = vsel %vm12141_vm8, %v2579_v35, %v13287_v18  ;;  %v3613_v43 = vld [vmem:[#allocation2 + $0x84] sm:$0xf]  ;;  %v2615_v14 = vshll.u32 %v13342_v4, 16  ;;  %v3860_v56 = vshll.u32 %v3614_v31, 16 }
 0x1ff   : > { %v4061_v18 = vpack.c.b16 %v4038_v28, %v4037_v29  ;;  %v3851_v17 = vshrl.u32 %v3613_v43, 16  ;;  %v3854_v1 = vshll.u32 %v3613_v43, 16  ;;  %v2612_v8 = vor.u32 %v2611_v30, %v13340_v59 }
 0x200   : > { %10957 = vmatmul.msk.bf16.gmra.mxu1 %vm1195_vm1, %v3111_v5  ;;  %v2694_v5 = vunpack.c.l.b16 %v2584_v38  ;;  %v2603_v41 = vrot.slane %v2602_v58, 4  ;;  %v3864_v61 = vshrl.u32 %v3614_v31, 16  ;;  %v3615_v38 = vld [vmem:[#allocation2 + $0x8c] sm:$0x1]  ;;  %v3862_v11 = vrot.slane %v3860_v56, 5 }
 0x201   : > { %v1903_v27 = vpop.f32.mrf.mxu2  ;;  %v3853_v28 = vrot.slane %v3851_v17, 4  ;;  %v3856_v50 = vrot.slane %v3854_v1, 5  ;;  %v3870_v30 = vshll.u32 %v3615_v38, 16  ;;  %v2617_v17 = vrot.slane %v2615_v14, 5  ;;  %v2277_v1 = vld [vmem:[#allocation2 + $0xb4] sm:$0xf] }
 0x202   : > { %v1941_v35 = vadd.f32 %v1903_v27, %v1547_v19  ;;  %11066 = vmatmul.msk.bf16.gmra.mxu3 %vm1195_vm1, %v4061_v18  ;;  %v3866_v27 = vrot.slane %v3864_v61, 4  ;;  %v2714_v43 = vpack.c.b16 %v2695_v46, %v2694_v5  ;;  %v2613_v18 = vrot.slane %v2612_v8, 4  ;;  %v2902_v46 = vld [vmem:[#allocation2 + $0x78] sm:$0xe] }
 0x203   : > { %v2798_v20 = vpop.f32.mrf.mxu0  ;;  %v3857_v47 = vor.u32 %v3856_v50, %v3853_v28  ;;  %v2608_v56 = vsel %vm12141_vm8, %v2603_v41, %v13340_v59  ;;  %v13364_v28 = vld [vmem:[#allocation2 + $0xb8] sm:$0xf]  ;;  %v3022_v8 = vrot.slane %v13099_v34, 5  ;;  %v3872_v14 = vrot.slane %v3870_v30, 5 }
 0x204   : > { %v13345_v37 = vadd.f32 %v2798_v20, %v16675_v36  ;;  %v13348_v63 = vadd.f32 %v13251_v13, %v1941_v35  ;;  %v534_v13 = vrot.slane %v16677_v55, 4  ;;  %v16678_v20 = vld [vmem:[#allocation27_spill] sm:$0xff]  ;;  %v16679_v35 = vld [vmem:[#allocation14_spill] sm:$0xff]  ;;  %v13359_v58 = vpop.f32.mrf.mxu3  ;;  %v3867_v61 = vor.u32 %v3866_v27, %v3862_v11 }
 0x205   : > { %v2170_v29 = vpop.f32.mrf.mxu1  ;;  %v1549_v36 = vadd.f32 %v16679_v35, %v16678_v20  ;;  %v3858_v50 = vrot.slane %v3857_v47, 4  ;;  %v16680_v55 = vld [vmem:[#allocation26_spill] sm:$0xff]  ;;  %v698_v20 = vld [vmem:[#allocation2 + $0xc8] sm:$0x1]  ;;  %v2620_v35 = vshrl.u32 %v2277_v1, 16  ;;  %v2623_v44 = vshll.u32 %v2277_v1, 16 }
 0x206   : > { %16676 = vst [vmem:[#allocation11_spill] sm:$0xff] %v13348_v63  ;;  %v13354_v19 = vadd.f32 %v2170_v29, %v13092_v15  ;;  %v11649_v15 = vld [vmem:[#allocation2 + $0x6c] sm:$0xff]  ;;  %v3112_v29 = vpack.c.b16 %v3089_v2, %v3088_v53  ;;  %v3868_v2 = vrot.slane %v3867_v61, 4  ;;  %v2629_v41 = vshll.u32 %v13364_v28, 16 }
 0x207   : > { %v3863_v53 = vsel %vm12141_vm8, %v3858_v50, %v3862_v11  ;;  %v2633_v34 = vshrl.u32 %v13364_v28, 16  ;;  %v10937_v27 = vrot.slane %v2902_v46, 9  ;;  %v699_v1 = vsel %vm12230_vm11, %v534_v13, %v698_v20  ;;  %v16683_v61 = vld [vmem:[#allocation15_spill] sm:$0xff] }
 0x208   : > { %v3873_v30 = vsel %vm12141_vm8, %v3868_v2, %v3872_v14  ;;  %700 = vst [vmem:[#allocation2 + $0xc8] sm:$0x1] %v699_v1  ;;  %v2625_v50 = vrot.slane %v2623_v44, 5  ;;  %v13394_v13 = vrot.slane %v2629_v41, 5  ;;  %v13405_v41 = vld [vmem:[#allocation2 + $0x94] sm:$0xf] }
 0x209   : > { %v1905_v31 = vpop.f32.mrf.mxu2  ;;  %v3023_v44 = vsel %vm12401_vm14, %v10937_v27, %v3022_v8  ;;  %16685 = vst [vmem:[#allocation12_spill] sm:$0xff] %v13405_v41  ;;  %v3888_v27 = vshrl.u32 %v13405_v41, 16 }
 0x20a   : > { %v1942_v38 = vadd.f32 %v1905_v31, %v1549_v36  ;;  %v4039_v36 = vunpack.c.l.b16 %v3863_v53  ;;  %v2622_v31 = vrot.slane %v2620_v35, 4  ;;  %v3616_v35 = vld [vmem:[#allocation2 + $0x90] sm:$0xf] }
 0x20b   : > { %v2801_v63 = vpop.f32.mrf.mxu0 }
 0x20c   : > { %v13367_v5 = vadd.f32 %v2801_v63, %v16680_v55  ;;  %v13373_v59 = vadd.f32 %v13292_v26, %v1942_v38  ;;  %v2618_v63 = vsel %vm12141_vm8, %v2613_v18, %v2617_v17  ;;  %v3025_v18 = vrot.slane %v13119_v62, 5  ;;  %v13392_v55 = vld [vmem:[#allocation2 + $0xbc] sm:$0x1] }
 0x20d   : > { %v3183_v47 = vpop.f32.mrf.mxu1  ;;  %v4040_v17 = vunpack.c.l.b16 %v3873_v30  ;;  %v1552_v38 = vadd.f32 %v16683_v61, %v13089_v52  ;;  %v2697_v20 = vunpack.c.l.b16 %v2618_v63  ;;  %v3875_v63 = vshrl.u32 %v3616_v35, 16 }
 0x20e   : > { %16681 = vst [vmem:[#allocation21_spill] sm:$0xff] %v13367_v5  ;;  %10924 = vmatmul.msk.bf16.gmra.mxu0 %vm1195_vm1, %v2714_v43  ;;  %v13385_v26 = vadd.f32 %v3183_v47, %v13140_v40  ;;  %11043 = vmatmul.msk.bf16.gmra.mxu2 %vm1195_vm1, %v11649_v15  ;;  %v3024_v43 = vrot.slane %v3022_v8, 4  ;;  %v2635_v40 = vrot.slane %v2633_v34, 4  ;;  %v2696_v15 = vunpack.c.l.b16 %v2608_v56  ;;  %v2903_v5 = vld [vmem:[#allocation2 + $0x84] sm:$0xe] }
 0x20f   : > { %v4062_v53 = vpack.c.b16 %v4040_v17, %v4039_v36  ;;  %v2626_v34 = vor.u32 %v2625_v50, %v2622_v31  ;;  %v2639_v56 = vshll.u32 %v13392_v55, 16  ;;  %v3878_v47 = vshll.u32 %v3616_v35, 16 }
 0x210   : > { %10958 = vmatmul.msk.bf16.gmra.mxu1 %vm1195_vm1, %v3112_v29  ;;  %v3026_v52 = vsel %vm12401_vm14, %v3024_v43, %v3025_v18  ;;  %v13403_v29 = vpop.f32.mrf.mxu3  ;;  %v3884_v8 = vshll.u32 %v13405_v41, 16  ;;  %v3877_v11 = vrot.slane %v3875_v63, 4  ;;  %v16686_v43 = vld [vmem:[#allocation29_spill] sm:$0xff]  ;;  %v16687_v18 = vld [vmem:[#allocation16_spill] sm:$0xff]  ;;  %v3090_v50 = vunpack.c.l.b16 %v3023_v44 }
 0x211   : > { %v1908_v46 = vpop.f32.mrf.mxu2  ;;  %v3880_v1 = vrot.slane %v3878_v47, 5  ;;  %v1554_v17 = vadd.f32 %v16687_v18, %v16686_v43  ;;  %v2627_v35 = vrot.slane %v2626_v34, 4  ;;  %v2641_v63 = vrot.slane %v2639_v56, 5  ;;  %v16688_v41 = vld [vmem:[#allocation17_spill] sm:$0xff]  ;;  %v2280_v34 = vld [vmem:[#allocation2 + $0xc0] sm:$0xf] }
 0x212   : > { %v1943_v62 = vadd.f32 %v1908_v46, %v1552_v38  ;;  %11067 = vmatmul.msk.bf16.gmra.mxu3 %vm1195_vm1, %v4062_v53  ;;  %v3886_v61 = vrot.slane %v3884_v8, 5  ;;  %v3091_v38 = vunpack.c.l.b16 %v3026_v52  ;;  %v3890_v46 = vrot.slane %v3888_v27, 4  ;;  %v11650_v52 = vld [vmem:[#allocation2 + $0x78] sm:$0xff] }
 0x213   : > { %v2803_v14 = vpop.f32.mrf.mxu0  ;;  %v3029_v43 = vrot.slane %v13151_v39, 5  ;;  %v13427_v27 = vld [vmem:[#allocation2 + $0x1c] sm:$0xf] }
 0x214   : > { %v13397_v2 = vadd.f32 %v2803_v14, %v13086_v54  ;;  %v13409_v30 = vadd.f32 %v13326_v45, %v1943_v62  ;;  %v2636_v54 = vor.u32 %v2635_v40, %v13394_v13  ;;  %v13420_v45 = vld [vmem:[#allocation2 + $0x98] sm:$0x1]  ;;  %v3881_v40 = vor.u32 %v3880_v1, %v3877_v11 }
 0x215   : > { %v3185_v36 = vpop.f32.mrf.mxu1  ;;  %v3894_v14 = vshll.u32 %v13420_v45, 16  ;;  %v2715_v62 = vpack.c.b16 %v2697_v20, %v2696_v15  ;;  %v16605_v15 = vrot.slane %v13427_v27, 5  ;;  %v3113_v20 = vpack.c.b16 %v3091_v38, %v3090_v50  ;;  %v13444_v38 = vld [vmem:[#allocation2 + $0xc4] sm:$0xf] }
 0x216   : > { %16684 = vst [vmem:[#allocation23_spill] sm:$0xff] %v13397_v2  ;;  %v13418_v31 = vadd.f32 %v3185_v36, %v13171_v60  ;;  %v2637_v53 = vrot.slane %v2636_v54, 4  ;;  %v3882_v60 = vrot.slane %v3881_v40, 4  ;;  %v3891_v36 = vor.u32 %v3890_v46, %v3886_v61 }
 0x217   : > { %v3896_v44 = vrot.slane %v3894_v14, 5  ;;  %v10938_v1 = vrot.slane %v2903_v5, 9  ;;  %v3031_v50 = vrot.slane %v3029_v43, 4  ;;  %v2647_v14 = vshll.u32 %v2280_v34, 16 }
 0x218   : > { %v3887_v56 = vsel %vm12141_vm8, %v3882_v60, %v3886_v61  ;;  %v3892_v54 = vrot.slane %v3891_v36, 4  ;;  %v13436_v11 = vpop.f32.mrf.mxu3  ;;  %v3032_v61 = vrot.slane %v13173_v3, 5  ;;  %v4312_v60 = vrot.slane %v16605_v15, 4 }
 0x219   : > { %v1910_v47 = vpop.f32.mrf.mxu2  ;;  %v4041_v40 = vunpack.c.l.b16 %v3887_v56 }
 0x21a   : > { %v1944_v18 = vadd.f32 %v1910_v47, %v1554_v17  ;;  %v2657_v47 = vshrl.u32 %v13444_v38, 16 }
 0x21b   : > { %v2806_v2 = vpop.f32.mrf.mxu0 }
 0x21c   : > { %v13425_v8 = vadd.f32 %v2806_v2, %v16688_v41  ;;  %v13433_v39 = vadd.f32 %v13359_v58, %v1944_v18  ;;  %v2632_v2 = vsel %vm12141_vm8, %v2627_v35, %v13394_v13  ;;  %v2642_v41 = vsel %vm12141_vm8, %v2637_v53, %v2641_v63  ;;  %v11931_v35 = vld [vmem:[#allocation2 + $0x20] sm:$0x1] }
 0x21d   : > { %v3188_v17 = vpop.f32.mrf.mxu1  ;;  %v3897_v58 = vsel %vm12141_vm8, %v3892_v54, %v3896_v44  ;;  %v2644_v13 = vshrl.u32 %v2280_v34, 16  ;;  %v4313_v5 = vrot.slane %v11931_v35, 5  ;;  %v2698_v53 = vunpack.c.l.b16 %v2632_v2  ;;  %v16690_v34 = vld [vmem:[#allocation31_spill] sm:$0xff] }
 0x21e   : > { %16689 = vst [vmem:[#allocation22_spill] sm:$0xff] %v13425_v8  ;;  %10925 = vmatmul.msk.bf16.gmra.mxu0 %vm1195_vm1, %v2715_v62  ;;  %v13449_v46 = vadd.f32 %v3188_v17, %v13195_v9  ;;  %11044 = vmatmul.msk.bf16.gmra.mxu2 %vm1195_vm1, %v11650_v52  ;;  %v4042_v62 = vunpack.c.l.b16 %v3897_v58  ;;  %v2699_v3 = vunpack.c.l.b16 %v2642_v41  ;;  %v2653_v63 = vshll.u32 %v13444_v38, 16  ;;  %v3619_v41 = vld [vmem:[#allocation2 + $0x9c] sm:$0xf]  ;;  %v13465_v17 = vld [vmem:[#allocation2 + $0xa0] sm:$0xf] }
 0x21f   : > { %v3030_v44 = vsel %vm12401_vm14, %v10938_v1, %v3029_v43  ;;  %v3033_v18 = vsel %vm12401_vm14, %v3031_v50, %v3032_v61  ;;  %v2646_v54 = vrot.slane %v2644_v13, 4  ;;  %v2649_v2 = vrot.slane %v2647_v14, 5  ;;  %16692 = vst [vmem:[#allocation25_spill] sm:$0xff] %v13465_v17  ;;  %v13472_v61 = vld [vmem:[#allocation2 + $0xc8] sm:$0x1] }
 0x220   : > { %10959 = vmatmul.msk.bf16.gmra.mxu1 %vm1195_vm1, %v3113_v20  ;;  %v4063_v52 = vpack.c.b16 %v4042_v62, %v4041_v40  ;;  %v3899_v58 = vshrl.u32 %v3619_v41, 16  ;;  %v3902_v35 = vshll.u32 %v3619_v41, 16  ;;  %v3908_v15 = vshll.u32 %v13465_v17, 16  ;;  %v4244_v13 = vld [vmem:[#allocation2 + $0x18] sm:$0xe] }
 0x221   : > { %v3474_v36 = vpop.f32.mrf.mxu2  ;;  %v3912_v43 = vshrl.u32 %v13465_v17, 16  ;;  %v2716_v50 = vpack.c.b16 %v2699_v3, %v2698_v53  ;;  %v2655_v40 = vrot.slane %v2653_v63, 5  ;;  %v2659_v62 = vrot.slane %v2657_v47, 4  ;;  %v13478_v53 = vld [vmem:[#allocation2 + $0xa4] sm:$0x1] }
 0x222   : > { %v3554_v56 = vadd.f32 %v3474_v36, %v13385_v26  ;;  %11068 = vmatmul.msk.bf16.gmra.mxu3 %vm1195_vm1, %v4063_v52  ;;  %v3901_v14 = vrot.slane %v3899_v58, 4  ;;  %v3910_v36 = vrot.slane %v3908_v15, 5  ;;  %v3093_v8 = vunpack.c.l.b16 %v3033_v18 }
 0x223   : > { %v2808_v9 = vpop.f32.mrf.mxu0  ;;  %v2650_v3 = vor.u32 %v2649_v2, %v2646_v54  ;;  %v3918_v17 = vshll.u32 %v13478_v53, 16  ;;  %v2660_v52 = vor.u32 %v2659_v62, %v2655_v40  ;;  %v2663_v58 = vshll.u32 %v13472_v61, 16 }
 0x224   : > { %v13462_v20 = vadd.f32 %v2808_v9, %v16690_v34  ;;  %v13470_v1 = vadd.f32 %v13403_v29, %v3554_v56  ;;  %v3904_v9 = vrot.slane %v3902_v35, 5  ;;  %v3914_v34 = vrot.slane %v3912_v43, 4  ;;  %v4137_v29 = vpop.f32.mrf.mxu3 }
 0x225   : > { %v3190_v26 = vpop.f32.mrf.mxu1  ;;  %v11074_v56 = vrot.slane %v4244_v13, 9  ;;  %v16693_v15 = vrot.slane %v13427_v27, 5  ;;  %v2651_v27 = vrot.slane %v2650_v3, 4  ;;  %v2904_v3 = vld [vmem:[#allocation2 + $0x90] sm:$0xe] }
 0x226   : > { %16691 = vst [vmem:[#allocation28_spill] sm:$0xff] %v13462_v20  ;;  %v13476_v41 = vadd.f32 %v3190_v26, %v13230_v25  ;;  %v3092_v20 = vunpack.c.l.b16 %v3030_v44  ;;  %v3905_v63 = vor.u32 %v3904_v9, %v3901_v14  ;;  %v3915_v47 = vor.u32 %v3914_v34, %v3910_v36  ;;  %v11651_v14 = vld [vmem:[#allocation2 + $0x84] sm:$0xff] }
 0x227   : > { %v4311_v25 = vsel %vm12401_vm14, %v11074_v56, %v16693_v15  ;;  %v4314_v44 = vsel %vm12401_vm14, %v4312_v60, %v4313_v5  ;;  %v3920_v9 = vrot.slane %v3918_v17, 5  ;;  %v2665_v17 = vrot.slane %v2663_v58, 5 }
 0x228   : > { %v4423_v43 = vunpack.c.l.b16 %v4311_v25  ;;  %v4424_v26 = vunpack.c.l.b16 %v4314_v44  ;;  %v3906_v54 = vrot.slane %v3905_v63, 4  ;;  %v3916_v2 = vrot.slane %v3915_v47, 4 }
 0x229   : > { %v3476_v35 = vpop.f32.mrf.mxu2  ;;  %v3114_v60 = vpack.c.b16 %v3093_v8, %v3092_v20  ;;  %v3036_v63 = vrot.slane %v13197_v7, 5  ;;  %v2661_v47 = vrot.slane %v2660_v52, 4  ;;  %v10939_v8 = vrot.slane %v2904_v3, 9 }
 0x22a   : > { %v3555_v62 = vadd.f32 %v3476_v35, %v13418_v31  ;;  %v13492_v34 = vpack.c.b16 %v4424_v26, %v4423_v43  ;;  %v3911_v56 = vsel %vm12141_vm8, %v3906_v54, %v3910_v36  ;;  %v13517_v26 = vld [vmem:[#allocation2 + $0xac] sm:$0xf] }
 0x22b   : > { %v2811_v18 = vpop.f32.mrf.mxu0  ;;  %v4043_v15 = vunpack.c.l.b16 %v3911_v56  ;;  %v3038_v20 = vrot.slane %v3036_v63, 4  ;;  %v2666_v58 = vsel %vm12141_vm8, %v2661_v47, %v2665_v17  ;;  %v13531_v17 = vld [vmem:[#allocation2 + $0xb0] sm:$0x1]  ;;  %v4394_v32 = vrot.slane %v13517_v26, 5 }
 0x22c   : > { %v13489_v13 = vadd.f32 %v2811_v18, %v13156_v10  ;;  %v13497_v5 = vadd.f32 %v13436_v11, %v3555_v62  ;;  %v3921_v10 = vsel %vm12141_vm8, %v3916_v2, %v3920_v9  ;;  %v2656_v11 = vsel %vm12141_vm8, %v2651_v27, %v2655_v40  ;;  %v4139_v7 = vpop.f32.mrf.mxu3  ;;  %v3622_v40 = vld [vmem:[#allocation2 + $0xa8] sm:$0xf] }
 0x22d   : > { %v3193_v31 = vpop.f32.mrf.mxu1  ;;  %v4044_v25 = vunpack.c.l.b16 %v3921_v10  ;;  %v2700_v43 = vunpack.c.l.b16 %v2656_v11  ;;  %v3923_v54 = vshrl.u32 %v3622_v40, 16  ;;  %v3926_v2 = vshll.u32 %v3622_v40, 16 }
 0x22e   : > { %10926 = vmatmul.msk.bf16.gmra.mxu0 %vm1195_vm1, %v2716_v50  ;;  %v13504_v44 = vadd.f32 %v3193_v31, %v13249_v0  ;;  %11045 = vmatmul.msk.bf16.gmra.mxu2 %vm1195_vm1, %v11651_v14  ;;  %v3039_v50 = vrot.slane %v13225_v21, 5  ;;  %v3932_v62 = vshll.u32 %v13517_v26, 16  ;;  %v3936_v21 = vshrl.u32 %v13517_v26, 16 }
 0x22f   : > { %v4064_v18 = vpack.c.b16 %v4044_v25, %v4043_v15  ;;  %v2701_v9 = vunpack.c.l.b16 %v2666_v58  ;;  %v3037_v27 = vsel %vm12401_vm14, %v10939_v8, %v3036_v63  ;;  %v3925_v56 = vrot.slane %v3923_v54, 4 }
 0x230   : > { %10960 = vmatmul.msk.bf16.gmra.mxu1 %vm1195_vm1, %v3114_v60  ;;  %v3928_v60 = vrot.slane %v3926_v2, 5  ;;  %v3934_v10 = vrot.slane %v3932_v62, 5  ;;  %v3938_v31 = vrot.slane %v3936_v21, 4  ;;  %v3942_v15 = vshll.u32 %v13531_v17, 16  ;;  %v2905_v21 = vld [vmem:[#allocation2 + $0x9c] sm:$0xe] }
 0x231   : > { %v3479_v52 = vpop.f32.mrf.mxu2  ;;  %v2717_v63 = vpack.c.b16 %v2701_v9, %v2700_v43  ;;  %v3094_v25 = vunpack.c.l.b16 %v3037_v27  ;;  %v3043_v2 = vrot.slane %v13253_v16, 5  ;;  %v4397_v26 = vrot.slane %v13531_v17, 5 }
 0x232   : > { %v3556_v35 = vadd.f32 %v3479_v52, %v13449_v46  ;;  %11069 = vmatmul.msk.bf16.gmra.mxu3 %vm1195_vm1, %v4064_v18  ;;  %v3939_v3 = vor.u32 %v3938_v31, %v3934_v10 }
 0x233   : > { %v2813_v36 = vpop.f32.mrf.mxu0 }
 0x234   : > { %v13514_v0 = vadd.f32 %v2813_v36, %v13186_v22  ;;  %v13521_v14 = vadd.f32 %v4137_v29, %v3556_v35  ;;  %v3040_v22 = vsel %vm12401_vm14, %v3038_v20, %v3039_v50  ;;  %v3929_v29 = vor.u32 %v3928_v60, %v3925_v56  ;;  %v4142_v18 = vpop.f32.mrf.mxu3 }
 0x235   : > { %v3195_v46 = vpop.f32.mrf.mxu1  ;;  %v3095_v11 = vunpack.c.l.b16 %v3040_v22  ;;  %v3940_v36 = vrot.slane %v3939_v3, 4  ;;  %v3944_v35 = vrot.slane %v3942_v15, 5  ;;  %v3045_v22 = vrot.slane %v3043_v2, 4  ;;  %v13556_v3 = vld [vmem:[#allocation2 + $0xb8] sm:$0xf] }
 0x236   : > { %v13529_v47 = vadd.f32 %v3195_v46, %v13285_v42  ;;  %v3930_v50 = vrot.slane %v3929_v29, 4  ;;  %v11652_v42 = vld [vmem:[#allocation2 + $0x90] sm:$0xff]  ;;  %v3046_v46 = vrot.slane %v13282_v48, 5 }
 0x237   : > { %v3115_v43 = vpack.c.b16 %v3095_v11, %v3094_v25  ;;  %v3945_v62 = vsel %vm12141_vm8, %v3940_v36, %v3944_v35  ;;  %v3625_v29 = vld [vmem:[#allocation2 + $0xb4] sm:$0xf]  ;;  %v3960_v25 = vshrl.u32 %v13556_v3, 16  ;;  %v13570_v35 = vld [vmem:[#allocation2 + $0xbc] sm:$0x1] }
 0x238   : > { %v3935_v40 = vsel %vm12141_vm8, %v3930_v50, %v3934_v10  ;;  %v3950_v15 = vshll.u32 %v3625_v29, 16 }
 0x239   : > { %v3481_v20 = vpop.f32.mrf.mxu2  ;;  %v4045_v9 = vunpack.c.l.b16 %v3935_v40 }
 0x23a   : > { %v3557_v58 = vadd.f32 %v3481_v20, %v13476_v41  ;;  %v4046_v41 = vunpack.c.l.b16 %v3945_v62  ;;  %v3952_v50 = vrot.slane %v3950_v15, 5 }
 0x23b   : > { %v2816_v8 = vpop.f32.mrf.mxu0 }
 0x23c   : > { %v13535_v52 = vadd.f32 %v2816_v8, %v13211_v57  ;;  %v13540_v54 = vadd.f32 %v4139_v7, %v3557_v58  ;;  %v10940_v7 = vrot.slane %v2905_v21, 9  ;;  %v4065_v60 = vpack.c.b16 %v4046_v41, %v4045_v9  ;;  %v4144_v48 = vpop.f32.mrf.mxu3  ;;  %v11932_v41 = vld [vmem:[#allocation2 + $0x28] sm:$0xf] }
 0x23d   : > { %v3198_v57 = vpop.f32.mrf.mxu1  ;;  %v3962_v58 = vrot.slane %v3960_v25, 4  ;;  %v11933_v25 = vld [vmem:[#allocation2 + $0x2c] sm:$0x1] }
 0x23e   : > { %10927 = vmatmul.msk.bf16.gmra.mxu0 %vm1195_vm1, %v2717_v63  ;;  %v13547_v27 = vadd.f32 %v3198_v57, %v13309_v6  ;;  %11046 = vmatmul.msk.bf16.gmra.mxu2 %vm1195_vm1, %v11652_v42  ;;  %v3947_v6 = vshrl.u32 %v3625_v29, 16  ;;  %v3956_v63 = vshll.u32 %v13556_v3, 16  ;;  %v3044_v8 = vsel %vm12401_vm14, %v10940_v7, %v3043_v2  ;;  %v4245_v57 = vld [vmem:[#allocation2 + $0x24] sm:$0xe] }
 0x23f   : > { %v3096_v2 = vunpack.c.l.b16 %v3044_v8  ;;  %v4317_v7 = vrot.slane %v11932_v41, 5  ;;  %v4320_v8 = vrot.slane %v11933_v25, 5 }
 0x240   : > { %10961 = vmatmul.msk.bf16.gmra.mxu1 %vm1195_vm1, %v3115_v43  ;;  %v3958_v36 = vrot.slane %v3956_v63, 5  ;;  %v3966_v43 = vshll.u32 %v13570_v35, 16  ;;  %v3050_v63 = vrot.slane %v13306_v49, 5  ;;  %v3053_v49 = vrot.slane %v13342_v4, 5 }
 0x241   : > { %v3484_v16 = vpop.f32.mrf.mxu2 }
 0x242   : > { %v3558_v31 = vadd.f32 %v3484_v16, %v13504_v44  ;;  %11070 = vmatmul.msk.bf16.gmra.mxu3 %vm1195_vm1, %v4065_v60  ;;  %v3949_v44 = vrot.slane %v3947_v6, 4  ;;  %v3963_v40 = vor.u32 %v3962_v58, %v3958_v36  ;;  %v11653_v16 = vld [vmem:[#allocation2 + $0x9c] sm:$0xff]  ;;  %v3968_v60 = vrot.slane %v3966_v43, 5 }
 0x243   : > { %v2818_v56 = vpop.f32.mrf.mxu0 }
 0x244   : > { %v13553_v10 = vadd.f32 %v2818_v56, %v13243_v33  ;;  %v13560_v11 = vadd.f32 %v4142_v18, %v3558_v31  ;;  %v3047_v33 = vsel %vm12401_vm14, %v3045_v22, %v3046_v46  ;;  %v3953_v18 = vor.u32 %v3952_v50, %v3949_v44  ;;  %v4147_v50 = vpop.f32.mrf.mxu3 }
 0x245   : > { %v3200_v20 = vpop.f32.mrf.mxu1  ;;  %v3097_v62 = vunpack.c.l.b16 %v3047_v33  ;;  %v3964_v46 = vrot.slane %v3963_v40, 4  ;;  %v11075_v31 = vrot.slane %v4245_v57, 9  ;;  %v2906_v33 = vld [vmem:[#allocation2 + $0xa8] sm:$0xe] }
 0x246   : > { %v13568_v42 = vadd.f32 %v3200_v20, %v13345_v37  ;;  %v3954_v22 = vrot.slane %v3953_v18, 4 }
 0x247   : > { %v3116_v15 = vpack.c.b16 %v3097_v62, %v3096_v2 }
 0x248   : > { %v3959_v29 = vsel %vm12141_vm8, %v3954_v22, %v3958_v36  ;;  %v3052_v36 = vrot.slane %v3050_v63, 4 }
 0x249   : > { %v3486_v9 = vpop.f32.mrf.mxu2  ;;  %v4047_v20 = vunpack.c.l.b16 %v3959_v29 }
 0x24a   : > { %v3559_v37 = vadd.f32 %v3486_v9, %v13529_v47  ;;  %v4319_v47 = vrot.slane %v4317_v7, 4  ;;  %v13597_v9 = vld [vmem:[#allocation2 + $0xc4] sm:$0xf] }
 0x24b   : > { %v2821_v21 = vpop.f32.mrf.mxu0  ;;  %v3980_v22 = vshll.u32 %v13597_v9, 16  ;;  %v3984_v4 = vshrl.u32 %v13597_v9, 16 }
 0x24c   : > { %v13574_v56 = vadd.f32 %v2821_v21, %v13270_v12  ;;  %v13579_v6 = vadd.f32 %v4144_v48, %v3559_v37  ;;  %v3969_v12 = vsel %vm12141_vm8, %v3964_v46, %v3968_v60  ;;  %v4318_v48 = vsel %vm12401_vm14, %v11075_v31, %v4317_v7  ;;  %v3628_v21 = vld [vmem:[#allocation2 + $0xc0] sm:$0xf] }
 0x24d   : > { %v4048_v44 = vunpack.c.l.b16 %v3969_v12  ;;  %v4321_v40 = vsel %vm12401_vm14, %v4319_v47, %v4320_v8  ;;  %v4425_v57 = vunpack.c.l.b16 %v4318_v48  ;;  %v3971_v41 = vshrl.u32 %v3628_v21, 16  ;;  %v4149_v47 = vpop.f32.mrf.mxu3  ;;  %v11934_v48 = vld [vmem:[#allocation2 + $0x34] sm:$0xf] }
 0x24e   : > { %11096 = vmatmul.msk.bf16.vlgmr.msra.gmra.mxu0 %vm1195_vm1, %v13492_v34  ;;  %11047 = vmatmul.msk.bf16.gmra.mxu2 %vm1195_vm1, %v11653_v16  ;;  %v10941_v34 = vrot.slane %v2906_v33, 9  ;;  %v3974_v7 = vshll.u32 %v3628_v21, 16  ;;  %v4426_v37 = vunpack.c.l.b16 %v4321_v40  ;;  %v3982_v31 = vrot.slane %v3980_v22, 5  ;;  %v11654_v40 = vld [vmem:[#allocation2 + $0xa8] sm:$0xff]  ;;  %v11935_v21 = vld [vmem:[#allocation2 + $0x38] sm:$0x1] }
 0x24f   : > { %v4066_v43 = vpack.c.b16 %v4048_v44, %v4047_v20  ;;  %v3986_v29 = vrot.slane %v3984_v4, 4  ;;  %v3057_v4 = vrot.slane %v13364_v28, 5 }
 0x250   : > { %10962 = vmatmul.msk.bf16.gmra.mxu1 %vm1195_vm1, %v3116_v15  ;;  %v3051_v16 = vsel %vm12401_vm14, %v10941_v34, %v3050_v63  ;;  %v3976_v60 = vrot.slane %v3974_v7, 5  ;;  %v13608_v15 = vld [vmem:[#allocation2 + $0xc8] sm:$0x1]  ;;  %v4456_v33 = vpack.c.b16 %v4426_v37, %v4425_v57  ;;  %v4324_v34 = vrot.slane %v11934_v48, 5 }
 0x251   : > { %v3489_v18 = vpop.f32.mrf.mxu2  ;;  %v3987_v25 = vor.u32 %v3986_v29, %v3982_v31  ;;  %v3990_v8 = vshll.u32 %v13608_v15, 16  ;;  %v3098_v20 = vunpack.c.l.b16 %v3051_v16  ;;  %v2907_v16 = vld [vmem:[#allocation2 + $0xb4] sm:$0xe]  ;;  %v3060_v29 = vrot.slane %v13392_v55, 5 }
 0x252   : > { %v3560_v62 = vadd.f32 %v3489_v18, %v13547_v27  ;;  %11071 = vmatmul.msk.bf16.gmra.mxu3 %vm1195_vm1, %v4066_v43  ;;  %v3973_v27 = vrot.slane %v3971_v41, 4  ;;  %v4246_v43 = vld [vmem:[#allocation2 + $0x30] sm:$0xe]  ;;  %v4327_v41 = vrot.slane %v11935_v21, 5 }
 0x253   : > { %v2823_v58 = vpop.f32.mrf.mxu0  ;;  %v11076_v37 = vrot.slane %v4246_v43, 9 }
 0x254   : > { %v13594_v2 = vadd.f32 %v2823_v58, %v13302_v24  ;;  %v13601_v46 = vadd.f32 %v4147_v50, %v3560_v62  ;;  %v3054_v24 = vsel %vm12401_vm14, %v3052_v36, %v3053_v49  ;;  %v3977_v12 = vor.u32 %v3976_v60, %v3973_v27 }
 0x255   : > { %v3099_v44 = vunpack.c.l.b16 %v3054_v24  ;;  %v3988_v49 = vrot.slane %v3987_v25, 4  ;;  %v3992_v62 = vrot.slane %v3990_v8, 5  ;;  %v10942_v60 = vrot.slane %v2907_v16, 9 }
 0x256   : > { %v3978_v36 = vrot.slane %v3977_v12, 4  ;;  %v4325_v28 = vsel %vm12401_vm14, %v11076_v37, %v4324_v34 }
 0x257   : > { %v3117_v22 = vpack.c.b16 %v3099_v44, %v3098_v20  ;;  %v13633_v20 = vld [vmem:[#allocation2 + $0xd0] sm:$0xf]  ;;  %v4427_v48 = vunpack.c.l.b16 %v4325_v28 }
 0x258   : > { %v3983_v57 = vsel %vm12141_vm8, %v3978_v36, %v3982_v31  ;;  %v3059_v31 = vrot.slane %v3057_v4, 4  ;;  %v4008_v55 = vshrl.u32 %v13633_v20, 16 }
 0x259   : > { %v3491_v50 = vpop.f32.mrf.mxu2  ;;  %v4049_v24 = vunpack.c.l.b16 %v3983_v57 }
 0x25a   : > { %v3561_v18 = vadd.f32 %v3491_v50, %v13568_v42  ;;  %v4326_v42 = vrot.slane %v4324_v34, 4  ;;  %v4004_v50 = vshll.u32 %v13633_v20, 16  ;;  %v3058_v34 = vsel %vm12401_vm14, %v10942_v60, %v3057_v4 }
 0x25b   : > { %v2826_v63 = vpop.f32.mrf.mxu0  ;;  %v4010_v43 = vrot.slane %v4008_v55, 4 }
 0x25c   : > { %v13612_v58 = vadd.f32 %v2826_v63, %v13323_v51  ;;  %v13617_v7 = vadd.f32 %v4149_v47, %v3561_v18  ;;  %v3993_v51 = vsel %vm12141_vm8, %v3988_v49, %v3992_v62  ;;  %v4328_v25 = vsel %vm12401_vm14, %v4326_v42, %v4327_v41  ;;  %v13642_v62 = vld [vmem:[#allocation2 + $0xd4] sm:$0x1]  ;;  %v11936_v42 = vld [vmem:[#allocation2 + $0x40] sm:$0xf] }
 0x25d   : > { %v4050_v27 = vunpack.c.l.b16 %v3993_v51  ;;  %v4428_v36 = vunpack.c.l.b16 %v4328_v25  ;;  %v3061_v49 = vsel %vm12401_vm14, %v3059_v31, %v3060_v29  ;;  %v4014_v57 = vshll.u32 %v13642_v62, 16  ;;  %v16694_v31 = vld [vmem:[#allocation30_spill] sm:$0xff] }
 0x25e   : > { %11097 = vmatmul.msk.bf16.gmra.mxu0 %vm1195_vm1, %v4456_v33  ;;  %11048 = vmatmul.msk.bf16.gmra.mxu2 %vm1195_vm1, %v11654_v40  ;;  %v3631_v33 = vld [vmem:[#allocation2 + $0xcc] sm:$0xf]  ;;  %v4006_v40 = vrot.slane %v4004_v50, 5  ;;  %v3100_v51 = vunpack.c.l.b16 %v3058_v34  ;;  %v3101_v37 = vunpack.c.l.b16 %v3061_v49  ;;  %v4331_v4 = vrot.slane %v11936_v42, 5  ;;  %v11937_v25 = vld [vmem:[#allocation2 + $0x44] sm:$0x1] }
 0x25f   : > { %v4067_v8 = vpack.c.b16 %v4050_v27, %v4049_v24  ;;  %v3995_v44 = vshrl.u32 %v3631_v33, 16  ;;  %v3998_v63 = vshll.u32 %v3631_v33, 16  ;;  %v4247_v24 = vld [vmem:[#allocation2 + $0x3c] sm:$0xe]  ;;  %v4016_v28 = vrot.slane %v4014_v57, 5 }
 0x260   : > { %10963 = vmatmul.msk.bf16.gmra.mxu1 %vm1195_vm1, %v3117_v22  ;;  %v4011_v41 = vor.u32 %v4010_v43, %v4006_v40  ;;  %v4457_v22 = vpack.c.b16 %v4428_v36, %v4427_v48  ;;  %v4333_v50 = vrot.slane %v4331_v4, 4  ;;  %v3064_v48 = vrot.slane %v13444_v38, 5  ;;  %v2908_v49 = vld [vmem:[#allocation2 + $0xc0] sm:$0xe]  ;;  %v16695_v38 = vld [vmem:[#allocation32_spill] sm:$0xff] }
 0x261   : > { %v4000_v18 = vrot.slane %v3998_v63, 5  ;;  %v11077_v63 = vrot.slane %v4247_v24, 9  ;;  %v10943_v43 = vrot.slane %v2908_v49, 9  ;;  %v16697_v49 = vld [vmem:[#allocation8_spill] sm:$0xff] }
 0x262   : > { %11072 = vmatmul.msk.bf16.gmra.mxu3 %vm1195_vm1, %v4067_v8  ;;  %v4012_v60 = vrot.slane %v4011_v41, 4  ;;  %v4334_v8 = vrot.slane %v11937_v25, 5  ;;  %v3067_v41 = vrot.slane %v13472_v61, 5  ;;  %v11656_v25 = vld [vmem:[#allocation2 + $0xc0] sm:$0xff] }
 0x263   : > { %v2828_v12 = vpop.f32.mrf.mxu0  ;;  %v3065_v42 = vsel %vm12401_vm14, %v10943_v43, %v3064_v48 }
 0x264   : > { %v13631_v47 = vadd.f32 %v2828_v12, %v13354_v19  ;;  %v3997_v19 = vrot.slane %v3995_v44, 4  ;;  %v11655_v12 = vld [vmem:[#allocation2 + $0xb4] sm:$0xff]  ;;  %v3118_v44 = vpack.c.b16 %v3101_v37, %v3100_v51  ;;  %v4017_v55 = vsel %vm12141_vm8, %v4012_v60, %v4016_v28 }
 0x265   : > { %v4052_v34 = vunpack.c.l.b16 %v4017_v55  ;;  %v3102_v24 = vunpack.c.l.b16 %v3065_v42  ;;  %v4249_v42 = vld [vmem:[#allocation2 + $0x54] sm:$0xe] }
 0x266   : > { %v4001_v21 = vor.u32 %v4000_v18, %v3997_v19  ;;  %v4332_v19 = vsel %vm12401_vm14, %v11077_v63, %v4331_v4  ;;  %v4335_v18 = vsel %vm12401_vm14, %v4333_v50, %v4334_v8  ;;  %v4248_v8 = vld [vmem:[#allocation2 + $0x48] sm:$0xe] }
 0x267   : > { %v4429_v51 = vunpack.c.l.b16 %v4332_v19  ;;  %v4430_v37 = vunpack.c.l.b16 %v4335_v18  ;;  %v11078_v50 = vrot.slane %v4248_v8, 9 }
 0x268   : > { %v4002_v27 = vrot.slane %v4001_v21, 4  ;;  %v3066_v21 = vrot.slane %v3064_v48, 4 }
 0x26a   : > { %v4007_v33 = vsel %vm12141_vm8, %v4002_v27, %v4006_v40  ;;  %v3068_v4 = vsel %vm12401_vm14, %v3066_v21, %v3067_v41  ;;  %v11940_v41 = vld [vmem:[#allocation2 + $0x58] sm:$0xf] }
 0x26b   : > { %v2831_v16 = vpop.f32.mrf.mxu0  ;;  %v4051_v36 = vunpack.c.l.b16 %v4007_v33  ;;  %v3103_v27 = vunpack.c.l.b16 %v3068_v4  ;;  %v11941_v4 = vld [vmem:[#allocation2 + $0x5c] sm:$0x1] }
 0x26c   : > { %v13646_v29 = vadd.f32 %v2831_v16, %v16694_v31  ;;  %v4458_v16 = vpack.c.b16 %v4430_v37, %v4429_v51  ;;  %v11938_v31 = vld [vmem:[#allocation2 + $0x4c] sm:$0xf] }
 0x26d   : > { %v4068_v57 = vpack.c.b16 %v4052_v34, %v4051_v36  ;;  %v4338_v61 = vrot.slane %v11938_v31, 5  ;;  %v3119_v33 = vpack.c.b16 %v3103_v27, %v3102_v24  ;;  %v11657_v37 = vld [vmem:[#allocation2 + $0xcc] sm:$0xff]  ;;  %v11079_v24 = vrot.slane %v4249_v42, 9 }
 0x26e   : > { %11098 = vmatmul.msk.bf16.gmra.mxu0 %vm1195_vm1, %v4457_v22  ;;  %11049 = vmatmul.msk.bf16.gmra.mxu2 %vm1195_vm1, %v11655_v12  ;;  %v16696_v12 = vld [vmem:[#allocation7_spill] sm:$0xff] }
 0x26f   : > { %v4340_v55 = vrot.slane %v4338_v61, 4  ;;  %v4339_v36 = vsel %vm12401_vm14, %v11078_v50, %v4338_v61  ;;  %v11942_v50 = vld [vmem:[#allocation2 + $0x64] sm:$0xf] }
 0x270   : > { %10964 = vmatmul.msk.bf16.gmra.mxu1 %vm1195_vm1, %v3118_v44  ;;  %v11939_v44 = vld [vmem:[#allocation2 + $0x50] sm:$0x1]  ;;  %v4431_v18 = vunpack.c.l.b16 %v4339_v36 }
 0x271   : > { %v4341_v63 = vrot.slane %v11939_v44, 5 }
 0x272   : > { %11073 = vmatmul.msk.bf16.gmra.mxu3 %vm1195_vm1, %v4068_v57  ;;  %v4345_v57 = vrot.slane %v11940_v41, 5 }
 0x273   : > { %v2833_v40 = vpop.f32.mrf.mxu0  ;;  %v4342_v34 = vsel %vm12401_vm14, %v4340_v55, %v4341_v63  ;;  %v4352_v55 = vrot.slane %v11942_v50, 5 }
 0x274   : > { %v13662_v22 = vadd.f32 %v2833_v40, %v16695_v38  ;;  %v4432_v40 = vunpack.c.l.b16 %v4342_v34  ;;  %v16698_v38 = vld [vmem:[#allocation19_spill] sm:$0xff]  ;;  %v4347_v27 = vrot.slane %v4345_v57, 4  ;;  %v4346_v31 = vsel %vm12401_vm14, %v11079_v24, %v4345_v57  ;;  %v4250_v34 = vld [vmem:[#allocation2 + $0x60] sm:$0xe] }
 0x275   : > { %v4433_v8 = vunpack.c.l.b16 %v4346_v31  ;;  %v16702_v31 = vld [vmem:[#allocation11_spill] sm:$0xff] }
 0x276   : > { %v4459_v43 = vpack.c.b16 %v4432_v40, %v4431_v18  ;;  %v4354_v18 = vrot.slane %v4352_v55, 4  ;;  %v11943_v40 = vld [vmem:[#allocation2 + $0x68] sm:$0x1] }
 0x27b   : > { %v2836_v60 = vpop.f32.mrf.mxu0 }
 0x27c   : > { %v13670_v28 = vadd.f32 %v2836_v60, %v16696_v12  ;;  %v16699_v12 = vld [vmem:[#allocation9_spill] sm:$0xff] }
 0x27e   : > { %11099 = vmatmul.msk.bf16.gmra.mxu0 %vm1195_vm1, %v4458_v16  ;;  %11050 = vmatmul.msk.bf16.gmra.mxu2 %vm1195_vm1, %v11656_v25  ;;  %v4348_v16 = vrot.slane %v11941_v4, 5 }
 0x280   : > { %10965 = vmatmul.msk.bf16.gmra.mxu1 %vm1195_vm1, %v3119_v33  ;;  %v4349_v61 = vsel %vm12401_vm14, %v4347_v27, %v4348_v16  ;;  %v11944_v27 = vld [vmem:[#allocation2 + $0x70] sm:$0xf] }
 0x281   : > { %v4434_v33 = vunpack.c.l.b16 %v4349_v61 }
 0x283   : > { %v2838_v48 = vpop.f32.mrf.mxu0  ;;  %v4460_v44 = vpack.c.b16 %v4434_v33, %v4433_v8 }
 0x284   : > { %v13680_v19 = vadd.f32 %v2838_v48, %v16697_v49  ;;  %v16700_v48 = vld [vmem:[#allocation20_spill] sm:$0xff]  ;;  %v11080_v49 = vrot.slane %v4250_v34, 9 }
 0x286   : > { %v4353_v41 = vsel %vm12401_vm14, %v11080_v49, %v4352_v55 }
 0x287   : > { %v4435_v42 = vunpack.c.l.b16 %v4353_v41 }
 0x28b   : > { %v2841_v21 = vpop.f32.mrf.mxu0 }
 0x28c   : > { %v13683_v51 = vadd.f32 %v2841_v21, %v16698_v38  ;;  %v16701_v38 = vld [vmem:[#allocation10_spill] sm:$0xff] }
 0x28e   : > { %11100 = vmatmul.msk.bf16.gmra.mxu0 %vm1195_vm1, %v4459_v43  ;;  %11051 = vmatmul.msk.bf16.gmra.mxu2 %vm1195_vm1, %v11657_v37  ;;  %v4355_v43 = vrot.slane %v11943_v40, 5 }
 0x290   : > { %v4356_v57 = vsel %vm12401_vm14, %v4354_v18, %v4355_v43 }
 0x291   : > { %v4436_v4 = vunpack.c.l.b16 %v4356_v57 }
 0x293   : > { %v2843_v60 = vpop.f32.mrf.mxu0  ;;  %v4461_v16 = vpack.c.b16 %v4436_v4, %v4435_v42 }
 0x294   : > { %v13692_v25 = vadd.f32 %v2843_v60, %v16699_v12  ;;  %v4359_v60 = vrot.slane %v11944_v27, 5  ;;  %v4251_v12 = vld [vmem:[#allocation2 + $0x6c] sm:$0xe] }
 0x295   : > { %v11081_v8 = vrot.slane %v4251_v12, 9 }
 0x296   : > { %v4361_v33 = vrot.slane %v4359_v60, 4 }
 0x297   : > { %v4360_v55 = vsel %vm12401_vm14, %v11081_v8, %v4359_v60 }
 0x298   : > { %v4437_v49 = vunpack.c.l.b16 %v4360_v55 }
 0x29b   : > { %v2846_v63 = vpop.f32.mrf.mxu0 }
 0x29c   : > { %v13695_v36 = vadd.f32 %v2846_v63, %v16700_v48 }
 0x29e   : > { %11101 = vmatmul.msk.bf16.gmra.mxu0 %vm1195_vm1, %v4460_v44  ;;  %v11945_v44 = vld [vmem:[#allocation2 + $0x74] sm:$0x1] }
 0x29f   : > { %v4362_v63 = vrot.slane %v11945_v44, 5  ;;  %v11948_v44 = vld [vmem:[#allocation2 + $0x88] sm:$0xf] }
 0x2a1   : > { %v4363_v48 = vsel %vm12401_vm14, %v4361_v33, %v4362_v63  ;;  %v4373_v63 = vrot.slane %v11948_v44, 5 }
 0x2a2   : > { %v4438_v18 = vunpack.c.l.b16 %v4363_v48 }
 0x2a3   : > { %v2848_v21 = vpop.f32.mrf.mxu0  ;;  %v4375_v48 = vrot.slane %v4373_v63, 4 }
 0x2a4   : > { %v13703_v37 = vadd.f32 %v2848_v21, %v16701_v38  ;;  %v4462_v40 = vpack.c.b16 %v4438_v18, %v4437_v49  ;;  %v11946_v21 = vld [vmem:[#allocation2 + $0x7c] sm:$0xf]  ;;  %v4252_v38 = vld [vmem:[#allocation2 + $0x78] sm:$0xe]  ;;  %v11949_v49 = vld [vmem:[#allocation2 + $0x8c] sm:$0x1] }
 0x2a5   : > { %v4366_v41 = vrot.slane %v11946_v21, 5  ;;  %v11082_v42 = vrot.slane %v4252_v38, 9  ;;  %v4376_v18 = vrot.slane %v11949_v49, 5  ;;  %v13737_v38 = vpop.f32.mrf.mxu2 }
 0x2a7   : > { %v4368_v4 = vrot.slane %v4366_v41, 4  ;;  %v4377_v21 = vsel %vm12401_vm14, %v4375_v48, %v4376_v18 }
 0x2ab   : > { %v2851_v24 = vpop.f32.mrf.mxu0 }
 0x2ac   : > { %v13706_v61 = vadd.f32 %v2851_v24, %v16702_v31 }
 0x2ae   : > { %11102 = vmatmul.msk.bf16.gmra.mxu0 %vm1195_vm1, %v4461_v16  ;;  %v11947_v16 = vld [vmem:[#allocation2 + $0x80] sm:$0x1] }
 0x2af   : > { %v4369_v24 = vrot.slane %v11947_v16, 5  ;;  %v13741_v16 = vpop.f32.mrf.mxu3 }
 0x2b1   : > { %v4370_v60 = vsel %vm12401_vm14, %v4368_v4, %v4369_v24  ;;  %v4442_v4 = vunpack.c.l.b16 %v4377_v21 }
 0x2b3   : > { %v2853_v50 = vpop.f32.mrf.mxu0 }
 0x2b4   : > { %v13714_v34 = vadd.f32 %v2853_v50, %v13373_v59  ;;  %v4367_v59 = vsel %vm12401_vm14, %v11082_v42, %v4366_v41  ;;  %v4253_v50 = vld [vmem:[#allocation2 + $0x84] sm:$0xe] }
 0x2b5   : > { %v4439_v12 = vunpack.c.l.b16 %v4367_v59  ;;  %v11083_v55 = vrot.slane %v4253_v50, 9  ;;  %v16704_v59 = vld [vmem:[#allocation12_spill] sm:$0xff]  ;;  %v4383_v50 = vrot.slane %v13420_v45, 5 }
 0x2bb   : > { %v2856_v43 = vpop.f32.mrf.mxu0 }
 0x2bc   : > { %v13717_v57 = vadd.f32 %v2856_v43, %v13409_v30  ;;  %v4440_v30 = vunpack.c.l.b16 %v4370_v60  ;;  %v4380_v60 = vrot.slane %v16704_v59, 5 }
 0x2be   : > { %11103 = vmatmul.msk.bf16.gmra.mxu0 %vm1195_vm1, %v4462_v40  ;;  %v4463_v8 = vpack.c.b16 %v4440_v30, %v4439_v12  ;;  %v13728_v40 = vpop.f32.mrf.mxu1  ;;  %v4254_v30 = vld [vmem:[#allocation2 + $0x90] sm:$0xe] }
 0x2bf   : > { %v11084_v44 = vrot.slane %v4254_v30, 9 }
 0x2c3   : > { %v2858_v27 = vpop.f32.mrf.mxu0 }
 0x2c4   : > { %v13725_v31 = vadd.f32 %v2858_v27, %v13433_v39  ;;  %v4374_v39 = vsel %vm12401_vm14, %v11083_v55, %v4373_v63  ;;  %v4382_v63 = vrot.slane %v4380_v60, 4  ;;  %v13755_v55 = vpop.f32.mrf.mxu3 }
 0x2c5   : > { %v4441_v42 = vunpack.c.l.b16 %v4374_v39 }
 0x2c6   : > { %16703 = vst [vmem:[#allocation13_spill] sm:$0xff] %v13725_v31 }
 0x2c7   : > { %v4464_v24 = vpack.c.b16 %v4442_v4, %v4441_v42  ;;  %v16705_v4 = vld [vmem:[#allocation25_spill] sm:$0xff] }
 0x2cb   : > { %v4534_v33 = vpop.f32.mrf.mxu0 }
 0x2cc   : > { %v13745_v12 = vadd.f32 %v4534_v33, %v13470_v1  ;;  %v4381_v1 = vsel %vm12401_vm14, %v11084_v44, %v4380_v60  ;;  %v4384_v33 = vsel %vm12401_vm14, %v4382_v63, %v4383_v50  ;;  %v4255_v60 = vld [vmem:[#allocation2 + $0x9c] sm:$0xe]  ;;  %v13774_v30 = vpop.f32.mrf.mxu3  ;;  %v4390_v63 = vrot.slane %v13478_v53, 5 }
 0x2cd   : > { %v4443_v18 = vunpack.c.l.b16 %v4381_v1 }
 0x2ce   : > { %11104 = vmatmul.msk.bf16.gmra.mxu0 %vm1195_vm1, %v4463_v8  ;;  %v13752_v8 = vpop.f32.mrf.mxu2 }
 0x2d3   : > { %v4536_v43 = vpop.f32.mrf.mxu0 }
 0x2d4   : > { %v13735_v41 = vadd.f32 %v4536_v43, %v13497_v5  ;;  %v13747_v5 = vpop.f32.mrf.mxu1  ;;  %v4444_v43 = vunpack.c.l.b16 %v4384_v33  ;;  %v13793_v53 = vpop.f32.mrf.mxu3 }
 0x2d6   : > { %4650 = vrot.lane.b32.xlu0 %v13735_v41, %s11986_s9  ;;  %v13768_v45 = vpop.f32.mrf.mxu2  ;;  %v4465_v21 = vpack.c.b16 %v4444_v43, %v4443_v18 }
 0x2db   : > { %v4539_v27 = vpop.f32.mrf.mxu0 }
 0x2dc   : > { %v13766_v39 = vpop.f32.mrf.mxu1  ;;  %v13772_v59 = vadd.f32 %v4539_v27, %v13521_v14 }
 0x2de   : > { %11105 = vmatmul.msk.bf16.gmra.mxu0 %vm1195_vm1, %v4464_v24  ;;  %4648 = vrot.lane.b32.xlu0 %v13745_v12, %s11986_s9  ;;  %v4387_v24 = vrot.slane %v16705_v4, 5 }
 0x2e0   : > { %v4389_v44 = vrot.slane %v4387_v24, 4 }
 0x2e2   : > { %v4391_v27 = vsel %vm12401_vm14, %v4389_v44, %v4390_v63 }
 0x2e3   : > { %v4541_v48 = vpop.f32.mrf.mxu0  ;;  %v4446_v43 = vunpack.c.l.b16 %v4391_v27  ;;  %v16706_v27 = vld [vmem:[#allocation21_spill] sm:$0xff] }
 0x2e4   : > { %v13762_v49 = vadd.f32 %v4541_v48, %v13540_v54  ;;  %v11085_v54 = vrot.slane %v4255_v60, 9  ;;  %v13780_v50 = vpop.f32.mrf.mxu1  ;;  %v13782_v48 = vpop.f32.mrf.mxu2 }
 0x2e6   : > { %4688 = vrot.lane.b32.xlu1 %v13762_v49, %s11986_s9  ;;  %v4388_v14 = vsel %vm12401_vm14, %v11085_v54, %v4387_v24 }
 0x2e7   : > { %v4445_v18 = vunpack.c.l.b16 %v4388_v14 }
 0x2eb   : > { %v4544_v42 = vpop.f32.mrf.mxu0 }
 0x2ec   : > { %v13795_v4 = vpop.f32.mrf.mxu1  ;;  %v13799_v24 = vadd.f32 %v4544_v42, %v13560_v11  ;;  %v13804_v44 = vpop.f32.mrf.mxu2 }
 0x2ed   : > { %v13812_v11 = vpop.f32.mrf.mxu3 }
 0x2ee   : > { %11106 = vmatmul.msk.bf16.gmra.mxu0 %vm1195_vm1, %v4465_v21  ;;  %4686 = vrot.lane.b32.xlu1 %v13772_v59, %s11986_s9  ;;  %v4466_v21 = vpack.c.b16 %v4446_v43, %v4445_v18  ;;  %v3271_v18 = vadd.f32 %v13728_v40, %v16706_v27 }
 0x2f3   : > { %v4546_v1 = vpop.f32.mrf.mxu0 }
 0x2f4   : > { %v13789_v33 = vadd.f32 %v4546_v1, %v13579_v6  ;;  %v4256_v6 = vld [vmem:[#allocation2 + $0xa8] sm:$0xe]  ;;  %v4396_v1 = vrot.slane %v4394_v32, 4  ;;  %v13828_v31 = vpop.f32.mrf.mxu2 }
 0x2f5   : > { %v11086_v63 = vrot.slane %v4256_v6, 9 }
 0x2f6   : > { %4725 = vrot.lane.b32.xlu2 %v13789_v33, %s11986_s9  ;;  %v4398_v14 = vsel %vm12401_vm14, %v4396_v1, %v4397_v26  ;;  %v13831_v1 = vpop.f32.mrf.mxu3  ;;  %v16707_v26 = vld [vmem:[#allocation23_spill] sm:$0xff] }
 0x2f7   : > { %v4448_v6 = vunpack.c.l.b16 %v4398_v14 }
 0x2fb   : > { %v4549_v60 = vpop.f32.mrf.mxu0 }
 0x2fc   : > { %v13802_v54 = vadd.f32 %v4549_v60, %v13601_v46  ;;  %v4395_v46 = vsel %vm12401_vm14, %v11086_v63, %v4394_v32  ;;  %v3562_v60 = vadd.f32 %v13737_v38, %v3271_v18  ;;  %v4257_v38 = vld [vmem:[#allocation2 + $0xb4] sm:$0xe] }
 0x2fd   : > { %v4447_v17 = vunpack.c.l.b16 %v4395_v46  ;;  %v11087_v46 = vrot.slane %v4257_v38, 9 }
 0x2fe   : > { %11107 = vmatmul.msk.bf16.gmra.mxu0 %vm1195_vm1, %v4466_v21  ;;  %4723 = vrot.lane.b32.xlu2 %v13799_v24, %s11986_s9  ;;  %v13823_v21 = vpop.f32.mrf.mxu1  ;;  %v4220_v32 = vadd.f32 %v13741_v16, %v3562_v60  ;;  %v4404_v60 = vrot.slane %v13570_v35, 5  ;;  %v13858_v35 = vpop.f32.mrf.mxu3 }
 0x2ff   : > { %4760 = vrot.lane.b32.xlu1 %v13802_v54, %s11986_s9  ;;  %v4467_v63 = vpack.c.b16 %v4448_v6, %v4447_v17 }
 0x303   : > { %v4551_v42 = vpop.f32.mrf.mxu0 }
 0x304   : > { %v13821_v43 = vadd.f32 %v4551_v42, %v13617_v7  ;;  %v4401_v7 = vrot.slane %v13556_v3, 5  ;;  %v3272_v42 = vadd.f32 %v13747_v5, %v16707_v26  ;;  %v13845_v3 = vpop.f32.mrf.mxu2  ;;  %v11722_v26 = vpack.i.bf16 %v13745_v12, %v13735_v41 }
 0x306   : > { %4762 = vrot.lane.b32.xlu0 %v13821_v43, %s11986_s9  ;;  %v3563_v18 = vadd.f32 %v13752_v8, %v3272_v42  ;;  %v13842_v16 = vpop.f32.mrf.mxu1  ;;  %v4403_v14 = vrot.slane %v4401_v7, 4  ;;  %v4402_v6 = vsel %vm12401_vm14, %v11087_v46, %v4401_v7 }
 0x308   : > { %v4221_v5 = vadd.f32 %v13755_v55, %v3563_v18  ;;  %v4405_v8 = vsel %vm12401_vm14, %v4403_v14, %v4404_v60  ;;  %v4449_v55 = vunpack.c.l.b16 %v4402_v6  ;;  %v4408_v60 = vrot.slane %v13597_v9, 5  ;;  %v4258_v6 = vld [vmem:[#allocation2 + $0xc0] sm:$0xe] }
 0x309   : > { %v4450_v7 = vunpack.c.l.b16 %v4405_v8  ;;  %v11088_v9 = vrot.slane %v4258_v6, 9 }
 0x30b   : > { %v4554_v40 = vpop.f32.mrf.mxu0  ;;  %v4468_v18 = vpack.c.b16 %v4450_v7, %v4449_v55  ;;  %v4409_v7 = vsel %vm12401_vm14, %v11088_v9, %v4408_v60 }
 0x30c   : > { %v13836_v27 = vadd.f32 %v4554_v40, %v4220_v32  ;;  %v16708_v32 = vld [vmem:[#allocation22_spill] sm:$0xff]  ;;  %v13867_v46 = vpop.f32.mrf.mxu2 }
 0x30e   : > { %11108 = vmatmul.msk.bf16.gmra.mxu0 %vm1195_vm1, %v4467_v63  ;;  %4797 = vrot.lane.b32.xlu0 %v13836_v27, %s11986_s9  ;;  %v3273_v63 = vadd.f32 %v13766_v39, %v16708_v32  ;;  %v13864_v38 = vpop.f32.mrf.mxu1  ;;  %v11732_v32 = vpack.i.bf16 %v13799_v24, %v13789_v33 }
 0x310   : > { %v3564_v42 = vadd.f32 %v13768_v45, %v3273_v63  ;;  %v4410_v63 = vrot.slane %v4408_v60, 4 }
 0x312   : > { %v4222_v39 = vadd.f32 %v13774_v30, %v3564_v42  ;;  %v4169_v30 = vpop.f32.mrf.mxu3 }
 0x313   : > { %v4556_v17 = vpop.f32.mrf.mxu0 }
 0x314   : > { %v13854_v40 = vadd.f32 %v4556_v17, %v4221_v5  ;;  %v16709_v5 = vld [vmem:[#allocation28_spill] sm:$0xff] }
 0x315   : > { %v3274_v45 = vadd.f32 %v13780_v50, %v16709_v5  ;;  %v4411_v50 = vrot.slane %v13608_v15, 5  ;;  %v11727_v5 = vpack.i.bf16 %v13772_v59, %v13762_v49 }
 0x316   : > { %11723 = vrot.lane.b32.xlu0 %v11722_v26, %s11987_s10  ;;  %4799 = vrot.lane.b32.xlu2 %v13854_v40, %s11986_s9  ;;  %v3223_v42 = vpop.f32.mrf.mxu1 }
 0x317   : > { %v3565_v8 = vadd.f32 %v13782_v48, %v3274_v45  ;;  %v4412_v48 = vsel %vm12401_vm14, %v4410_v63, %v4411_v50  ;;  %v11737_v50 = vpack.i.bf16 %v13802_v54, %v13821_v43 }
 0x318   : > { %v4452_v45 = vunpack.c.l.b16 %v4412_v48 }
 0x319   : > { %v4223_v26 = vadd.f32 %v13793_v53, %v3565_v8  ;;  %v4451_v53 = vunpack.c.l.b16 %v4409_v7  ;;  %v3276_v8 = vadd.f32 %v13823_v21, %v13514_v0  ;;  %v4418_v0 = vrot.slane %v13642_v62, 5 }
 0x31a   : > { %v4172_v60 = vpop.f32.mrf.mxu3 }
 0x31b   : > { %v4559_v14 = vpop.f32.mrf.mxu0  ;;  %v4469_v6 = vpack.c.b16 %v4452_v45, %v4451_v53 }
 0x31c   : > { %v13872_v17 = vadd.f32 %v4559_v14, %v4222_v39  ;;  %v3275_v39 = vadd.f32 %v13795_v4, %v13489_v13  ;;  %v3514_v14 = vpop.f32.mrf.mxu2  ;;  %v4415_v4 = vrot.slane %v13633_v20, 5 }
 0x31e   : > { %11109 = vmatmul.msk.bf16.gmra.mxu0 %vm1195_vm1, %v4468_v18  ;;  %11733 = vrot.lane.b32.xlu0 %v11732_v32, %s11987_s10  ;;  %v3566_v15 = vadd.f32 %v13804_v44, %v3275_v39  ;;  %v4259_v44 = vld [vmem:[#allocation2 + $0xcc] sm:$0xe]  ;;  %v3225_v63 = vpop.f32.mrf.mxu1 }
 0x31f   : > { %4834 = vrot.lane.b32.xlu2 %v13872_v17, %s11986_s9  ;;  %v11089_v20 = vrot.slane %v4259_v44, 9 }
 0x320   : > { %v4224_v32 = vadd.f32 %v13812_v11, %v3566_v15 }
 0x321   : > { %v4416_v39 = vsel %vm12401_vm14, %v11089_v20, %v4415_v4 }
 0x322   : > { %v4174_v7 = vpop.f32.mrf.mxu3  ;;  %v4453_v62 = vunpack.c.l.b16 %v4416_v39 }
 0x323   : > { %v4561_v55 = vpop.f32.mrf.mxu0 }
 0x324   : > { %v13889_v18 = vadd.f32 %v4561_v55, %v4223_v26  ;;  %v3567_v26 = vadd.f32 %v13828_v31, %v3276_v8  ;;  %v3516_v11 = vpop.f32.mrf.mxu2  ;;  %v4417_v55 = vrot.slane %v4415_v4, 4  ;;  %v3278_v8 = vadd.f32 %v13864_v38, %v13553_v10 }
 0x326   : > { %4836 = vrot.lane.b32.xlu1 %v13889_v18, %s11986_s9  ;;  %v4225_v21 = vadd.f32 %v13831_v1, %v3567_v26  ;;  %v4419_v31 = vsel %vm12401_vm14, %v4417_v55, %v4418_v0  ;;  %v3228_v45 = vpop.f32.mrf.mxu1 }
 0x327   : > { %11728 = vrot.lane.b32.xlu2 %v11727_v5, %s11987_s10  ;;  %v3277_v5 = vadd.f32 %v13842_v16, %v13535_v52  ;;  %v4454_v1 = vunpack.c.l.b16 %v4419_v31  ;;  %v3569_v16 = vadd.f32 %v13867_v46, %v3278_v8 }
 0x329   : > { %v3568_v53 = vadd.f32 %v13845_v3, %v3277_v5 }
 0x32a   : > { %v4177_v52 = vpop.f32.mrf.mxu3 }
 0x32b   : > { %v4564_v13 = vpop.f32.mrf.mxu0 }
 0x32c   : > { %v13901_v9 = vadd.f32 %v4564_v13, %v4224_v32  ;;  %v3519_v32 = vpop.f32.mrf.mxu2  ;;  %v4470_v13 = vpack.c.b16 %v4454_v1, %v4453_v62  ;;  %v3281_v62 = vadd.f32 %v3228_v45, %v13612_v58 }
 0x32e   : > { %11110 = vmatmul.msk.bf16.gmra.mxu0 %vm1195_vm1, %v4469_v6  ;;  %4871 = vrot.lane.b32.xlu1 %v13901_v9, %s11986_s9  ;;  %v4226_v6 = vadd.f32 %v13858_v35, %v3568_v53  ;;  %v3230_v3 = vpop.f32.mrf.mxu1  ;;  %v3279_v35 = vadd.f32 %v3223_v42, %v13574_v56 }
 0x32f   : > { %11738 = vrot.lane.b32.xlu2 %v11737_v50, %s11987_s10  ;;  %v4227_v50 = vadd.f32 %v4169_v30, %v3569_v16  ;;  %v3280_v30 = vadd.f32 %v3225_v63, %v13594_v2  ;;  %v3572_v63 = vadd.f32 %v3519_v32, %v3281_v62  ;;  %v3282_v45 = vadd.f32 %v3230_v3, %v13631_v47 }
 0x330   : > { %v3570_v0 = vadd.f32 %v3514_v14, %v3279_v35  ;;  %v11742_v62 = vpack.i.bf16 %v13836_v27, %v13854_v40 }
 0x331   : > { %v3571_v56 = vadd.f32 %v3516_v11, %v3280_v30 }
 0x332   : > { %v4179_v10 = vpop.f32.mrf.mxu3  ;;  %v4228_v46 = vadd.f32 %v4172_v60, %v3570_v0 }
 0x333   : > { %v4566_v48 = vpop.f32.mrf.mxu0  ;;  %v4229_v53 = vadd.f32 %v4174_v7, %v3571_v56  ;;  %v4230_v7 = vadd.f32 %v4177_v52, %v3572_v63 }
 0x334   : > { %v13918_v15 = vadd.f32 %v4566_v48, %v4225_v21  ;;  %v3521_v26 = vpop.f32.mrf.mxu2 }
 0x335   : > { %v3573_v32 = vadd.f32 %v3521_v26, %v3282_v45 }
 0x336   : > { %4873 = vrot.lane.b32.xlu0 %v13918_v15, %s11986_s9  ;;  %v3233_v21 = vpop.f32.mrf.mxu1 }
 0x337   : > { %v4231_v3 = vadd.f32 %v4179_v10, %v3573_v32 }
 0x33a   : > { %v4182_v5 = vpop.f32.mrf.mxu3 }
 0x33b   : > { %v4569_v4 = vpop.f32.mrf.mxu0 }
 0x33c   : > { %v13926_v44 = vadd.f32 %v4569_v4, %v4226_v6  ;;  %v3524_v31 = vpop.f32.mrf.mxu2 }
 0x33e   : > { %11111 = vmatmul.msk.bf16.gmra.mxu0 %vm1195_vm1, %v4470_v13  ;;  %4908 = vrot.lane.b32.xlu0 %v13926_v44, %s11986_s9  ;;  %v3235_v2 = vpop.f32.mrf.mxu1 }
 0x342   : > { %v4184_v4 = vpop.f32.mrf.mxu3 }
 0x343   : > { %v4571_v20 = vpop.f32.mrf.mxu0 }
 0x344   : > { %v13933_v55 = vadd.f32 %v4571_v20, %v4227_v50  ;;  %v3526_v11 = vpop.f32.mrf.mxu2 }
 0x346   : > { %4910 = vrot.lane.b32.xlu2 %v13933_v55, %s11986_s9  ;;  %v3238_v52 = vpop.f32.mrf.mxu1  ;;  %v11757_v32 = vpack.i.bf16 %v13926_v44, %v13933_v55 }
 0x348   : > { %v4651_v38 = vpop.permute.xlu0 %4650 }
 0x349   : > { %11112 = vmatpush.xpose.msk.msrb.mxu1 %vm4652_vm15, %v4651_v38 }
 0x34b   : > { %v4574_v48 = vpop.f32.mrf.mxu0 }
 0x34c   : > { %v13939_v39 = vadd.f32 %v4574_v48, %v4228_v46  ;;  %v3529_v47 = vpop.f32.mrf.mxu2  ;;  %v3284_v46 = vadd.f32 %v3235_v2, %v13662_v22  ;;  %v11752_v22 = vpack.i.bf16 %v13901_v9, %v13918_v15 }
 0x34e   : > { %4945 = vrot.lane.b32.xlu1 %v13939_v39, %s11986_s9  ;;  %v3240_v35 = vpop.f32.mrf.mxu1 }
 0x350   : > { %v4649_v42 = vpop.permute.xlu0 %4648  ;;  %v4726_v14 = vpop.permute.xlu2 %4725 }
 0x351   : > { %11113 = vmatpush.xpose.msk.msrb.mxu1 %vm4652_vm15, %v4649_v42  ;;  %11120 = vmatpush.xpose.msk.msra.mxu3 %vm4652_vm15, %v4726_v14 }
 0x353   : > { %v4576_v60 = vpop.f32.mrf.mxu0 }
 0x354   : > { %v13946_v1 = vadd.f32 %v4576_v60, %v4229_v53  ;;  %11114 = vmatmul.msk.f32.vlgmr.msrb.gmra.mxu1 %vm4652_vm15, %v13745_v12  ;;  %v11747_v12 = vpack.i.bf16 %v13872_v17, %v13889_v18  ;;  %v3531_v38 = vpop.f32.mrf.mxu2  ;;  %v3286_v53 = vadd.f32 %v3240_v35, %v13680_v19 }
 0x356   : > { %4947 = vrot.lane.b32.xlu0 %v13946_v1, %s11986_s9  ;;  %v3243_v30 = vpop.f32.mrf.mxu1  ;;  %v3577_v63 = vadd.f32 %v3531_v38, %v3286_v53 }
 0x358   : > { %v4689_v6 = vpop.permute.xlu1 %4688  ;;  %v4724_v13 = vpop.permute.xlu2 %4723 }
 0x359   : > { %11116 = vmatpush.xpose.msk.msrb.mxu2 %vm4652_vm15, %v4689_v6  ;;  %11121 = vmatpush.xpose.msk.msra.mxu3 %vm4652_vm15, %v4724_v13 }
 0x35b   : > { %v4579_v58 = vpop.f32.mrf.mxu0 }
 0x35c   : > { %v13955_v8 = vadd.f32 %v4579_v58, %v4230_v7  ;;  %11115 = vmatmul.msk.f32.gmra.mxu1 %vm4652_vm15, %v13735_v41  ;;  %11122 = vmatmul.msk.f32.vlgmr.msra.gmra.mxu3 %vm4652_vm15, %v13799_v24  ;;  %v3283_v41 = vadd.f32 %v3233_v21, %v13646_v29  ;;  %v4187_v24 = vpop.f32.mrf.mxu3  ;;  %v3534_v42 = vpop.f32.mrf.mxu2  ;;  %v3287_v58 = vadd.f32 %v3243_v30, %v13683_v51 }
 0x35e   : > { %11748 = vrot.lane.b32.xlu0 %v11747_v12, %s11987_s10  ;;  %4982 = vrot.lane.b32.xlu2 %v13955_v8, %s11986_s9  ;;  %v3574_v26 = vadd.f32 %v3524_v31, %v3283_v41  ;;  %v3245_v2 = vpop.f32.mrf.mxu1 }
 0x360   : > { %v4687_v16 = vpop.permute.xlu1 %4686  ;;  %v4232_v0 = vadd.f32 %v4182_v5, %v3574_v26 }
 0x361   : > { %11117 = vmatpush.xpose.msk.msrb.mxu2 %vm4652_vm15, %v4687_v16  ;;  %v3578_v16 = vadd.f32 %v3534_v42, %v3287_v58 }
 0x363   : > { %v4581_v50 = vpop.f32.mrf.mxu0 }
 0x364   : > { %v13968_v20 = vadd.f32 %v4581_v50, %v4231_v3  ;;  %11118 = vmatmul.msk.f32.vlgmr.msrb.gmra.mxu2 %vm4652_vm15, %v13772_v59  ;;  %11123 = vmatmul.msk.f32.gmra.mxu3 %vm4652_vm15, %v13789_v33  ;;  %v3575_v59 = vadd.f32 %v3526_v11, %v3284_v46  ;;  %v4189_v33 = vpop.f32.mrf.mxu3  ;;  %v3536_v11 = vpop.f32.mrf.mxu2 }
 0x365   : > { %v4235_v13 = vadd.f32 %v4189_v33, %v3577_v63 }
 0x366   : > { %4984 = vrot.lane.b32.xlu1 %v13968_v20, %s11986_s9  ;;  %v4233_v48 = vadd.f32 %v4184_v4, %v3575_v59  ;;  %v3285_v4 = vadd.f32 %v3238_v52, %v13670_v28  ;;  %v3248_v3 = vpop.f32.mrf.mxu1 }
 0x36b   : > { %v4584_v10 = vpop.f32.mrf.mxu0 }
 0x36c   : > { %v13977_v29 = vadd.f32 %v4584_v10, %v4232_v0  ;;  %11119 = vmatmul.msk.f32.gmra.mxu2 %vm4652_vm15, %v13762_v49  ;;  %v4192_v14 = vpop.f32.mrf.mxu3  ;;  %v3539_v28 = vpop.f32.mrf.mxu2  ;;  %v3289_v10 = vadd.f32 %v3248_v3, %v13695_v36 }
 0x36d   : > { %v4236_v52 = vadd.f32 %v4192_v14, %v3578_v16 }
 0x36e   : > { %5019 = vrot.lane.b32.xlu2 %v13977_v29, %s11986_s9  ;;  %v3580_v59 = vadd.f32 %v3539_v28, %v3289_v10 }
 0x370   : > { %v4800_v21 = vpop.permute.xlu2 %4799 }
 0x371   : > { %11128 = vmatpush.xpose.msk.msra.mxu2 %vm4652_vm15, %v4800_v21  ;;  %v4761_v60 = vpop.permute.xlu1 %4760 }
 0x373   : > { %v4586_v31 = vpop.f32.mrf.mxu0 }
 0x374   : > { %v13984_v56 = vadd.f32 %v4586_v31, %v4233_v48  ;;  %v4194_v7 = vpop.f32.mrf.mxu3 }
 0x376   : > { %11753 = vrot.lane.b32.xlu2 %v11752_v22, %s11987_s10  ;;  %5021 = vrot.lane.b32.xlu1 %v13984_v56, %s11986_s9 }
 0x378   : > { %v4763_v49 = vpop.permute.xlu0 %4762 }
 0x379   : > { %11124 = vmatpush.xpose.msk.msra.mxu1 %vm4652_vm15, %v4763_v49  ;;  %v4835_v45 = vpop.permute.xlu2 %4834 }
 0x37b   : > { %v4589_v5 = vpop.f32.mrf.mxu0 }
 0x37d   : > { %11125 = vmatpush.xpose.msk.msra.mxu1 %vm4652_vm15, %v4761_v60 }
 0x37e   : > { %11743 = vrot.lane.b32.xlu1 %v11742_v62, %s11987_s10 }
 0x380   : > { %11126 = vmatmul.msk.f32.vlgmr.msra.gmra.mxu1 %vm4652_vm15, %v13802_v54  ;;  %v4798_v6 = vpop.permute.xlu0 %4797  ;;  %v3576_v54 = vadd.f32 %v3529_v47, %v3285_v4  ;;  %v4197_v47 = vpop.f32.mrf.mxu3 }
 0x381   : > { %11129 = vmatpush.xpose.msk.msra.mxu2 %vm4652_vm15, %v4798_v6  ;;  %v14020_v0 = vpop.permute.xlu2 %11728  ;;  %v4238_v30 = vadd.f32 %v4197_v47, %v3580_v59 }
 0x382   : > { %v4234_v51 = vadd.f32 %v4187_v24, %v3576_v54 }
 0x383   : > { %v4591_v19 = vpop.f32.mrf.mxu0 }
 0x384   : > { %v14002_v12 = vadd.f32 %v4591_v19, %v4235_v13  ;;  %11130 = vmatmul.msk.f32.vlgmr.msra.gmra.mxu2 %vm4652_vm15, %v13836_v27  ;;  %v3288_v27 = vadd.f32 %v3245_v2, %v13692_v25  ;;  %v14014_v41 = vadd.f32 %v4589_v5, %v4234_v51  ;;  %v3541_v25 = vpop.f32.mrf.mxu2 }
 0x386   : > { %11758 = vrot.lane.b32.xlu1 %v11757_v32, %s11987_s10  ;;  %5058 = vrot.lane.b32.xlu0 %v14002_v12, %s11986_s9  ;;  %v3579_v35 = vadd.f32 %v3536_v11, %v3288_v27 }
 0x388   : > { %11127 = vmatmul.msk.f32.gmra.mxu1 %vm4652_vm15, %v13821_v43  ;;  %v3250_v43 = vpop.f32.mrf.mxu1  ;;  %v4237_v24 = vadd.f32 %v4194_v7, %v3579_v35  ;;  %v4199_v33 = vpop.f32.mrf.mxu3 }
 0x389   : > { %v14033_v21 = vpop.permute.xlu2 %11738  ;;  %v3290_v42 = vadd.f32 %v3250_v43, %v13703_v37  ;;  %v16710_v43 = vld [vmem:[#allocation13_spill] sm:$0xff] }
 0x38b   : > { %v4594_v50 = vpop.f32.mrf.mxu0  ;;  %v3581_v14 = vadd.f32 %v3541_v25, %v3290_v42 }
 0x38c   : > { %v14016_v26 = vadd.f32 %v4594_v50, %v4236_v52  ;;  %11131 = vmatmul.msk.f32.gmra.mxu2 %vm4652_vm15, %v13854_v40  ;;  %v14029_v40 = vpop.permute.xlu0 %11723  ;;  %v3544_v49 = vpop.f32.mrf.mxu2 }
 0x38d   : > { %v4239_v62 = vadd.f32 %v4199_v33, %v3581_v14 }
 0x38e   : > { %5056 = vrot.lane.b32.xlu1 %v14014_v41, %s11986_s9  ;;  %5093 = vrot.lane.b32.xlu0 %v14016_v26, %s11986_s9 }
 0x390   : > { %v3253_v31 = vpop.f32.mrf.mxu1  ;;  %v4202_v60 = vpop.f32.mrf.mxu3 }
 0x391   : > { %v3291_v2 = vadd.f32 %v3253_v31, %v13706_v61 }
 0x393   : > { %v4596_v38 = vpop.f32.mrf.mxu0  ;;  %v3582_v6 = vadd.f32 %v3544_v49, %v3291_v2 }
 0x394   : > { %v14027_v46 = vadd.f32 %v4596_v38, %v4237_v24  ;;  %v14042_v5 = vpop.permute.xlu0 %11733  ;;  %v3546_v13 = vpop.f32.mrf.mxu2 }
 0x395   : > { %v4240_v7 = vadd.f32 %v4202_v60, %v3582_v6 }
 0x396   : > { %5095 = vrot.lane.b32.xlu0 %v14027_v46, %s11986_s9 }
 0x398   : > { %v4837_v48 = vpop.permute.xlu1 %4836  ;;  %v3255_v11 = vpop.f32.mrf.mxu1 }
 0x399   : > { %11132 = vmatpush.xpose.msk.msrb.mxu3 %vm4652_vm15, %v4837_v48  ;;  %v4204_v19 = vpop.f32.mrf.mxu3  ;;  %v3292_v58 = vadd.f32 %v3255_v11, %v13714_v34 }
 0x39b   : > { %v4599_v22 = vpop.f32.mrf.mxu0  ;;  %v3583_v32 = vadd.f32 %v3546_v13, %v3292_v58 }
 0x39c   : > { %v14037_v36 = vadd.f32 %v4599_v22, %v4238_v30  ;;  %v3549_v16 = vpop.f32.mrf.mxu2 }
 0x39d   : > { %11133 = vmatpush.xpose.msk.msrb.mxu3 %vm4652_vm15, %v4835_v45  ;;  %v4241_v3 = vadd.f32 %v4204_v19, %v3583_v32 }
 0x39e   : > { %5130 = vrot.lane.b32.xlu0 %v14037_v36, %s11986_s9 }
 0x3a0   : > { %11134 = vmatmul.msk.f32.vlgmr.msrb.gmra.mxu3 %vm4652_vm15, %v13872_v17  ;;  %v4911_v53 = vpop.permute.xlu2 %4910  ;;  %v4872_v61 = vpop.permute.xlu1 %4871 }
 0x3a1   : > { %11140 = vmatpush.xpose.msk.msrb.mxu2 %vm4652_vm15, %v4911_v53  ;;  %v3258_v54 = vpop.f32.mrf.mxu1  ;;  %v4207_v52 = vpop.f32.mrf.mxu3 }
 0x3a2   : > { %v3293_v34 = vadd.f32 %v3258_v54, %v13717_v57 }
 0x3a3   : > { %v4601_v37 = vpop.f32.mrf.mxu0 }
 0x3a4   : > { %v14048_v63 = vadd.f32 %v4601_v37, %v4239_v62  ;;  %v3584_v50 = vadd.f32 %v3549_v16, %v3293_v34  ;;  %v3551_v47 = vpop.f32.mrf.mxu2 }
 0x3a6   : > { %5132 = vrot.lane.b32.xlu2 %v14048_v63, %s11986_s9  ;;  %v4242_v27 = vadd.f32 %v4207_v52, %v3584_v50  ;;  %v11767_v50 = vpack.i.bf16 %v13939_v39, %v13946_v1 }
 0x3a8   : > { %11135 = vmatmul.msk.f32.gmra.mxu3 %vm4652_vm15, %v13889_v18  ;;  %v4874_v17 = vpop.permute.xlu0 %4873 }
 0x3a9   : > { %11136 = vmatpush.xpose.msk.msrb.mxu1 %vm4652_vm15, %v4874_v17  ;;  %v4209_v25 = vpop.f32.mrf.mxu3 }
 0x3ab   : > { %v4604_v4 = vpop.f32.mrf.mxu0 }
 0x3ac   : > { %v14056_v45 = vadd.f32 %v4604_v4, %v4240_v7 }
 0x3ad   : > { %11137 = vmatpush.xpose.msk.msrb.mxu1 %vm4652_vm15, %v4872_v61 }
 0x3ae   : > { %5167 = vrot.lane.b32.xlu0 %v14056_v45, %s11986_s9 }
 0x3b0   : > { %11138 = vmatmul.msk.f32.vlgmr.msrb.gmra.mxu1 %vm4652_vm15, %v13901_v9  ;;  %v4909_v18 = vpop.permute.xlu0 %4908  ;;  %v3260_v9 = vpop.f32.mrf.mxu1 }
 0x3b1   : > { %11141 = vmatpush.xpose.msk.msrb.mxu2 %vm4652_vm15, %v4909_v18  ;;  %v3294_v24 = vadd.f32 %v3260_v9, %v16710_v43  ;;  %v11740_v43 = vunpack.i.l.bf16 %v14033_v21 }
 0x3b3   : > { %v4606_v28 = vpop.f32.mrf.mxu0 }
 0x3b4   : > { %v14065_v51 = vadd.f32 %v4606_v28, %v4241_v3  ;;  %11142 = vmatmul.msk.f32.vlgmr.msrb.gmra.mxu2 %vm4652_vm15, %v13926_v44  ;;  %v3585_v44 = vadd.f32 %v3551_v47, %v3294_v24  ;;  %v11741_v24 = vunpack.i.h.bf16 %v14033_v21 }
 0x3b6   : > { %5169 = vrot.lane.b32.xlu0 %v14065_v51, %s11986_s9  ;;  %v4243_v38 = vadd.f32 %v4209_v25, %v3585_v44 }
 0x3b8   : > { %11139 = vmatmul.msk.f32.gmra.mxu1 %vm4652_vm15, %v13918_v15  ;;  %v4983_v48 = vpop.permute.xlu2 %4982 }
 0x3bb   : > { %v4609_v35 = vpop.f32.mrf.mxu0 }
 0x3bc   : > { %v14074_v57 = vadd.f32 %v4609_v35, %v4242_v27  ;;  %11143 = vmatmul.msk.f32.gmra.mxu2 %vm4652_vm15, %v13933_v55  ;;  %v11725_v27 = vunpack.i.l.bf16 %v14029_v40  ;;  %v11762_v35 = vpack.i.bf16 %v13977_v29, %v13984_v56 }
 0x3be   : > { %5204 = vrot.lane.b32.xlu2 %v14074_v57, %s11986_s9 }
 0x3c0   : > { %v4946_v33 = vpop.permute.xlu1 %4945 }
 0x3c3   : > { %v4611_v10 = vpop.f32.mrf.mxu0 }
 0x3c4   : > { %v14080_v59 = vadd.f32 %v4611_v10, %v4243_v38  ;;  %v11731_v38 = vunpack.i.h.bf16 %v14020_v0 }
 0x3c6   : > { %5206 = vrot.lane.b32.xlu1 %v14080_v59, %s11986_s9 }
 0x3c8   : > { %v4948_v15 = vpop.permute.xlu0 %4947  ;;  %v5020_v14 = vpop.permute.xlu2 %5019 }
 0x3c9   : > { %11144 = vmatpush.xpose.msk.msra.mxu3 %vm4652_vm15, %v4948_v15 }
 0x3cd   : > { %11145 = vmatpush.xpose.msk.msra.mxu3 %vm4652_vm15, %v4946_v33 }
 0x3d0   : > { %11146 = vmatmul.msk.f32.vlgmr.msra.gmra.mxu3 %vm4652_vm15, %v13939_v39  ;;  %v14114_v2 = vpop.permute.xlu0 %11748  ;;  %v14132_v58 = vpop.permute.xlu2 %11753  ;;  %v11726_v39 = vunpack.i.h.bf16 %v14029_v40  ;;  %v11730_v40 = vunpack.i.l.bf16 %v14020_v0 }
 0x3d1   : > { %v14094_v30 = vpop.f32.mrf.mxu1 }
 0x3d2   : > { %v5239_v31 = vsel %vm1195_vm1, %v14094_v30, -inf }
 0x3d8   : > { %11147 = vmatmul.msk.f32.gmra.mxu3 %vm4652_vm15, %v13946_v1  ;;  %v4985_v55 = vpop.permute.xlu1 %4984 }
 0x3d9   : > { %11148 = vmatpush.xpose.msk.msra.mxu1 %vm4652_vm15, %v4985_v55  ;;  %v14105_v53 = vpop.f32.mrf.mxu1 }
 0x3da   : > { %v5242_v37 = vsel %vm1195_vm1, %v14105_v53, -inf }
 0x3dd   : > { %11149 = vmatpush.xpose.msk.msra.mxu1 %vm4652_vm15, %v4983_v48 }
 0x3df   : > { %v14102_v49 = vpop.f32.mrf.mxu3 }
 0x3e0   : > { %11150 = vmatmul.msk.f32.vlgmr.msra.gmra.mxu1 %vm4652_vm15, %v13955_v8  ;;  %v5251_v7 = vsel %vm1195_vm1, %v14102_v49, -inf }
 0x3e7   : > { %v14098_v22 = vpop.f32.mrf.mxu2  ;;  %5240 = vmax.xlane.f32.xlu2 %v5239_v31  ;;  %v14122_v13 = vpop.f32.mrf.mxu3 }
 0x3e8   : > { %11151 = vmatmul.msk.f32.gmra.mxu1 %vm4652_vm15, %v13968_v20  ;;  %v5022_v42 = vpop.permute.xlu1 %5021  ;;  %v5245_v60 = vsel %vm1195_vm1, %v14098_v22, -inf  ;;  %v5254_v17 = vsel %vm1195_vm1, %v14122_v13, -inf }
 0x3e9   : > { %11152 = vmatpush.xpose.msk.msra.mxu2 %vm4652_vm15, %v5022_v42 }
 0x3ed   : > { %11153 = vmatpush.xpose.msk.msra.mxu2 %vm4652_vm15, %v5020_v14  ;;  %v11735_v14 = vunpack.i.l.bf16 %v14042_v5 }
 0x3ef   : > { %v14110_v62 = vpop.f32.mrf.mxu2  ;;  %5246 = vmax.xlane.f32.xlu2 %v5245_v60 }
 0x3f0   : > { %11154 = vmatmul.msk.f32.vlgmr.msra.gmra.mxu2 %vm4652_vm15, %v13977_v29  ;;  %v14118_v11 = vpop.permute.xlu1 %11743  ;;  %5243 = vmax.xlane.f32.xlu1 %v5242_v37  ;;  %v5248_v6 = vsel %vm1195_vm1, %v14110_v62, -inf }
 0x3f1   : > { %5249 = vmax.xlane.f32.xlu0 %v5248_v6  ;;  %v11745_v15 = vunpack.i.l.bf16 %v14118_v11  ;;  %v11746_v33 = vunpack.i.h.bf16 %v14118_v11  ;;  %v11736_v11 = vunpack.i.h.bf16 %v14042_v5 }
 0x3f7   : > { %5255 = vmax.xlane.f32.xlu2 %v5254_v17  ;;  %v11750_v17 = vunpack.i.l.bf16 %v14114_v2 }
 0x3f8   : > { %11155 = vmatmul.msk.f32.gmra.mxu2 %vm4652_vm15, %v13984_v56  ;;  %v14130_v19 = vpop.permute.xlu1 %11758  ;;  %v5059_v4 = vpop.permute.xlu0 %5058  ;;  %5252 = vmax.xlane.f32.xlu1 %v5251_v7 }
 0x3f9   : > { %11156 = vmatpush.xpose.msk.msrb.mxu3 %vm4652_vm15, %v5059_v4 }
 0x3fd   : > { %v14135_v61 = vpop.f32.mrf.mxu1 }
 0x3fe   : > { %v5257_v32 = vsel %vm1195_vm1, %v14135_v61, -inf }
 0x3ff   : > { %5258 = vmax.xlane.f32.xlu0 %v5257_v32  ;;  %v11751_v32 = vunpack.i.h.bf16 %v14114_v2 }
 0x400   : > { %v5057_v54 = vpop.permute.xlu1 %5056  ;;  %v5094_v18 = vpop.permute.xlu0 %5093 }
 0x401   : > { %v5133_v16 = vpop.permute.xlu2 %5132  ;;  %11157 = vmatpush.xpose.msk.msrb.mxu3 %vm4652_vm15, %v5057_v54 }
 0x402   : > { %11164 = vmatpush.xpose.msk.msrb.mxu2 %vm4652_vm15, %v5133_v16 }
 0x404   : > { %11158 = vmatmul.msk.f32.vlgmr.msrb.gmra.mxu3 %vm4652_vm15, %v14014_v41 }
 0x405   : > { %v14143_v3 = vpop.f32.mrf.mxu1 }
 0x406   : > { %v5260_v28 = vsel %vm1195_vm1, %v14143_v3, -inf }
 0x407   : > { %5261 = vmax.xlane.f32.xlu1 %v5260_v28  ;;  %v14147_v52 = vpop.f32.mrf.mxu2 }
 0x408   : > { %v5096_v34 = vpop.permute.xlu0 %5095  ;;  %v5263_v9 = vsel %vm1195_vm1, %v14147_v52, -inf }
 0x409   : > { %11160 = vmatpush.xpose.msk.msrb.mxu1 %vm4652_vm15, %v5096_v34 }
 0x40c   : > { %11159 = vmatmul.msk.f32.gmra.mxu3 %vm4652_vm15, %v14002_v12 }
 0x40d   : > { %11161 = vmatpush.xpose.msk.msrb.mxu1 %vm4652_vm15, %v5094_v18 }
 0x40f   : > { %11768 = vrot.lane.b32.xlu2 %v11767_v50, %s11987_s10  ;;  %5264 = vmax.xlane.f32.xlu1 %v5263_v9  ;;  %v14165_v1 = vpop.f32.mrf.mxu2 }
 0x410   : > { %11162 = vmatmul.msk.f32.vlgmr.msrb.gmra.mxu1 %vm4652_vm15, %v14016_v26  ;;  %v5131_v47 = vpop.permute.xlu0 %5130  ;;  %v5266_v44 = vsel %vm1195_vm1, %v14165_v1, -inf }
 0x411   : > { %11165 = vmatpush.xpose.msk.msrb.mxu2 %vm4652_vm15, %v5131_v47 }
 0x413   : > { %11763 = vrot.lane.b32.xlu0 %v11762_v35, %s11987_s10 }
 0x414   : > { %11166 = vmatmul.msk.f32.vlgmr.msrb.gmra.mxu2 %vm4652_vm15, %v14037_v36 }
 0x415   : > { %5553 = vmatpush.msra.mxu2 %v11725_v27 }
 0x417   : > { %5554 = vmatpush.msra.mxu2 %v11726_v39  ;;  %5267 = vmax.xlane.f32.xlu1 %v5266_v44 }
 0x418   : > { %11163 = vmatmul.msk.f32.gmra.mxu1 %vm4652_vm15, %v14027_v46  ;;  %v5205_v60 = vpop.permute.xlu2 %5204 }
 0x419   : > { %5658 = vmatpush.msrb.mxu2 %v11740_v43 }
 0x41b   : > { %5659 = vmatpush.msrb.mxu2 %v11741_v24  ;;  %v11755_v24 = vunpack.i.l.bf16 %v14132_v58 }
 0x41c   : > { %11167 = vmatmul.msk.f32.gmra.mxu2 %vm4652_vm15, %v14048_v63 }
 0x420   : > { %v5168_v29 = vpop.permute.xlu0 %5167 }
 0x423   : > { %v14186_v10 = vpop.f32.mrf.mxu3 }
 0x424   : > { %v5269_v48 = vsel %vm1195_vm1, %v14186_v10, -inf }
 0x428   : > { %v5170_v56 = vpop.permute.xlu0 %5169 }
 0x429   : > { %11168 = vmatpush.xpose.msk.msra.mxu3 %vm4652_vm15, %v5170_v56  ;;  %v11756_v56 = vunpack.i.h.bf16 %v14132_v58 }
 0x42b   : > { %v14200_v42 = vpop.f32.mrf.mxu3 }
 0x42c   : > { %v5272_v37 = vsel %vm1195_vm1, %v14200_v42, -inf }
 0x42d   : > { %v14180_v25 = vpop.f32.mrf.mxu1  ;;  %11169 = vmatpush.xpose.msk.msra.mxu3 %vm4652_vm15, %v5168_v29 }
 0x42e   : > { %v5275_v21 = vsel %vm1195_vm1, %v14180_v25, -inf }
 0x42f   : > { %5276 = vmax.xlane.f32.xlu1 %v5275_v21 }
 0x430   : > { %11170 = vmatmul.msk.f32.vlgmr.msra.gmra.mxu3 %vm4652_vm15, %v14056_v45 }
 0x431   : > { %5588 = vmatpush.msrb.mxu3 %v11730_v40 }
 0x433   : > { %5589 = vmatpush.msrb.mxu3 %v11731_v38 }
 0x435   : > { %5693 = vmatpush.msra.mxu3 %v11745_v15  ;;  %v14215_v4 = vpop.f32.mrf.mxu1 }
 0x436   : > { %v5278_v5 = vsel %vm1195_vm1, %v14215_v4, -inf }
 0x437   : > { %5694 = vmatpush.msra.mxu3 %v11746_v33  ;;  %v14192_v55 = vpop.f32.mrf.mxu2  ;;  %v11760_v33 = vunpack.i.l.bf16 %v14130_v19 }
 0x438   : > { %11171 = vmatmul.msk.f32.gmra.mxu3 %vm4652_vm15, %v14065_v51  ;;  %5270 = vmax.xlane.f32.xlu2 %v5269_v48  ;;  %v5207_v0 = vpop.permute.xlu1 %5206  ;;  %v5281_v31 = vsel %vm1195_vm1, %v14192_v55, -inf }
 0x439   : > { %5282 = vmax.xlane.f32.xlu1 %v5281_v31  ;;  %11172 = vmatpush.xpose.msk.msra.mxu1 %vm4652_vm15, %v5207_v0 }
 0x43d   : > { %5273 = vmax.xlane.f32.xlu0 %v5272_v37  ;;  %11173 = vmatpush.xpose.msk.msra.mxu1 %vm4652_vm15, %v5205_v60 }
 0x43f   : > { %v14208_v6 = vpop.f32.mrf.mxu2 }
 0x440   : > { %11174 = vmatmul.msk.f32.vlgmr.msra.gmra.mxu1 %vm4652_vm15, %v14074_v57  ;;  %v5284_v7 = vsel %vm1195_vm1, %v14208_v6, -inf }
 0x441   : > { %5623 = vmatpush.msrb.mxu1 %v11735_v14  ;;  %5285 = vmax.xlane.f32.xlu2 %v5284_v7 }
 0x443   : > { %5624 = vmatpush.msrb.mxu1 %v11736_v11 }
 0x445   : > { %5728 = vmatpush.msra.mxu1 %v11750_v17  ;;  %5279 = vmax.xlane.f32.xlu0 %v5278_v5 }
 0x447   : > { %5729 = vmatpush.msra.mxu1 %v11751_v32 }
 0x448   : > { %11175 = vmatmul.msk.f32.gmra.mxu1 %vm4652_vm15, %v14080_v59 }
 0x453   : > { %v14222_v54 = vpop.f32.mrf.mxu3 }
 0x454   : > { %v5287_v18 = vsel %vm1195_vm1, %v14222_v54, -inf }
 0x455   : > { %5288 = vmax.xlane.f32.xlu1 %v5287_v18 }
 0x45a   : > { %v5241_v16 = vpop.xlane.xlu2 %5240 }
 0x45b   : > { %v5335_v28 = vsub.f32 %v14094_v30, %v5241_v16  ;;  %v14227_v34 = vpop.f32.mrf.mxu3 }
 0x45c   : > { %v5290_v2 = vsel %vm1195_vm1, %v14227_v34, -inf }
 0x45d   : > { %v5367_v50 = vmul.f32 1.442695, %v5335_v28  ;;  %5291 = vmax.xlane.f32.xlu0 %v5290_v2 }
 0x45f   : > { %11802 = vpow2.f32 %v5367_v50 }
 0x462   : > { %v5247_v9 = vpop.xlane.xlu2 %5246 }
 0x463   : > { %v5337_v27 = vsub.f32 %v14098_v22, %v5247_v9  ;;  %v5244_v47 = vpop.xlane.xlu1 %5243 }
 0x464   : > { %v5336_v35 = vsub.f32 %v14105_v53, %v5244_v47  ;;  %v5250_v39 = vpop.xlane.xlu0 %5249 }
 0x465   : > { %v11803_v43 = vpop.eup %11802  ;;  %v5371_v44 = vmul.f32 1.442695, %v5337_v27  ;;  %v5338_v40 = vsub.f32 %v14110_v62, %v5250_v39  ;;  %v11761_v62 = vunpack.i.h.bf16 %v14130_v19 }
 0x466   : > { %v5369_v30 = vmul.f32 1.442695, %v5336_v35  ;;  %11176 = vmatmul.msk.f32.vlgmr.msra.gmra.mxu2 %vm1195_vm1, %v11803_v43  ;;  %v5431_v29 = vsel %vm1195_vm1, %v11803_v43, 0.0 }
 0x467   : > { %11804 = vpow2.f32 %v5371_v44  ;;  %5763 = vmatpush.msra.mxu2 %v11755_v24  ;;  %5432 = vadd.xlane.f32.xlu2 %v5431_v29  ;;  %v5373_v53 = vmul.f32 1.442695, %v5338_v40 }
 0x468   : > { %11806 = vpow2.f32 %v5369_v30 }
 0x469   : > { %5764 = vmatpush.msra.mxu2 %v11756_v56  ;;  %11808 = vpow2.f32 %v5373_v53 }
 0x46a   : > { %v5256_v22 = vpop.xlane.xlu2 %5255 }
 0x46b   : > { %v5253_v21 = vpop.xlane.xlu1 %5252  ;;  %v5340_v31 = vsub.f32 %v14122_v13, %v5256_v22 }
 0x46c   : > { %v5339_v38 = vsub.f32 %v14102_v49, %v5253_v21  ;;  %v14248_v49 = vpop.f32.mrf.mxu1 }
 0x46d   : > { %v14239_v15 = vpop.eup %11804  ;;  %v5377_v19 = vmul.f32 1.442695, %v5340_v31 }
 0x46e   : > { %v11807_v48 = vpop.eup %11806  ;;  %v5375_v0 = vmul.f32 1.442695, %v5339_v38  ;;  %11178 = vmatmul.msk.f32.vlgmr.msrb.gmra.mxu3 %vm1195_vm1, %v14239_v15 }
 0x46f   : > { %5798 = vmatpush.msrb.mxu3 %v11760_v33  ;;  %11177 = vmatmul.msk.f32.gmra.mxu2 %vm1195_vm1, %v11807_v48  ;;  %v5434_v58 = vsel %vm1195_vm1, %v11807_v48, 0.0  ;;  %v11809_v7 = vpop.eup %11808 }
 0x470   : > { %11810 = vpow2.f32 %v5375_v0  ;;  %5435 = vadd.xlane.f32.xlu1 %v5434_v58  ;;  %v5440_v0 = vsel %vm1195_vm1, %v11809_v7, 0.0 }
 0x471   : > { %5799 = vmatpush.msrb.mxu3 %v11761_v62 }
 0x472   : > { %v5259_v14 = vpop.xlane.xlu0 %5258  ;;  %v11769_v37 = vpop.permute.xlu2 %11768 }
 0x473   : > { %v5341_v60 = vsub.f32 %v14135_v61, %v5259_v14  ;;  %v14251_v11 = vpop.f32.mrf.mxu2  ;;  %v11770_v13 = vunpack.i.l.bf16 %v11769_v37  ;;  %v5293_v61 = vsel %vm1195_vm1, %v14248_v49, -inf  ;;  %v11771_v18 = vunpack.i.h.bf16 %v11769_v37 }
 0x474   : > { %v5299_v17 = vsel %vm1195_vm1, %v14251_v11, -inf  ;;  %v14262_v50 = vpop.f32.mrf.mxu1 }
 0x475   : > { %v5379_v32 = vmul.f32 1.442695, %v5341_v60  ;;  %5300 = vmax.xlane.f32.xlu0 %v5299_v17 }
 0x476   : > { %v11811_v5 = vpop.eup %11810  ;;  %11179 = vmatmul.msk.f32.gmra.mxu3 %vm1195_vm1, %v11809_v7 }
 0x477   : > { %11812 = vpow2.f32 %v5379_v32  ;;  %11180 = vmatmul.msk.f32.vlgmr.msrb.gmra.mxu1 %vm1195_vm1, %v11811_v5  ;;  %v5443_v31 = vsel %vm1195_vm1, %v11811_v5, 0.0 }
 0x478   : > { %11814 = vpow2.f32 %v5377_v19  ;;  %5833 = vmatpush.msrb.mxu1 %v11770_v13  ;;  %5294 = vmax.xlane.f32.xlu1 %v5293_v61 }
 0x47a   : > { %5834 = vmatpush.msrb.mxu1 %v11771_v18  ;;  %v5262_v16 = vpop.xlane.xlu1 %5261 }
 0x47b   : > { %v5342_v28 = vsub.f32 %v14143_v3, %v5262_v16  ;;  %v14260_v2 = vpop.f32.mrf.mxu2  ;;  %v5296_v3 = vsel %vm1195_vm1, %v14262_v50, -inf }
 0x47c   : > { %v5302_v9 = vsel %vm1195_vm1, %v14260_v2, -inf }
 0x47d   : > { %v14266_v27 = vpop.eup %11812  ;;  %v5381_v47 = vmul.f32 1.442695, %v5342_v28  ;;  %5303 = vmax.xlane.f32.xlu0 %v5302_v9 }
 0x47e   : > { %v14268_v35 = vpop.eup %11814  ;;  %11182 = vmatmul.msk.f32.vlgmr.msrb.gmra.mxu2 %vm1195_vm1, %v14266_v27 }
 0x47f   : > { %11816 = vpow2.f32 %v5381_v47  ;;  %11181 = vmatmul.msk.f32.gmra.mxu1 %vm1195_vm1, %v14268_v35 }
 0x480   : > { %5297 = vmax.xlane.f32.xlu1 %v5296_v3 }
 0x482   : > { %v5265_v39 = vpop.xlane.xlu1 %5264 }
 0x483   : > { %v5343_v43 = vsub.f32 %v14147_v52, %v5265_v39  ;;  %v11772_v52 = vpack.i.bf16 %v14037_v36, %v14048_v63  ;;  %v11777_v39 = vpack.i.bf16 %v13955_v8, %v13968_v20 }
 0x485   : > { %v14277_v24 = vpop.eup %11816  ;;  %v5383_v44 = vmul.f32 1.442695, %v5343_v43  ;;  %v11764_v30 = vpop.permute.xlu0 %11763  ;;  %v5437_v43 = vsel %vm1195_vm1, %v14239_v15, 0.0 }
 0x486   : > { %11183 = vmatmul.msk.f32.gmra.mxu2 %vm1195_vm1, %v14277_v24  ;;  %v11765_v22 = vunpack.i.l.bf16 %v11764_v30  ;;  %v11766_v21 = vunpack.i.h.bf16 %v11764_v30 }
 0x487   : > { %11818 = vpow2.f32 %v5383_v44  ;;  %v14304_v14 = vpop.f32.mrf.mxu3 }
 0x488   : > { %v5305_v5 = vsel %vm1195_vm1, %v14304_v14, -inf }
 0x48a   : > { %v5268_v29 = vpop.xlane.xlu1 %5267 }
 0x48b   : > { %v5344_v56 = vsub.f32 %v14165_v1, %v5268_v29 }
 0x48d   : > { %v14282_v40 = vpop.eup %11818  ;;  %v5385_v53 = vmul.f32 1.442695, %v5344_v56  ;;  %v14338_v56 = vpop.f32.mrf.mxu1 }
 0x48e   : > { %11184 = vmatmul.msk.f32.vlgmr.msra.gmra.mxu3 %vm1195_vm1, %v14282_v40  ;;  %v5311_v8 = vsel %vm1195_vm1, %v14338_v56, -inf }
 0x48f   : > { %11820 = vpow2.f32 %v5385_v53  ;;  %5903 = vmatpush.msra.mxu3 %v11765_v22  ;;  %v14315_v16 = vpop.f32.mrf.mxu3  ;;  %v5449_v22 = vsel %vm1195_vm1, %v14266_v27, 0.0 }
 0x491   : > { %5904 = vmatpush.msra.mxu3 %v11766_v21  ;;  %11773 = vrot.lane.b32.xlu0 %v11772_v52, %s11987_s10  ;;  %v16711_v21 = vmov 0   ;;  %v11782_v52 = vpack.i.bf16 %v14014_v41, %v14002_v12 }
 0x492   : > { %6156 = vst.msk [vmem:[#allocation3 + $0xc] sm:$0xf] %vm6151_vm0, %v16711_v21 }
 0x493   : > { %6152 = vst.msk [vmem:[#allocation3] sm:$0xf] %vm6151_vm0, %v16711_v21 }
 0x494   : > { %6153 = vst.msk [vmem:[#allocation3 + $0x4] sm:$0xf] %vm6151_vm0, %v16711_v21 }
 0x495   : > { %v14289_v38 = vpop.eup %11820  ;;  %6157 = vst.msk [vmem:[#allocation3 + $0x10] sm:$0xf] %vm6151_vm0, %v16711_v21 }
 0x496   : > { %11185 = vmatmul.msk.f32.gmra.mxu3 %vm1195_vm1, %v14289_v38  ;;  %6159 = vst.msk [vmem:[#allocation3 + $0x18] sm:$0xf] %vm6151_vm0, %v16711_v21 }
 0x497   : > { %v14293_v1 = vpop.f32.mrf.mxu2  ;;  %6160 = vst.msk [vmem:[#allocation3 + $0x1c] sm:$0xf] %vm6151_vm0, %v16711_v21 }
 0x498   : > { %v5317_v33 = vsel %vm1195_vm1, %v14293_v1, -inf  ;;  %6162 = vst.msk [vmem:[#allocation3 + $0x24] sm:$0xf] %vm6151_vm0, %v16711_v21 }
 0x499   : > { %5318 = vmax.xlane.f32.xlu2 %v5317_v33  ;;  %v5452_v33 = vsel %vm1195_vm1, %v14277_v24, 0.0  ;;  %6163 = vst.msk [vmem:[#allocation3 + $0x28] sm:$0xf] %vm6151_vm0, %v16711_v21 }
 0x49a   : > { %6165 = vst.msk [vmem:[#allocation3 + $0x30] sm:$0xf] %vm6151_vm0, %v16711_v21 }
 0x49b   : > { %6166 = vst.msk [vmem:[#allocation3 + $0x34] sm:$0xf] %vm6151_vm0, %v16711_v21 }
 0x49c   : > { %6168 = vst.msk [vmem:[#allocation3 + $0x3c] sm:$0xf] %vm6151_vm0, %v16711_v21 }
 0x49d   : > { %6169 = vst.msk [vmem:[#allocation3 + $0x40] sm:$0xf] %vm6151_vm0, %v16711_v21 }
 0x49e   : > { %6171 = vst.msk [vmem:[#allocation3 + $0x48] sm:$0xf] %vm6151_vm0, %v16711_v21 }
 0x49f   : > { %v14297_v48 = vpop.f32.mrf.mxu2  ;;  %6172 = vst.msk [vmem:[#allocation3 + $0x4c] sm:$0xf] %vm6151_vm0, %v16711_v21 }
 0x4a0   : > { %v5320_v36 = vsel %vm1195_vm1, %v14297_v48, -inf  ;;  %6174 = vst.msk [vmem:[#allocation3 + $0x54] sm:$0xf] %vm6151_vm0, %v16711_v21 }
 0x4a1   : > { %5441 = vadd.xlane.f32.xlu2 %v5440_v0  ;;  %5321 = vmax.xlane.f32.xlu1 %v5320_v36  ;;  %6175 = vst.msk [vmem:[#allocation3 + $0x58] sm:$0xf] %vm6151_vm0, %v16711_v21  ;;  %v5458_v0 = vsel %vm1195_vm1, %v14289_v38, 0.0  ;;  %v5446_v36 = vsel %vm1195_vm1, %v14268_v35, 0.0 }
 0x4a2   : > { %v5277_v63 = vpop.xlane.xlu1 %5276  ;;  %6177 = vst.msk [vmem:[#allocation3 + $0x60] sm:$0xf] %vm6151_vm0, %v16711_v21 }
 0x4a3   : > { %v5347_v62 = vsub.f32 %v14180_v25, %v5277_v63  ;;  %6178 = vst.msk [vmem:[#allocation3 + $0x64] sm:$0xf] %vm6151_vm0, %v16711_v21  ;;  %v11338_v63 = vld [vmem:[%s16596_s2 + $0xc] sm:$0xf] }
 0x4a4   : > { %6180 = vst.msk [vmem:[#allocation3 + $0x6c] sm:$0xf] %vm6151_vm0, %v16711_v21  ;;  %v8066_v38 = vsel %vm7208_vm2, %v11338_v63, 0 }
 0x4a5   : > { %v5391_v58 = vmul.f32 1.442695, %v5347_v62  ;;  %6181 = vst.msk [vmem:[#allocation3 + $0x70] sm:$0xf] %vm6151_vm0, %v16711_v21  ;;  %8075 = vmatpush.bf16.msrb.mxu0 %v8066_v38 }
 0x4a6   : > { %6183 = vst.msk [vmem:[#allocation3 + $0x78] sm:$0xf] %vm6151_vm0, %v16711_v21 }
 0x4a7   : > { %11822 = vpow2.f32 %v5391_v58  ;;  %6184 = vst.msk [vmem:[#allocation3 + $0x7c] sm:$0xf] %vm6151_vm0, %v16711_v21 }
 0x4a8   : > { %6186 = vst.msk [vmem:[#allocation3 + $0x84] sm:$0xf] %vm6151_vm0, %v16711_v21 }
 0x4a9   : > { %5444 = vadd.xlane.f32.xlu2 %v5443_v31  ;;  %6187 = vst.msk [vmem:[#allocation3 + $0x88] sm:$0xf] %vm6151_vm0, %v16711_v21 }
 0x4aa   : > { %6189 = vst.msk [vmem:[#allocation3 + $0x90] sm:$0xf] %vm6151_vm0, %v16711_v21 }
 0x4ab   : > { %v5271_v60 = vpop.xlane.xlu2 %5270  ;;  %6190 = vst.msk [vmem:[#allocation3 + $0x94] sm:$0xf] %vm6151_vm0, %v16711_v21 }
 0x4ac   : > { %v5345_v37 = vsub.f32 %v14186_v10, %v5271_v60  ;;  %v5283_v19 = vpop.xlane.xlu1 %5282  ;;  %6192 = vst.msk [vmem:[#allocation3 + $0x9c] sm:$0xf] %vm6151_vm0, %v16711_v21 }
 0x4ad   : > { %v14307_v17 = vpop.eup %11822  ;;  %v5349_v7 = vsub.f32 %v14192_v55, %v5283_v19  ;;  %6193 = vst.msk [vmem:[#allocation3 + $0xa0] sm:$0xf] %vm6151_vm0, %v16711_v21 }
 0x4ae   : > { %v5387_v32 = vmul.f32 1.442695, %v5345_v37  ;;  %11188 = vmatmul.msk.f32.vlgmr.msra.gmra.mxu2 %vm1195_vm1, %v14307_v17  ;;  %6195 = vst.msk [vmem:[#allocation3 + $0xa8] sm:$0xf] %vm6151_vm0, %v16711_v21 }
 0x4af   : > { %v5395_v25 = vmul.f32 1.442695, %v5349_v7  ;;  %6196 = vst.msk [vmem:[#allocation3 + $0xac] sm:$0xf] %vm6151_vm0, %v16711_v21 }
 0x4b0   : > { %11824 = vpow2.f32 %v5387_v32  ;;  %v5274_v13 = vpop.xlane.xlu0 %5273  ;;  %6198 = vst.msk [vmem:[#allocation3 + $0xb4] sm:$0xf] %vm6151_vm0, %v16711_v21 }
 0x4b1   : > { %11826 = vpow2.f32 %v5395_v25  ;;  %v5346_v61 = vsub.f32 %v14200_v42, %v5274_v13  ;;  %5306 = vmax.xlane.f32.xlu2 %v5305_v5  ;;  %v5308_v42 = vsel %vm1195_vm1, %v14315_v16, -inf  ;;  %6199 = vst.msk [vmem:[#allocation3 + $0xb8] sm:$0xf] %vm6151_vm0, %v16711_v21 }
 0x4b2   : > { %6201 = vst.msk [vmem:[#allocation3 + $0xc0] sm:$0xf] %vm6151_vm0, %v16711_v21 }
 0x4b3   : > { %v5389_v10 = vmul.f32 1.442695, %v5346_v61  ;;  %6202 = vst.msk [vmem:[#allocation3 + $0xc4] sm:$0xf] %vm6151_vm0, %v16711_v21 }
 0x4b4   : > { %v5286_v18 = vpop.xlane.xlu2 %5285  ;;  %6204 = vst.msk [vmem:[#allocation3 + $0xcc] sm:$0xf] %vm6151_vm0, %v16711_v21 }
 0x4b5   : > { %v5350_v55 = vsub.f32 %v14208_v6, %v5286_v18  ;;  %11828 = vpow2.f32 %v5389_v10  ;;  %6205 = vst.msk [vmem:[#allocation3 + $0xd0] sm:$0xf] %vm6151_vm0, %v16711_v21  ;;  %v6562_v10 = vld [vmem:[#allocation3 + $0xc] sm:$0xf] }
 0x4b6   : > { %v14318_v28 = vpop.eup %11824  ;;  %6158 = vst.msk [vmem:[#allocation3 + $0x14] sm:$0x1] %vm6154_vm3, %v16711_v21 }
 0x4b7   : > { %v14320_v9 = vpop.eup %11826  ;;  %v5397_v47 = vmul.f32 1.442695, %v5350_v55  ;;  %11186 = vmatmul.msk.f32.vlgmr.msra.gmra.mxu1 %vm1195_vm1, %v14318_v28  ;;  %v5461_v19 = vsel %vm1195_vm1, %v14318_v28, 0.0  ;;  %6155 = vst.msk [vmem:[#allocation3 + $0x8] sm:$0x1] %vm6154_vm3, %v16711_v21 }
 0x4b8   : > { %v5280_v3 = vpop.xlane.xlu0 %5279  ;;  %11190 = vmatmul.msk.f32.vlgmr.msrb.gmra.mxu3 %vm1195_vm1, %v14320_v9  ;;  %6161 = vst.msk [vmem:[#allocation3 + $0x20] sm:$0x1] %vm6154_vm3, %v16711_v21 }
 0x4b9   : > { %11830 = vpow2.f32 %v5397_v47  ;;  %v5348_v6 = vsub.f32 %v14215_v4, %v5280_v3  ;;  %5309 = vmax.xlane.f32.xlu2 %v5308_v42  ;;  %v5467_v3 = vsel %vm1195_vm1, %v14307_v17, 0.0  ;;  %6164 = vst.msk [vmem:[#allocation3 + $0x2c] sm:$0x1] %vm6154_vm3, %v16711_v21 }
 0x4ba   : > { %11778 = vrot.lane.b32.xlu1 %v11777_v39, %s11987_s10  ;;  %6167 = vst.msk [vmem:[#allocation3 + $0x38] sm:$0x1] %vm6154_vm3, %v16711_v21 }
 0x4bb   : > { %v5393_v44 = vmul.f32 1.442695, %v5348_v6  ;;  %5438 = vadd.xlane.f32.xlu0 %v5437_v43  ;;  %v14334_v30 = vpop.eup %11828  ;;  %v14475_v43 = vpop.f32.mrf.mxu3  ;;  %6170 = vst.msk [vmem:[#allocation3 + $0x44] sm:$0x1] %vm6154_vm3, %v16711_v21 }
 0x4bc   : > { %6173 = vst.msk [vmem:[#allocation3 + $0x50] sm:$0x1] %vm6154_vm3, %v16711_v21 }
 0x4bd   : > { %11832 = vpow2.f32 %v5393_v44  ;;  %v14477_v44 = vpop.f32.mrf.mxu1  ;;  %6176 = vst.msk [vmem:[#allocation3 + $0x5c] sm:$0x1] %vm6154_vm3, %v16711_v21 }
 0x4be   : > { %6179 = vst.msk [vmem:[#allocation3 + $0x68] sm:$0x1] %vm6154_vm3, %v16711_v21 }
 0x4bf   : > { %v14336_v29 = vpop.eup %11830  ;;  %11187 = vmatmul.msk.f32.gmra.mxu1 %vm1195_vm1, %v14334_v30  ;;  %6182 = vst.msk [vmem:[#allocation3 + $0x74] sm:$0x1] %vm6154_vm3, %v16711_v21 }
 0x4c0   : > { %11191 = vmatmul.msk.f32.gmra.mxu3 %vm1195_vm1, %v14336_v29  ;;  %6185 = vst.msk [vmem:[#allocation3 + $0x80] sm:$0x1] %vm6154_vm3, %v16711_v21 }
 0x4c1   : > { %6188 = vst.msk [vmem:[#allocation3 + $0x8c] sm:$0x1] %vm6154_vm3, %v16711_v21 }
 0x4c2   : > { %6191 = vst.msk [vmem:[#allocation3 + $0x98] sm:$0x1] %vm6154_vm3, %v16711_v21 }
 0x4c3   : > { %v14346_v20 = vpop.eup %11832  ;;  %5312 = vmax.xlane.f32.xlu0 %v5311_v8  ;;  %6194 = vst.msk [vmem:[#allocation3 + $0xa4] sm:$0x1] %vm6154_vm3, %v16711_v21 }
 0x4c4   : > { %11189 = vmatmul.msk.f32.gmra.mxu2 %vm1195_vm1, %v14346_v20  ;;  %6197 = vst.msk [vmem:[#allocation3 + $0xb0] sm:$0x1] %vm6154_vm3, %v16711_v21 }
 0x4c5   : > { %6200 = vst.msk [vmem:[#allocation3 + $0xbc] sm:$0x1] %vm6154_vm3, %v16711_v21 }
 0x4c6   : > { %6203 = vst.msk [vmem:[#allocation3 + $0xc8] sm:$0x1] %vm6154_vm3, %v16711_v21 }
 0x4c7   : > { %6206 = vst.msk [vmem:[#allocation3 + $0xd4] sm:$0x1] %vm6154_vm3, %v16711_v21 }
 0x4c8   : > { %v5289_v4 = vpop.xlane.xlu1 %5288 }
 0x4c9   : > { %v5351_v15 = vsub.f32 %v14222_v54, %v5289_v4 }
 0x4cb   : > { %v5399_v53 = vmul.f32 1.442695, %v5351_v15  ;;  %5450 = vadd.xlane.f32.xlu0 %v5449_v22  ;;  %v5314_v22 = vsel %vm1195_vm1, %v14477_v44, -inf }
 0x4cd   : > { %11834 = vpow2.f32 %v5399_v53 }
 0x4d0   : > { %v5292_v54 = vpop.xlane.xlu0 %5291 }
 0x4d1   : > { %v5352_v27 = vsub.f32 %v14227_v34, %v5292_v54  ;;  %11783 = vrot.lane.b32.xlu2 %v11782_v52, %s11987_s10  ;;  %v5455_v34 = vsel %vm1195_vm1, %v14282_v40, 0.0  ;;  %v6568_v52 = vld [vmem:[#allocation3 + $0x14] sm:$0x1]  ;;  %v5323_v54 = vsel %vm1195_vm1, %v14475_v43, -inf }
 0x4d3   : > { %v14371_v12 = vpop.eup %11834  ;;  %v5401_v41 = vmul.f32 1.442695, %v5352_v27  ;;  %5453 = vadd.xlane.f32.xlu0 %v5452_v33 }
 0x4d4   : > { %11192 = vmatmul.msk.f32.vlgmr.msrb.gmra.mxu1 %vm1195_vm1, %v14371_v12 }
 0x4d5   : > { %11836 = vpow2.f32 %v5401_v41 }
 0x4da   : > { %v5433_v40 = vpop.xlane.xlu2 %5432 }
 0x4db   : > { %v14393_v24 = vpop.eup %11836  ;;  %5456 = vadd.xlane.f32.xlu0 %v5455_v34  ;;  %11838 = vrcp.f32 %v5433_v40  ;;  %v11787_v40 = vpack.i.bf16 %v14016_v26, %v14027_v46  ;;  %v14517_v26 = vpop.f32.mrf.mxu3 }
 0x4dc   : > { %11193 = vmatmul.msk.f32.gmra.mxu1 %vm1195_vm1, %v14393_v24  ;;  %v5326_v38 = vsel %vm1195_vm1, %v14517_v26, -inf }
 0x4e1   : > { %v11839_v62 = vpop.eup %11838 }
 0x4e3   : > { %5459 = vadd.xlane.f32.xlu0 %v5458_v0  ;;  %v5436_v58 = vpop.xlane.xlu1 %5435 }
 0x4e4   : > { %5447 = vadd.xlane.f32.xlu1 %v5446_v36  ;;  %11840 = vrcp.f32 %v5436_v58 }
 0x4e8   : > { %v5301_v35 = vpop.xlane.xlu0 %5300 }
 0x4e9   : > { %v5355_v31 = vsub.f32 %v14251_v11, %v5301_v35  ;;  %v5556_v60 = vpop.f32.mrf.mxu2 }
 0x4ea   : > { %v6119_v37 = vmul.f32 %v11839_v62, %v5556_v60  ;;  %v11841_v55 = vpop.eup %11840 }
 0x4eb   : > { %v5407_v7 = vmul.f32 1.442695, %v5355_v31  ;;  %5462 = vadd.xlane.f32.xlu0 %v5461_v19  ;;  %v14523_v46 = vpop.xlane.xlu1 %5294  ;;  %v11208_v31 = vld [vmem:[%s16596_s2 + $0x4] sm:$0xf] }
 0x4ec   : > { %v6207_v32 = vpack.c.bf16 %v6119_v37, %v6119_v37 }
 0x4ed   : > { %11842 = vpow2.f32 %v5407_v7  ;;  %v7210_v7 = vsel %vm7208_vm2, %v11208_v31, 0 }
 0x4ee   : > { %v6240_v11 = vshrl.u32 %v6207_v32, 16  ;;  %v6243_v13 = vshll.u32 %v6207_v32, 16 }
 0x4f0   : > { %v6242_v25 = vrot.slane %v6240_v11, 7  ;;  %v5304_v5 = vpop.xlane.xlu0 %5303 }
 0x4f1   : > { %v5356_v18 = vsub.f32 %v14260_v2, %v5304_v5 }
 0x4f2   : > { %v6245_v28 = vor.u32 %v6243_v13, %v6242_v25  ;;  %v5559_v47 = vpop.f32.mrf.mxu2  ;;  %v6246_v33 = vrot.slane %v6242_v25, 4 }
 0x4f3   : > { %v14465_v42 = vpop.eup %11842  ;;  %v5409_v39 = vmul.f32 1.442695, %v5356_v18  ;;  %v6120_v6 = vmul.f32 %v11841_v55, %v5559_v47  ;;  %5468 = vadd.xlane.f32.xlu0 %v5467_v3  ;;  %v5470_v18 = vsel %vm1195_vm1, %v14346_v20, 0.0  ;;  %v6677_v55 = vld [vmem:[#allocation3 + $0x4] sm:$0xf] }
 0x4f4   : > { %v6563_v2 = vsel %vm14454_vm4, %v6245_v28, %v6562_v10  ;;  %11196 = vmatmul.msk.f32.vlgmr.msra.gmra.mxu3 %vm1195_vm1, %v14465_v42  ;;  %v6676_v10 = vld [vmem:[#allocation3] sm:$0xf] }
 0x4f5   : > { %6564 = vst [vmem:[#allocation3 + $0xc] sm:$0xf] %v6563_v2  ;;  %11844 = vpow2.f32 %v5409_v39  ;;  %v6208_v17 = vpack.c.bf16 %v6120_v6, %v6120_v6  ;;  %v5298_v39 = vpop.xlane.xlu1 %5297  ;;  %v6726_v2 = vshrl.u32 %v6676_v10, 16 }
 0x4f6   : > { %v5354_v20 = vsub.f32 %v14262_v50, %v5298_v39 }
 0x4f7   : > { %v6248_v8 = vshrl.u32 %v6208_v17, 16  ;;  %v6251_v15 = vshll.u32 %v6208_v17, 16  ;;  %v6729_v17 = vshll.u32 %v6676_v10, 16 }
 0x4f8   : > { %v5405_v50 = vmul.f32 1.442695, %v5354_v20 }
 0x4f9   : > { %v6250_v4 = vrot.slane %v6248_v8, 7 }
 0x4fa   : > { %5315 = vmax.xlane.f32.xlu2 %v5314_v22 }
 0x4fb   : > { %v14499_v27 = vpop.eup %11844  ;;  %v6253_v41 = vor.u32 %v6251_v15, %v6250_v4  ;;  %v6255_v34 = vrot.slane %v6250_v4, 4  ;;  %5324 = vmax.xlane.f32.xlu0 %v5323_v54  ;;  %v6735_v4 = vshll.u32 %v6677_v55, 16  ;;  %v6739_v15 = vshrl.u32 %v6677_v55, 16 }
 0x4fc   : > { %11197 = vmatmul.msk.f32.gmra.mxu3 %vm1195_vm1, %v14499_v27  ;;  %v7522_v62 = vld [vmem:[#allocation3 + $0xc] sm:$0xe]  ;;  %v11792_v54 = vpack.i.bf16 %v14056_v45, %v14065_v51 }
 0x4fd   : > { %v6254_v36 = vsel %vm12206_vm10, %v6246_v33, %v6253_v41  ;;  %v6569_v63 = vsel %vm14491_vm6, %v6255_v34, %v6568_v52  ;;  %11788 = vrot.lane.b32.xlu1 %v11787_v40, %s11987_s10  ;;  %v11306_v11 = vrot.slane %v7522_v62, 9  ;;  %v6728_v33 = vrot.slane %v6726_v2, 4  ;;  %v14558_v34 = vpop.f32.mrf.mxu1  ;;  %v14560_v40 = vpop.f32.mrf.mxu3  ;;  %v6678_v39 = vld [vmem:[#allocation3 + $0xc] sm:$0xf] }
 0x4fe   : > { %6565 = vst.msk [vmem:[#allocation3 + $0x10] sm:$0xf] %vm6151_vm0, %v6254_v36  ;;  %v6731_v41 = vrot.slane %v6729_v17, 5  ;;  %v6737_v36 = vrot.slane %v6735_v4, 5 }
 0x4ff   : > { %6570 = vst [vmem:[#allocation3 + $0x14] sm:$0x1] %v6569_v63  ;;  %v6741_v63 = vrot.slane %v6739_v15, 4 }
 0x500   : > { %v6732_v45 = vor.u32 %v6731_v41, %v6728_v33 }
 0x503   : > { %v11774_v35 = vpop.permute.xlu0 %11773  ;;  %5327 = vmax.xlane.f32.xlu0 %v5326_v38  ;;  %v6709_v38 = vld [vmem:[#allocation3 + $0x8] sm:$0x1] }
 0x504   : > { %v11775_v58 = vunpack.i.l.bf16 %v11774_v35  ;;  %v11776_v19 = vunpack.i.h.bf16 %v11774_v35  ;;  %v6745_v31 = vshll.u32 %v6709_v38, 16 }
 0x505   : > { %v11677_v60 = vld [vmem:[#allocation3 + $0xc] sm:$0xff] }
 0x506   : > { %v14538_v37 = vld [vmem:[#allocation3 + $0x10] sm:$0xf]  ;;  %6008 = vmatpush.msrb.mxu3 %v11775_v58  ;;  %v14541_v32 = vld [vmem:[#allocation3 + $0x14] sm:$0x1]  ;;  %11403 = vmatmul.msk.bf16.vlgmr.msrb.gmra.mxu0 %vm7159_vm5, %v11677_v60  ;;  %v6742_v58 = vor.u32 %v6741_v63, %v6737_v36 }
 0x507   : > { %v7578_v25 = vrot.slane %v14538_v37, 5  ;;  %v7581_v21 = vrot.slane %v14541_v32, 5 }
 0x508   : > { %6009 = vmatpush.msrb.mxu3 %v11776_v19 }
 0x509   : > { %v7579_v13 = vsel %vm12401_vm14, %v11306_v11, %v7578_v25  ;;  %v7580_v5 = vrot.slane %v7578_v25, 4  ;;  %v6747_v11 = vrot.slane %v6745_v31, 5  ;;  %v5482_v25 = vsel %vm1195_vm1, %v14393_v24, 0.0 }
 0x50a   : > { %7219 = vmatpush.bf16.msra.mxu3 %v7210_v7  ;;  %v7685_v47 = vunpack.c.l.b16 %v7579_v13  ;;  %v6743_v7 = vrot.slane %v6742_v58, 4  ;;  %v6759_v24 = vshll.u32 %v14538_v37, 16 }
 0x50b   : > { %v7582_v28 = vsel %vm12401_vm14, %v7580_v5, %v7581_v21  ;;  %5471 = vadd.xlane.f32.xlu0 %v5470_v18  ;;  %v14572_v5 = vpop.f32.mrf.mxu1 }
 0x50c   : > { %v7686_v3 = vunpack.c.l.b16 %v7582_v28  ;;  %v5319_v6 = vpop.xlane.xlu2 %5318  ;;  %v6748_v28 = vsel %vm12141_vm8, %v6743_v7, %v6747_v11  ;;  %v6761_v33 = vrot.slane %v6759_v24, 5  ;;  %v5494_v11 = vsel %vm1195_vm1, %v14499_v27, 0.0 }
 0x50d   : > { %v5361_v8 = vsub.f32 %v14293_v1, %v5319_v6  ;;  %v5473_v1 = vsel %vm1195_vm1, %v14320_v9, 0.0  ;;  %v6733_v9 = vrot.slane %v6732_v45, 4  ;;  %v6763_v6 = vshrl.u32 %v14538_v37, 16 }
 0x50e   : > { %v14553_v22 = vpack.c.b16 %v7686_v3, %v7685_v47  ;;  %v7112_v4 = vunpack.c.l.b16 %v6748_v28  ;;  %v5353_v37 = vsub.f32 %v14248_v49, %v14523_v46  ;;  %v5464_v45 = vsel %vm1195_vm1, %v14334_v30, 0.0 }
 0x50f   : > { %v5419_v52 = vmul.f32 1.442695, %v5361_v8  ;;  %v6738_v55 = vsel %vm12141_vm8, %v6733_v9, %v6737_v36  ;;  %v6765_v41 = vrot.slane %v6763_v6, 4  ;;  %v6769_v46 = vshll.u32 %v14541_v32, 16 }
 0x510   : > { %v7111_v8 = vunpack.c.l.b16 %v6738_v55  ;;  %v5403_v7 = vmul.f32 1.442695, %v5353_v37 }
 0x511   : > { %11846 = vpow2.f32 %v5419_v52  ;;  %v6750_v52 = vshrl.u32 %v6678_v39, 16  ;;  %v6766_v9 = vor.u32 %v6765_v41, %v6761_v33  ;;  %v6771_v24 = vrot.slane %v6769_v46, 5 }
 0x512   : > { %11793 = vrot.lane.b32.xlu2 %v11792_v54, %s11987_s10  ;;  %v6753_v54 = vshll.u32 %v6678_v39, 16 }
 0x513   : > { %5474 = vadd.xlane.f32.xlu0 %v5473_v1  ;;  %v5626_v63 = vpop.f32.mrf.mxu1  ;;  %v6575_v1 = vld [vmem:[#allocation3 + $0x20] sm:$0x1] }
 0x514   : > { %v5442_v35 = vpop.xlane.xlu2 %5441  ;;  %v5322_v62 = vpop.xlane.xlu1 %5321 }
 0x515   : > { %11848 = vrcp.f32 %v5442_v35  ;;  %v5362_v51 = vsub.f32 %v14297_v48, %v5322_v62  ;;  %v5594_v48 = vpop.f32.mrf.mxu3  ;;  %v7143_v62 = vpack.c.b16 %v7112_v4, %v7111_v8  ;;  %v5479_v8 = vsel %vm1195_vm1, %v14371_v12, 0.0 }
 0x516   : > { %11850 = vpow2.f32 %v5405_v50 }
 0x517   : > { %v14566_v60 = vpop.eup %11846  ;;  %v5421_v19 = vmul.f32 1.442695, %v5362_v51  ;;  %v6752_v51 = vrot.slane %v6750_v52, 4 }
 0x518   : > { %11202 = vmatmul.msk.f32.vlgmr.msrb.gmra.mxu3 %vm1195_vm1, %v14566_v60 }
 0x519   : > { %11852 = vpow2.f32 %v5421_v19  ;;  %v6755_v19 = vrot.slane %v6753_v54, 5 }
 0x51b   : > { %v11849_v13 = vpop.eup %11848  ;;  %5483 = vadd.xlane.f32.xlu0 %v5482_v25 }
 0x51c   : > { %v6122_v21 = vmul.f32 %v11849_v13, %v5594_v48  ;;  %v5445_v10 = vpop.xlane.xlu2 %5444  ;;  %v14578_v47 = vpop.eup %11850  ;;  %v6756_v13 = vor.u32 %v6755_v19, %v6752_v51  ;;  %v6767_v48 = vrot.slane %v6766_v9, 4 }
 0x51d   : > { %11854 = vrcp.f32 %v5445_v10  ;;  %v5488_v15 = vsel %vm1195_vm1, %v14578_v47, 0.0 }
 0x51e   : > { %v14580_v3 = vpack.c.bf16 %v6122_v21, %v6122_v21  ;;  %11856 = vpow2.f32 %v5403_v7  ;;  %v6578_v21 = vld [vmem:[#allocation3 + $0x24] sm:$0xf]  ;;  %v6757_v4 = vrot.slane %v6756_v13, 4 }
 0x51f   : > { %v14584_v2 = vpop.eup %11852 }
 0x520   : > { %v6265_v17 = vshrl.u32 %v14580_v3, 16  ;;  %11203 = vmatmul.msk.f32.gmra.mxu3 %vm1195_vm1, %v14584_v2  ;;  %v6762_v41 = vsel %vm12141_vm8, %v6757_v4, %v6761_v33  ;;  %v6268_v9 = vshll.u32 %v14580_v3, 16 }
 0x521   : > { %v7113_v37 = vunpack.c.l.b16 %v6762_v41 }
 0x522   : > { %v14591_v20 = vrot.slane %v6265_v17, 7 }
 0x523   : > { %v11855_v36 = vpop.eup %11854  ;;  %5489 = vadd.xlane.f32.xlu0 %v5488_v15 }
 0x524   : > { %v6272_v38 = vrot.slane %v14591_v20, 4  ;;  %v6123_v50 = vmul.f32 %v11855_v36, %v5626_v63  ;;  %v5307_v35 = vpop.xlane.xlu2 %5306 }
 0x525   : > { %v5357_v10 = vsub.f32 %v14304_v14, %v5307_v35  ;;  %v6772_v14 = vsel %vm12141_vm8, %v6767_v48, %v6771_v24 }
 0x526   : > { %v6576_v58 = vsel %vm14491_vm6, %v6272_v38, %v6575_v1  ;;  %v6211_v31 = vpack.c.bf16 %v6123_v50, %v6123_v50  ;;  %v7114_v12 = vunpack.c.l.b16 %v6772_v14 }
 0x527   : > { %6577 = vst [vmem:[#allocation3 + $0x20] sm:$0x1] %v6576_v58  ;;  %5465 = vadd.xlane.f32.xlu1 %v5464_v45  ;;  %v5411_v15 = vmul.f32 1.442695, %v5357_v10 }
 0x528   : > { %v6274_v49 = vshrl.u32 %v6211_v31, 16  ;;  %11209 = vmatmul.msk.bf16.vlgmr.msra.gmra.mxu3 %vm7159_vm5, %v7143_v62  ;;  %v6277_v30 = vshll.u32 %v6211_v31, 16  ;;  %v7144_v62 = vpack.c.b16 %v7114_v12, %v7113_v37 }
 0x52a   : > { %v14604_v25 = vrot.slane %v6274_v49, 7 }
 0x52b   : > { %5495 = vadd.xlane.f32.xlu0 %v5494_v11  ;;  %v6571_v11 = vld [vmem:[#allocation3 + $0x18] sm:$0xf] }
 0x52c   : > { %v6279_v55 = vor.u32 %v6277_v30, %v14604_v25  ;;  %v5310_v28 = vpop.xlane.xlu2 %5309  ;;  %v11779_v39 = vpop.permute.xlu1 %11778  ;;  %v6270_v30 = vor.u32 %v6268_v9, %v14591_v20 }
 0x52d   : > { %v5358_v32 = vsub.f32 %v14315_v16, %v5310_v28  ;;  %v11780_v6 = vunpack.i.l.bf16 %v11779_v39  ;;  %v11781_v54 = vunpack.i.h.bf16 %v11779_v39  ;;  %v11857_v16 = vpop.eup %11856  ;;  %v5661_v20 = vpop.f32.mrf.mxu2 }
 0x52e   : > { %v6579_v27 = vsel %vm14454_vm4, %v6279_v55, %v6578_v21  ;;  %v5439_v17 = vpop.xlane.xlu0 %5438  ;;  %v5485_v35 = vsel %vm1195_vm1, %v11857_v16, 0.0  ;;  %v6711_v24 = vld [vmem:[#allocation3 + $0x20] sm:$0x1] }
 0x52f   : > { %6580 = vst [vmem:[#allocation3 + $0x24] sm:$0xf] %v6579_v27  ;;  %v5413_v52 = vmul.f32 1.442695, %v5358_v32  ;;  %11858 = vrcp.f32 %v5439_v17  ;;  %5480 = vadd.xlane.f32.xlu1 %v5479_v8  ;;  %5868 = vmatpush.msrb.mxu2 %v11780_v6 }
 0x531   : > { %11860 = vpow2.f32 %v5413_v52  ;;  %5869 = vmatpush.msrb.mxu2 %v11781_v54 }
 0x532   : > { %11194 = vmatmul.msk.f32.vlgmr.msrb.gmra.mxu2 %vm1195_vm1, %v11857_v16  ;;  %11862 = vpow2.f32 %v5411_v15  ;;  %v6793_v16 = vshll.u32 %v6711_v24, 16 }
 0x534   : > { %v11784_v36 = vpop.permute.xlu2 %11783 }
 0x535   : > { %v11859_v63 = vpop.eup %11858  ;;  %v11785_v1 = vunpack.i.l.bf16 %v11784_v36  ;;  %v11786_v51 = vunpack.i.h.bf16 %v11784_v36 }
 0x536   : > { %v6121_v38 = vmul.f32 %v11859_v63, %v14560_v40  ;;  %v5313_v50 = vpop.xlane.xlu0 %5312  ;;  %v5476_v40 = vsel %vm1195_vm1, %v14336_v29, 0.0 }
 0x537   : > { %v11861_v45 = vpop.eup %11860  ;;  %5938 = vmatpush.msra.mxu1 %v11785_v1  ;;  %5486 = vadd.xlane.f32.xlu1 %v5485_v35  ;;  %v5359_v46 = vsub.f32 %v14338_v56, %v5313_v50  ;;  %v5509_v56 = vsel %vm1195_vm1, %v14566_v60, 0.0 }
 0x538   : > { %v6209_v58 = vpack.c.bf16 %v6121_v38, %v6121_v38  ;;  %11210 = vmatmul.msk.bf16.gmra.mxu3 %vm7159_vm5, %v7144_v62  ;;  %v5500_v33 = vsel %vm1195_vm1, %v11861_v45, 0.0  ;;  %v11863_v31 = vpop.eup %11862  ;;  %v5664_v62 = vpop.f32.mrf.mxu2 }
 0x539   : > { %5939 = vmatpush.msra.mxu1 %v11786_v51  ;;  %5501 = vadd.xlane.f32.xlu0 %v5500_v33  ;;  %v5415_v10 = vmul.f32 1.442695, %v5359_v46  ;;  %v5497_v39 = vsel %vm1195_vm1, %v11863_v31, 0.0 }
 0x53a   : > { %v6257_v19 = vshrl.u32 %v6209_v58, 16  ;;  %11195 = vmatmul.msk.f32.gmra.mxu2 %vm1195_vm1, %v14578_v47  ;;  %11198 = vmatmul.msk.f32.vlgmr.msra.gmra.mxu1 %vm1195_vm1, %v11863_v31  ;;  %v6260_v49 = vshll.u32 %v6209_v58, 16  ;;  %v5491_v47 = vsel %vm1195_vm1, %v14465_v42, 0.0  ;;  %v7588_v31 = vrot.slane %v6711_v24, 5 }
 0x53b   : > { %5477 = vadd.xlane.f32.xlu2 %v5476_v40 }
 0x53c   : > { %v6259_v7 = vrot.slane %v6257_v19, 7 }
 0x53e   : > { %v6262_v13 = vor.u32 %v6260_v49, %v6259_v7  ;;  %v6263_v48 = vrot.slane %v6259_v7, 4  ;;  %v5451_v21 = vpop.xlane.xlu0 %5450 }
 0x53f   : > { %11864 = vrcp.f32 %v5451_v21  ;;  %5492 = vadd.xlane.f32.xlu1 %v5491_v47 }
 0x540   : > { %v6271_v29 = vsel %vm12206_vm10, %v6263_v48, %v6270_v30  ;;  %v6572_v3 = vsel %vm14454_vm4, %v6262_v13, %v6571_v11  ;;  %11866 = vpow2.f32 %v5415_v10  ;;  %v6795_v11 = vrot.slane %v6793_v16, 5 }
 0x541   : > { %6573 = vst [vmem:[#allocation3 + $0x18] sm:$0xf] %v6572_v3 }
 0x542   : > { %6574 = vst.msk [vmem:[#allocation3 + $0x1c] sm:$0xf] %vm6151_vm0, %v6271_v29  ;;  %11199 = vmatmul.msk.f32.gmra.mxu1 %vm1195_vm1, %v11861_v45  ;;  %v6585_v45 = vld [vmem:[#allocation3 + $0x30] sm:$0xf] }
 0x543   : > { %5510 = vadd.xlane.f32.xlu2 %v5509_v56 }
 0x545   : > { %v11865_v42 = vpop.eup %11864 }
 0x546   : > { %v6125_v55 = vmul.f32 %v11865_v42, %v5661_v20  ;;  %v5454_v28 = vpop.xlane.xlu0 %5453  ;;  %v14641_v15 = vpop.eup %11866 }
 0x547   : > { %11868 = vrcp.f32 %v5454_v28  ;;  %5498 = vadd.xlane.f32.xlu1 %v5497_v39  ;;  %v5503_v51 = vsel %vm1195_vm1, %v14641_v15, 0.0  ;;  %v5696_v42 = vpop.f32.mrf.mxu3 }
 0x548   : > { %v6213_v32 = vpack.c.bf16 %v6125_v55, %v6125_v55  ;;  %v6680_v6 = vld [vmem:[#allocation3 + $0x18] sm:$0xf] }
 0x549   : > { %v7523_v27 = vld [vmem:[#allocation3 + $0x18] sm:$0xe]  ;;  %v6681_v8 = vld [vmem:[#allocation3 + $0x1c] sm:$0xf]  ;;  %v6774_v4 = vshrl.u32 %v6680_v6, 16  ;;  %v6777_v14 = vshll.u32 %v6680_v6, 16 }
 0x54a   : > { %v11678_v17 = vld [vmem:[#allocation3 + $0x18] sm:$0xff]  ;;  %v6291_v60 = vshrl.u32 %v6213_v32, 16  ;;  %v6783_v52 = vshll.u32 %v6681_v8, 16  ;;  %v6787_v54 = vshrl.u32 %v6681_v8, 16  ;;  %v11307_v36 = vrot.slane %v7523_v27, 9 }
 0x54b   : > { %11404 = vmatmul.msk.bf16.gmra.mxu0 %vm7159_vm5, %v11678_v17  ;;  %v6776_v41 = vrot.slane %v6774_v4, 4  ;;  %v6779_v12 = vrot.slane %v6777_v14, 5  ;;  %v7585_v37 = vrot.slane %v6681_v8, 5  ;;  %v6294_v1 = vshll.u32 %v6213_v32, 16  ;;  %v6589_v6 = vld [vmem:[#allocation3 + $0x38] sm:$0x1] }
 0x54c   : > { %v6293_v63 = vrot.slane %v6291_v60, 7  ;;  %v6785_v38 = vrot.slane %v6783_v52, 5  ;;  %v6789_v50 = vrot.slane %v6787_v54, 4  ;;  %v5512_v17 = vsel %vm1195_vm1, %v14584_v2, 0.0 }
 0x54d   : > { %v11869_v35 = vpop.eup %11868  ;;  %v6780_v58 = vor.u32 %v6779_v12, %v6776_v41  ;;  %v7587_v33 = vrot.slane %v7585_v37, 4  ;;  %v7586_v49 = vsel %vm12401_vm14, %v11307_v36, %v7585_v37 }
 0x54e   : > { %v6296_v19 = vor.u32 %v6294_v1, %v6293_v63  ;;  %v6126_v40 = vmul.f32 %v11869_v35, %v5664_v62  ;;  %v5457_v9 = vpop.xlane.xlu0 %5456  ;;  %v6790_v7 = vor.u32 %v6789_v50, %v6785_v38  ;;  %v7687_v3 = vunpack.c.l.b16 %v7586_v49  ;;  %v5629_v1 = vpop.f32.mrf.mxu1  ;;  %v6592_v50 = vld [vmem:[#allocation3 + $0x3c] sm:$0xf] }
 0x54f   : > { %11870 = vrcp.f32 %v5457_v9  ;;  %5504 = vadd.xlane.f32.xlu1 %v5503_v51  ;;  %v6781_v46 = vrot.slane %v6780_v58, 4  ;;  %v7589_v30 = vsel %vm12401_vm14, %v7587_v33, %v7588_v31  ;;  %v6297_v8 = vrot.slane %v6293_v63, 4 }
 0x550   : > { %v6586_v13 = vsel %vm14454_vm4, %v6296_v19, %v6585_v45  ;;  %v6214_v48 = vpack.c.bf16 %v6126_v40, %v6126_v40  ;;  %v6791_v21 = vrot.slane %v6790_v7, 4  ;;  %v7688_v47 = vunpack.c.l.b16 %v7589_v30 }
 0x551   : > { %6587 = vst [vmem:[#allocation3 + $0x30] sm:$0xf] %v6586_v13  ;;  %v6786_v29 = vsel %vm12141_vm8, %v6781_v46, %v6785_v38  ;;  %v5699_v38 = vpop.f32.mrf.mxu3  ;;  %v5329_v58 = vsel %vm1195_vm1, %v14558_v34, -inf  ;;  %v6280_v13 = vrot.slane %v14604_v25, 4 }
 0x552   : > { %v6299_v10 = vshrl.u32 %v6214_v48, 16  ;;  %v6796_v56 = vsel %vm12141_vm8, %v6791_v21, %v6795_v11  ;;  %v7115_v20 = vunpack.c.l.b16 %v6786_v29  ;;  %v14656_v28 = vpack.c.b16 %v7688_v47, %v7687_v3 }
 0x553   : > { %v7116_v55 = vunpack.c.l.b16 %v6796_v56  ;;  %v6302_v24 = vshll.u32 %v6214_v48, 16  ;;  %v6596_v56 = vld [vmem:[#allocation3 + $0x44] sm:$0x1] }
 0x554   : > { %v6301_v39 = vrot.slane %v6299_v10, 7 }
 0x555   : > { %v11871_v32 = vpop.eup %11870  ;;  %v7145_v27 = vpack.c.b16 %v7116_v55, %v7115_v20 }
 0x556   : > { %v6304_v4 = vor.u32 %v6302_v24, %v6301_v39  ;;  %v6306_v14 = vrot.slane %v6301_v39, 4  ;;  %v6127_v60 = vmul.f32 %v11871_v32, %v5696_v42  ;;  %v5460_v52 = vpop.xlane.xlu0 %5459  ;;  %v5731_v3 = vpop.f32.mrf.mxu1  ;;  %v6582_v32 = vld [vmem:[#allocation3 + $0x2c] sm:$0x1] }
 0x557   : > { %11872 = vrcp.f32 %v5460_v52  ;;  %11211 = vmatmul.msk.bf16.gmra.mxu3 %vm7159_vm5, %v7145_v27  ;;  %5513 = vadd.xlane.f32.xlu1 %v5512_v17  ;;  %v5448_v54 = vpop.xlane.xlu1 %5447  ;;  %v6682_v17 = vld [vmem:[#allocation3 + $0x24] sm:$0xf] }
 0x558   : > { %v6305_v16 = vsel %vm12206_vm10, %v6297_v8, %v6304_v4  ;;  %v6590_v41 = vsel %vm14491_vm6, %v6306_v14, %v6589_v6  ;;  %v6215_v12 = vpack.c.bf16 %v6127_v60, %v6127_v60  ;;  %11874 = vrcp.f32 %v5448_v54  ;;  %v7525_v49 = vld [vmem:[#allocation3 + $0x30] sm:$0xe] }
 0x559   : > { %6588 = vst.msk [vmem:[#allocation3 + $0x34] sm:$0xf] %vm6151_vm0, %v6305_v16  ;;  %v11309_v55 = vrot.slane %v7525_v49, 9 }
 0x55a   : > { %6591 = vst [vmem:[#allocation3 + $0x38] sm:$0x1] %v6590_v41  ;;  %v6308_v2 = vshrl.u32 %v6215_v12, 16  ;;  %v6311_v37 = vshll.u32 %v6215_v12, 16 }
 0x55c   : > { %v6310_v36 = vrot.slane %v6308_v2, 7  ;;  %v6798_v2 = vshrl.u32 %v6682_v17, 16 }
 0x55d   : > { %v11873_v63 = vpop.eup %11872 }
 0x55e   : > { %v11875_v35 = vpop.eup %11874  ;;  %v6313_v62 = vor.u32 %v6311_v37, %v6310_v36  ;;  %v6128_v45 = vmul.f32 %v11873_v63, %v5699_v38  ;;  %v5463_v51 = vpop.xlane.xlu0 %5462  ;;  %v6314_v10 = vrot.slane %v6310_v36, 4  ;;  %v6801_v36 = vshll.u32 %v6682_v17, 16  ;;  %v6606_v17 = vld [vmem:[#allocation3 + $0x54] sm:$0xf] }
 0x55f   : > { %v6124_v33 = vmul.f32 %v11875_v35, %v5629_v1  ;;  %11876 = vrcp.f32 %v5463_v51  ;;  %5330 = vmax.xlane.f32.xlu1 %v5329_v58  ;;  %v6800_v58 = vrot.slane %v6798_v2, 4 }
 0x560   : > { %v6593_v31 = vsel %vm14454_vm4, %v6313_v62, %v6592_v50  ;;  %v6216_v19 = vpack.c.bf16 %v6128_v45, %v6128_v45  ;;  %v14670_v40 = vld [vmem:[#allocation3 + $0x34] sm:$0xf]  ;;  %v5766_v62 = vpop.f32.mrf.mxu2  ;;  %v6599_v45 = vld [vmem:[#allocation3 + $0x48] sm:$0xf] }
 0x561   : > { %6594 = vst [vmem:[#allocation3 + $0x3c] sm:$0xf] %v6593_v31  ;;  %v6212_v9 = vpack.c.bf16 %v6124_v33, %v6124_v33  ;;  %v7599_v46 = vrot.slane %v14670_v40, 5  ;;  %v14673_v30 = vld [vmem:[#allocation3 + $0x38] sm:$0x1]  ;;  %v6803_v33 = vrot.slane %v6801_v36, 5 }
 0x562   : > { %v6316_v7 = vshrl.u32 %v6216_v19, 16  ;;  %v6319_v21 = vshll.u32 %v6216_v19, 16  ;;  %v7602_v8 = vrot.slane %v14673_v30, 5 }
 0x563   : > { %v6282_v11 = vshrl.u32 %v6212_v9, 16  ;;  %v7601_v47 = vrot.slane %v7599_v46, 4  ;;  %v6285_v42 = vshll.u32 %v6212_v9, 16  ;;  %v7600_v14 = vsel %vm12401_vm14, %v11309_v55, %v7599_v46 }
 0x564   : > { %v6318_v48 = vrot.slane %v6316_v7, 7  ;;  %v7691_v63 = vunpack.c.l.b16 %v7600_v14 }
 0x565   : > { %v11877_v29 = vpop.eup %11876  ;;  %v6284_v20 = vrot.slane %v6282_v11, 7  ;;  %v7603_v16 = vsel %vm12401_vm14, %v7601_v47, %v7602_v8 }
 0x566   : > { %v6321_v39 = vor.u32 %v6319_v21, %v6318_v48  ;;  %v6323_v24 = vrot.slane %v6318_v48, 4  ;;  %v6129_v6 = vmul.f32 %v11877_v29, %v5731_v3  ;;  %v5469_v27 = vpop.xlane.xlu0 %5468  ;;  %v7692_v1 = vunpack.c.l.b16 %v7603_v16 }
 0x567   : > { %v6287_v4 = vor.u32 %v6285_v42, %v6284_v20  ;;  %v6289_v25 = vrot.slane %v6284_v20, 4  ;;  %11878 = vrcp.f32 %v5469_v27  ;;  %v6804_v3 = vor.u32 %v6803_v33, %v6800_v58  ;;  %v6684_v42 = vld [vmem:[#allocation3 + $0x30] sm:$0xf]  ;;  %v6708_v27 = vld [vmem:[%s16596_s2] sm:$0xf] }
 0x568   : > { %v6322_v60 = vsel %vm12206_vm10, %v6314_v10, %v6321_v39  ;;  %v6597_v52 = vsel %vm14491_vm6, %v6323_v24, %v6596_v56  ;;  %v6217_v54 = vpack.c.bf16 %v6129_v6, %v6129_v6  ;;  %v14693_v31 = vpack.c.b16 %v7692_v1, %v7691_v63  ;;  %v7524_v1 = vld [vmem:[#allocation3 + $0x24] sm:$0xe] }
 0x569   : > { %6595 = vst.msk [vmem:[#allocation3 + $0x40] sm:$0xf] %vm6151_vm0, %v6322_v60  ;;  %v6288_v41 = vsel %vm12206_vm10, %v6280_v13, %v6287_v4  ;;  %v6583_v12 = vsel %vm14491_vm6, %v6289_v25, %v6582_v32  ;;  %v6805_v4 = vrot.slane %v6804_v3, 4  ;;  %v6822_v60 = vshrl.u32 %v6684_v42, 16 }
 0x56a   : > { %6598 = vst [vmem:[#allocation3 + $0x44] sm:$0x1] %v6597_v52  ;;  %v6325_v37 = vshrl.u32 %v6217_v54, 16  ;;  %v6328_v50 = vshll.u32 %v6217_v54, 16  ;;  %v6825_v63 = vshll.u32 %v6684_v42, 16 }
 0x56b   : > { %6581 = vst.msk [vmem:[#allocation3 + $0x28] sm:$0xf] %vm6151_vm0, %v6288_v41  ;;  %v6831_v41 = vshll.u32 %v14670_v40, 16 }
 0x56c   : > { %6584 = vst [vmem:[#allocation3 + $0x2c] sm:$0x1] %v6583_v12  ;;  %v14691_v38 = vrot.slane %v6325_v37, 7  ;;  %v6835_v12 = vshrl.u32 %v14670_v40, 16  ;;  %v7430_v37 = vsel %vm7208_vm2, %v6708_v27, 0  ;;  %v6827_v3 = vrot.slane %v6825_v63, 5 }
 0x56d   : > { %v11879_v35 = vpop.eup %11878  ;;  %v5316_v51 = vpop.xlane.xlu2 %5315 }
 0x56e   : > { %v6330_v19 = vor.u32 %v6328_v50, %v14691_v38  ;;  %v6131_v9 = vmul.f32 %v11879_v35, %v5766_v62  ;;  %v5360_v7 = vsub.f32 %v14477_v44, %v5316_v51  ;;  %v5325_v49 = vpop.xlane.xlu0 %5324 }
 0x56f   : > { %v5363_v46 = vsub.f32 %v14475_v43, %v5325_v49  ;;  %v11789_v11 = vpop.permute.xlu1 %11788  ;;  %v11308_v49 = vrot.slane %v7524_v1, 9  ;;  %v5769_v1 = vpop.f32.mrf.mxu2 }
 0x570   : > { %v6600_v13 = vsel %vm14454_vm4, %v6330_v19, %v6599_v45  ;;  %v6219_v48 = vpack.c.bf16 %v6131_v9, %v6131_v9  ;;  %v5417_v21 = vmul.f32 1.442695, %v5360_v7  ;;  %v11790_v29 = vunpack.i.l.bf16 %v11789_v11  ;;  %v14723_v7 = vld [vmem:[#allocation3 + $0x40] sm:$0xf] }
 0x571   : > { %6601 = vst [vmem:[#allocation3 + $0x48] sm:$0xf] %v6600_v13  ;;  %v5423_v47 = vmul.f32 1.442695, %v5363_v46  ;;  %v11791_v44 = vunpack.i.h.bf16 %v11789_v11  ;;  %v14721_v19 = vrot.slane %v6831_v41, 5  ;;  %v6837_v9 = vrot.slane %v6835_v12, 4  ;;  %v14749_v12 = vpop.f32.mrf.mxu1 }
 0x572   : > { %v6342_v10 = vshrl.u32 %v6219_v48, 16  ;;  %11880 = vpow2.f32 %v5417_v21  ;;  %v11679_v56 = vld [vmem:[#allocation3 + $0x24] sm:$0xff]  ;;  %5973 = vmatpush.msra.mxu2 %v11790_v29  ;;  %v6345_v32 = vshll.u32 %v6219_v48, 16  ;;  %v7526_v11 = vld [vmem:[#allocation3 + $0x3c] sm:$0xe]  ;;  %v6824_v29 = vrot.slane %v6822_v60, 4 }
 0x573   : > { %v6683_v20 = vld [vmem:[#allocation3 + $0x28] sm:$0xf]  ;;  %11882 = vpow2.f32 %v5423_v47  ;;  %v14700_v55 = vld [vmem:[#allocation3 + $0x2c] sm:$0x1]  ;;  %11405 = vmatmul.msk.bf16.gmra.mxu0 %vm7159_vm5, %v11679_v56 }
 0x574   : > { %v6807_v43 = vshll.u32 %v6683_v20, 16  ;;  %v6811_v39 = vshrl.u32 %v6683_v20, 16  ;;  %v14702_v24 = vrot.slane %v6342_v10, 7  ;;  %v6817_v6 = vshll.u32 %v14700_v55, 16  ;;  %5974 = vmatpush.msra.mxu2 %v11791_v44  ;;  %v14730_v10 = vld [vmem:[#allocation3 + $0x44] sm:$0x1] }
 0x575   : > { %v11794_v8 = vpop.permute.xlu2 %11793  ;;  %11200 = vmatmul.msk.f32.vlgmr.msra.gmra.mxu2 %vm1195_vm1, %v14641_v15  ;;  %v7592_v15 = vrot.slane %v6683_v20, 5  ;;  %v7595_v56 = vrot.slane %v14700_v55, 5  ;;  %v7606_v20 = vrot.slane %v14723_v7, 5  ;;  %v6828_v60 = vor.u32 %v6827_v3, %v6824_v29 }
 0x576   : > { %v6809_v25 = vrot.slane %v6807_v43, 5  ;;  %v6813_v14 = vrot.slane %v6811_v39, 4  ;;  %v6347_v52 = vor.u32 %v6345_v32, %v14702_v24  ;;  %v11795_v54 = vunpack.i.l.bf16 %v11794_v8  ;;  %v5328_v16 = vpop.xlane.xlu0 %5327 }
 0x577   : > { %v5364_v2 = vsub.f32 %v14517_v26, %v5328_v16  ;;  %v11796_v62 = vunpack.i.h.bf16 %v11794_v8  ;;  %v6819_v45 = vrot.slane %v6817_v6, 5  ;;  %v7593_v21 = vsel %vm12401_vm14, %v11308_v49, %v7592_v15  ;;  %v5801_v49 = vpop.f32.mrf.mxu3 }
 0x578   : > { %v6814_v36 = vor.u32 %v6813_v14, %v6809_v25  ;;  %v11881_v50 = vpop.eup %11880  ;;  %v6607_v35 = vsel %vm14454_vm4, %v6347_v52, %v6606_v17  ;;  %6043 = vmatpush.msrb.mxu1 %v11795_v54  ;;  %v6810_v26 = vsel %vm12141_vm8, %v6805_v4, %v6809_v25  ;;  %v7594_v47 = vrot.slane %v7592_v15, 4  ;;  %v11680_v52 = vld [vmem:[#allocation3 + $0x30] sm:$0xff] }
 0x579   : > { %v11883_v51 = vpop.eup %11882  ;;  %6608 = vst [vmem:[#allocation3 + $0x54] sm:$0xf] %v6607_v35  ;;  %v5425_v58 = vmul.f32 1.442695, %v5364_v2  ;;  %v5506_v40 = vsel %vm1195_vm1, %v11881_v50, 0.0  ;;  %v7117_v13 = vunpack.c.l.b16 %v6810_v26  ;;  %v6838_v43 = vor.u32 %v6837_v9, %v14721_v19 }
 0x57a   : > { %v6815_v33 = vrot.slane %v6814_v36, 4  ;;  %6044 = vmatpush.msrb.mxu1 %v11796_v62  ;;  %5507 = vadd.xlane.f32.xlu0 %v5506_v40  ;;  %v11310_v39 = vrot.slane %v7526_v11, 9  ;;  %v6841_v32 = vshll.u32 %v14673_v30, 16  ;;  %v7596_v6 = vsel %vm12401_vm14, %v7594_v47, %v7595_v56  ;;  %v6686_v9 = vld [vmem:[#allocation3 + $0x3c] sm:$0xf] }
 0x57b   : > { %11884 = vpow2.f32 %v5425_v58  ;;  %11204 = vmatmul.msk.f32.vlgmr.msrb.gmra.mxu1 %vm1195_vm1, %v11883_v51  ;;  %v7689_v27 = vunpack.c.l.b16 %v7593_v21  ;;  %v7690_v17 = vunpack.c.l.b16 %v7596_v6  ;;  %v7608_v8 = vrot.slane %v7606_v20, 4  ;;  %v14764_v21 = vpop.f32.mrf.mxu1 }
 0x57c   : > { %v6820_v46 = vsel %vm12141_vm8, %v6815_v33, %v6819_v45  ;;  %7439 = vmatpush.bf16.msra.mxu1 %v7430_v37  ;;  %v7607_v55 = vsel %vm12401_vm14, %v11310_v39, %v7606_v20  ;;  %v7609_v4 = vrot.slane %v14730_v10, 5  ;;  %v5515_v14 = vsel %vm1195_vm1, %v11883_v51, 0.0  ;;  %v11661_v51 = vld [vmem:[#allocation3] sm:$0xff] }
 0x57d   : > { %v7118_v48 = vunpack.c.l.b16 %v6820_v46  ;;  %11201 = vmatmul.msk.f32.gmra.mxu2 %vm1195_vm1, %v11881_v50  ;;  %v6839_v54 = vrot.slane %v6838_v43, 4  ;;  %v14745_v16 = vpack.c.b16 %v7690_v17, %v7689_v27  ;;  %v7693_v2 = vunpack.c.l.b16 %v7607_v55 }
 0x57e   : > { %v5472_v42 = vpop.xlane.xlu0 %5471  ;;  %v7610_v41 = vsel %vm12401_vm14, %v7608_v8, %v7609_v4  ;;  %v6843_v37 = vrot.slane %v6841_v32, 5  ;;  %v6829_v50 = vrot.slane %v6828_v60, 4  ;;  %v6855_v40 = vshll.u32 %v14723_v7, 16 }
 0x57f   : > { %v7146_v44 = vpack.c.b16 %v7118_v48, %v7117_v13  ;;  %11886 = vrcp.f32 %v5472_v42  ;;  %v7694_v36 = vunpack.c.l.b16 %v7610_v41  ;;  %v6859_v26 = vshrl.u32 %v14723_v7, 16  ;;  %v6610_v42 = vld [vmem:[#allocation3 + $0x5c] sm:$0x1] }
 0x580   : > { %v6844_v15 = vsel %vm12141_vm8, %v6839_v54, %v6843_v37  ;;  %v6834_v58 = vsel %vm12141_vm8, %v6829_v50, %v14721_v19  ;;  %v5332_v46 = vsel %vm1195_vm1, %v14572_v5, -inf  ;;  %v6846_v47 = vshrl.u32 %v6686_v9, 16 }
 0x581   : > { %11212 = vmatmul.msk.bf16.gmra.mxu3 %vm7159_vm5, %v7146_v44  ;;  %v11885_v25 = vpop.eup %11884  ;;  %v14753_v35 = vpack.c.b16 %v7694_v36, %v7693_v2  ;;  %v7120_v11 = vunpack.c.l.b16 %v6844_v15  ;;  %v7119_v48 = vunpack.c.l.b16 %v6834_v58  ;;  %v6849_v19 = vshll.u32 %v6686_v9, 16 }
 0x582   : > { %5516 = vadd.xlane.f32.xlu0 %v5515_v14  ;;  %v5518_v30 = vsel %vm1195_vm1, %v11885_v25, 0.0  ;;  %v6857_v29 = vrot.slane %v6855_v40, 5  ;;  %v6861_v3 = vrot.slane %v6859_v26, 4  ;;  %v6348_v43 = vrot.slane %v14702_v24, 4 }
 0x583   : > { %5519 = vadd.xlane.f32.xlu2 %v5518_v30  ;;  %11205 = vmatmul.msk.f32.gmra.mxu1 %vm1195_vm1, %v11885_v25  ;;  %v7147_v44 = vpack.c.b16 %v7120_v11, %v7119_v48  ;;  %v6848_v17 = vrot.slane %v6846_v47, 4  ;;  %v6851_v55 = vrot.slane %v6849_v19, 5  ;;  %v6865_v24 = vshll.u32 %v14730_v10, 16  ;;  %v11681_v30 = vld [vmem:[#allocation3 + $0x3c] sm:$0xff] }
 0x584   : > { %11406 = vmatmul.msk.bf16.gmra.mxu0 %vm7159_vm5, %v11680_v52  ;;  %v6862_v8 = vor.u32 %v6861_v3, %v6857_v29  ;;  %v14775_v52 = vpop.f32.mrf.mxu3  ;;  %v11797_v26 = vpack.i.bf16 %v14074_v57, %v14080_v59  ;;  %v6624_v57 = vld [vmem:[#allocation3 + $0x74] sm:$0x1]  ;;  %v7528_v59 = vld [vmem:[#allocation3 + $0x54] sm:$0xe] }
 0x585   : > { %v11887_v63 = vpop.eup %11886  ;;  %v6852_v54 = vor.u32 %v6851_v55, %v6848_v17  ;;  %v6867_v50 = vrot.slane %v6865_v24, 5 }
 0x586   : > { %v6132_v62 = vmul.f32 %v11887_v63, %v5769_v1  ;;  %v5475_v45 = vpop.xlane.xlu0 %5474  ;;  %v6863_v41 = vrot.slane %v6862_v8, 4  ;;  %v5839_v63 = vpop.f32.mrf.mxu1  ;;  %v6613_v1 = vld [vmem:[#allocation3 + $0x60] sm:$0xf] }
 0x587   : > { %11888 = vrcp.f32 %v5475_v45  ;;  %v6853_v15 = vrot.slane %v6852_v54, 4 }
 0x588   : > { %v6220_v33 = vpack.c.bf16 %v6132_v62, %v6132_v62 }
 0x589   : > { %v6858_v9 = vsel %vm12141_vm8, %v6853_v15, %v6857_v29 }
 0x58a   : > { %v6350_v13 = vshrl.u32 %v6220_v33, 16  ;;  %5333 = vmax.xlane.f32.xlu0 %v5332_v46  ;;  %v6353_v7 = vshll.u32 %v6220_v33, 16  ;;  %v11662_v33 = vld [vmem:[#allocation3 + $0xc] sm:$0xff]  ;;  %v7121_v47 = vunpack.c.l.b16 %v6858_v9 }
 0x58b   : > { %11289 = vmatmul.msk.bf16.vlgmr.msra.gmra.mxu1 %vm7159_vm5, %v11661_v51  ;;  %v6868_v51 = vsel %vm12141_vm8, %v6863_v41, %v6867_v50 }
 0x58c   : > { %v6352_v56 = vrot.slane %v6350_v13, 7  ;;  %v7122_v11 = vunpack.c.l.b16 %v6868_v51  ;;  %v14794_v13 = vpop.f32.mrf.mxu3 }
 0x58d   : > { %v11889_v20 = vpop.eup %11888 }
 0x58e   : > { %v6355_v39 = vor.u32 %v6353_v7, %v6352_v56  ;;  %v6357_v32 = vrot.slane %v6352_v56, 4  ;;  %v6133_v6 = vmul.f32 %v11889_v20, %v5801_v49  ;;  %v5484_v27 = vpop.xlane.xlu0 %5483  ;;  %v7148_v56 = vpack.c.b16 %v7122_v11, %v7121_v47  ;;  %v6690_v11 = vld [vmem:[#allocation3 + $0x54] sm:$0xf] }
 0x58f   : > { %11890 = vrcp.f32 %v5484_v27 }
 0x590   : > { %v6356_v4 = vsel %vm12206_vm10, %v6348_v43, %v6355_v39  ;;  %v6611_v25 = vsel %vm14491_vm6, %v6357_v32, %v6610_v42  ;;  %v6221_v14 = vpack.c.bf16 %v6133_v6, %v6133_v6  ;;  %v6688_v6 = vld [vmem:[#allocation3 + $0x48] sm:$0xf] }
 0x591   : > { %11213 = vmatmul.msk.bf16.gmra.mxu3 %vm7159_vm5, %v7147_v44  ;;  %6609 = vst.msk [vmem:[#allocation3 + $0x58] sm:$0xf] %vm6151_vm0, %v6356_v4  ;;  %v11312_v44 = vrot.slane %v7528_v59, 9  ;;  %v6870_v24 = vshrl.u32 %v6688_v6, 16 }
 0x592   : > { %6612 = vst [vmem:[#allocation3 + $0x5c] sm:$0x1] %v6611_v25  ;;  %v6359_v60 = vshrl.u32 %v6221_v14, 16  ;;  %v6362_v36 = vshll.u32 %v6221_v14, 16 }
 0x593   : > { %v6872_v15 = vrot.slane %v6870_v24, 4 }
 0x594   : > { %v14777_v2 = vrot.slane %v6359_v60, 7  ;;  %11407 = vmatmul.msk.bf16.gmra.mxu0 %vm7159_vm5, %v11681_v30  ;;  %v5909_v14 = vpop.f32.mrf.mxu3  ;;  %v6873_v60 = vshll.u32 %v6688_v6, 16 }
 0x595   : > { %v11891_v37 = vpop.eup %11890 }
 0x596   : > { %v6364_v62 = vor.u32 %v6362_v36, %v14777_v2  ;;  %v6136_v45 = vmul.f32 %v11891_v37, %v5839_v63  ;;  %v14781_v10 = vpop.xlane.xlu0 %5489  ;;  %v6875_v51 = vrot.slane %v6873_v60, 5 }
 0x598   : > { %v6614_v58 = vsel %vm14454_vm4, %v6364_v62, %v6613_v1  ;;  %v14787_v40 = vpack.c.bf16 %v6136_v45, %v6136_v45  ;;  %v14800_v19 = vld [vmem:[#allocation3 + $0x58] sm:$0xf]  ;;  %v6603_v62 = vld [vmem:[#allocation3 + $0x50] sm:$0x1] }
 0x599   : > { %6615 = vst [vmem:[#allocation3 + $0x60] sm:$0xf] %v6614_v58  ;;  %v14803_v7 = vld [vmem:[#allocation3 + $0x5c] sm:$0x1]  ;;  %v7620_v20 = vrot.slane %v14800_v19, 5  ;;  %v6331_v58 = vrot.slane %v14691_v38, 4 }
 0x59a   : > { %v6384_v49 = vshrl.u32 %v14787_v40, 16  ;;  %v5466_v46 = vpop.xlane.xlu1 %5465  ;;  %v7623_v55 = vrot.slane %v14803_v7, 5  ;;  %v11663_v45 = vld [vmem:[#allocation3 + $0x18] sm:$0xff]  ;;  %v6638_v38 = vld [vmem:[#allocation3 + $0x8c] sm:$0x1] }
 0x59b   : > { %11892 = vrcp.f32 %v5466_v46  ;;  %11798 = vrot.lane.b32.xlu2 %v11797_v26, %s11987_s10  ;;  %11290 = vmatmul.msk.bf16.gmra.mxu1 %vm7159_vm5, %v11662_v33  ;;  %v7621_v27 = vsel %vm12401_vm14, %v11312_v44, %v7620_v20  ;;  %v7622_v17 = vrot.slane %v7620_v20, 4  ;;  %v6894_v20 = vshrl.u32 %v6690_v11, 16 }
 0x59c   : > { %v14798_v48 = vrot.slane %v6384_v49, 7  ;;  %v7697_v30 = vunpack.c.l.b16 %v7621_v27  ;;  %v6620_v27 = vld [vmem:[#allocation3 + $0x6c] sm:$0xf] }
 0x59d   : > { %v7624_v4 = vsel %vm12401_vm14, %v7622_v17, %v7623_v55 }
 0x59e   : > { %v6391_v29 = vrot.slane %v14798_v48, 4  ;;  %v5496_v3 = vpop.xlane.xlu0 %5495  ;;  %v7698_v54 = vunpack.c.l.b16 %v7624_v4 }
 0x59f   : > { %11894 = vrcp.f32 %v5496_v3  ;;  %v6876_v3 = vor.u32 %v6875_v51, %v6872_v15 }
 0x5a0   : > { %v6625_v42 = vsel %vm14491_vm6, %v6391_v29, %v6624_v57  ;;  %v14815_v36 = vpack.c.b16 %v7698_v54, %v7697_v30  ;;  %v6365_v30 = vrot.slane %v14777_v2, 4 }
 0x5a1   : > { %11214 = vmatmul.msk.bf16.gmra.mxu3 %vm7159_vm5, %v7148_v56  ;;  %v11893_v43 = vpop.eup %11892  ;;  %6626 = vst [vmem:[#allocation3 + $0x74] sm:$0x1] %v6625_v42  ;;  %v6897_v42 = vshll.u32 %v6690_v11, 16  ;;  %v14834_v55 = vrot.slane %v6876_v3, 4 }
 0x5a2   : > { %v6130_v39 = vmul.f32 %v11893_v43, %v14749_v12  ;;  %v5481_v32 = vpop.xlane.xlu1 %5480 }
 0x5a3   : > { %11896 = vrcp.f32 %v5481_v32  ;;  %v14838_v4 = vrot.slane %v6897_v42, 5 }
 0x5a4   : > { %v6218_v8 = vpack.c.bf16 %v6130_v39, %v6130_v39  ;;  %v6387_v39 = vshll.u32 %v14787_v40, 16 }
 0x5a5   : > { %v11895_v25 = vpop.eup %11894 }
 0x5a6   : > { %v6333_v12 = vshrl.u32 %v6218_v8, 16  ;;  %v6140_v41 = vmul.f32 %v11895_v25, %v5909_v14  ;;  %v6336_v63 = vshll.u32 %v6218_v8, 16  ;;  %v14836_v8 = vrot.slane %v6894_v20, 4 }
 0x5a7   : > { %v6389_v25 = vor.u32 %v6387_v39, %v14798_v48 }
 0x5a8   : > { %v6335_v37 = vrot.slane %v6333_v12, 7  ;;  %v14817_v1 = vpack.c.bf16 %v6140_v41, %v6140_v41  ;;  %v6903_v12 = vshll.u32 %v14800_v19, 16  ;;  %v6907_v41 = vshrl.u32 %v14800_v19, 16 }
 0x5a9   : > { %v11897_v50 = vpop.eup %11896 }
 0x5aa   : > { %v6338_v26 = vor.u32 %v6336_v63, %v6335_v37  ;;  %v6340_v33 = vrot.slane %v6335_v37, 4  ;;  %v6418_v9 = vshrl.u32 %v14817_v1, 16  ;;  %v5487_v49 = vpop.xlane.xlu1 %5486  ;;  %v6135_v46 = vmul.f32 %v11897_v50, %v14764_v21 }
 0x5ab   : > { %11291 = vmatmul.msk.bf16.gmra.mxu1 %vm7159_vm5, %v11663_v45  ;;  %11898 = vrcp.f32 %v5487_v49  ;;  %v6421_v20 = vshll.u32 %v14817_v1, 16 }
 0x5ac   : > { %v6339_v47 = vsel %vm12206_vm10, %v6331_v58, %v6338_v26  ;;  %v6604_v57 = vsel %vm14491_vm6, %v6340_v33, %v6603_v62  ;;  %v14827_v59 = vrot.slane %v6418_v9, 7  ;;  %v6223_v29 = vpack.c.bf16 %v6135_v46, %v6135_v46  ;;  %v5502_v51 = vpop.xlane.xlu0 %5501 }
 0x5ad   : > { %6602 = vst.msk [vmem:[#allocation3 + $0x4c] sm:$0xf] %vm6151_vm0, %v6339_v47 }
 0x5ae   : > { %6605 = vst [vmem:[#allocation3 + $0x50] sm:$0x1] %v6604_v57  ;;  %v6425_v56 = vrot.slane %v14827_v59, 4  ;;  %v5478_v21 = vpop.xlane.xlu2 %5477  ;;  %v6376_v44 = vshrl.u32 %v6223_v29, 16  ;;  %v6379_v6 = vshll.u32 %v6223_v29, 16  ;;  %v14859_v57 = vrot.slane %v6903_v12, 5 }
 0x5af   : > { %11900 = vrcp.f32 %v5478_v21  ;;  %v11664_v29 = vld [vmem:[#allocation3 + $0x24] sm:$0xff]  ;;  %v6423_v1 = vor.u32 %v6421_v20, %v14827_v59 }
 0x5b0   : > { %v6639_v43 = vsel %vm14491_vm6, %v6425_v56, %v6638_v38  ;;  %v6378_v32 = vrot.slane %v6376_v44, 7  ;;  %v14863_v56 = vrot.slane %v6907_v41, 4  ;;  %v6617_v12 = vld [vmem:[#allocation3 + $0x68] sm:$0x1] }
 0x5b1   : > { %6640 = vst [vmem:[#allocation3 + $0x8c] sm:$0x1] %v6639_v43  ;;  %v11899_v60 = vpop.eup %11898 }
 0x5b2   : > { %v5493_v17 = vpop.xlane.xlu1 %5492  ;;  %v6381_v14 = vor.u32 %v6379_v6, %v6378_v32  ;;  %v6382_v24 = vrot.slane %v6378_v32, 4 }
 0x5b3   : > { %11902 = vrcp.f32 %v5493_v17 }
 0x5b4   : > { %v11682_v40 = vld [vmem:[#allocation3 + $0x48] sm:$0xff]  ;;  %v6390_v63 = vsel %vm12206_vm10, %v6382_v24, %v6389_v25  ;;  %v6621_v48 = vsel %vm14454_vm4, %v6381_v14, %v6620_v27  ;;  %11904 = vrcp.f32 %v14781_v10 }
 0x5b5   : > { %v14842_v54 = vld [vmem:[#allocation3 + $0x4c] sm:$0xf]  ;;  %v11901_v37 = vpop.eup %11900  ;;  %v5871_v50 = vpop.f32.mrf.mxu2  ;;  %v6715_v62 = vld [vmem:[#allocation3 + $0x50] sm:$0x1]  ;;  %6622 = vst [vmem:[#allocation3 + $0x6c] sm:$0xf] %v6621_v48  ;;  %11408 = vmatmul.msk.bf16.gmra.mxu0 %vm7159_vm5, %v11682_v40 }
 0x5b6   : > { %v6879_v45 = vshll.u32 %v14842_v54, 16  ;;  %v6883_v15 = vshrl.u32 %v14842_v54, 16  ;;  %v6134_v58 = vmul.f32 %v11901_v37, %v14775_v52  ;;  %v6137_v19 = vmul.f32 %v11899_v60, %v5871_v50  ;;  %v5511_v26 = vpop.xlane.xlu2 %5510  ;;  %6623 = vst.msk [vmem:[#allocation3 + $0x70] sm:$0xf] %vm6151_vm0, %v6390_v63  ;;  %v6011_v48 = vpop.f32.mrf.mxu3 }
 0x5b7   : > { %v7613_v33 = vrot.slane %v14842_v54, 5  ;;  %11906 = vrcp.f32 %v5511_v26  ;;  %v5941_v9 = vpop.f32.mrf.mxu1  ;;  %v6889_v11 = vshll.u32 %v6715_v62, 16  ;;  %v6913_v52 = vshll.u32 %v14803_v7, 16 }
 0x5b8   : > { %v14857_v49 = vrot.slane %v6879_v45, 5  ;;  %v6885_v46 = vrot.slane %v6883_v15, 4  ;;  %v6222_v47 = vpack.c.bf16 %v6134_v58, %v6134_v58  ;;  %v6225_v10 = vpack.c.bf16 %v6137_v19, %v6137_v19  ;;  %v6627_v15 = vld [vmem:[#allocation3 + $0x78] sm:$0xf] }
 0x5b9   : > { %v11903_v38 = vpop.eup %11902  ;;  %11908 = vrcp.f32 %v5502_v51  ;;  %v7615_v21 = vrot.slane %v7613_v33, 4  ;;  %v6891_v6 = vrot.slane %v6889_v11, 5  ;;  %v7616_v27 = vrot.slane %v6715_v62, 5 }
 0x5ba   : > { %v6886_v3 = vor.u32 %v6885_v46, %v14857_v49  ;;  %v6367_v42 = vshrl.u32 %v6222_v47, 16  ;;  %v6139_v44 = vmul.f32 %v11903_v38, %v14794_v13  ;;  %v6393_v43 = vshrl.u32 %v6225_v10, 16  ;;  %v5499_v39 = vpop.xlane.xlu1 %5498  ;;  %v11905_v17 = vpop.eup %11904 }
 0x5bb   : > { %11910 = vrcp.f32 %v5499_v39  ;;  %11292 = vmatmul.msk.bf16.gmra.mxu1 %vm7159_vm5, %v11664_v29  ;;  %v6370_v14 = vshll.u32 %v6222_v47, 16  ;;  %v6396_v41 = vshll.u32 %v6225_v10, 16  ;;  %v6882_v37 = vsel %vm12141_vm8, %v14834_v55, %v14857_v49  ;;  %v6634_v29 = vld [vmem:[#allocation3 + $0x84] sm:$0xf] }
 0x5bc   : > { %v6887_v32 = vrot.slane %v6886_v3, 4  ;;  %v6369_v25 = vrot.slane %v6367_v42, 7  ;;  %v6227_v24 = vpack.c.bf16 %v6139_v44, %v6139_v44  ;;  %v14870_v60 = vrot.slane %v6393_v43, 7 }
 0x5bd   : > { %v11907_v40 = vpop.eup %11906  ;;  %v5874_v13 = vpop.f32.mrf.mxu2  ;;  %v14879_v63 = vsel %vm12401_vm14, %v7615_v21, %v7616_v27 }
 0x5be   : > { %v6372_v50 = vor.u32 %v6370_v14, %v6369_v25  ;;  %v6374_v62 = vrot.slane %v6369_v25, 4  ;;  %v6410_v45 = vshrl.u32 %v6227_v24, 16  ;;  %v6892_v59 = vsel %vm12141_vm8, %v6887_v32, %v6891_v6 }
 0x5bf   : > { %v11909_v51 = vpop.eup %11908  ;;  %v6413_v58 = vshll.u32 %v6227_v24, 16  ;;  %v6398_v19 = vor.u32 %v6396_v41, %v14870_v60  ;;  %v6145_v26 = vmul.f32 %v11907_v40, %v6011_v48  ;;  %v6138_v46 = vmul.f32 %v11905_v17, %v5874_v13  ;;  %v5944_v11 = vpop.f32.mrf.mxu1  ;;  %v6655_v24 = vld [vmem:[#allocation3 + $0xa8] sm:$0xf]  ;;  %v11683_v41 = vld [vmem:[#allocation3 + $0x54] sm:$0xff] }
 0x5c0   : > { %v6373_v55 = vsel %vm12206_vm10, %v6365_v30, %v6372_v50  ;;  %v6618_v49 = vsel %vm14491_vm6, %v6374_v62, %v6617_v12  ;;  %v6412_v47 = vrot.slane %v6410_v45, 7  ;;  %v6142_v10 = vmul.f32 %v11909_v51, %v5944_v11 }
 0x5c1   : > { %v11911_v38 = vpop.eup %11910  ;;  %6616 = vst.msk [vmem:[#allocation3 + $0x64] sm:$0xf] %vm6151_vm0, %v6373_v55  ;;  %v6628_v3 = vsel %vm14454_vm4, %v6398_v19, %v6627_v15  ;;  %v6233_v21 = vpack.c.bf16 %v6145_v26, %v6145_v26  ;;  %v6226_v20 = vpack.c.bf16 %v6138_v46, %v6138_v46  ;;  %v7124_v42 = vunpack.c.l.b16 %v6892_v59 }
 0x5c2   : > { %6619 = vst [vmem:[#allocation3 + $0x68] sm:$0x1] %v6618_v49  ;;  %v6415_v2 = vor.u32 %v6413_v58, %v6412_v47  ;;  %v6416_v44 = vrot.slane %v6412_v47, 4  ;;  %v6141_v43 = vmul.f32 %v11911_v38, %v5941_v9  ;;  %v6230_v30 = vpack.c.bf16 %v6142_v10, %v6142_v10  ;;  %v14893_v39 = vpop.xlane.xlu1 %5504  ;;  %v6641_v49 = vld [vmem:[#allocation3 + $0x90] sm:$0xf] }
 0x5c3   : > { %6629 = vst [vmem:[#allocation3 + $0x78] sm:$0xf] %v6628_v3  ;;  %v6461_v32 = vshrl.u32 %v6233_v21, 16  ;;  %v6464_v6 = vshll.u32 %v6233_v21, 16  ;;  %v6401_v27 = vshrl.u32 %v6226_v20, 16  ;;  %v7123_v17 = vunpack.c.l.b16 %v6882_v37  ;;  %v11665_v10 = vld [vmem:[#allocation3 + $0x30] sm:$0xff] }
 0x5c4   : > { %v6424_v25 = vsel %vm12206_vm10, %v6416_v44, %v6423_v1  ;;  %v6635_v14 = vsel %vm14454_vm4, %v6415_v2, %v6634_v29  ;;  %v6229_v40 = vpack.c.bf16 %v6141_v43, %v6141_v43  ;;  %v6435_v12 = vshrl.u32 %v6230_v30, 16  ;;  %v6631_v37 = vld [vmem:[#allocation3 + $0x80] sm:$0x1] }
 0x5c5   : > { %6636 = vst [vmem:[#allocation3 + $0x84] sm:$0xf] %v6635_v14  ;;  %v14899_v9 = vrot.slane %v6461_v32, 7  ;;  %v6403_v13 = vrot.slane %v6401_v27, 7  ;;  %v6404_v48 = vshll.u32 %v6226_v20, 16  ;;  %v7149_v50 = vpack.c.b16 %v7124_v42, %v7123_v17  ;;  %11409 = vmatmul.msk.bf16.gmra.mxu0 %vm7159_vm5, %v11683_v41  ;;  %v6014_v32 = vpop.f32.mrf.mxu3 }
 0x5c6   : > { %6637 = vst.msk [vmem:[#allocation3 + $0x88] sm:$0xf] %vm6151_vm0, %v6424_v25  ;;  %v6427_v62 = vshrl.u32 %v6229_v40, 16  ;;  %v6437_v45 = vrot.slane %v6435_v12, 7  ;;  %v6910_v1 = vor.u32 %v14863_v56, %v14859_v57  ;;  %v6399_v15 = vrot.slane %v14870_v60, 4 }
 0x5c7   : > { %v6466_v59 = vor.u32 %v6464_v6, %v14899_v9  ;;  %v6406_v51 = vor.u32 %v6404_v48, %v6403_v13  ;;  %v6408_v58 = vrot.slane %v6403_v13, 4  ;;  %11215 = vmatmul.msk.bf16.gmra.mxu3 %vm7159_vm5, %v7149_v50  ;;  %v6430_v26 = vshll.u32 %v6229_v40, 16  ;;  %v6645_v60 = vld [vmem:[#allocation3 + $0x98] sm:$0x1]  ;;  %v6692_v27 = vld [vmem:[#allocation3 + $0x60] sm:$0xf] }
 0x5c8   : > { %v6429_v19 = vrot.slane %v6427_v62, 7  ;;  %v6438_v46 = vshll.u32 %v6230_v30, 16  ;;  %v6442_v11 = vrot.slane %v6437_v45, 4  ;;  %v6900_v38 = vor.u32 %v14838_v4, %v14836_v8  ;;  %v14918_v2 = vld [vmem:[#allocation3 + $0x64] sm:$0xf] }
 0x5c9   : > { %v6656_v55 = vsel %vm14454_vm4, %v6466_v59, %v6655_v24  ;;  %v6407_v47 = vsel %vm12206_vm10, %v6399_v15, %v6406_v51  ;;  %v6632_v56 = vsel %vm14491_vm6, %v6408_v58, %v6631_v37  ;;  %v6911_v42 = vrot.slane %v6910_v1, 4  ;;  %v14937_v59 = vld [vmem:[#allocation3 + $0x68] sm:$0x1] }
 0x5ca   : > { %6657 = vst [vmem:[#allocation3 + $0xa8] sm:$0xf] %v6656_v55  ;;  %v6432_v29 = vor.u32 %v6430_v26, %v6429_v19  ;;  %v6433_v3 = vrot.slane %v6429_v19, 4  ;;  %v6440_v21 = vor.u32 %v6438_v46, %v6437_v45  ;;  %v5514_v20 = vpop.xlane.xlu1 %5513  ;;  %v6646_v4 = vsel %vm14491_vm6, %v6442_v11, %v6645_v60  ;;  %v11684_v45 = vld [vmem:[#allocation3 + $0x60] sm:$0xff]  ;;  %v7527_v26 = vld [vmem:[#allocation3 + $0x48] sm:$0xe] }
 0x5cb   : > { %6630 = vst.msk [vmem:[#allocation3 + $0x7c] sm:$0xf] %vm6151_vm0, %v6407_v47  ;;  %11912 = vrcp.f32 %v5514_v20  ;;  %11293 = vmatmul.msk.bf16.gmra.mxu1 %vm7159_vm5, %v11665_v10  ;;  %v6915_v43 = vrot.slane %v6913_v52, 5  ;;  %v6901_v30 = vrot.slane %v6900_v38, 4  ;;  %v6927_v17 = vshll.u32 %v14918_v2, 16 }
 0x5cc   : > { %v6642_v44 = vsel %vm14454_vm4, %v6432_v29, %v6641_v49  ;;  %6633 = vst [vmem:[#allocation3 + $0x80] sm:$0x1] %v6632_v56  ;;  %v6441_v8 = vsel %vm12206_vm10, %v6433_v3, %v6440_v21  ;;  %v6931_v25 = vshrl.u32 %v14918_v2, 16  ;;  %v6918_v24 = vshrl.u32 %v6692_v27, 16  ;;  %v6694_v49 = vld [vmem:[#allocation3 + $0x6c] sm:$0xf] }
 0x5cd   : > { %6643 = vst [vmem:[#allocation3 + $0x90] sm:$0xf] %v6642_v44  ;;  %v6916_v6 = vsel %vm12141_vm8, %v6911_v42, %v6915_v43  ;;  %v6906_v14 = vsel %vm12141_vm8, %v6901_v30, %v14859_v57  ;;  %v6921_v40 = vshll.u32 %v6692_v27, 16  ;;  %v6929_v13 = vrot.slane %v6927_v17, 5  ;;  %v14941_v46 = vpop.f32.mrf.mxu3  ;;  %v6659_v47 = vld [vmem:[#allocation3 + $0xb0] sm:$0x1] }
 0x5ce   : > { %6644 = vst.msk [vmem:[#allocation3 + $0x94] sm:$0xf] %vm6151_vm0, %v6441_v8  ;;  %v7126_v52 = vunpack.c.l.b16 %v6916_v6  ;;  %v6933_v48 = vrot.slane %v6931_v25, 4  ;;  %v7125_v50 = vunpack.c.l.b16 %v6906_v14  ;;  %v6920_v51 = vrot.slane %v6918_v24, 4  ;;  %v11666_v56 = vld [vmem:[#allocation3 + $0x3c] sm:$0xff] }
 0x5cf   : > { %6647 = vst [vmem:[#allocation3 + $0x98] sm:$0x1] %v6646_v4  ;;  %v6923_v58 = vrot.slane %v6921_v40, 5  ;;  %v6937_v55 = vshll.u32 %v14937_v59, 16  ;;  %v11311_v10 = vrot.slane %v7527_v26, 9  ;;  %v6467_v38 = vrot.slane %v14899_v9, 4 }
 0x5d0   : > { %v7150_v1 = vpack.c.b16 %v7126_v52, %v7125_v50  ;;  %v6934_v19 = vor.u32 %v6933_v48, %v6929_v13  ;;  %v6695_v20 = vld [vmem:[#allocation3 + $0x70] sm:$0xf]  ;;  %v6942_v42 = vshrl.u32 %v6694_v49, 16  ;;  %v6945_v9 = vshll.u32 %v6694_v49, 16  ;;  %v7529_v40 = vld [vmem:[#allocation3 + $0x60] sm:$0xe] }
 0x5d1   : > { %v11913_v7 = vpop.eup %11912  ;;  %v6924_v60 = vor.u32 %v6923_v58, %v6920_v51  ;;  %v7614_v44 = vsel %vm12401_vm14, %v11311_v10, %v7613_v33  ;;  %v6939_v43 = vrot.slane %v6937_v55, 5  ;;  %v6951_v6 = vshll.u32 %v6695_v20, 16  ;;  %v6718_v58 = vld [vmem:[#allocation3 + $0x74] sm:$0x1] }
 0x5d2   : > { %v6146_v12 = vmul.f32 %v11913_v7, %v6014_v32  ;;  %v5331_v41 = vpop.xlane.xlu1 %5330  ;;  %v6935_v21 = vrot.slane %v6934_v19, 4  ;;  %v6955_v27 = vshrl.u32 %v6695_v20, 16  ;;  %v7695_v17 = vunpack.c.l.b16 %v7614_v44  ;;  %v7531_v44 = vld [vmem:[#allocation3 + $0x78] sm:$0xe] }
 0x5d3   : > { %v5365_v62 = vsub.f32 %v14558_v34, %v5331_v41  ;;  %v6925_v32 = vrot.slane %v6924_v60, 4  ;;  %v6944_v14 = vrot.slane %v6942_v42, 4  ;;  %v6947_v7 = vrot.slane %v6945_v9, 5  ;;  %v6696_v60 = vld [vmem:[#allocation3 + $0x78] sm:$0xf] }
 0x5d4   : > { %v6234_v37 = vpack.c.bf16 %v6146_v12, %v6146_v12  ;;  %v6940_v33 = vsel %vm12141_vm8, %v6935_v21, %v6939_v43  ;;  %v7696_v52 = vunpack.c.l.b16 %v14879_v63  ;;  %v6953_v41 = vrot.slane %v6951_v6, 5  ;;  %v6719_v6 = vld [vmem:[#allocation3 + $0x80] sm:$0x1] }
 0x5d5   : > { %v5427_v15 = vmul.f32 1.442695, %v5365_v62  ;;  %11410 = vmatmul.msk.bf16.gmra.mxu0 %vm7159_vm5, %v11684_v45  ;;  %v6930_v25 = vsel %vm12141_vm8, %v6925_v32, %v6929_v13  ;;  %v7128_v24 = vunpack.c.l.b16 %v6940_v33  ;;  %v14964_v12 = vpop.f32.mrf.mxu3  ;;  %v6957_v48 = vrot.slane %v6955_v27, 4  ;;  %v7530_v62 = vld [vmem:[#allocation3 + $0x6c] sm:$0xe] }
 0x5d6   : > { %v6469_v57 = vshrl.u32 %v6234_v37, 16  ;;  %v6472_v34 = vshll.u32 %v6234_v37, 16  ;;  %v14966_v50 = vpack.c.b16 %v7696_v52, %v7695_v17  ;;  %v7127_v37 = vunpack.c.l.b16 %v6930_v25 }
 0x5d7   : > { %11216 = vmatmul.msk.bf16.gmra.mxu3 %vm7159_vm5, %v7150_v1  ;;  %11914 = vpow2.f32 %v5427_v15  ;;  %v7627_v45 = vrot.slane %v14918_v2, 5  ;;  %v11685_v1 = vld [vmem:[#allocation3 + $0x6c] sm:$0xff]  ;;  %v6948_v15 = vor.u32 %v6947_v7, %v6944_v14  ;;  %v11313_v51 = vrot.slane %v7529_v40, 9 }
 0x5d8   : > { %v6471_v11 = vrot.slane %v6469_v57, 7  ;;  %v7151_v13 = vpack.c.b16 %v7128_v24, %v7127_v37  ;;  %v11314_v57 = vrot.slane %v7530_v62, 9  ;;  %v7634_v19 = vrot.slane %v6695_v20, 5  ;;  %v6697_v20 = vld [vmem:[#allocation3 + $0x7c] sm:$0xf] }
 0x5d9   : > { %v6958_v63 = vor.u32 %v6957_v48, %v6953_v41  ;;  %v7628_v26 = vsel %vm12401_vm14, %v11313_v51, %v7627_v45  ;;  %v6949_v55 = vrot.slane %v6948_v15, 4  ;;  %v6961_v2 = vshll.u32 %v6718_v58, 16 }
 0x5da   : > { %v6474_v29 = vor.u32 %v6472_v34, %v6471_v11  ;;  %v6476_v3 = vrot.slane %v6471_v11, 4  ;;  %v7629_v11 = vrot.slane %v7627_v45, 4  ;;  %v7630_v34 = vrot.slane %v14937_v59, 5 }
 0x5db   : > { %11294 = vmatmul.msk.bf16.gmra.mxu1 %vm7159_vm5, %v11666_v56  ;;  %v11667_v56 = vld [vmem:[#allocation3 + $0x48] sm:$0xff]  ;;  %v7699_v10 = vunpack.c.l.b16 %v7628_v26  ;;  %v6959_v21 = vrot.slane %v6958_v63, 4  ;;  %v6966_v43 = vshrl.u32 %v6696_v60, 16  ;;  %v6954_v33 = vsel %vm12141_vm8, %v6949_v55, %v6953_v41  ;;  %v11686_v63 = vld [vmem:[#allocation3 + $0x78] sm:$0xff] }
 0x5dc   : > { %v6475_v8 = vsel %vm12206_vm10, %v6467_v38, %v6474_v29  ;;  %v6660_v4 = vsel %vm14491_vm6, %v6476_v3, %v6659_v47  ;;  %v7631_v49 = vsel %vm12401_vm14, %v7629_v11, %v7630_v34  ;;  %v7637_v47 = vrot.slane %v6718_v58, 5  ;;  %v6699_v26 = vld [vmem:[#allocation3 + $0x88] sm:$0xf] }
 0x5dd   : > { %v14954_v30 = vpop.eup %11914  ;;  %6658 = vst.msk [vmem:[#allocation3 + $0xac] sm:$0xf] %vm6151_vm0, %v6475_v8  ;;  %v7700_v38 = vunpack.c.l.b16 %v7631_v49  ;;  %v7635_v29 = vsel %vm12401_vm14, %v11314_v57, %v7634_v19  ;;  %v7636_v3 = vrot.slane %v7634_v19, 4  ;;  %v14983_v8 = vpop.f32.mrf.mxu3  ;;  %v6969_v27 = vshll.u32 %v6696_v60, 16 }
 0x5de   : > { %6661 = vst [vmem:[#allocation3 + $0xb0] sm:$0x1] %v6660_v4  ;;  %v5521_v54 = vsel %vm1195_vm1, %v14954_v30, 0.0  ;;  %v6963_v4 = vrot.slane %v6961_v2, 5  ;;  %v7701_v9 = vunpack.c.l.b16 %v7635_v29  ;;  %v6975_v17 = vshll.u32 %v6697_v20, 16 }
 0x5df   : > { %5522 = vadd.xlane.f32.xlu1 %v5521_v54  ;;  %v14979_v59 = vpack.c.b16 %v7700_v38, %v7699_v10  ;;  %v7638_v42 = vsel %vm12401_vm14, %v7636_v3, %v7637_v47  ;;  %v7641_v25 = vrot.slane %v6697_v20, 5  ;;  %v6979_v7 = vshrl.u32 %v6697_v20, 16 }
 0x5e0   : > { %v7702_v32 = vunpack.c.l.b16 %v7638_v42  ;;  %v6964_v14 = vsel %vm12141_vm8, %v6959_v21, %v6963_v4  ;;  %v11315_v24 = vrot.slane %v7531_v44, 9  ;;  %v7644_v62 = vrot.slane %v6719_v6, 5  ;;  %v11668_v42 = vld [vmem:[#allocation3 + $0x54] sm:$0xff] }
 0x5e1   : > { %v7643_v48 = vrot.slane %v7641_v25, 4  ;;  %v7129_v37 = vunpack.c.l.b16 %v6954_v33  ;;  %v7130_v45 = vunpack.c.l.b16 %v6964_v14  ;;  %v6971_v41 = vrot.slane %v6969_v27, 5 }
 0x5e2   : > { %v14989_v52 = vpack.c.b16 %v7702_v32, %v7701_v9  ;;  %v7642_v40 = vsel %vm12401_vm14, %v11315_v24, %v7641_v25  ;;  %v6977_v15 = vrot.slane %v6975_v17, 5  ;;  %v6981_v51 = vrot.slane %v6979_v7, 4 }
 0x5e3   : > { %v7645_v58 = vsel %vm12401_vm14, %v7643_v48, %v7644_v62  ;;  %11916 = vrcp.f32 %v14893_v39  ;;  %v7703_v57 = vunpack.c.l.b16 %v7642_v40  ;;  %v7152_v11 = vpack.c.b16 %v7130_v45, %v7129_v37 }
 0x5e4   : > { %v7704_v19 = vunpack.c.l.b16 %v7645_v58  ;;  %v6982_v10 = vor.u32 %v6981_v51, %v6977_v15  ;;  %v6999_v39 = vshll.u32 %v6699_v26, 16  ;;  %v7003_v38 = vshrl.u32 %v6699_v26, 16  ;;  %v11950_v26 = vld [vmem:[#allocation3 + $0x4] sm:$0xf] }
 0x5e5   : > { %11411 = vmatmul.msk.bf16.gmra.mxu0 %vm7159_vm5, %v11685_v1  ;;  %v6968_v1 = vrot.slane %v6966_v43, 4  ;;  %v14998_v47 = vpop.f32.mrf.mxu3  ;;  %v6985_v3 = vshll.u32 %v6719_v6, 16 }
 0x5e6   : > { %v14996_v49 = vpack.c.b16 %v7704_v19, %v7703_v57  ;;  %v6983_v32 = vrot.slane %v6982_v10, 4  ;;  %v15007_v33 = vrot.slane %v6999_v39, 5  ;;  %v15009_v27 = vrot.slane %v7003_v38, 4  ;;  %v7521_v38 = vld [vmem:[#allocation3] sm:$0xe] }
 0x5e7   : > { %11217 = vmatmul.msk.bf16.gmra.mxu3 %vm7159_vm5, %v7151_v13  ;;  %v6698_v13 = vld [vmem:[#allocation3 + $0x84] sm:$0xf]  ;;  %v6972_v60 = vor.u32 %v6971_v41, %v6968_v1  ;;  %v6987_v14 = vrot.slane %v6985_v3, 5 }
 0x5e8   : > { %v6990_v55 = vshrl.u32 %v6698_v13, 16  ;;  %v6993_v2 = vshll.u32 %v6698_v13, 16  ;;  %v7006_v13 = vor.u32 %v15009_v27, %v15007_v33  ;;  %v6662_v27 = vld [vmem:[#allocation3 + $0xb4] sm:$0xf] }
 0x5e9   : > { %v11917_v21 = vpop.eup %11916  ;;  %v6973_v9 = vrot.slane %v6972_v60, 4  ;;  %v6988_v37 = vsel %vm12141_vm8, %v6983_v32, %v6987_v14 }
 0x5ea   : > { %v15002_v44 = vrot.slane %v6990_v55, 4  ;;  %v15004_v4 = vrot.slane %v6993_v2, 5  ;;  %v6648_v55 = vld [vmem:[#allocation3 + $0x9c] sm:$0xf]  ;;  %v7132_v39 = vunpack.c.l.b16 %v6988_v37 }
 0x5eb   : > { %11295 = vmatmul.msk.bf16.gmra.mxu1 %vm7159_vm5, %v11667_v56  ;;  %v6978_v25 = vsel %vm12141_vm8, %v6973_v9, %v6977_v15  ;;  %v11321_v15 = vld [vmem:[%s16596_s2 + $0x8] sm:$0xf] }
 0x5ec   : > { %v6996_v45 = vor.u32 %v15004_v4, %v15002_v44  ;;  %v7131_v51 = vunpack.c.l.b16 %v6978_v25  ;;  %v6720_v4 = vld [vmem:[#allocation3 + $0x8c] sm:$0x1]  ;;  %v11305_v25 = vrot.slane %v7521_v38, 9 }
 0x5ed   : > { %v5508_v54 = vpop.xlane.xlu0 %5507  ;;  %v15013_v40 = vpop.f32.mrf.mxu3  ;;  %v7009_v37 = vshll.u32 %v6720_v4, 16  ;;  %v6701_v4 = vld [vmem:[#allocation3 + $0x94] sm:$0xf] }
 0x5f5   : > { %v5517_v34 = vpop.xlane.xlu0 %5516  ;;  %11412 = vmatmul.msk.bf16.gmra.mxu0 %vm7159_vm5, %v11686_v63 }
 0x5f6   : > { %11918 = vrcp.f32 %v5517_v34  ;;  %v5520_v56 = vpop.xlane.xlu2 %5519 }
 0x5f7   : > { %11218 = vmatmul.msk.bf16.gmra.mxu3 %vm7159_vm5, %v7152_v11  ;;  %11920 = vrcp.f32 %v5520_v56  ;;  %v7571_v11 = vrot.slane %v11950_v26, 5  ;;  %v6666_v26 = vld [vmem:[#allocation3 + $0xbc] sm:$0x1] }
 0x5f8   : > { %v6046_v29 = vpop.f32.mrf.mxu1  ;;  %v5976_v20 = vpop.f32.mrf.mxu2  ;;  %11922 = vrcp.f32 %v5508_v54 }
 0x5f9   : > { %v6143_v43 = vmul.f32 %v11917_v21, %v5976_v20  ;;  %v7780_v21 = vsel %vm7208_vm2, %v11321_v15, 0  ;;  %v7573_v14 = vrot.slane %v7571_v11, 4 }
 0x5fb   : > { %11296 = vmatmul.msk.bf16.gmra.mxu1 %vm7159_vm5, %v11668_v42  ;;  %v6231_v6 = vpack.c.bf16 %v6143_v43, %v6143_v43  ;;  %v11951_v43 = vld [vmem:[#allocation3 + $0x8] sm:$0x1] }
 0x5fc   : > { %v11919_v17 = vpop.eup %11918  ;;  %v7574_v9 = vrot.slane %v11951_v43, 5 }
 0x5fd   : > { %v6147_v7 = vmul.f32 %v11919_v17, %v6046_v29  ;;  %v5334_v24 = vpop.xlane.xlu0 %5333  ;;  %v6444_v48 = vshrl.u32 %v6231_v6, 16  ;;  %v11921_v58 = vpop.eup %11920 }
 0x5fe   : > { %v5366_v62 = vsub.f32 %v14572_v5, %v5334_v24  ;;  %v11799_v54 = vpop.permute.xlu2 %11798  ;;  %v6447_v5 = vshll.u32 %v6231_v6, 16  ;;  %v11923_v34 = vpop.eup %11922  ;;  %v11687_v6 = vld [vmem:[#allocation3 + $0x84] sm:$0xff] }
 0x5ff   : > { %v6235_v1 = vpack.c.bf16 %v6147_v7, %v6147_v7  ;;  %v11800_v41 = vunpack.i.l.bf16 %v11799_v54  ;;  %v15025_v57 = vrot.slane %v6444_v48, 7  ;;  %v11801_v56 = vunpack.i.h.bf16 %v11799_v54 }
 0x600   : > { %v5429_v19 = vmul.f32 1.442695, %v5366_v62  ;;  %v6049_v63 = vpop.f32.mrf.mxu1  ;;  %v5979_v60 = vpop.f32.mrf.mxu2  ;;  %v7153_v48 = vpack.c.b16 %v7132_v39, %v7131_v51  ;;  %v6997_v54 = vrot.slane %v6996_v45, 4  ;;  %v7572_v45 = vsel %vm12401_vm14, %v11305_v25, %v7571_v11  ;;  %v11419_v39 = vld [vmem:[%s16596_s2 + $0x10] sm:$0xf] }
 0x601   : > { %v6478_v2 = vshrl.u32 %v6235_v1, 16  ;;  %v6148_v10 = vmul.f32 %v11921_v58, %v6049_v63  ;;  %6078 = vmatpush.msrb.mxu2 %v11800_v41  ;;  %v6449_v29 = vor.u32 %v6447_v5, %v15025_v57  ;;  %v6144_v3 = vmul.f32 %v11923_v34, %v5979_v60  ;;  %v6652_v41 = vld [vmem:[#allocation3 + $0xa4] sm:$0x1] }
 0x602   : > { %11924 = vpow2.f32 %v5429_v19  ;;  %v6481_v42 = vshll.u32 %v6235_v1, 16  ;;  %v15037_v19 = vpop.f32.mrf.mxu3  ;;  %v6450_v38 = vrot.slane %v15025_v57, 4  ;;  %v8720_v11 = vsel %vm7208_vm2, %v11419_v39, 0 }
 0x603   : > { %v6480_v20 = vrot.slane %v6478_v2, 7  ;;  %v6236_v44 = vpack.c.bf16 %v6148_v10, %v6148_v10  ;;  %6079 = vmatpush.msrb.mxu2 %v11801_v56  ;;  %v6649_v32 = vsel %vm14454_vm4, %v6449_v29, %v6648_v55  ;;  %v6232_v17 = vpack.c.bf16 %v6144_v3, %v6144_v3  ;;  %v11669_v10 = vld [vmem:[#allocation3 + $0x60] sm:$0xff]  ;;  %8729 = vmatpush.bf16.msrb.mxu3 %v8720_v11 }
 0x604   : > { %11206 = vmatmul.msk.f32.vlgmr.msrb.gmra.mxu2 %vm1195_vm1, %v14954_v30  ;;  %6650 = vst [vmem:[#allocation3 + $0x9c] sm:$0xf] %v6649_v32  ;;  %v7007_v30 = vrot.slane %v7006_v13, 4  ;;  %v7575_v55 = vsel %vm12401_vm14, %v7573_v14, %v7574_v9  ;;  %v7023_v14 = vshll.u32 %v6701_v4, 16 }
 0x605   : > { %v6483_v7 = vor.u32 %v6481_v42, %v6480_v20  ;;  %v6486_v24 = vshrl.u32 %v6236_v44, 16  ;;  %7789 = vmatpush.bf16.msra.mxu2 %v7780_v21  ;;  %v6452_v62 = vshrl.u32 %v6232_v17, 16  ;;  %11413 = vmatmul.msk.bf16.gmra.mxu0 %vm7159_vm5, %v11687_v6  ;;  %v6489_v58 = vshll.u32 %v6236_v44, 16  ;;  %v6700_v21 = vld [vmem:[#allocation3 + $0x90] sm:$0xf] }
 0x606   : > { %v6455_v63 = vshll.u32 %v6232_v17, 16  ;;  %v6484_v2 = vrot.slane %v6480_v20, 4  ;;  %v7011_v42 = vrot.slane %v7009_v37, 5  ;;  %v7683_v44 = vunpack.c.l.b16 %v7572_v45 }
 0x607   : > { %v6663_v1 = vsel %vm14454_vm4, %v6483_v7, %v6662_v27  ;;  %v6488_v15 = vrot.slane %v6486_v24, 7  ;;  %11219 = vmatmul.msk.bf16.gmra.mxu3 %vm7159_vm5, %v7153_v48  ;;  %v6454_v51 = vrot.slane %v6452_v62, 7  ;;  %v7684_v32 = vunpack.c.l.b16 %v7575_v55 }
 0x608   : > { %v11925_v5 = vpop.eup %11924  ;;  %6664 = vst [vmem:[#allocation3 + $0xb4] sm:$0xf] %v6663_v1  ;;  %v15039_v34 = vpop.f32.mrf.mxu1  ;;  %v7014_v27 = vshrl.u32 %v6700_v21, 16  ;;  %v7017_v17 = vshll.u32 %v6700_v21, 16  ;;  %v7002_v6 = vsel %vm12141_vm8, %v6997_v54, %v15007_v33  ;;  %v7012_v25 = vsel %vm12141_vm8, %v7007_v30, %v7011_v42  ;;  %v11688_v33 = vld [vmem:[#allocation3 + $0x90] sm:$0xff] }
 0x609   : > { %v6491_v56 = vor.u32 %v6489_v58, %v6488_v15  ;;  %v6493_v60 = vrot.slane %v6488_v15, 4  ;;  %v5524_v13 = vsel %vm1195_vm1, %v11925_v5, 0.0  ;;  %v6457_v29 = vor.u32 %v6455_v63, %v6454_v51 }
 0x60a   : > { %v6459_v3 = vrot.slane %v6454_v51, 4  ;;  %5525 = vadd.xlane.f32.xlu0 %v5524_v13  ;;  %v7027_v7 = vshrl.u32 %v6701_v4, 16  ;;  %v15068_v24 = vpop.f32.mrf.mxu3  ;;  %v7715_v62 = vpack.c.b16 %v7684_v32, %v7683_v44  ;;  %v7133_v37 = vunpack.c.l.b16 %v7002_v6  ;;  %v6721_v51 = vld [vmem:[#allocation3 + $0x98] sm:$0x1] }
 0x60b   : > { %v6492_v20 = vsel %vm12206_vm10, %v6484_v2, %v6491_v56  ;;  %11297 = vmatmul.msk.bf16.gmra.mxu1 %vm7159_vm5, %v11669_v10  ;;  %v6458_v43 = vsel %vm12206_vm10, %v6450_v38, %v6457_v29  ;;  %v6667_v9 = vsel %vm14491_vm6, %v6493_v60, %v6666_v26  ;;  %v7134_v1 = vunpack.c.l.b16 %v7012_v25  ;;  %v15075_v26 = vpop.f32.mrf.mxu0  ;;  %v11670_v2 = vld [vmem:[#allocation3 + $0x6c] sm:$0xff]  ;;  %v6702_v11 = vld [vmem:[#allocation3 + $0x9c] sm:$0xf] }
 0x60c   : > { %v6653_v57 = vsel %vm14491_vm6, %v6459_v3, %v6652_v41  ;;  %6665 = vst.msk [vmem:[#allocation3 + $0xb8] sm:$0xf] %vm6151_vm0, %v6492_v20  ;;  %11207 = vmatmul.msk.f32.gmra.mxu2 %vm1195_vm1, %v11925_v5  ;;  %v7016_v41 = vrot.slane %v7014_v27, 4  ;;  %v7019_v15 = vrot.slane %v7017_v17, 5  ;;  %v7025_v58 = vrot.slane %v7023_v14, 5 }
 0x60d   : > { %6651 = vst.msk [vmem:[#allocation3 + $0xa0] sm:$0xf] %vm6151_vm0, %v6458_v43  ;;  %v7029_v5 = vrot.slane %v7027_v7, 4  ;;  %v7154_v54 = vpack.c.b16 %v7134_v1, %v7133_v37  ;;  %v7033_v55 = vshll.u32 %v6721_v51, 16  ;;  %v7038_v43 = vshrl.u32 %v6702_v11, 16 }
 0x60e   : > { %6654 = vst [vmem:[#allocation3 + $0xa4] sm:$0x1] %v6653_v57  ;;  %v7020_v30 = vor.u32 %v7019_v15, %v7016_v41  ;;  %v7041_v57 = vshll.u32 %v6702_v11, 16  ;;  %v11671_v41 = vld [vmem:[#allocation3 + $0x78] sm:$0xff]  ;;  %v15109_v11 = vld [vmem:[#allocation3 + $0x34] sm:$0xf] }
 0x60f   : > { %6668 = vst [vmem:[#allocation3 + $0xbc] sm:$0x1] %v6667_v9  ;;  %v7030_v63 = vor.u32 %v7029_v5, %v7025_v58  ;;  %v7035_v39 = vrot.slane %v7033_v55, 5  ;;  %v7040_v14 = vrot.slane %v7038_v43, 4 }
 0x610   : > { %v15070_v48 = vpop.f32.mrf.mxu1  ;;  %16718 = vst [vmem:[#allocation24_spill] sm:$0xff] %v15075_v26  ;;  %v7021_v60 = vrot.slane %v7020_v30, 4  ;;  %v7043_v7 = vrot.slane %v7041_v57, 5  ;;  %v6723_v57 = vld [vmem:[#allocation3 + $0xb0] sm:$0x1] }
 0x611   : > { %v7031_v13 = vrot.slane %v7030_v63, 4  ;;  %v6704_v63 = vld [vmem:[#allocation3 + $0xa8] sm:$0xf] }
 0x612   : > { %v15079_v56 = vpop.f32.mrf.mxu3  ;;  %v7026_v38 = vsel %vm12141_vm8, %v7021_v60, %v7025_v58  ;;  %v7044_v58 = vor.u32 %v7043_v7, %v7040_v14  ;;  %v15118_v14 = vld [vmem:[#allocation3 + $0x38] sm:$0x1] }
 0x613   : > { %16719 = vst [vmem:[#allocation18_spill] sm:$0xff] %v15079_v56  ;;  %v7036_v29 = vsel %vm12141_vm8, %v7031_v13, %v7035_v39  ;;  %v7135_v42 = vunpack.c.l.b16 %v7026_v38  ;;  %v15088_v4 = vpop.f32.mrf.mxu0  ;;  %v7062_v39 = vshrl.u32 %v6704_v63, 16  ;;  %v7065_v38 = vshll.u32 %v6704_v63, 16  ;;  %v6707_v63 = vld [vmem:[#allocation3 + $0xb8] sm:$0xf] }
 0x614   : > { %11322 = vmatmul.msk.bf16.vlgmr.msra.gmra.mxu2 %vm7159_vm5, %v7715_v62  ;;  %v6703_v10 = vld [vmem:[#allocation3 + $0xa0] sm:$0xf]  ;;  %v7136_v44 = vunpack.c.l.b16 %v7036_v29  ;;  %16720 = vst [vmem:[#allocation27_spill] sm:$0xff] %v15088_v4  ;;  %v7045_v51 = vrot.slane %v7044_v58, 4  ;;  %v11672_v58 = vld [vmem:[#allocation3 + $0x84] sm:$0xff] }
 0x615   : > { %11414 = vmatmul.msk.bf16.gmra.mxu0 %vm7159_vm5, %v11688_v33  ;;  %v7047_v3 = vshll.u32 %v6703_v10, 16  ;;  %v7051_v21 = vshrl.u32 %v6703_v10, 16  ;;  %v11689_v17 = vld [vmem:[#allocation3 + $0x9c] sm:$0xff]  ;;  %v6722_v25 = vld [vmem:[#allocation3 + $0xa4] sm:$0x1] }
 0x616   : > { %v7155_v6 = vpack.c.b16 %v7136_v44, %v7135_v42  ;;  %v7057_v1 = vshll.u32 %v6722_v25, 16  ;;  %v11690_v44 = vld [vmem:[#allocation3 + $0xa8] sm:$0xff]  ;;  %v10262_v25 = vrot.slane %v15109_v11, 5 }
 0x617   : > { %11220 = vmatmul.msk.bf16.gmra.mxu3 %vm7159_vm5, %v7154_v54  ;;  %v7049_v9 = vrot.slane %v7047_v3, 5  ;;  %v7053_v32 = vrot.slane %v7051_v21, 4 }
 0x618   : > { %v15077_v45 = vpop.f32.mrf.mxu1  ;;  %v7059_v33 = vrot.slane %v7057_v1, 5  ;;  %v7081_v1 = vshll.u32 %v6723_v57, 16 }
 0x619   : > { %v7054_v62 = vor.u32 %v7053_v32, %v7049_v9  ;;  %v7050_v13 = vsel %vm12141_vm8, %v7045_v51, %v7049_v9  ;;  %v7064_v32 = vrot.slane %v7062_v39, 4  ;;  %v10264_v51 = vrot.slane %v10262_v25, 4 }
 0x61a   : > { %v15090_v27 = vpop.f32.mrf.mxu3  ;;  %v7137_v21 = vunpack.c.l.b16 %v7050_v13 }
 0x61b   : > { %11298 = vmatmul.msk.bf16.gmra.mxu1 %vm7159_vm5, %v11670_v2  ;;  %v15098_v15 = vpop.f32.mrf.mxu0  ;;  %v7055_v5 = vrot.slane %v7054_v62, 4 }
 0x61c   : > { %16721 = vst [vmem:[#allocation14_spill] sm:$0xff] %v15098_v15  ;;  %v15208_v15 = vld [vmem:[#allocation3 + $0x20] sm:$0x1] }
 0x61d   : > { %v7060_v30 = vsel %vm12141_vm8, %v7055_v5, %v7059_v33 }
 0x61e   : > { %v7138_v10 = vunpack.c.l.b16 %v7060_v30  ;;  %v10265_v30 = vrot.slane %v15118_v14, 5 }
 0x620   : > { %v15086_v20 = vpop.f32.mrf.mxu1  ;;  %v7156_v43 = vpack.c.b16 %v7138_v10, %v7137_v21  ;;  %v10266_v13 = vsel %vm12401_vm14, %v10264_v51, %v10265_v30  ;;  %v7095_v21 = vshll.u32 %v6707_v63, 16  ;;  %v6724_v51 = vld [vmem:[#allocation3 + $0xbc] sm:$0x1] }
 0x621   : > { %v10365_v39 = vunpack.c.l.b16 %v10266_v13  ;;  %v7105_v13 = vshll.u32 %v6724_v51, 16 }
 0x622   : > { %v15101_v54 = vpop.f32.mrf.mxu3 }
 0x623   : > { %16722 = vst [vmem:[#allocation26_spill] sm:$0xff] %v15101_v54  ;;  %v15111_v42 = vpop.f32.mrf.mxu0 }
 0x624   : > { %11323 = vmatmul.msk.bf16.gmra.mxu2 %vm7159_vm5, %v14553_v22  ;;  %v6705_v22 = vld [vmem:[#allocation3 + $0xac] sm:$0xf]  ;;  %16723 = vst [vmem:[#allocation6_spill] sm:$0xff] %v15111_v42 }
 0x625   : > { %11415 = vmatmul.msk.bf16.gmra.mxu0 %vm7159_vm5, %v11689_v17  ;;  %v7071_v55 = vshll.u32 %v6705_v22, 16  ;;  %v7075_v2 = vshrl.u32 %v6705_v22, 16  ;;  %v7067_v17 = vrot.slane %v7065_v38, 5 }
 0x627   : > { %11221 = vmatmul.msk.bf16.gmra.mxu3 %vm7159_vm5, %v7155_v6  ;;  %v7073_v29 = vrot.slane %v7071_v55, 5  ;;  %v7077_v3 = vrot.slane %v7075_v2, 4  ;;  %v10184_v6 = vld [vmem:[#allocation3 + $0x30] sm:$0xe]  ;;  %v7068_v5 = vor.u32 %v7067_v17, %v7064_v32  ;;  %v7083_v2 = vrot.slane %v7081_v1, 5 }
 0x628   : > { %v15096_v37 = vpop.f32.mrf.mxu1 }
 0x629   : > { %v7078_v9 = vor.u32 %v7077_v3, %v7073_v29  ;;  %v7069_v38 = vrot.slane %v7068_v5, 4 }
 0x62a   : > { %v15120_v7 = vpop.f32.mrf.mxu3 }
 0x62b   : > { %11299 = vmatmul.msk.bf16.gmra.mxu1 %vm7159_vm5, %v11671_v41  ;;  %v7079_v22 = vrot.slane %v7078_v9, 4  ;;  %v15129_v55 = vpop.f32.mrf.mxu0  ;;  %v7074_v32 = vsel %vm12141_vm8, %v7069_v38, %v7073_v29  ;;  %v15154_v38 = vld [vmem:[#allocation3 + $0x10] sm:$0xf] }
 0x62c   : > { %16724 = vst [vmem:[#allocation15_spill] sm:$0xff] %v15129_v55 }
 0x62d   : > { %v7084_v3 = vsel %vm12141_vm8, %v7079_v22, %v7083_v2 }
 0x62e   : > { %v7140_v9 = vunpack.c.l.b16 %v7084_v3 }
 0x630   : > { %v15105_v60 = vpop.f32.mrf.mxu1 }
 0x633   : > { %v15145_v30 = vpop.f32.mrf.mxu0 }
 0x634   : > { %11324 = vmatmul.msk.bf16.gmra.mxu2 %vm7159_vm5, %v14656_v28  ;;  %v11569_v28 = vrot.slane %v10184_v6, 9  ;;  %16727 = vst [vmem:[#allocation17_spill] sm:$0xff] %v15145_v30 }
 0x635   : > { %11416 = vmatmul.msk.bf16.gmra.mxu0 %vm7159_vm5, %v11690_v44  ;;  %v7099_v44 = vshrl.u32 %v6707_v63, 16 }
 0x636   : > { %v10263_v33 = vsel %vm12401_vm14, %v11569_v28, %v10262_v25  ;;  %v15141_v25 = vpop.f32.mrf.mxu3  ;;  %v7139_v28 = vunpack.c.l.b16 %v7074_v32  ;;  %v8247_v32 = vshll.u32 %v15154_v38, 16 }
 0x637   : > { %11222 = vmatmul.msk.bf16.gmra.mxu3 %vm7159_vm5, %v7156_v43  ;;  %v10364_v10 = vunpack.c.l.b16 %v10263_v33  ;;  %v7101_v1 = vrot.slane %v7099_v44, 4  ;;  %v8189_v44 = vld [vmem:[#allocation3 + $0xc] sm:$0xf] }
 0x638   : > { %v7456_v62 = vpop.f32.mrf.mxu1  ;;  %v7157_v33 = vpack.c.b16 %v7140_v9, %v7139_v28  ;;  %v8238_v28 = vshrl.u32 %v8189_v44, 16 }
 0x639   : > { %v15123_v41 = vadd.f32 %v7456_v62, %v15068_v24  ;;  %v6706_v24 = vld [vmem:[#allocation3 + $0xb4] sm:$0xf]  ;;  %v15135_v43 = vpack.c.b16 %v10365_v39, %v10364_v10  ;;  %v7097_v62 = vrot.slane %v7095_v21, 5  ;;  %v7107_v21 = vrot.slane %v7105_v13, 5 }
 0x63a   : > { %v7086_v17 = vshrl.u32 %v6706_v24, 16  ;;  %v7089_v6 = vshll.u32 %v6706_v24, 16  ;;  %v11673_v10 = vld [vmem:[#allocation3 + $0x90] sm:$0xff] }
 0x63b   : > { %11300 = vmatmul.msk.bf16.gmra.mxu1 %vm7159_vm5, %v11672_v58  ;;  %16725 = vst [vmem:[#allocation29_spill] sm:$0xff] %v15135_v43  ;;  %v11691_v58 = vld [vmem:[#allocation3 + $0xb4] sm:$0xff]  ;;  %v7102_v29 = vor.u32 %v7101_v1, %v7097_v62 }
 0x63c   : > { %v7088_v5 = vrot.slane %v7086_v17, 4  ;;  %v7091_v22 = vrot.slane %v7089_v6, 5  ;;  %v8251_v17 = vshrl.u32 %v15154_v38, 16  ;;  %v15174_v13 = vld [vmem:[#allocation3 + $0x14] sm:$0x1] }
 0x63d   : > { %v7103_v39 = vrot.slane %v7102_v29, 4 }
 0x63e   : > { %v7092_v2 = vor.u32 %v7091_v22, %v7088_v5  ;;  %v8249_v22 = vrot.slane %v8247_v32, 5  ;;  %v8257_v32 = vshll.u32 %v15174_v13, 16 }
 0x63f   : > { %v7108_v6 = vsel %vm12141_vm8, %v7103_v39, %v7107_v21 }
 0x640   : > { %v15137_v57 = vpop.f32.mrf.mxu1  ;;  %v7093_v3 = vrot.slane %v7092_v2, 4  ;;  %v7142_v5 = vunpack.c.l.b16 %v7108_v6 }
 0x641   : > { %16726 = vst [vmem:[#allocation16_spill] sm:$0xff] %v15137_v57  ;;  %v15317_v57 = vld [vmem:[#allocation3 + $0x44] sm:$0x1] }
 0x642   : > { %v7098_v1 = vsel %vm12141_vm8, %v7093_v3, %v7097_v62 }
 0x643   : > { %v7141_v2 = vunpack.c.l.b16 %v7098_v1  ;;  %v11674_v1 = vld [vmem:[#allocation3 + $0x9c] sm:$0xff] }
 0x644   : > { %11325 = vmatmul.msk.bf16.gmra.mxu2 %vm7159_vm5, %v14745_v16 }
 0x645   : > { %11417 = vmatmul.msk.bf16.gmra.mxu0 %vm7159_vm5, %v11691_v58  ;;  %v8241_v58 = vshll.u32 %v8189_v44, 16  ;;  %v7158_v62 = vpack.c.b16 %v7142_v5, %v7141_v2  ;;  %v8192_v2 = vld [vmem:[#allocation3 + $0x18] sm:$0xf] }
 0x646   : > { %v8265_v43 = vshll.u32 %v8192_v2, 16 }
 0x647   : > { %11223 = vmatmul.msk.bf16.gmra.mxu3 %vm7159_vm5, %v7157_v33  ;;  %v8253_v33 = vrot.slane %v8251_v17, 4  ;;  %v8243_v39 = vrot.slane %v8241_v58, 5 }
 0x648   : > { %v7461_v63 = vpop.f32.mrf.mxu1 }
 0x649   : > { %v15150_v24 = vadd.f32 %v7461_v63, %v15090_v27  ;;  %v15161_v27 = vld [vmem:[#allocation3 + $0x40] sm:$0xf]  ;;  %v15170_v63 = vld [vmem:[#allocation3 + $0x44] sm:$0x1]  ;;  %v8254_v3 = vor.u32 %v8253_v33, %v8249_v22  ;;  %v8259_v33 = vrot.slane %v8257_v32, 5 }
 0x64a   : > { %v15152_v16 = vpop.f32.mrf.mxu3  ;;  %v16609_v51 = vrot.slane %v15161_v27, 5  ;;  %v10272_v44 = vrot.slane %v15170_v63, 5 }
 0x64b   : > { %16728 = vst [vmem:[#allocation31_spill] sm:$0xff] %v15150_v24  ;;  %11301 = vmatmul.msk.bf16.gmra.mxu1 %vm7159_vm5, %v11673_v10  ;;  %v8240_v10 = vrot.slane %v8238_v28, 4  ;;  %v8255_v58 = vrot.slane %v8254_v3, 4 }
 0x64c   : > { %v10271_v21 = vrot.slane %v16609_v51, 4 }
 0x64d   : > { %v8244_v28 = vor.u32 %v8243_v39, %v8240_v10 }
 0x64e   : > { %v15183_v17 = vsel %vm12401_vm14, %v10271_v21, %v10272_v44  ;;  %v8260_v21 = vsel %vm12141_vm8, %v8255_v58, %v8259_v33  ;;  %v8262_v44 = vshrl.u32 %v8192_v2, 16  ;;  %v8267_v58 = vrot.slane %v8265_v43, 5  ;;  %v11675_v43 = vld [vmem:[#allocation3 + $0xa8] sm:$0xff] }
 0x64f   : > { %v8245_v51 = vrot.slane %v8244_v28, 4  ;;  %v8624_v32 = vunpack.c.l.b16 %v8260_v21  ;;  %v8281_v21 = vshll.u32 %v15208_v15, 16 }
 0x650   : > { %v15163_v9 = vpop.f32.mrf.mxu1  ;;  %v8264_v30 = vrot.slane %v8262_v44, 4 }
 0x651   : > { %16729 = vst [vmem:[#allocation30_spill] sm:$0xff] %v15163_v9  ;;  %v8250_v39 = vsel %vm12141_vm8, %v8245_v51, %v8249_v22 }
 0x652   : > { %v15168_v29 = vpop.f32.mrf.mxu3  ;;  %v8623_v55 = vunpack.c.l.b16 %v8250_v39  ;;  %v8268_v22 = vor.u32 %v8267_v58, %v8264_v30  ;;  %v8283_v30 = vrot.slane %v8281_v21, 5  ;;  %v8195_v58 = vld [vmem:[#allocation3 + $0x24] sm:$0xf]  ;;  %v5523_v4 = vpop.xlane.xlu1 %5522 }
 0x653   : > { %v8286_v21 = vshrl.u32 %v8195_v58, 16  ;;  %11926 = vrcp.f32 %v5523_v4 }
 0x654   : > { %11326 = vmatmul.msk.bf16.gmra.mxu2 %vm7159_vm5, %v14693_v31  ;;  %v8655_v42 = vpack.c.b16 %v8624_v32, %v8623_v55 }
 0x657   : > { %11224 = vmatmul.msk.bf16.gmra.mxu3 %vm7159_vm5, %v7158_v62  ;;  %v15191_v62 = vld [vmem:[#allocation3 + $0x1c] sm:$0xf] }
 0x658   : > { %v7466_v31 = vpop.f32.mrf.mxu1 }
 0x659   : > { %v15186_v6 = vadd.f32 %v7466_v31, %v15120_v7  ;;  %v8271_v7 = vshll.u32 %v15191_v62, 16  ;;  %v8275_v31 = vshrl.u32 %v15191_v62, 16 }
 0x65a   : > { %v15188_v5 = vpop.f32.mrf.mxu3 }
 0x65b   : > { %16730 = vst [vmem:[#allocation32_spill] sm:$0xff] %v15186_v6  ;;  %11302 = vmatmul.msk.bf16.gmra.mxu1 %vm7159_vm5, %v11674_v1  ;;  %v15202_v1 = vpop.f32.mrf.mxu0  ;;  %v8273_v33 = vrot.slane %v8271_v7, 5  ;;  %v8277_v2 = vrot.slane %v8275_v31, 4  ;;  %v8269_v7 = vrot.slane %v8268_v22, 4 }
 0x65c   : > { %16732 = vst [vmem:[#allocation8_spill] sm:$0xff] %v15202_v1 }
 0x65d   : > { %v8278_v51 = vor.u32 %v8277_v2, %v8273_v33 }
 0x65f   : > { %v8279_v31 = vrot.slane %v8278_v51, 4 }
 0x660   : > { %v7468_v10 = vpop.f32.mrf.mxu1 }
 0x661   : > { %v15200_v3 = vadd.f32 %v7468_v10, %v15141_v25  ;;  %v8284_v39 = vsel %vm12141_vm8, %v8279_v31, %v8283_v30 }
 0x662   : > { %v15204_v28 = vpop.f32.mrf.mxu3 }
 0x663   : > { %16731 = vst [vmem:[#allocation7_spill] sm:$0xff] %v15200_v3  ;;  %v15220_v55 = vpop.f32.mrf.mxu0 }
 0x664   : > { %11327 = vmatmul.msk.bf16.gmra.mxu2 %vm7159_vm5, %v14753_v35  ;;  %v15218_v35 = vld [vmem:[#allocation3 + $0x28] sm:$0xf]  ;;  %16734 = vst [vmem:[#allocation9_spill] sm:$0xff] %v15220_v55  ;;  %v8289_v55 = vshll.u32 %v8195_v58, 16 }
 0x665   : > { %v8299_v32 = vshrl.u32 %v15218_v35, 16 }
 0x667   : > { %11420 = vmatmul.msk.bf16.vlgmr.msrb.gmra.mxu3 %vm7159_vm5, %v8655_v42  ;;  %v8274_v42 = vsel %vm12141_vm8, %v8269_v7, %v8273_v33  ;;  %v8301_v33 = vrot.slane %v8299_v32, 4  ;;  %v11452_v7 = vld [vmem:[%s16596_s2 + $0x14] sm:$0xf] }
 0x668   : > { %v7471_v25 = vpop.f32.mrf.mxu1  ;;  %v8625_v51 = vunpack.c.l.b16 %v8274_v42  ;;  %v9118_v31 = vsel %vm7208_vm2, %v11452_v7, 0  ;;  %v11676_v7 = vld [vmem:[#allocation3 + $0xb4] sm:$0xff] }
 0x669   : > { %v15213_v10 = vadd.f32 %v7471_v25, %v15152_v16  ;;  %v8295_v16 = vshll.u32 %v15218_v35, 16  ;;  %v8626_v25 = vunpack.c.l.b16 %v8284_v39  ;;  %9127 = vmatpush.bf16.msrb.mxu1 %v9118_v31  ;;  %v8288_v39 = vrot.slane %v8286_v21, 4  ;;  %v15252_v21 = vld [vmem:[#allocation3 + $0x34] sm:$0xf] }
 0x66a   : > { %v15215_v44 = vpop.f32.mrf.mxu3 }
 0x66b   : > { %16733 = vst [vmem:[#allocation19_spill] sm:$0xff] %v15213_v10  ;;  %11303 = vmatmul.msk.bf16.gmra.mxu1 %vm7159_vm5, %v11675_v43  ;;  %v8297_v1 = vrot.slane %v8295_v16, 5  ;;  %v8656_v30 = vpack.c.b16 %v8626_v25, %v8625_v51  ;;  %v15241_v42 = vpop.f32.mrf.mxu0  ;;  %v8198_v10 = vld [vmem:[#allocation3 + $0x30] sm:$0xf] }
 0x66c   : > { %16736 = vst [vmem:[#allocation10_spill] sm:$0xff] %v15241_v42  ;;  %v8912_v42 = vrot.slane %v15174_v13, 5 }
 0x66d   : > { %v8302_v58 = vor.u32 %v8301_v33, %v8297_v1 }
 0x66f   : > { %v8303_v31 = vrot.slane %v8302_v58, 4 }
 0x670   : > { %v7473_v2 = vpop.f32.mrf.mxu1 }
 0x671   : > { %v15229_v22 = vadd.f32 %v7473_v2, %v15168_v29  ;;  %v15239_v29 = vld [vmem:[#allocation3 + $0x2c] sm:$0x1]  ;;  %v8291_v2 = vrot.slane %v8289_v55, 5 }
 0x672   : > { %v15231_v43 = vpop.f32.mrf.mxu3  ;;  %v8305_v32 = vshll.u32 %v15239_v29, 16 }
 0x673   : > { %16735 = vst [vmem:[#allocation20_spill] sm:$0xff] %v15229_v22  ;;  %v8909_v22 = vrot.slane %v15154_v38, 5  ;;  %v8292_v25 = vor.u32 %v8291_v2, %v8288_v39  ;;  %v8323_v39 = vshrl.u32 %v15252_v21, 16  ;;  %v15259_v2 = vpop.f32.mrf.mxu0 }
 0x674   : > { %11328 = vmatmul.msk.bf16.gmra.mxu2 %vm7159_vm5, %v14966_v50  ;;  %v8307_v55 = vrot.slane %v8305_v32, 5  ;;  %16738 = vst [vmem:[#allocation12_spill] sm:$0xff] %v15259_v2 }
 0x675   : > { %v8911_v33 = vrot.slane %v8909_v22, 4  ;;  %v8293_v38 = vrot.slane %v8292_v25, 4  ;;  %v8325_v2 = vrot.slane %v8323_v39, 4  ;;  %v11927_v39 = vpop.eup %11926 }
 0x677   : > { %11421 = vmatmul.msk.bf16.gmra.mxu3 %vm7159_vm5, %v8656_v30  ;;  %v8843_v30 = vld [vmem:[#allocation3 + $0xc] sm:$0xe]  ;;  %v8298_v32 = vsel %vm12141_vm8, %v8293_v38, %v8297_v1  ;;  %v8913_v13 = vsel %vm12401_vm14, %v8911_v33, %v8912_v42  ;;  %v15276_v33 = vld [vmem:[#allocation3 + $0x38] sm:$0x1] }
 0x678   : > { %v7476_v16 = vpop.f32.mrf.mxu1  ;;  %v8627_v6 = vunpack.c.l.b16 %v8298_v32  ;;  %v9022_v42 = vunpack.c.l.b16 %v8913_v13 }
 0x679   : > { %v15247_v50 = vadd.f32 %v7476_v16, %v15188_v5  ;;  %v8308_v5 = vsel %vm12141_vm8, %v8303_v31, %v8307_v55  ;;  %v8319_v16 = vshll.u32 %v15252_v21, 16  ;;  %v8313_v55 = vshll.u32 %v8198_v10, 16 }
 0x67a   : > { %v15249_v51 = vpop.f32.mrf.mxu3  ;;  %v8628_v31 = vunpack.c.l.b16 %v8308_v5 }
 0x67b   : > { %16737 = vst [vmem:[#allocation11_spill] sm:$0xff] %v15247_v50  ;;  %11304 = vmatmul.msk.bf16.gmra.mxu1 %vm7159_vm5, %v11676_v7  ;;  %v11436_v7 = vrot.slane %v8843_v30, 9  ;;  %v8310_v50 = vshrl.u32 %v8198_v10, 16  ;;  %v15270_v26 = vrot.slane %v8319_v16, 5  ;;  %v10185_v30 = vld [vmem:[#allocation3 + $0x3c] sm:$0xe] }
 0x67c   : > { %v8657_v4 = vpack.c.b16 %v8628_v31, %v8627_v6  ;;  %v8315_v38 = vrot.slane %v8313_v55, 5  ;;  %v8329_v31 = vshll.u32 %v15276_v33, 16 }
 0x67d   : > { %v8910_v1 = vsel %vm12401_vm14, %v11436_v7, %v8909_v22  ;;  %v5526_v10 = vpop.xlane.xlu0 %5525  ;;  %v8326_v16 = vor.u32 %v8325_v2, %v15270_v26  ;;  %v8916_v22 = vrot.slane %v15191_v62, 5  ;;  %v15281_v7 = vpop.f32.mrf.mxu0  ;;  %v10367_v62 = vunpack.c.l.b16 %v15183_v17 }
 0x67e   : > { %v9021_v5 = vunpack.c.l.b16 %v8910_v1  ;;  %16740 = vst [vmem:[#allocation21_spill] sm:$0xff] %v15281_v7  ;;  %11928 = vrcp.f32 %v5526_v10  ;;  %v8201_v10 = vld [vmem:[#allocation3 + $0x3c] sm:$0xf] }
 0x680   : > { %v7478_v58 = vpop.f32.mrf.mxu1  ;;  %v9053_v6 = vpack.c.b16 %v9022_v42, %v9021_v5  ;;  %v8327_v42 = vrot.slane %v8326_v16, 4  ;;  %v8844_v5 = vld [vmem:[#allocation3 + $0x18] sm:$0xe] }
 0x681   : > { %v15266_v25 = vadd.f32 %v7478_v58, %v15204_v28  ;;  %v8312_v28 = vrot.slane %v8310_v50, 4  ;;  %v11570_v58 = vrot.slane %v10185_v30, 9  ;;  %v16741_v50 = vrot.slane %v15161_v27, 5  ;;  %v15291_v30 = vld [vmem:[#allocation3 + $0x40] sm:$0xf] }
 0x682   : > { %v15268_v3 = vpop.f32.mrf.mxu3 }
 0x683   : > { %16739 = vst [vmem:[#allocation25_spill] sm:$0xff] %v15266_v25  ;;  %v10270_v55 = vsel %vm12401_vm14, %v11570_v58, %v16741_v50  ;;  %v8316_v1 = vor.u32 %v8315_v38, %v8312_v28  ;;  %v8331_v58 = vrot.slane %v8329_v31, 5  ;;  %v8347_v28 = vshrl.u32 %v15291_v30, 16  ;;  %v6669_v31 = vld [vmem:[#allocation3 + $0xc0] sm:$0xf] }
 0x684   : > { %11329 = vmatmul.msk.bf16.gmra.mxu2 %vm7159_vm5, %v14815_v36  ;;  %v10366_v7 = vunpack.c.l.b16 %v10270_v55  ;;  %v9528_v55 = vld [vmem:[#allocation3 + $0x18] sm:$0xf] }
 0x685   : > { %v8317_v38 = vrot.slane %v8316_v1, 4  ;;  %v8337_v1 = vshll.u32 %v8201_v10, 16  ;;  %v15319_v56 = vpop.f32.mrf.mxu0 }
 0x686   : > { %v15300_v17 = vpack.c.b16 %v10367_v62, %v10366_v7  ;;  %v8334_v7 = vshrl.u32 %v8201_v10, 16 }
 0x687   : > { %11422 = vmatmul.msk.bf16.gmra.mxu3 %vm7159_vm5, %v8657_v4  ;;  %v6081_v32 = vpop.f32.mrf.mxu2  ;;  %v8322_v54 = vsel %vm12141_vm8, %v8317_v38, %v15270_v26  ;;  %v9577_v26 = vshrl.u32 %v9528_v55, 16  ;;  %v9580_v38 = vshll.u32 %v9528_v55, 16  ;;  %v8353_v55 = vshll.u32 %v15317_v57, 16 }
 0x688   : > { %v6149_v36 = vmul.f32 %v11927_v39, %v6081_v32  ;;  %v7481_v13 = vpop.f32.mrf.mxu1  ;;  %v8918_v32 = vrot.slane %v8916_v22, 4  ;;  %16743 = vst [vmem:[#allocation22_spill] sm:$0xff] %v15300_v17 }
 0x689   : > { %v15289_v2 = vadd.f32 %v7481_v13, %v15215_v44  ;;  %v8343_v44 = vshll.u32 %v15291_v30, 16  ;;  %v8919_v13 = vrot.slane %v15208_v15, 5 }
 0x68a   : > { %v15294_v4 = vpop.f32.mrf.mxu3  ;;  %v6237_v39 = vpack.c.bf16 %v6149_v36, %v6149_v36  ;;  %v8332_v36 = vsel %vm12141_vm8, %v8327_v42, %v8331_v58 }
 0x68b   : > { %16742 = vst [vmem:[#allocation23_spill] sm:$0xff] %v15289_v2  ;;  %11453 = vmatmul.msk.bf16.vlgmr.msrb.gmra.mxu1 %vm7159_vm5, %v9053_v6  ;;  %v11437_v6 = vrot.slane %v8844_v5, 9  ;;  %v11929_v2 = vpop.eup %11928  ;;  %v8920_v15 = vsel %vm12401_vm14, %v8918_v32, %v8919_v13  ;;  %v15312_v42 = vrot.slane %v8343_v44, 5  ;;  %v8349_v5 = vrot.slane %v8347_v28, 4 }
 0x68c   : > { %v6495_v25 = vshrl.u32 %v6237_v39, 16  ;;  %v6498_v16 = vshll.u32 %v6237_v39, 16  ;;  %v8630_v24 = vunpack.c.l.b16 %v8332_v36  ;;  %v8336_v28 = vrot.slane %v8334_v7, 4 }
 0x68d   : > { %v8339_v13 = vrot.slane %v8337_v1, 5  ;;  %v9024_v36 = vunpack.c.l.b16 %v8920_v15  ;;  %v8350_v61 = vor.u32 %v8349_v5, %v15312_v42 }
 0x68e   : > { %v15302_v50 = vrot.slane %v6495_v25, 7  ;;  %v9529_v25 = vld [vmem:[#allocation3 + $0x1c] sm:$0xf] }
 0x68f   : > { %v6084_v9 = vpop.f32.mrf.mxu2  ;;  %v9586_v44 = vshll.u32 %v9529_v25, 16 }
 0x690   : > { %v6500_v62 = vor.u32 %v6498_v16, %v15302_v50  ;;  %v6150_v39 = vmul.f32 %v11929_v2, %v6084_v9  ;;  %v7483_v17 = vpop.f32.mrf.mxu1  ;;  %v8917_v2 = vsel %vm12401_vm14, %v11437_v6, %v8916_v22  ;;  %v9582_v22 = vrot.slane %v9580_v38, 5 }
 0x691   : > { %v15315_v58 = vadd.f32 %v7483_v17, %v15231_v43  ;;  %v8629_v43 = vunpack.c.l.b16 %v8322_v54  ;;  %v9590_v17 = vshrl.u32 %v9529_v25, 16  ;;  %v7442_v54 = vadd.f32 %v15039_v34, %v14941_v46 }
 0x692   : > { %v6670_v32 = vsel %vm14454_vm4, %v6500_v62, %v6669_v31  ;;  %v15323_v10 = vpop.f32.mrf.mxu3  ;;  %v6238_v9 = vpack.c.bf16 %v6150_v39, %v6150_v39  ;;  %v8923_v62 = vrot.slane %v15218_v35, 5  ;;  %v9579_v39 = vrot.slane %v9577_v26, 4 }
 0x693   : > { %6671 = vst [vmem:[#allocation3 + $0xc0] sm:$0xf] %v6670_v32  ;;  %v8658_v31 = vpack.c.b16 %v8630_v24, %v8629_v43  ;;  %v15334_v1 = vrot.slane %v9586_v44, 5  ;;  %v6501_v25 = vrot.slane %v15302_v50, 4  ;;  %v9023_v5 = vunpack.c.l.b16 %v8917_v2  ;;  %v11550_v24 = vld [vmem:[%s16596_s2 + $0x1c] sm:$0xf] }
 0x694   : > { %v6503_v16 = vshrl.u32 %v6238_v9, 16  ;;  %11330 = vmatmul.msk.bf16.gmra.mxu2 %vm7159_vm5, %v14979_v59  ;;  %v6506_v7 = vshll.u32 %v6238_v9, 16  ;;  %v6673_v59 = vld [vmem:[#allocation3 + $0xc8] sm:$0x1]  ;;  %v8340_v32 = vor.u32 %v8339_v13, %v8336_v28  ;;  %v9592_v26 = vrot.slane %v9590_v17, 4 }
 0x695   : > { %v8204_v9 = vld [vmem:[#allocation3 + $0x48] sm:$0xf]  ;;  %v10059_v44 = vsel %vm7208_vm2, %v11550_v24, 0  ;;  %v8351_v17 = vrot.slane %v8350_v61, 4  ;;  %v9583_v0 = vor.u32 %v9582_v22, %v9579_v39 }
 0x696   : > { %v6505_v6 = vrot.slane %v6503_v16, 7  ;;  %v9054_v16 = vpack.c.b16 %v9024_v36, %v9023_v5  ;;  %10068 = vmatpush.bf16.msra.mxu0 %v10059_v44  ;;  %v8358_v36 = vshrl.u32 %v8204_v9, 16  ;;  %v8341_v53 = vrot.slane %v8340_v32, 4 }
 0x697   : > { %11423 = vmatmul.msk.bf16.gmra.mxu3 %vm7159_vm5, %v8658_v31  ;;  %v7791_v15 = vpop.f32.mrf.mxu2  ;;  %v8845_v31 = vld [vmem:[#allocation3 + $0x24] sm:$0xe]  ;;  %v9593_v61 = vor.u32 %v9592_v26, %v15334_v1  ;;  %v8926_v5 = vrot.slane %v15239_v29, 5  ;;  %v9584_v44 = vrot.slane %v9583_v0, 4 }
 0x698   : > { %v6508_v38 = vor.u32 %v6506_v7, %v6505_v6  ;;  %v6510_v43 = vrot.slane %v6505_v6, 4  ;;  %v15341_v46 = vadd.f32 %v7791_v15, %v7442_v54  ;;  %v7486_v34 = vpop.f32.mrf.mxu1  ;;  %v15353_v54 = vld [vmem:[#allocation3 + $0x4c] sm:$0xf]  ;;  %v9530_v6 = vld [vmem:[#allocation3 + $0x20] sm:$0x1]  ;;  %v8361_v7 = vshll.u32 %v8204_v9, 16 }
 0x699   : > { %v15345_v50 = vadd.f32 %v7486_v34, %v15249_v51  ;;  %v8925_v51 = vrot.slane %v8923_v62, 4  ;;  %v11438_v15 = vrot.slane %v8845_v31, 9  ;;  %v8367_v24 = vshll.u32 %v15353_v54, 16 }
 0x69a   : > { %v6509_v2 = vsel %vm12206_vm10, %v6501_v25, %v6508_v38  ;;  %v6674_v28 = vsel %vm14491_vm6, %v6510_v43, %v6673_v59  ;;  %v15351_v13 = vpop.f32.mrf.mxu3  ;;  %v15359_v25 = vpop.f32.mrf.mxu0  ;;  %v8355_v59 = vrot.slane %v8353_v55, 5  ;;  %v8371_v38 = vshrl.u32 %v15353_v54, 16  ;;  %v9531_v43 = vld [vmem:[#allocation3 + $0x24] sm:$0xf] }
 0x69b   : > { %6672 = vst.msk [vmem:[#allocation3 + $0xc4] sm:$0xf] %vm6151_vm0, %v6509_v2  ;;  %11454 = vmatmul.msk.bf16.gmra.mxu1 %vm7159_vm5, %v9054_v16  ;;  %v7444_v34 = vadd.f32 %v15070_v48, %v14964_v12  ;;  %v8346_v39 = vsel %vm12141_vm8, %v8341_v53, %v15312_v42  ;;  %v9596_v22 = vshll.u32 %v9530_v6, 16  ;;  %v8927_v29 = vsel %vm12401_vm14, %v8925_v51, %v8926_v5  ;;  %v9532_v5 = vld [vmem:[#allocation3 + $0x28] sm:$0xf] }
 0x69c   : > { %16744 = vst [vmem:[#allocation28_spill] sm:$0xff] %v15359_v25  ;;  %v8356_v55 = vsel %vm12141_vm8, %v8351_v17, %v8355_v59  ;;  %v8360_v26 = vrot.slane %v8358_v36, 4  ;;  %v8363_v9 = vrot.slane %v8361_v7, 5  ;;  %v9594_v2 = vrot.slane %v9593_v61, 4 }
 0x69d   : > { %6675 = vst [vmem:[#allocation3 + $0xc8] sm:$0x1] %v6674_v28  ;;  %v9601_v12 = vshrl.u32 %v9531_v43, 16  ;;  %v9604_v48 = vshll.u32 %v9531_v43, 16  ;;  %v8632_v42 = vunpack.c.l.b16 %v8356_v55  ;;  %v15379_v53 = vrot.slane %v8367_v24, 5 }
 0x69e   : > { %v8373_v17 = vrot.slane %v8371_v38, 4  ;;  %v8924_v51 = vsel %vm12401_vm14, %v11438_v15, %v8923_v62  ;;  %v9598_v36 = vrot.slane %v9596_v22, 5  ;;  %v8631_v7 = vunpack.c.l.b16 %v8346_v39  ;;  %v15393_v24 = vld [vmem:[#allocation3 + $0x50] sm:$0x1] }
 0x69f   : > { %v7793_v32 = vpop.f32.mrf.mxu2  ;;  %v9026_v0 = vunpack.c.l.b16 %v8927_v29  ;;  %v8364_v61 = vor.u32 %v8363_v9, %v8360_v26  ;;  %v8930_v62 = vrot.slane %v15252_v21, 5  ;;  %v9603_v15 = vrot.slane %v9601_v12, 4 }
 0x6a0   : > { %v15374_v16 = vadd.f32 %v7793_v32, %v7444_v34  ;;  %v7488_v31 = vpop.f32.mrf.mxu1  ;;  %v9599_v35 = vsel %vm12141_vm8, %v9594_v2, %v9598_v36  ;;  %v9606_v38 = vrot.slane %v9604_v48, 5  ;;  %v8659_v43 = vpack.c.b16 %v8632_v42, %v8631_v7  ;;  %v15411_v48 = vld [vmem:[#allocation3 + $0x58] sm:$0xf] }
 0x6a1   : > { %v15377_v28 = vadd.f32 %v7488_v31, %v15268_v3  ;;  %v9589_v3 = vsel %vm12141_vm8, %v9584_v44, %v15334_v1  ;;  %v9025_v34 = vunpack.c.l.b16 %v8924_v51  ;;  %v8374_v39 = vor.u32 %v8373_v17, %v15379_v53  ;;  %v8846_v31 = vld [vmem:[#allocation3 + $0x30] sm:$0xe] }
 0x6a2   : > { %v15381_v6 = vpop.f32.mrf.mxu3  ;;  %v11692_v59 = vld [vmem:[#allocation3 + $0xc0] sm:$0xff]  ;;  %v7447_v1 = vadd.f32 %v15077_v45, %v14983_v8  ;;  %v15401_v55 = vpop.f32.mrf.mxu0  ;;  %v9610_v22 = vshll.u32 %v9532_v5, 16  ;;  %v9614_v32 = vshrl.u32 %v9532_v5, 16  ;;  %v8377_v21 = vshll.u32 %v15393_v24, 16 }
 0x6a3   : > { %11418 = vmatmul.msk.bf16.gmra.mxu0 %vm7159_vm5, %v11692_v59  ;;  %16745 = vst [vmem:[#allocation13_spill] sm:$0xff] %v15401_v55  ;;  %v9055_v26 = vpack.c.b16 %v9026_v0, %v9025_v34  ;;  %v15405_v9 = vunpack.c.l.b16 %v9589_v3  ;;  %v15407_v44 = vunpack.c.l.b16 %v9599_v35  ;;  %v8365_v8 = vrot.slane %v8364_v61, 4 }
 0x6a4   : > { %11331 = vmatmul.msk.bf16.gmra.mxu2 %vm7159_vm5, %v14989_v52  ;;  %v8207_v52 = vld [vmem:[#allocation3 + $0x54] sm:$0xf]  ;;  %v8932_v45 = vrot.slane %v8930_v62, 4  ;;  %v9607_v42 = vor.u32 %v9606_v38, %v9603_v15  ;;  %v8375_v59 = vrot.slane %v8374_v39, 4  ;;  %v11439_v0 = vrot.slane %v8846_v31, 9 }
 0x6a5   : > { %v8382_v51 = vshrl.u32 %v8207_v52, 16  ;;  %v8385_v36 = vshll.u32 %v8207_v52, 16  ;;  %v8933_v3 = vrot.slane %v15276_v33, 5  ;;  %v15419_v5 = vrot.slane %v9610_v22, 5 }
 0x6a6   : > { %v9616_v35 = vrot.slane %v9614_v32, 4  ;;  %v8379_v61 = vrot.slane %v8377_v21, 5  ;;  %v9994_v15 = vpack.c.b16 %v15407_v44, %v15405_v9  ;;  %v8395_v38 = vshrl.u32 %v15411_v48, 16 }
 0x6a7   : > { %11424 = vmatmul.msk.bf16.gmra.mxu3 %vm7159_vm5, %v8659_v43  ;;  %v7796_v29 = vpop.f32.mrf.mxu2  ;;  %v9534_v43 = vld [vmem:[#allocation3 + $0x30] sm:$0xf]  ;;  %v8370_v34 = vsel %vm12141_vm8, %v8365_v8, %v15379_v53  ;;  %v8931_v33 = vsel %vm12401_vm14, %v11439_v0, %v8930_v62  ;;  %v8934_v39 = vsel %vm12401_vm14, %v8932_v45, %v8933_v3  ;;  %v8384_v22 = vrot.slane %v8382_v51, 4 }
 0x6a8   : > { %v15409_v2 = vadd.f32 %v7796_v29, %v7447_v1  ;;  %v7491_v12 = vpop.f32.mrf.mxu1  ;;  %v15433_v1 = vrot.slane %v9607_v42, 4  ;;  %v8380_v52 = vsel %vm12141_vm8, %v8375_v59, %v8379_v61  ;;  %v8387_v32 = vrot.slane %v8385_v36, 5  ;;  %v9533_v29 = vld [vmem:[#allocation3 + $0x2c] sm:$0x1]  ;;  %v15452_v61 = vld [vmem:[#allocation3 + $0x5c] sm:$0x1] }
 0x6a9   : > { %v15414_v17 = vadd.f32 %v7491_v12, %v15294_v4  ;;  %v8391_v4 = vshll.u32 %v15411_v48, 16  ;;  %v7449_v21 = vadd.f32 %v15086_v20, %v14998_v47  ;;  %v9617_v53 = vor.u32 %v9616_v35, %v15419_v5 }
 0x6aa   : > { %v15416_v7 = vpop.f32.mrf.mxu3  ;;  %v9625_v9 = vshrl.u32 %v9534_v43, 16  ;;  %v9628_v62 = vshll.u32 %v9534_v43, 16  ;;  %v8397_v12 = vrot.slane %v8395_v38, 4  ;;  %v9634_v8 = vshll.u32 %v15109_v11, 16  ;;  %v15445_v42 = vpop.f32.mrf.mxu0 }
 0x6ab   : > { %11455 = vmatmul.msk.bf16.gmra.mxu1 %vm7159_vm5, %v9055_v26  ;;  %v8937_v26 = vrot.slane %v15291_v30, 5  ;;  %v15441_v31 = vrot.slane %v8391_v4, 5  ;;  %v9638_v45 = vshrl.u32 %v15109_v11, 16  ;;  %16746 = vst [vmem:[#allocation5_spill] sm:$0xff] %v15445_v42  ;;  %v9027_v36 = vunpack.c.l.b16 %v8931_v33  ;;  %v8847_v11 = vld [vmem:[#allocation3 + $0x3c] sm:$0xe] }
 0x6ac   : > { %v9028_v0 = vunpack.c.l.b16 %v8934_v39  ;;  %v9620_v47 = vshll.u32 %v9533_v29, 16  ;;  %v8633_v3 = vunpack.c.l.b16 %v8370_v34  ;;  %v8634_v35 = vunpack.c.l.b16 %v8380_v52  ;;  %v11952_v39 = vld [vmem:[#allocation3 + $0x88] sm:$0xf] }
 0x6ad   : > { %v8388_v4 = vor.u32 %v8387_v32, %v8384_v22  ;;  %v9618_v43 = vrot.slane %v9617_v53, 4  ;;  %v9630_v42 = vrot.slane %v9628_v62, 5  ;;  %v8398_v33 = vor.u32 %v8397_v12, %v15441_v31 }
 0x6ae   : > { %v7648_v29 = vrot.slane %v11952_v39, 5  ;;  %v9640_v34 = vrot.slane %v9638_v45, 4  ;;  %v8401_v52 = vshll.u32 %v15452_v61, 16  ;;  %v9622_v22 = vrot.slane %v9620_v47, 5 }
 0x6af   : > { %v7798_v44 = vpop.f32.mrf.mxu2  ;;  %v8940_v32 = vrot.slane %v15317_v57, 5  ;;  %v8660_v53 = vpack.c.b16 %v8634_v35, %v8633_v3  ;;  %v9613_v62 = vsel %vm12141_vm8, %v15433_v1, %v15419_v5  ;;  %v11440_v12 = vrot.slane %v8847_v11, 9 }
 0x6b0   : > { %v15447_v59 = vadd.f32 %v7798_v44, %v7449_v21  ;;  %v7493_v51 = vpop.f32.mrf.mxu1  ;;  %v8939_v21 = vrot.slane %v8937_v26, 4  ;;  %v9627_v44 = vrot.slane %v9625_v9, 4  ;;  %v9056_v9 = vpack.c.b16 %v9028_v0, %v9027_v36 }
 0x6b1   : > { %v15450_v20 = vadd.f32 %v7493_v51, %v15323_v10  ;;  %v15459_v10 = vrot.slane %v9634_v8, 5  ;;  %v8210_v8 = vld [vmem:[#allocation3 + $0x60] sm:$0xf]  ;;  %v7452_v45 = vadd.f32 %v15096_v37, %v15013_v40  ;;  %v9623_v51 = vsel %vm12141_vm8, %v9618_v43, %v9622_v22  ;;  %v15487_v22 = vld [vmem:[#allocation3 + $0x64] sm:$0xf] }
 0x6b2   : > { %v15454_v38 = vpop.f32.mrf.mxu3  ;;  %v15478_v57 = vsel %vm12401_vm14, %v8939_v21, %v8940_v32  ;;  %v8399_v0 = vrot.slane %v8398_v33, 4  ;;  %v7650_v5 = vrot.slane %v7648_v29, 4  ;;  %v9631_v1 = vor.u32 %v9630_v42, %v9627_v44  ;;  %v11953_v21 = vld [vmem:[#allocation3 + $0x8c] sm:$0x1]  ;;  %v15490_v32 = vpop.f32.mrf.mxu0 }
 0x6b3   : > { %11551 = vmatmul.msk.bf16.vlgmr.msra.gmra.mxu0 %vm7159_vm5, %v9994_v15  ;;  %v7532_v15 = vld [vmem:[#allocation3 + $0x84] sm:$0xe]  ;;  %v9641_v47 = vor.u32 %v9640_v34, %v15459_v10  ;;  %v8403_v37 = vrot.slane %v8401_v52, 5  ;;  %v8406_v35 = vshrl.u32 %v8210_v8, 16  ;;  %v7651_v39 = vrot.slane %v11953_v21, 5  ;;  %16748 = vst [vmem:[#allocation33_spill] sm:$0xff] %v15490_v32 }
 0x6b4   : > { %11332 = vmatmul.msk.bf16.gmra.mxu2 %vm7159_vm5, %v14996_v49  ;;  %v15472_v49 = vrot.slane %v8388_v4, 4  ;;  %v8409_v4 = vshll.u32 %v8210_v8, 16  ;;  %v11316_v11 = vrot.slane %v7532_v15, 9  ;;  %v9644_v33 = vshll.u32 %v15118_v14, 16  ;;  %v15569_v32 = vld [vmem:[#allocation3 + $0x70] sm:$0xf] }
 0x6b5   : > { %v9964_v44 = vunpack.c.l.b16 %v9613_v62  ;;  %v9965_v34 = vunpack.c.l.b16 %v9623_v51  ;;  %v8938_v52 = vsel %vm12401_vm14, %v11440_v12, %v8937_v26  ;;  %v8404_v8 = vsel %vm12141_vm8, %v8399_v0, %v8403_v37 }
 0x6b6   : > { %v7652_v14 = vsel %vm12401_vm14, %v7650_v5, %v7651_v39  ;;  %v9642_v15 = vrot.slane %v9641_v47, 4  ;;  %v8408_v62 = vrot.slane %v8406_v35, 4  ;;  %v8411_v51 = vrot.slane %v8409_v4, 5 }
 0x6b7   : > { %11425 = vmatmul.msk.bf16.gmra.mxu3 %vm7159_vm5, %v8660_v53  ;;  %v7801_v36 = vpop.f32.mrf.mxu2  ;;  %v9537_v53 = vld [vmem:[#allocation3 + $0x3c] sm:$0xf]  ;;  %v8415_v30 = vshll.u32 %v15487_v22, 16  ;;  %v7649_v26 = vsel %vm12401_vm14, %v11316_v11, %v7648_v29  ;;  %v9646_v12 = vrot.slane %v9644_v33, 5  ;;  %v7454_v0 = vadd.f32 %v15105_v60, %v15037_v19 }
 0x6b8   : > { %v15482_v3 = vadd.f32 %v7801_v36, %v7452_v45  ;;  %v7496_v40 = vpop.f32.mrf.mxu1  ;;  %v9632_v45 = vrot.slane %v9631_v1, 4  ;;  %v8419_v36 = vshrl.u32 %v15487_v22, 16  ;;  %v8394_v5 = vsel %vm12141_vm8, %v15472_v49, %v15441_v31 }
 0x6b9   : > { %v15485_v43 = vadd.f32 %v7496_v40, %v15351_v13  ;;  %v9030_v13 = vunpack.c.l.b16 %v15478_v57  ;;  %v9649_v57 = vshrl.u32 %v9537_v53, 16  ;;  %v7706_v1 = vunpack.c.l.b16 %v7652_v14 }
 0x6ba   : > { %v15492_v42 = vpop.f32.mrf.mxu3  ;;  %v9637_v47 = vsel %vm12141_vm8, %v9632_v45, %v15459_v10  ;;  %v8636_v37 = vunpack.c.l.b16 %v8404_v8  ;;  %v9647_v29 = vsel %vm12141_vm8, %v9642_v15, %v9646_v12  ;;  %v9658_v35 = vshll.u32 %v15161_v27, 16  ;;  %v15534_v12 = vld [vmem:[#allocation3 + $0x48] sm:$0xf] }
 0x6bb   : > { %16747 = vst [vmem:[#allocation4_spill] sm:$0xff] %v15485_v43  ;;  %11456 = vmatmul.msk.bf16.gmra.mxu1 %vm7159_vm5, %v9056_v9  ;;  %v9652_v9 = vshll.u32 %v9537_v53, 16  ;;  %v9662_v4 = vshrl.u32 %v15161_v27, 16  ;;  %v7705_v11 = vunpack.c.l.b16 %v7649_v26  ;;  %v15523_v21 = vrot.slane %v8415_v30, 5  ;;  %v15532_v27 = vld [vmem:[#allocation3 + $0x48] sm:$0xe] }
 0x6bc   : > { %v8421_v31 = vrot.slane %v8419_v36, 4  ;;  %v8412_v10 = vor.u32 %v8411_v51, %v8408_v62  ;;  %v9651_v39 = vrot.slane %v9649_v57, 4  ;;  %v9995_v14 = vpack.c.b16 %v9965_v34, %v9964_v44  ;;  %v15536_v26 = vld [vmem:[#allocation3 + $0x68] sm:$0x1]  ;;  %v11954_v36 = vld [vmem:[#allocation3 + $0x94] sm:$0xf]  ;;  %v15540_v51 = vpop.f32.mrf.mxu0 }
 0x6bd   : > { %v9654_v33 = vrot.slane %v9652_v9, 5  ;;  %v7726_v8 = vpack.c.b16 %v7706_v1, %v7705_v11  ;;  %v9029_v45 = vunpack.c.l.b16 %v8938_v52  ;;  %v15530_v15 = vunpack.c.l.b16 %v9647_v29  ;;  %16750 = vst [vmem:[#allocation35_spill] sm:$0xff] %v15540_v51  ;;  %v9543_v57 = vld [vmem:[#allocation3 + $0x54] sm:$0xf]  ;;  %v8213_v1 = vld [vmem:[#allocation3 + $0x6c] sm:$0xf] }
 0x6be   : > { %v8635_v30 = vunpack.c.l.b16 %v8394_v5  ;;  %v9664_v62 = vrot.slane %v9662_v4, 4  ;;  %v8422_v34 = vor.u32 %v8421_v31, %v15523_v21  ;;  %v15545_v52 = vunpack.c.l.b16 %v9637_v47  ;;  %v15550_v29 = vld [vmem:[#allocation3 + $0x54] sm:$0xe]  ;;  %v7533_v4 = vld [vmem:[#allocation3 + $0x90] sm:$0xe] }
 0x6bf   : > { %v7803_v40 = vpop.f32.mrf.mxu2  ;;  %v9057_v44 = vpack.c.b16 %v9030_v13, %v9029_v45  ;;  %v15547_v5 = vrot.slane %v8412_v10, 4  ;;  %v9668_v13 = vshll.u32 %v15170_v63, 16  ;;  %v9673_v47 = vshrl.u32 %v15534_v12, 16 }
 0x6c0   : > { %v15521_v19 = vadd.f32 %v7803_v40, %v7454_v0  ;;  %v7498_v60 = vpop.f32.mrf.mxu1  ;;  %v15538_v0 = vrot.slane %v9658_v35, 5  ;;  %v8661_v9 = vpack.c.b16 %v8636_v37, %v8635_v30  ;;  %v9655_v40 = vor.u32 %v9654_v33, %v9651_v39 }
 0x6c1   : > { %v15526_v49 = vadd.f32 %v7498_v60, %v15381_v6  ;;  %v7655_v6 = vrot.slane %v11954_v36, 5  ;;  %v8425_v35 = vshll.u32 %v15536_v26, 16  ;;  %v9697_v10 = vshrl.u32 %v9543_v57, 16 }
 0x6c2   : > { %v15528_v53 = vpop.f32.mrf.mxu3  ;;  %v9665_v31 = vor.u32 %v9664_v62, %v15538_v0  ;;  %v9700_v39 = vshll.u32 %v9543_v57, 16  ;;  %v8944_v45 = vrot.slane %v15353_v54, 5  ;;  %v11317_v36 = vrot.slane %v7533_v4, 9 }
 0x6c3   : > { %16749 = vst [vmem:[#allocation34_spill] sm:$0xff] %v15526_v49  ;;  %11552 = vmatmul.msk.bf16.gmra.mxu0 %vm7159_vm5, %v9995_v14  ;;  %v7657_v11 = vrot.slane %v7655_v6, 4  ;;  %v8423_v14 = vrot.slane %v8422_v34, 4  ;;  %v9656_v51 = vrot.slane %v9655_v40, 4  ;;  %v8427_v57 = vrot.slane %v8425_v35, 5 }
 0x6c4   : > { %11333 = vmatmul.msk.bf16.gmra.mxu2 %vm7159_vm5, %v7726_v8  ;;  %v9676_v54 = vshll.u32 %v15534_v12, 16  ;;  %v9666_v34 = vrot.slane %v9665_v31, 4  ;;  %v9699_v4 = vrot.slane %v9697_v10, 4  ;;  %v8430_v35 = vshrl.u32 %v8213_v1, 16  ;;  %v16753_v31 = vld [vmem:[#allocation16_spill] sm:$0xff] }
 0x6c5   : > { %v8428_v40 = vsel %vm12141_vm8, %v8423_v14, %v8427_v57  ;;  %v7656_v12 = vsel %vm12401_vm14, %v11317_v36, %v7655_v6  ;;  %v8947_v57 = vrot.slane %v15393_v24, 5  ;;  %v8418_v6 = vsel %vm12141_vm8, %v15547_v5, %v15523_v21  ;;  %v9544_v5 = vld [vmem:[#allocation3 + $0x58] sm:$0xf]  ;;  %v9566_v49 = vld [vmem:[#allocation3 + $0xb0] sm:$0x1] }
 0x6c6   : > { %v15591_v30 = vrot.slane %v9676_v54, 5  ;;  %v8432_v54 = vrot.slane %v8430_v35, 4  ;;  %v15619_v35 = vld [vmem:[#allocation3 + $0x74] sm:$0x1] }
 0x6c7   : > { %11426 = vmatmul.msk.bf16.gmra.mxu3 %vm7159_vm5, %v8661_v9  ;;  %v7806_v37 = vpop.f32.mrf.mxu2  ;;  %v11955_v9 = vld [vmem:[#allocation3 + $0x98] sm:$0x1] }
 0x6c8   : > { %v15560_v33 = vadd.f32 %v7806_v37, %v15123_v41  ;;  %v7501_v8 = vpop.f32.mrf.mxu1  ;;  %v7658_v60 = vrot.slane %v11955_v9, 5  ;;  %v9670_v41 = vrot.slane %v9668_v13, 5  ;;  %v15571_v37 = vrot.slane %v9673_v47, 4 }
 0x6c9   : > { %v15565_v63 = vadd.f32 %v7501_v8, %v15416_v7  ;;  %v9702_v8 = vrot.slane %v9700_v39, 5  ;;  %v8946_v9 = vrot.slane %v8944_v45, 4  ;;  %v9661_v13 = vsel %vm12141_vm8, %v9656_v51, %v15538_v0  ;;  %v15588_v39 = vpop.f32.mrf.mxu0 }
 0x6ca   : > { %v15567_v62 = vpop.f32.mrf.mxu3  ;;  %v7659_v7 = vsel %vm12401_vm14, %v7657_v11, %v7658_v60  ;;  %v8433_v47 = vshll.u32 %v8213_v1, 16  ;;  %v8443_v60 = vshrl.u32 %v15569_v32, 16  ;;  %v16752_v11 = vld [vmem:[#allocation18_spill] sm:$0xff]  ;;  %v8638_v0 = vunpack.c.l.b16 %v8428_v40 }
 0x6cb   : > { %16751 = vst [vmem:[#allocation36_spill] sm:$0xff] %v15565_v63  ;;  %11457 = vmatmul.msk.bf16.gmra.mxu1 %vm7159_vm5, %v9057_v44  ;;  %v8439_v44 = vshll.u32 %v15569_v32, 16  ;;  %v7459_v10 = vadd.f32 %v16753_v31, %v16752_v11  ;;  %v7708_v14 = vunpack.c.l.b16 %v7659_v7  ;;  %v9671_v51 = vsel %vm12141_vm8, %v9666_v34, %v9670_v41 }
 0x6cc   : > { %16754 = vst [vmem:[#allocation18_spill] sm:$0xff] %v15588_v39  ;;  %v9703_v1 = vor.u32 %v9702_v8, %v9699_v4  ;;  %v7707_v31 = vunpack.c.l.b16 %v7656_v12  ;;  %v8948_v24 = vsel %vm12401_vm14, %v8946_v9, %v8947_v57  ;;  %v8435_v39 = vrot.slane %v8433_v47, 5  ;;  %v11956_v12 = vld [vmem:[#allocation3 + $0xa0] sm:$0xf] }
 0x6cd   : > { %v15606_v55 = vrot.slane %v8439_v44, 5  ;;  %v8445_v21 = vrot.slane %v8443_v60, 4  ;;  %v15610_v34 = vunpack.c.l.b16 %v9661_v13  ;;  %v8951_v4 = vrot.slane %v15411_v48, 5  ;;  %v15623_v60 = vld [vmem:[#allocation3 + $0x5c] sm:$0x1] }
 0x6ce   : > { %v7727_v41 = vpack.c.b16 %v7708_v14, %v7707_v31  ;;  %v8637_v8 = vunpack.c.l.b16 %v8418_v6  ;;  %v16756_v9 = vrot.slane %v15532_v27, 9  ;;  %v7662_v47 = vrot.slane %v11956_v12, 5 }
 0x6cf   : > { %v7808_v63 = vpop.f32.mrf.mxu2  ;;  %v16757_v48 = vpack.c.b16 %v15530_v15, %v15545_v52  ;;  %v9032_v27 = vunpack.c.l.b16 %v8948_v24  ;;  %v8954_v13 = vrot.slane %v15452_v61, 5  ;;  %v9706_v14 = vshll.u32 %v9544_v5, 16 }
 0x6d0   : > { %v15599_v36 = vadd.f32 %v7808_v63, %v7459_v10  ;;  %v7503_v11 = vpop.f32.mrf.mxu1  ;;  %v15612_v63 = vunpack.c.l.b16 %v9671_v51  ;;  %v15631_v10 = vrot.slane %v9703_v1, 4  ;;  %v8662_v57 = vpack.c.b16 %v8638_v0, %v8637_v8  ;;  %v16760_v8 = vld [vmem:[#allocation31_spill] sm:$0xff] }
 0x6d1   : > { %v15604_v7 = vadd.f32 %v7503_v11, %v15454_v38  ;;  %v8945_v38 = vsel %vm12401_vm14, %v16756_v9, %v8944_v45  ;;  %v9541_v45 = vld [vmem:[#allocation3 + $0x4c] sm:$0xf]  ;;  %v8436_v6 = vor.u32 %v8435_v39, %v8432_v54  ;;  %v8446_v51 = vor.u32 %v8445_v21, %v15606_v55  ;;  %v10194_v21 = vld [vmem:[#allocation3 + $0xa8] sm:$0xe] }
 0x6d2   : > { %v15608_v40 = vpop.f32.mrf.mxu3  ;;  %v9710_v11 = vshrl.u32 %v9544_v5, 16  ;;  %v9031_v31 = vunpack.c.l.b16 %v8945_v38  ;;  %v8953_v9 = vrot.slane %v8951_v4, 4  ;;  %v7664_v24 = vrot.slane %v7662_v47, 4  ;;  %v9565_v54 = vld [vmem:[#allocation3 + $0xac] sm:$0xf]  ;;  %v15645_v5 = vpop.f32.mrf.mxu0 }
 0x6d3   : > { %16755 = vst [vmem:[#allocation16_spill] sm:$0xff] %v15604_v7  ;;  %11553 = vmatmul.msk.bf16.gmra.mxu0 %vm7159_vm5, %v16757_v48  ;;  %v16758_v1 = vrot.slane %v15550_v29, 9  ;;  %v9682_v0 = vshll.u32 %v9541_v45, 16  ;;  %v9686_v15 = vshrl.u32 %v9541_v45, 16  ;;  %v15650_v44 = vrot.slane %v9706_v14, 5 }
 0x6d4   : > { %11334 = vmatmul.msk.bf16.gmra.mxu2 %vm7159_vm5, %v7727_v41  ;;  %v8449_v41 = vshll.u32 %v15619_v35, 16  ;;  %16759 = vst [vmem:[#allocation37_spill] sm:$0xff] %v15645_v5  ;;  %v9058_v48 = vpack.c.b16 %v9032_v27, %v9031_v31  ;;  %v8437_v61 = vrot.slane %v8436_v6, 4  ;;  %v11579_v27 = vrot.slane %v10194_v21, 9  ;;  %v15664_v6 = vld [vmem:[#allocation3 + $0x7c] sm:$0xf] }
 0x6d5   : > { %v15643_v39 = vsel %vm12401_vm14, %v16758_v1, %v8951_v4  ;;  %v8447_v4 = vrot.slane %v8446_v51, 4  ;;  %v11957_v1 = vld [vmem:[#allocation3 + $0xa4] sm:$0x1]  ;;  %v10332_v31 = vrot.slane %v9565_v54, 5  ;;  %v15666_v51 = vrot.slane %v9682_v0, 5  ;;  %v16763_v21 = vld [vmem:[#allocation30_spill] sm:$0xff] }
 0x6d6   : > { %v7665_v7 = vrot.slane %v11957_v1, 5  ;;  %v8451_v45 = vrot.slane %v8449_v41, 5  ;;  %v8442_v41 = vsel %vm12141_vm8, %v8437_v61, %v15606_v55  ;;  %v9709_v55 = vsel %vm12141_vm8, %v15631_v10, %v15650_v44 }
 0x6d7   : > { %11427 = vmatmul.msk.bf16.gmra.mxu3 %vm7159_vm5, %v8662_v57  ;;  %v7811_v52 = vpop.f32.mrf.mxu2  ;;  %v7534_v57 = vld [vmem:[#allocation3 + $0x9c] sm:$0xe]  ;;  %v10333_v1 = vsel %vm12401_vm14, %v11579_v27, %v10332_v31 }
 0x6d8   : > { %v15648_v38 = vadd.f32 %v7811_v52, %v16760_v8  ;;  %v7506_v12 = vpop.f32.mrf.mxu1  ;;  %v15659_v52 = vsel %vm12401_vm14, %v8953_v9, %v8954_v13  ;;  %v9712_v8 = vrot.slane %v9710_v11, 4  ;;  %v11318_v14 = vrot.slane %v7534_v57, 9  ;;  %v16762_v11 = vld [vmem:[#allocation26_spill] sm:$0xff] }
 0x6d9   : > { %v15653_v29 = vadd.f32 %v7506_v12, %v15492_v42  ;;  %v7666_v42 = vsel %vm12401_vm14, %v7664_v24, %v7665_v7  ;;  %v9688_v12 = vrot.slane %v9686_v15, 4  ;;  %v10334_v13 = vrot.slane %v10332_v31, 4  ;;  %v8216_v15 = vld [vmem:[#allocation3 + $0x78] sm:$0xf] }
 0x6da   : > { %v15655_v25 = vpop.f32.mrf.mxu3  ;;  %v10335_v9 = vrot.slane %v9566_v49, 5  ;;  %v7464_v54 = vadd.f32 %v16763_v21, %v16762_v11  ;;  %v8452_v7 = vsel %vm12141_vm8, %v8447_v4, %v8451_v45  ;;  %v7663_v24 = vsel %vm12401_vm14, %v11318_v14, %v7662_v47  ;;  %v9546_v21 = vld [vmem:[#allocation3 + $0x60] sm:$0xf]  ;;  %v15696_v10 = vpop.f32.mrf.mxu0 }
 0x6db   : > { %16761 = vst [vmem:[#allocation31_spill] sm:$0xff] %v15653_v29  ;;  %11458 = vmatmul.msk.bf16.gmra.mxu1 %vm7159_vm5, %v9058_v48  ;;  %v7710_v0 = vunpack.c.l.b16 %v7666_v42  ;;  %v8463_v48 = vshll.u32 %v15664_v6, 16  ;;  %v8467_v57 = vshrl.u32 %v15664_v6, 16  ;;  %v9713_v61 = vor.u32 %v9712_v8, %v15650_v44  ;;  %v9542_v29 = vld [vmem:[#allocation3 + $0x50] sm:$0x1] }
 0x6dc   : > { %v10336_v49 = vsel %vm12401_vm14, %v10334_v13, %v10335_v9  ;;  %v10384_v4 = vunpack.c.l.b16 %v10333_v1  ;;  %v8639_v14 = vunpack.c.l.b16 %v8442_v41  ;;  %v7709_v42 = vunpack.c.l.b16 %v7663_v24  ;;  %16766 = vst [vmem:[#allocation38_spill] sm:$0xff] %v15696_v10  ;;  %v15702_v24 = vld [vmem:[#allocation3 + $0x60] sm:$0xe] }
 0x6dd   : > { %v10385_v31 = vunpack.c.l.b16 %v10336_v49  ;;  %v9689_v11 = vor.u32 %v9688_v12, %v15666_v51  ;;  %v8640_v9 = vunpack.c.l.b16 %v8452_v7  ;;  %v8454_v5 = vshrl.u32 %v8216_v15, 16  ;;  %v11958_v12 = vld [vmem:[#allocation3 + $0xac] sm:$0xf] }
 0x6de   : > { %v7728_v8 = vpack.c.b16 %v7710_v0, %v7709_v42  ;;  %v8457_v1 = vshll.u32 %v8216_v15, 16  ;;  %v8469_v41 = vrot.slane %v8467_v57, 4  ;;  %v7669_v49 = vrot.slane %v11958_v12, 5 }
 0x6df   : > { %v7813_v27 = vpop.f32.mrf.mxu2  ;;  %v15694_v43 = vpack.c.b16 %v10385_v31, %v10384_v4  ;;  %v9724_v7 = vshll.u32 %v9546_v21, 16  ;;  %v16767_v4 = vpack.c.b16 %v15612_v63, %v15610_v34  ;;  %v9033_v0 = vunpack.c.l.b16 %v15643_v39 }
 0x6e0   : > { %v15688_v47 = vadd.f32 %v7813_v27, %v7464_v54  ;;  %v7508_v45 = vpop.f32.mrf.mxu1  ;;  %v15700_v54 = vrot.slane %v8463_v48, 5  ;;  %v9721_v27 = vshrl.u32 %v9546_v21, 16  ;;  %v9034_v15 = vunpack.c.l.b16 %v15659_v52 }
 0x6e1   : > { %v15692_v13 = vadd.f32 %v7508_v45, %v15528_v53  ;;  %16765 = vst [vmem:[#allocation30_spill] sm:$0xff] %v15694_v43  ;;  %v9714_v53 = vrot.slane %v9713_v61, 4  ;;  %v16768_v48 = vor.u32 %v15591_v30, %v15571_v37  ;;  %v9692_v31 = vshll.u32 %v9542_v29, 16  ;;  %v15714_v61 = vld [vmem:[#allocation3 + $0x80] sm:$0x1] }
 0x6e2   : > { %v15698_v44 = vpop.f32.mrf.mxu3  ;;  %v8663_v45 = vpack.c.b16 %v8640_v9, %v8639_v14  ;;  %v16769_v21 = vshll.u32 %v15623_v60, 16  ;;  %v15719_v34 = vunpack.c.l.b16 %v9709_v55  ;;  %v8456_v63 = vrot.slane %v8454_v5, 4  ;;  %v16770_v60 = vld [vmem:[#allocation32_spill] sm:$0xff] }
 0x6e3   : > { %16764 = vst [vmem:[#allocation26_spill] sm:$0xff] %v15692_v13  ;;  %11554 = vmatmul.msk.bf16.gmra.mxu0 %vm7159_vm5, %v16767_v4  ;;  %v9680_v57 = vrot.slane %v16768_v48, 4  ;;  %v8459_v12 = vrot.slane %v8457_v1, 5  ;;  %v8470_v39 = vor.u32 %v8469_v41, %v15700_v54  ;;  %v9690_v52 = vrot.slane %v9689_v11, 4  ;;  %v7535_v41 = vld [vmem:[#allocation3 + $0xa8] sm:$0xe] }
 0x6e4   : > { %11335 = vmatmul.msk.bf16.gmra.mxu2 %vm7159_vm5, %v7728_v8  ;;  %v9718_v8 = vrot.slane %v16769_v21, 5  ;;  %v7671_v37 = vrot.slane %v7669_v49, 4  ;;  %v15725_v14 = vrot.slane %v9721_v27, 4  ;;  %v15727_v9 = vrot.slane %v9724_v7, 5  ;;  %v8219_v48 = vld [vmem:[#allocation3 + $0x84] sm:$0xf] }
 0x6e5   : > { %v9059_v5 = vpack.c.b16 %v9034_v15, %v9033_v0  ;;  %v8473_v1 = vshll.u32 %v15714_v61, 16  ;;  %v9694_v11 = vrot.slane %v9692_v31, 5  ;;  %v8958_v7 = vrot.slane %v15487_v22, 5  ;;  %v15741_v15 = vld [vmem:[#allocation3 + $0x88] sm:$0xf]  ;;  %v15750_v22 = vpop.f32.mrf.mxu0 }
 0x6e6   : > { %v9719_v29 = vsel %vm12141_vm8, %v9714_v53, %v9718_v8  ;;  %v11959_v53 = vld [vmem:[#allocation3 + $0xb0] sm:$0x1] }
 0x6e7   : > { %11428 = vmatmul.msk.bf16.gmra.mxu3 %vm7159_vm5, %v8663_v45  ;;  %v7816_v30 = vpop.f32.mrf.mxu2  ;;  %v16771_v45 = vld [vmem:[#allocation24_spill] sm:$0xff]  ;;  %v7672_v27 = vrot.slane %v11959_v53, 5  ;;  %v9695_v0 = vsel %vm12141_vm8, %v9690_v52, %v9694_v11  ;;  %v15743_v31 = vunpack.c.l.b16 %v9719_v29  ;;  %v8481_v52 = vshll.u32 %v8219_v48, 16 }
 0x6e8   : > { %v15730_v4 = vadd.f32 %v7816_v30, %v16770_v60  ;;  %v7511_v55 = vpop.f32.mrf.mxu1  ;;  %v8157_v21 = vadd.f32 %v16771_v45, %v15341_v46  ;;  %v8460_v30 = vor.u32 %v8459_v12, %v8456_v63  ;;  %v8471_v60 = vrot.slane %v8470_v39, 4  ;;  %16773 = vst [vmem:[#allocation24_spill] sm:$0xff] %v15750_v22  ;;  %v15755_v39 = vld [vmem:[#allocation3 + $0x8c] sm:$0x1] }
 0x6e9   : > { %v15736_v42 = vadd.f32 %v7511_v55, %v15567_v62  ;;  %v11319_v46 = vrot.slane %v7535_v41, 9  ;;  %v7673_v62 = vsel %vm12401_vm14, %v7671_v37, %v7672_v27  ;;  %v8478_v55 = vshrl.u32 %v8219_v48, 16 }
 0x6ea   : > { %v8731_v8 = vpop.f32.mrf.mxu3  ;;  %v8475_v63 = vrot.slane %v8473_v1, 5  ;;  %v9685_v12 = vsel %vm12141_vm8, %v9680_v57, %v15666_v51  ;;  %v9727_v29 = vor.u32 %v15727_v9, %v15725_v14  ;;  %v9971_v41 = vunpack.c.l.b16 %v9695_v0  ;;  %v16774_v9 = vld [vmem:[#allocation7_spill] sm:$0xff] }
 0x6eb   : > { %16772 = vst [vmem:[#allocation32_spill] sm:$0xff] %v15736_v42  ;;  %v15745_v43 = vadd.f32 %v8731_v8, %v8157_v21  ;;  %11459 = vmatmul.msk.bf16.gmra.mxu1 %vm7159_vm5, %v9059_v5  ;;  %v7670_v5 = vsel %vm12401_vm14, %v11319_v46, %v7669_v49  ;;  %v8960_v11 = vrot.slane %v8958_v7, 4  ;;  %v8487_v37 = vshll.u32 %v15741_v15, 16  ;;  %v16775_v46 = vld [vmem:[#allocation27_spill] sm:$0xff]  ;;  %v8851_v42 = vld [vmem:[#allocation3 + $0x6c] sm:$0xe] }
 0x6ec   : > { %v8461_v45 = vrot.slane %v8460_v30, 4  ;;  %v8476_v1 = vsel %vm12141_vm8, %v8471_v60, %v8475_v63  ;;  %v7712_v21 = vunpack.c.l.b16 %v7673_v62  ;;  %v8491_v51 = vshrl.u32 %v15741_v15, 16 }
 0x6ed   : > { %v9970_v53 = vunpack.c.l.b16 %v9685_v12  ;;  %v8961_v48 = vrot.slane %v15536_v26, 5  ;;  %v8480_v27 = vrot.slane %v8478_v55, 4  ;;  %v8497_v14 = vshll.u32 %v15755_v39, 16 }
 0x6ee   : > { %v8466_v30 = vsel %vm12141_vm8, %v8461_v45, %v15700_v54  ;;  %v7711_v0 = vunpack.c.l.b16 %v7670_v5  ;;  %v8483_v60 = vrot.slane %v8481_v52, 5  ;;  %v8158_v62 = vadd.f32 %v16775_v46, %v15374_v16 }
 0x6ef   : > { %v7818_v57 = vpop.f32.mrf.mxu2  ;;  %v8642_v26 = vunpack.c.l.b16 %v8476_v1  ;;  %v8962_v55 = vsel %vm12401_vm14, %v8960_v11, %v8961_v48  ;;  %v15780_v22 = vrot.slane %v8487_v37, 5  ;;  %v8493_v10 = vrot.slane %v8491_v51, 4  ;;  %v11469_v11 = vld [vmem:[%s16596_s2 + $0x18] sm:$0xf]  ;;  %v9547_v1 = vld [vmem:[#allocation3 + $0x64] sm:$0xf] }
 0x6f0   : > { %v15768_v49 = vadd.f32 %v7818_v57, %v16774_v9  ;;  %v7513_v8 = vpop.f32.mrf.mxu1  ;;  %v7729_v57 = vpack.c.b16 %v7712_v21, %v7711_v0  ;;  %v9998_v9 = vpack.c.b16 %v9971_v41, %v9970_v53  ;;  %v8641_v52 = vunpack.c.l.b16 %v8466_v30  ;;  %v15796_v51 = vld [vmem:[#allocation3 + $0x74] sm:$0x1]  ;;  %v15801_v0 = vpop.f32.mrf.mxu0 }
 0x6f1   : > { %v15776_v63 = vadd.f32 %v7513_v8, %v15608_v40  ;;  %v16777_v5 = vrot.slane %v15702_v24, 9  ;;  %v11960_v40 = vld [vmem:[#allocation3 + $0xb8] sm:$0xf]  ;;  %v9036_v41 = vunpack.c.l.b16 %v8962_v55  ;;  %v8484_v37 = vor.u32 %v8483_v60, %v8480_v27  ;;  %v8222_v8 = vld [vmem:[#allocation3 + $0x90] sm:$0xf]  ;;  %16778 = vst [vmem:[#allocation27_spill] sm:$0xff] %v15801_v0 }
 0x6f2   : > { %v8733_v12 = vpop.f32.mrf.mxu3  ;;  %v7676_v45 = vrot.slane %v11960_v40, 5  ;;  %v9405_v24 = vsel %vm7208_vm2, %v11469_v11, 0  ;;  %v11444_v53 = vrot.slane %v8851_v42, 9  ;;  %v8968_v48 = vrot.slane %v15619_v35, 5  ;;  %v9549_v35 = vld [vmem:[#allocation3 + $0x6c] sm:$0xf] }
 0x6f3   : > { %16776 = vst [vmem:[#allocation7_spill] sm:$0xff] %v15776_v63  ;;  %v15782_v54 = vadd.f32 %v8733_v12, %v8158_v62  ;;  %v8959_v16 = vsel %vm12401_vm14, %v16777_v5, %v8958_v7  ;;  %11555 = vmatmul.msk.bf16.gmra.mxu0 %vm7159_vm5, %v9998_v9  ;;  %v8664_v7 = vpack.c.b16 %v8642_v26, %v8641_v52  ;;  %v15799_v30 = vrot.slane %v9727_v29, 4 }
 0x6f4   : > { %11336 = vmatmul.msk.bf16.gmra.mxu2 %vm7159_vm5, %v7729_v57  ;;  %v9035_v46 = vunpack.c.l.b16 %v8959_v16  ;;  %v8494_v27 = vor.u32 %v8493_v10, %v15780_v22  ;;  %v8965_v60 = vrot.slane %v15569_v32, 5  ;;  %v9730_v62 = vshll.u32 %v9547_v1, 16  ;;  %v16779_v57 = vld [vmem:[#allocation19_spill] sm:$0xff]  ;;  %v16780_v10 = vld [vmem:[#allocation14_spill] sm:$0xff] }
 0x6f5   : > { %9414 = vmatpush.bf16.msrb.mxu2 %v9405_v24  ;;  %v8499_v12 = vrot.slane %v8497_v14, 5  ;;  %v7678_v26 = vrot.slane %v7676_v45, 4  ;;  %v9734_v42 = vshrl.u32 %v9547_v1, 16  ;;  %v8485_v5 = vrot.slane %v8484_v37, 4  ;;  %v7536_v16 = vld [vmem:[#allocation3 + $0xb4] sm:$0xe] }
 0x6f6   : > { %v9060_v52 = vpack.c.b16 %v9036_v41, %v9035_v46  ;;  %v8502_v40 = vshrl.u32 %v8222_v8, 16  ;;  %v8159_v32 = vadd.f32 %v16780_v10, %v15409_v2  ;;  %v11961_v24 = vld [vmem:[#allocation3 + $0xbc] sm:$0x1]  ;;  %v8505_v1 = vshll.u32 %v8222_v8, 16  ;;  %v9550_v10 = vld [vmem:[#allocation3 + $0x70] sm:$0xf] }
 0x6f7   : > { %11429 = vmatmul.msk.bf16.gmra.mxu3 %vm7159_vm5, %v8664_v7  ;;  %v7821_v55 = vpop.f32.mrf.mxu2  ;;  %v7679_v14 = vrot.slane %v11961_v24, 5  ;;  %v15815_v7 = vld [vmem:[#allocation3 + $0x94] sm:$0xf]  ;;  %v8966_v41 = vsel %vm12401_vm14, %v11444_v53, %v8965_v60  ;;  %v8967_v37 = vrot.slane %v8965_v60, 4  ;;  %v15819_v46 = vrot.slane %v9730_v62, 5 }
 0x6f8   : > { %v15808_v9 = vadd.f32 %v7821_v55, %v16779_v57  ;;  %v7516_v29 = vpop.f32.mrf.mxu1  ;;  %v8495_v55 = vrot.slane %v8494_v27, 4  ;;  %v8490_v8 = vsel %vm12141_vm8, %v8485_v5, %v15780_v22  ;;  %v8511_v27 = vshll.u32 %v15815_v7, 16  ;;  %v9548_v60 = vld [vmem:[#allocation3 + $0x68] sm:$0x1]  ;;  %v15838_v13 = vpop.f32.mrf.mxu0 }
 0x6f9   : > { %v15813_v11 = vadd.f32 %v7516_v29, %v15655_v25  ;;  %v11320_v25 = vrot.slane %v7536_v16, 9  ;;  %v7680_v2 = vsel %vm12401_vm14, %v7678_v26, %v7679_v14  ;;  %v9736_v29 = vrot.slane %v9734_v42, 4  ;;  %16782 = vst [vmem:[#allocation14_spill] sm:$0xff] %v15838_v13 }
 0x6fa   : > { %v8736_v21 = vpop.f32.mrf.mxu3  ;;  %v8515_v53 = vshrl.u32 %v15815_v7, 16  ;;  %v9745_v62 = vshrl.u32 %v9549_v35, 16  ;;  %v8507_v16 = vrot.slane %v8505_v1, 5  ;;  %v8500_v26 = vsel %vm12141_vm8, %v8495_v55, %v8499_v12  ;;  %v16784_v55 = vld [vmem:[#allocation6_spill] sm:$0xff] }
 0x6fb   : > { %16781 = vst [vmem:[#allocation19_spill] sm:$0xff] %v15813_v11  ;;  %v15821_v57 = vadd.f32 %v8736_v21, %v8159_v32  ;;  %11460 = vmatmul.msk.bf16.gmra.mxu1 %vm7159_vm5, %v9060_v52  ;;  %v7677_v21 = vsel %vm12401_vm14, %v11320_v25, %v7676_v45  ;;  %v8504_v52 = vrot.slane %v8502_v40, 4  ;;  %v9748_v32 = vshll.u32 %v9549_v35, 16  ;;  %v16783_v45 = vld [vmem:[#allocation20_spill] sm:$0xff] }
 0x6fc   : > { %v7714_v42 = vunpack.c.l.b16 %v7680_v2  ;;  %v8969_v24 = vsel %vm12401_vm14, %v8967_v37, %v8968_v48  ;;  %v9754_v22 = vshll.u32 %v9550_v10, 16  ;;  %v8643_v14 = vunpack.c.l.b16 %v8490_v8 }
 0x6fd   : > { %v9737_v0 = vor.u32 %v9736_v29, %v15819_v46  ;;  %v9740_v11 = vshll.u32 %v9548_v60, 16  ;;  %v9758_v63 = vshrl.u32 %v9550_v10, 16  ;;  %v7713_v1 = vunpack.c.l.b16 %v7677_v21  ;;  %v15850_v29 = vld [vmem:[#allocation3 + $0x98] sm:$0x1] }
 0x6fe   : > { %v15843_v25 = vrot.slane %v8511_v27, 5  ;;  %v8517_v12 = vrot.slane %v8515_v53, 4  ;;  %v8160_v48 = vadd.f32 %v16784_v55, %v15447_v59  ;;  %v8644_v2 = vunpack.c.l.b16 %v8500_v26 }
 0x6ff   : > { %v7823_v5 = vpop.f32.mrf.mxu2  ;;  %v8508_v10 = vor.u32 %v8507_v16, %v8504_v52  ;;  %v7730_v60 = vpack.c.b16 %v7714_v42, %v7713_v1  ;;  %v9038_v13 = vunpack.c.l.b16 %v8969_v24  ;;  %v9738_v53 = vrot.slane %v9737_v0, 4 }
 0x700   : > { %v15841_v40 = vadd.f32 %v7823_v5, %v16783_v45  ;;  %v7518_v35 = vpop.f32.mrf.mxu1  ;;  %v15852_v5 = vrot.slane %v9745_v62, 4  ;;  %v15854_v45 = vrot.slane %v9748_v32, 5  ;;  %v15858_v21 = vrot.slane %v9754_v22, 5  ;;  %v15874_v22 = vld [vmem:[#allocation3 + $0xa0] sm:$0xf] }
 0x701   : > { %v15848_v37 = vadd.f32 %v7518_v35, %v15698_v44  ;;  %v15860_v59 = vrot.slane %v9758_v63, 4  ;;  %v16786_v44 = vpack.c.b16 %v15743_v31, %v15719_v34  ;;  %v9037_v52 = vunpack.c.l.b16 %v8966_v41  ;;  %v15876_v34 = vld [vmem:[#allocation3 + $0xb8] sm:$0xf]  ;;  %v10193_v31 = vld [vmem:[#allocation3 + $0x9c] sm:$0xe] }
 0x702   : > { %v8738_v8 = vpop.f32.mrf.mxu3  ;;  %v8518_v62 = vor.u32 %v8517_v12, %v15843_v25  ;;  %v8521_v16 = vshll.u32 %v15850_v29, 16  ;;  %v9733_v0 = vsel %vm12141_vm8, %v15799_v30, %v15819_v46  ;;  %v8665_v32 = vpack.c.b16 %v8644_v2, %v8643_v14  ;;  %16787 = vst [vmem:[#allocation6_spill] sm:$0xff] %v15876_v34  ;;  %v16788_v46 = vld [vmem:[#allocation15_spill] sm:$0xff] }
 0x703   : > { %16785 = vst [vmem:[#allocation20_spill] sm:$0xff] %v15848_v37  ;;  %v15856_v27 = vadd.f32 %v8738_v8, %v8160_v48  ;;  %11556 = vmatmul.msk.bf16.gmra.mxu0 %vm7159_vm5, %v16786_v44  ;;  %v8509_v63 = vrot.slane %v8508_v10, 4  ;;  %v9742_v26 = vrot.slane %v9740_v11, 5  ;;  %v16610_v42 = vrot.slane %v15664_v6, 5  ;;  %v16789_v12 = vld [vmem:[#allocation11_spill] sm:$0xff] }
 0x704   : > { %11337 = vmatmul.msk.bf16.gmra.mxu2 %vm7159_vm5, %v7730_v60  ;;  %v9061_v24 = vpack.c.b16 %v9038_v13, %v9037_v52  ;;  %v15881_v1 = vunpack.c.l.b16 %v9733_v0  ;;  %v10195_v13 = vld [vmem:[#allocation3 + $0xb4] sm:$0xe]  ;;  %v8161_v14 = vadd.f32 %v16788_v46, %v15482_v3  ;;  %v8519_v2 = vrot.slane %v8518_v62, 4  ;;  %v15892_v8 = vld [vmem:[#allocation3 + $0xa4] sm:$0x1] }
 0x705   : > { %v9743_v35 = vsel %vm12141_vm8, %v9738_v53, %v9742_v26  ;;  %v8523_v10 = vrot.slane %v8521_v16, 5  ;;  %v15897_v53 = vld [vmem:[#allocation3 + $0xbc] sm:$0x1]  ;;  %v11578_v44 = vrot.slane %v10193_v31, 9  ;;  %v10325_v52 = vrot.slane %v15874_v22, 5 }
 0x706   : > { %16791 = vst [vmem:[#allocation11_spill] sm:$0xff] %v15897_v53  ;;  %v10339_v0 = vrot.slane %v15876_v34, 5  ;;  %v8514_v62 = vsel %vm12141_vm8, %v8509_v63, %v15843_v25  ;;  %v9975_v16 = vunpack.c.l.b16 %v9743_v35  ;;  %v8974_v26 = vrot.slane %v16610_v42, 4  ;;  %v11583_v31 = vld [vmem:[%s16596_s2 + $0x20] sm:$0xf] }
 0x707   : > { %11430 = vmatmul.msk.bf16.gmra.mxu3 %vm7159_vm5, %v8665_v32  ;;  %v7826_v41 = vpop.f32.mrf.mxu2  ;;  %v15901_v32 = vpop.f32.mrf.mxu0  ;;  %v10328_v25 = vrot.slane %v15892_v8, 5  ;;  %v8852_v63 = vld [vmem:[#allocation3 + $0x78] sm:$0xe]  ;;  %v10457_v35 = vsel %vm7208_vm2, %v11583_v31, 0  ;;  %v8975_v11 = vrot.slane %v15714_v61, 5  ;;  %v16793_v61 = vld [vmem:[#allocation25_spill] sm:$0xff] }
 0x708   : > { %v15890_v55 = vadd.f32 %v7826_v41, %v16789_v12  ;;  %v9129_v48 = vpop.f32.mrf.mxu1  ;;  %16792 = vst [vmem:[#allocation39_spill] sm:$0xff] %v15901_v32  ;;  %v11580_v41 = vrot.slane %v10195_v13, 9  ;;  %v10326_v12 = vsel %vm12401_vm14, %v11578_v44, %v10325_v52  ;;  %10466 = vmatpush.bf16.msra.mxu3 %v10457_v35  ;;  %v11445_v32 = vrot.slane %v8852_v63, 9  ;;  %v8225_v37 = vld [vmem:[#allocation3 + $0x9c] sm:$0xf] }
 0x709   : > { %v15895_v60 = vadd.f32 %v9129_v48, %v15745_v43  ;;  %v15908_v43 = vld [vmem:[#allocation3 + $0xa0] sm:$0xf]  ;;  %v10327_v48 = vrot.slane %v10325_v52, 4  ;;  %v10382_v31 = vunpack.c.l.b16 %v10326_v12  ;;  %v10000_v34 = vpack.c.b16 %v9975_v16, %v15881_v1 }
 0x70a   : > { %v8741_v3 = vpop.f32.mrf.mxu3  ;;  %v10340_v13 = vsel %vm12401_vm14, %v11580_v41, %v10339_v0  ;;  %v8535_v42 = vshll.u32 %v15908_v43, 16  ;;  %v8539_v52 = vshrl.u32 %v15908_v43, 16 }
 0x70b   : > { %16790 = vst [vmem:[#allocation15_spill] sm:$0xff] %v15895_v60  ;;  %v15910_v46 = vadd.f32 %v8741_v3, %v8161_v14  ;;  %11461 = vmatmul.msk.bf16.gmra.mxu1 %vm7159_vm5, %v9061_v24  ;;  %v10341_v14 = vrot.slane %v10339_v0, 4  ;;  %v10342_v3 = vrot.slane %v15897_v53, 5  ;;  %v8524_v24 = vsel %vm12141_vm8, %v8519_v2, %v8523_v10 }
 0x70c   : > { %v10329_v44 = vsel %vm12401_vm14, %v10327_v48, %v10328_v25  ;;  %v8645_v60 = vunpack.c.l.b16 %v8514_v62  ;;  %v10386_v2 = vunpack.c.l.b16 %v10340_v13  ;;  %v8976_v48 = vsel %vm12401_vm14, %v8974_v26, %v8975_v11  ;;  %v16795_v25 = vld [vmem:[#allocation17_spill] sm:$0xff] }
 0x70d   : > { %v10383_v30 = vunpack.c.l.b16 %v10329_v44  ;;  %v10343_v0 = vsel %vm12401_vm14, %v10341_v14, %v10342_v3  ;;  %v8162_v14 = vadd.f32 %v16795_v25, %v15521_v19  ;;  %v8646_v63 = vunpack.c.l.b16 %v8524_v24  ;;  %v11693_v44 = vld [vmem:[#allocation3 + $0x18] sm:$0xff] }
 0x70e   : > { %v10387_v10 = vunpack.c.l.b16 %v10343_v0  ;;  %v8526_v0 = vshrl.u32 %v8225_v37, 16  ;;  %v8541_v1 = vrot.slane %v8539_v52, 4  ;;  %v9040_v52 = vunpack.c.l.b16 %v8976_v48 }
 0x70f   : > { %v7828_v41 = vpop.f32.mrf.mxu2  ;;  %v15938_v12 = vpack.c.b16 %v10383_v30, %v10382_v31  ;;  %v16797_v30 = vor.u32 %v15854_v45, %v15852_v5  ;;  %v15954_v19 = vpop.f32.mrf.mxu0  ;;  %v8666_v24 = vpack.c.b16 %v8646_v63, %v8645_v60  ;;  %v15965_v31 = vld [vmem:[#allocation3 + $0xa4] sm:$0x1]  ;;  %v16801_v60 = vld [vmem:[#allocation23_spill] sm:$0xff] }
 0x710   : > { %v15933_v53 = vadd.f32 %v7828_v41, %v16793_v61  ;;  %v9131_v35 = vpop.f32.mrf.mxu1  ;;  %v15945_v13 = vpack.c.b16 %v10387_v10, %v10386_v2  ;;  %v8529_v41 = vshll.u32 %v8225_v37, 16  ;;  %v15947_v61 = vrot.slane %v8535_v42, 5 }
 0x711   : > { %16794 = vst [vmem:[#allocation25_spill] sm:$0xff] %v15938_v12  ;;  %v15943_v62 = vadd.f32 %v9131_v35, %v15782_v54  ;;  %v9752_v11 = vrot.slane %v16797_v30, 4  ;;  %v16798_v54 = vrot.slane %v15664_v6, 5  ;;  %v16799_v42 = vor.u32 %v15860_v59, %v15858_v21 }
 0x712   : > { %16796 = vst [vmem:[#allocation17_spill] sm:$0xff] %v15945_v13  ;;  %v8743_v3 = vpop.f32.mrf.mxu3  ;;  %v8528_v5 = vrot.slane %v8526_v0, 4  ;;  %v8531_v45 = vrot.slane %v8529_v41, 5  ;;  %v8542_v2 = vor.u32 %v8541_v1, %v15947_v61  ;;  %v16800_v10 = vshll.u32 %v15796_v51, 16  ;;  %v8228_v1 = vld [vmem:[#allocation3 + $0xa8] sm:$0xf] }
 0x713   : > { %v15949_v16 = vadd.f32 %v8743_v3, %v8162_v14  ;;  %11557 = vmatmul.msk.bf16.gmra.mxu0 %vm7159_vm5, %v10000_v34  ;;  %v8973_v37 = vsel %vm12401_vm14, %v11445_v32, %v16798_v54  ;;  %v9762_v26 = vrot.slane %v16799_v42, 4  ;;  %v9757_v59 = vsel %vm12141_vm8, %v9752_v11, %v15858_v21  ;;  %v8853_v32 = vld [vmem:[#allocation3 + $0x84] sm:$0xe]  ;;  %v9553_v3 = vld [vmem:[#allocation3 + $0x7c] sm:$0xf] }
 0x714   : > { %11534 = vmatmul.msk.bf16.vlgmr.msrb.gmra.mxu2 %vm7159_vm5, %v11693_v44  ;;  %v9766_v34 = vrot.slane %v16800_v10, 5  ;;  %v9039_v35 = vunpack.c.l.b16 %v8973_v37  ;;  %v8545_v14 = vshll.u32 %v15965_v31, 16  ;;  %v8979_v51 = vrot.slane %v15741_v15, 5  ;;  %v16802_v44 = vld [vmem:[#allocation8_spill] sm:$0xff] }
 0x715   : > { %v8163_v0 = vadd.f32 %v16802_v44, %v15560_v33  ;;  %v8532_v11 = vor.u32 %v8531_v45, %v8528_v5  ;;  %v8543_v54 = vrot.slane %v8542_v2, 4  ;;  %v9976_v37 = vunpack.c.l.b16 %v9757_v59 }
 0x716   : > { %v9767_v63 = vsel %vm12141_vm8, %v9762_v26, %v9766_v34  ;;  %v9062_v21 = vpack.c.b16 %v9040_v52, %v9039_v35  ;;  %v11446_v42 = vrot.slane %v8853_v32, 9  ;;  %v9552_v26 = vld [vmem:[#allocation3 + $0x78] sm:$0xf]  ;;  %v9778_v34 = vshll.u32 %v9553_v3, 16 }
 0x717   : > { %11431 = vmatmul.msk.bf16.gmra.mxu3 %vm7159_vm5, %v8666_v24  ;;  %v7831_v6 = vpop.f32.mrf.mxu2  ;;  %v15986_v24 = vld [vmem:[#allocation3 + $0xac] sm:$0xf]  ;;  %v9977_v15 = vunpack.c.l.b16 %v9767_v63  ;;  %v9782_v33 = vshrl.u32 %v9553_v3, 16  ;;  %v8982_v52 = vrot.slane %v15755_v39, 5  ;;  %v8553_v35 = vshll.u32 %v8228_v1, 16  ;;  %v15994_v2 = vpop.f32.mrf.mxu0 }
 0x718   : > { %v15975_v48 = vadd.f32 %v7831_v6, %v16801_v60  ;;  %v9134_v25 = vpop.f32.mrf.mxu1  ;;  %v8547_v6 = vrot.slane %v8545_v14, 5  ;;  %v8550_v60 = vshrl.u32 %v8228_v1, 16  ;;  %v8559_v5 = vshll.u32 %v15986_v24, 16 }
 0x719   : > { %v15984_v41 = vadd.f32 %v9134_v25, %v15821_v57  ;;  %v8981_v57 = vrot.slane %v8979_v51, 4  ;;  %v8563_v45 = vshrl.u32 %v15986_v24, 16  ;;  %v8533_v59 = vrot.slane %v8532_v11, 4 }
 0x71a   : > { %v8746_v30 = vpop.f32.mrf.mxu3  ;;  %v8548_v32 = vsel %vm12141_vm8, %v8543_v54, %v8547_v6  ;;  %v9769_v25 = vshrl.u32 %v9552_v26, 16  ;;  %v9772_v63 = vshll.u32 %v9552_v26, 16  ;;  %v10001_v3 = vpack.c.b16 %v9977_v15, %v9976_v37  ;;  %v16803_v37 = vld [vmem:[#allocation9_spill] sm:$0xff] }
 0x71b   : > { %v15988_v10 = vadd.f32 %v8746_v30, %v8163_v0  ;;  %11462 = vmatmul.msk.bf16.gmra.mxu1 %vm7159_vm5, %v9062_v21  ;;  %v8980_v14 = vsel %vm12401_vm14, %v11446_v42, %v8979_v51  ;;  %v16000_v0 = vrot.slane %v9778_v34, 5  ;;  %v9784_v39 = vrot.slane %v9782_v33, 4  ;;  %v16015_v34 = vld [vmem:[#allocation3 + $0x80] sm:$0x1]  ;;  %v11694_v33 = vld [vmem:[#allocation3 + $0x24] sm:$0xff] }
 0x71c   : > { %v8538_v30 = vsel %vm12141_vm8, %v8533_v59, %v15947_v61  ;;  %v8983_v11 = vsel %vm12401_vm14, %v8981_v57, %v8982_v52  ;;  %v8552_v54 = vrot.slane %v8550_v60, 4  ;;  %v8164_v15 = vadd.f32 %v16803_v37, %v15599_v36 }
 0x71d   : > { %v8648_v42 = vunpack.c.l.b16 %v8548_v32  ;;  %v8555_v26 = vrot.slane %v8553_v35, 5  ;;  %v16017_v6 = vrot.slane %v8559_v5, 5  ;;  %v9771_v61 = vrot.slane %v9769_v25, 4  ;;  %v9555_v32 = vld [vmem:[#allocation3 + $0x84] sm:$0xf] }
 0x71e   : > { %v9774_v59 = vrot.slane %v9772_v63, 5  ;;  %v8647_v57 = vunpack.c.l.b16 %v8538_v30  ;;  %v9042_v60 = vunpack.c.l.b16 %v8983_v11  ;;  %v9785_v36 = vor.u32 %v9784_v39, %v16000_v0 }
 0x71f   : > { %v7833_v44 = vpop.f32.mrf.mxu2  ;;  %v9788_v52 = vshll.u32 %v16015_v34, 16  ;;  %v9041_v5 = vunpack.c.l.b16 %v8980_v14  ;;  %v8986_v37 = vrot.slane %v15815_v7, 5 }
 0x720   : > { %v16003_v21 = vadd.f32 %v7833_v44, %v15315_v58  ;;  %v9136_v1 = vpop.f32.mrf.mxu1  ;;  %v8565_v44 = vrot.slane %v8563_v45, 4  ;;  %v8667_v35 = vpack.c.b16 %v8648_v42, %v8647_v57  ;;  %v8556_v45 = vor.u32 %v8555_v26, %v8552_v54 }
 0x721   : > { %v16013_v51 = vadd.f32 %v9136_v1, %v15856_v27  ;;  %v16024_v27 = vld [vmem:[#allocation3 + $0xb0] sm:$0x1]  ;;  %v9775_v63 = vor.u32 %v9774_v59, %v9771_v61  ;;  %v16028_v1 = vld [vmem:[#allocation3 + $0x88] sm:$0xf]  ;;  %v9063_v30 = vpack.c.b16 %v9042_v60, %v9041_v5  ;;  %v9790_v42 = vrot.slane %v9788_v52, 5 }
 0x722   : > { %v8748_v58 = vpop.f32.mrf.mxu3  ;;  %v8566_v25 = vor.u32 %v8565_v44, %v16017_v6  ;;  %v8569_v11 = vshll.u32 %v16024_v27, 16  ;;  %v9793_v26 = vshrl.u32 %v9555_v32, 16  ;;  %v9802_v59 = vshll.u32 %v16028_v1, 16 }
 0x723   : > { %v16019_v13 = vadd.f32 %v8748_v58, %v8164_v15  ;;  %11558 = vmatmul.msk.bf16.gmra.mxu0 %vm7159_vm5, %v10001_v3  ;;  %v9786_v3 = vrot.slane %v9785_v36, 4  ;;  %v16033_v15 = vpop.f32.mrf.mxu0  ;;  %v9796_v58 = vshll.u32 %v9555_v32, 16  ;;  %v9806_v57 = vshrl.u32 %v16028_v1, 16  ;;  %v16050_v32 = vld [vmem:[#allocation3 + $0xb8] sm:$0xf] }
 0x724   : > { %11535 = vmatmul.msk.bf16.gmra.mxu2 %vm7159_vm5, %v11694_v33  ;;  %v16804_v33 = vld [vmem:[#allocation10_spill] sm:$0xff]  ;;  %v8567_v60 = vrot.slane %v8566_v25, 4  ;;  %v9776_v36 = vrot.slane %v9775_v63, 4  ;;  %v8557_v52 = vrot.slane %v8556_v45, 4 }
 0x725   : > { %v8165_v44 = vadd.f32 %v16804_v33, %v15648_v38  ;;  %v9791_v5 = vsel %vm12141_vm8, %v9786_v3, %v9790_v42  ;;  %v8988_v38 = vrot.slane %v8986_v37, 4  ;;  %v9798_v25 = vrot.slane %v9796_v58, 5 }
 0x726   : > { %v8989_v33 = vrot.slane %v15850_v29, 5  ;;  %v9808_v45 = vrot.slane %v9806_v57, 4  ;;  %v9979_v3 = vunpack.c.l.b16 %v9791_v5  ;;  %v8583_v42 = vshll.u32 %v16050_v32, 16  ;;  %v16806_v5 = vld [vmem:[#allocation12_spill] sm:$0xff] }
 0x727   : > { %11432 = vmatmul.msk.bf16.gmra.mxu3 %vm7159_vm5, %v8667_v35  ;;  %v7836_v39 = vpop.f32.mrf.mxu2  ;;  %v8854_v35 = vld [vmem:[#allocation3 + $0x90] sm:$0xe] }
 0x728   : > { %v16036_v14 = vadd.f32 %v7836_v39, %v15345_v50  ;;  %v9139_v54 = vpop.f32.mrf.mxu1  ;;  %v9781_v39 = vsel %vm12141_vm8, %v9776_v36, %v16000_v0  ;;  %v11447_v63 = vrot.slane %v8854_v35, 9  ;;  %v8562_v0 = vsel %vm12141_vm8, %v8557_v52, %v16017_v6  ;;  %v16070_v36 = vld [vmem:[#allocation3 + $0x8c] sm:$0x1] }
 0x729   : > { %v16041_v61 = vadd.f32 %v9139_v54, %v15910_v46  ;;  %v8571_v46 = vrot.slane %v8569_v11, 5  ;;  %v9795_v54 = vrot.slane %v9793_v26, 4  ;;  %v8587_v11 = vshrl.u32 %v16050_v32, 16 }
 0x72a   : > { %v8751_v7 = vpop.f32.mrf.mxu3  ;;  %v9978_v26 = vunpack.c.l.b16 %v9781_v39  ;;  %v8990_v29 = vsel %vm12401_vm14, %v8988_v38, %v8989_v33  ;;  %v8987_v33 = vsel %vm12401_vm14, %v11447_v63, %v8986_v37  ;;  %v16089_v37 = vld [vmem:[#allocation3 + $0xbc] sm:$0x1] }
 0x72b   : > { %v16045_v50 = vadd.f32 %v8751_v7, %v8165_v44  ;;  %11463 = vmatmul.msk.bf16.gmra.mxu1 %vm7159_vm5, %v9063_v30  ;;  %v8231_v44 = vld [vmem:[#allocation3 + $0xb4] sm:$0xf]  ;;  %v16056_v7 = vrot.slane %v9802_v59, 5  ;;  %v8572_v30 = vsel %vm12141_vm8, %v8567_v60, %v8571_v46  ;;  %v9799_v35 = vor.u32 %v9798_v25, %v9795_v54  ;;  %v16078_v39 = vpop.f32.mrf.mxu0 }
 0x72c   : > { %v8574_v57 = vshrl.u32 %v8231_v44, 16  ;;  %v8577_v60 = vshll.u32 %v8231_v44, 16  ;;  %v8166_v46 = vadd.f32 %v16806_v5, %v15688_v47  ;;  %v8650_v6 = vunpack.c.l.b16 %v8572_v30 }
 0x72d   : > { %16805 = vst [vmem:[#allocation23_spill] sm:$0xff] %v16045_v50  ;;  %v9809_v52 = vor.u32 %v9808_v45, %v16056_v7  ;;  %v16082_v44 = vrot.slane %v8583_v42, 5  ;;  %v8589_v54 = vrot.slane %v8587_v11, 4  ;;  %v8649_v47 = vunpack.c.l.b16 %v8562_v0 }
 0x72e   : > { %v9044_v5 = vunpack.c.l.b16 %v8990_v29  ;;  %v8576_v45 = vrot.slane %v8574_v57, 4  ;;  %v8579_v30 = vrot.slane %v8577_v60, 5 }
 0x72f   : > { %v7838_v50 = vpop.f32.mrf.mxu2  ;;  %v9810_v63 = vrot.slane %v9809_v52, 4  ;;  %v8590_v42 = vor.u32 %v8589_v54, %v16082_v44 }
 0x730   : > { %v16068_v58 = vadd.f32 %v7838_v50, %v15377_v28  ;;  %v9141_v59 = vpop.f32.mrf.mxu1  ;;  %v11695_v28 = vld [vmem:[#allocation3 + $0x30] sm:$0xff]  ;;  %v10002_v50 = vpack.c.b16 %v9979_v3, %v9978_v26  ;;  %v8668_v26 = vpack.c.b16 %v8650_v6, %v8649_v47  ;;  %v8593_v6 = vshll.u32 %v16089_v37, 16 }
 0x731   : > { %v16075_v12 = vadd.f32 %v9141_v59, %v15949_v16  ;;  %v9812_v16 = vshll.u32 %v16070_v36, 16  ;;  %v9800_v59 = vrot.slane %v9799_v35, 4  ;;  %v9558_v3 = vld [vmem:[#allocation3 + $0x90] sm:$0xf]  ;;  %v8580_v35 = vor.u32 %v8579_v30, %v8576_v45 }
 0x732   : > { %v8753_v38 = vpop.f32.mrf.mxu3 }
 0x733   : > { %16807 = vst [vmem:[#allocation8_spill] sm:$0xff] %v16075_v12  ;;  %v16084_v25 = vadd.f32 %v8753_v38, %v8166_v46  ;;  %11559 = vmatmul.msk.bf16.gmra.mxu0 %vm7159_vm5, %v10002_v50  ;;  %v9043_v12 = vunpack.c.l.b16 %v8987_v33  ;;  %v9814_v29 = vrot.slane %v9812_v16, 5  ;;  %v16093_v46 = vld [vmem:[#allocation3 + $0x94] sm:$0xf]  ;;  %v9817_v38 = vshrl.u32 %v9558_v3, 16  ;;  %v16809_v50 = vld [vmem:[#allocation21_spill] sm:$0xff] }
 0x734   : > { %11536 = vmatmul.msk.bf16.gmra.mxu2 %vm7159_vm5, %v11695_v28  ;;  %v9820_v28 = vshll.u32 %v9558_v3, 16  ;;  %v9805_v52 = vsel %vm12141_vm8, %v9800_v59, %v16056_v7  ;;  %v8167_v33 = vadd.f32 %v16809_v50, %v15730_v4  ;;  %v9826_v16 = vshll.u32 %v16093_v46, 16  ;;  %v16114_v7 = vld [vmem:[#allocation3 + $0xc4] sm:$0xf]  ;;  %v16117_v59 = vpop.f32.mrf.mxu0 }
 0x735   : > { %16808 = vst [vmem:[#allocation9_spill] sm:$0xff] %v16084_v25  ;;  %v9064_v0 = vpack.c.b16 %v9044_v5, %v9043_v12  ;;  %v9815_v54 = vsel %vm12141_vm8, %v9810_v63, %v9814_v29  ;;  %v8591_v5 = vrot.slane %v8590_v42, 4  ;;  %v9819_v30 = vrot.slane %v9817_v38, 4 }
 0x736   : > { %v9822_v4 = vrot.slane %v9820_v28, 5  ;;  %v8581_v3 = vrot.slane %v8580_v35, 4  ;;  %v9980_v63 = vunpack.c.l.b16 %v9805_v52  ;;  %v8996_v38 = vrot.slane %v15965_v31, 5  ;;  %v8234_v28 = vld [vmem:[#allocation3 + $0xc0] sm:$0xf] }
 0x737   : > { %11433 = vmatmul.msk.bf16.gmra.mxu3 %vm7159_vm5, %v8668_v26  ;;  %v7841_v11 = vpop.f32.mrf.mxu2  ;;  %v8595_v26 = vrot.slane %v8593_v6, 5 }
 0x738   : > { %v16096_v57 = vadd.f32 %v7841_v11, %v15414_v17  ;;  %v9144_v60 = vpop.f32.mrf.mxu1  ;;  %v8993_v17 = vrot.slane %v15908_v43, 5  ;;  %v9981_v43 = vunpack.c.l.b16 %v9815_v54  ;;  %v8855_v11 = vld [vmem:[#allocation3 + $0x9c] sm:$0xe]  ;;  %v8586_v52 = vsel %vm12141_vm8, %v8581_v3, %v16082_v44  ;;  %v16139_v44 = vld [vmem:[#allocation3 + $0x98] sm:$0x1] }
 0x739   : > { %v16105_v12 = vadd.f32 %v9144_v60, %v15988_v10  ;;  %v9830_v10 = vshrl.u32 %v16093_v46, 16  ;;  %v8596_v29 = vsel %vm12141_vm8, %v8591_v5, %v8595_v26  ;;  %v8607_v60 = vshll.u32 %v16114_v7, 16 }
 0x73a   : > { %v8756_v47 = vpop.f32.mrf.mxu3  ;;  %v8995_v42 = vrot.slane %v8993_v17, 4  ;;  %v10003_v54 = vpack.c.b16 %v9981_v43, %v9980_v63  ;;  %v11448_v5 = vrot.slane %v8855_v11, 9  ;;  %v8168_v26 = vadd.f32 %v15319_v56, %v15768_v49  ;;  %v16147_v11 = vld [vmem:[#allocation3 + $0xc8] sm:$0x1] }
 0x73b   : > { %16810 = vst [vmem:[#allocation10_spill] sm:$0xff] %v16105_v12  ;;  %v16111_v45 = vadd.f32 %v8756_v47, %v8167_v33  ;;  %11464 = vmatmul.msk.bf16.gmra.mxu1 %vm7159_vm5, %v9064_v0  ;;  %v8611_v0 = vshrl.u32 %v16114_v7, 16  ;;  %v9823_v33 = vor.u32 %v9822_v4, %v9819_v30  ;;  %v9828_v47 = vrot.slane %v9826_v16, 5  ;;  %v11696_v30 = vld [vmem:[#allocation3 + $0x3c] sm:$0xff] }
 0x73c   : > { %v8652_v31 = vunpack.c.l.b16 %v8596_v29  ;;  %v8997_v16 = vsel %vm12401_vm14, %v8995_v42, %v8996_v38  ;;  %v8598_v4 = vshrl.u32 %v8234_v28, 16  ;;  %v8651_v63 = vunpack.c.l.b16 %v8586_v52  ;;  %v16150_v29 = vpop.f32.mrf.mxu0 }
 0x73d   : > { %16811 = vst [vmem:[#allocation12_spill] sm:$0xff] %v16111_v45  ;;  %v9832_v45 = vrot.slane %v9830_v10, 4  ;;  %v8601_v10 = vshll.u32 %v8234_v28, 16  ;;  %v8613_v12 = vrot.slane %v8611_v0, 4  ;;  %v8994_v49 = vsel %vm12401_vm14, %v11448_v5, %v8993_v17 }
 0x73e   : > { %v9046_v43 = vunpack.c.l.b16 %v8997_v16  ;;  %v9836_v42 = vshll.u32 %v16139_v44, 16  ;;  %v8617_v5 = vshll.u32 %v16147_v11, 16 }
 0x73f   : > { %v7843_v50 = vpop.f32.mrf.mxu2  ;;  %v9833_v56 = vor.u32 %v9832_v45, %v9828_v47  ;;  %v8603_v0 = vrot.slane %v8601_v10, 5  ;;  %v9824_v45 = vrot.slane %v9823_v33, 4 }
 0x740   : > { %v16125_v35 = vadd.f32 %v7843_v50, %v15450_v20  ;;  %v9146_v6 = vpop.f32.mrf.mxu1  ;;  %v16137_v50 = vrot.slane %v8607_v60, 5  ;;  %v8600_v60 = vrot.slane %v8598_v4, 4  ;;  %v9838_v16 = vrot.slane %v9836_v42, 5 }
 0x741   : > { %v16133_v25 = vadd.f32 %v9146_v6, %v16019_v13  ;;  %v8669_v13 = vpack.c.b16 %v8652_v31, %v8651_v63  ;;  %v9045_v6 = vunpack.c.l.b16 %v8994_v49  ;;  %v9834_v52 = vrot.slane %v9833_v56, 4  ;;  %v9561_v49 = vld [vmem:[#allocation3 + $0x9c] sm:$0xf] }
 0x742   : > { %v8758_v20 = vpop.f32.mrf.mxu3  ;;  %v8614_v38 = vor.u32 %v8613_v12, %v16137_v50  ;;  %v8604_v12 = vor.u32 %v8603_v0, %v8600_v60  ;;  %v9829_v10 = vsel %vm12141_vm8, %v9824_v45, %v9828_v47  ;;  %v9841_v45 = vshrl.u32 %v9561_v49, 16 }
 0x743   : > { %v16141_v3 = vadd.f32 %v8758_v20, %v8168_v26  ;;  %11560 = vmatmul.msk.bf16.gmra.mxu0 %vm7159_vm5, %v10003_v54  ;;  %v16812_v54 = vld [vmem:[#allocation4_spill] sm:$0xff]  ;;  %v9000_v20 = vrot.slane %v15986_v24, 5  ;;  %v9839_v56 = vsel %vm12141_vm8, %v9834_v52, %v9838_v16  ;;  %v9982_v24 = vunpack.c.l.b16 %v9829_v10  ;;  %v16815_v16 = vld [vmem:[#allocation13_spill] sm:$0xff]  ;;  %v11697_v10 = vld [vmem:[#allocation3 + $0x48] sm:$0xff] }
 0x744   : > { %11537 = vmatmul.msk.bf16.gmra.mxu2 %vm7159_vm5, %v11696_v30  ;;  %v16813_v26 = vld [vmem:[#allocation28_spill] sm:$0xff]  ;;  %v9065_v30 = vpack.c.b16 %v9046_v43, %v9045_v6  ;;  %v8615_v33 = vrot.slane %v8614_v38, 4  ;;  %v8619_v43 = vrot.slane %v8617_v5, 5  ;;  %v16170_v60 = vpop.f32.mrf.mxu0  ;;  %v8605_v0 = vrot.slane %v8604_v12, 4  ;;  %v8856_v6 = vld [vmem:[#allocation3 + $0xa8] sm:$0xe] }
 0x745   : > { %v8169_v31 = vadd.f32 %v16813_v26, %v15808_v9  ;;  %v9850_v9 = vshll.u32 %v15874_v22, 16  ;;  %v9002_v42 = vrot.slane %v9000_v20, 4  ;;  %v9983_v38 = vunpack.c.l.b16 %v9839_v56 }
 0x746   : > { %v8620_v47 = vsel %vm12141_vm8, %v8615_v33, %v8619_v43  ;;  %v9003_v5 = vrot.slane %v16024_v27, 5 }
 0x747   : > { %11434 = vmatmul.msk.bf16.gmra.mxu3 %vm7159_vm5, %v8669_v13  ;;  %v7846_v28 = vpop.f32.mrf.mxu2  ;;  %v9854_v13 = vshrl.u32 %v15874_v22, 16  ;;  %v16174_v52 = vrot.slane %v9850_v9, 5  ;;  %v8610_v22 = vsel %vm12141_vm8, %v8605_v0, %v16137_v50  ;;  %v8654_v12 = vunpack.c.l.b16 %v8620_v47  ;;  %v11962_v47 = vld [vmem:[#allocation3 + $0x1c] sm:$0xf] }
 0x748   : > { %v16155_v17 = vadd.f32 %v7846_v28, %v16812_v54  ;;  %v9844_v54 = vshll.u32 %v9561_v49, 16  ;;  %v10004_v56 = vpack.c.b16 %v9983_v38, %v9982_v24  ;;  %v11449_v49 = vrot.slane %v8856_v6, 9 }
 0x749   : > { %v9856_v26 = vrot.slane %v9854_v13, 4  ;;  %v9004_v9 = vsel %vm12401_vm14, %v9002_v42, %v9003_v5  ;;  %v9843_v13 = vrot.slane %v9841_v45, 4  ;;  %v9860_v0 = vshll.u32 %v15892_v8, 16 }
 0x74a   : > { %v8761_v4 = vpop.f32.mrf.mxu3  ;;  %v9048_v24 = vunpack.c.l.b16 %v9004_v9  ;;  %v10248_v42 = vrot.slane %v11962_v47, 5  ;;  %v11963_v9 = vld [vmem:[#allocation3 + $0xac] sm:$0xf] }
 0x74b   : > { %v16163_v63 = vadd.f32 %v8761_v4, %v8169_v31  ;;  %11465 = vmatmul.msk.bf16.gmra.mxu1 %vm7159_vm5, %v9065_v30  ;;  %v16814_v31 = vld [vmem:[#allocation34_spill] sm:$0xff]  ;;  %v8170_v4 = vadd.f32 %v16815_v16, %v15841_v40  ;;  %v9857_v50 = vor.u32 %v9856_v26, %v16174_v52  ;;  %v9001_v40 = vsel %vm12401_vm14, %v11449_v49, %v9000_v20  ;;  %v16817_v16 = vld [vmem:[#allocation5_spill] sm:$0xff] }
 0x74c   : > { %v9047_v45 = vunpack.c.l.b16 %v9001_v40  ;;  %v16196_v26 = vpop.f32.mrf.mxu0  ;;  %v8171_v20 = vadd.f32 %v16817_v16, %v15890_v55  ;;  %v9564_v49 = vld [vmem:[#allocation3 + $0xa8] sm:$0xf]  ;;  %v9878_v40 = vshrl.u32 %v11963_v9, 16 }
 0x74f   : > { %v7848_v28 = vpop.f32.mrf.mxu2 }
 0x750   : > { %v16177_v30 = vadd.f32 %v7848_v28, %v16814_v31  ;;  %v8653_v28 = vunpack.c.l.b16 %v8610_v22  ;;  %v9846_v31 = vrot.slane %v9844_v54, 5  ;;  %v9858_v54 = vrot.slane %v9857_v50, 4  ;;  %v16816_v22 = vld [vmem:[#allocation36_spill] sm:$0xff] }
 0x752   : > { %v8763_v33 = vpop.f32.mrf.mxu3  ;;  %v8670_v27 = vpack.c.b16 %v8654_v12, %v8653_v28  ;;  %v9847_v6 = vor.u32 %v9846_v31, %v9843_v13  ;;  %v10182_v12 = vld [vmem:[#allocation3 + $0x18] sm:$0xe]  ;;  %v9874_v28 = vshll.u32 %v11963_v9, 16  ;;  %v16820_v9 = vld [vmem:[#allocation33_spill] sm:$0xff] }
 0x753   : > { %v16187_v43 = vadd.f32 %v8763_v33, %v8170_v4  ;;  %11561 = vmatmul.msk.bf16.gmra.mxu0 %vm7159_vm5, %v10004_v56  ;;  %v9066_v4 = vpack.c.b16 %v9048_v24, %v9047_v45  ;;  %v9862_v33 = vrot.slane %v9860_v0, 5  ;;  %v9007_v56 = vrot.slane %v16050_v32, 5 }
 0x754   : > { %11538 = vmatmul.msk.bf16.gmra.mxu2 %vm7159_vm5, %v11697_v10  ;;  %v10250_v10 = vrot.slane %v10248_v42, 4  ;;  %v9848_v31 = vrot.slane %v9847_v6, 4  ;;  %v11567_v55 = vrot.slane %v10182_v12, 9  ;;  %v9865_v32 = vshrl.u32 %v9564_v49, 16  ;;  %v8857_v6 = vld [vmem:[#allocation3 + $0xb4] sm:$0xe] }
 0x755   : > { %v9863_v50 = vsel %vm12141_vm8, %v9858_v54, %v9862_v33  ;;  %v9009_v45 = vrot.slane %v9007_v56, 4  ;;  %v9880_v54 = vrot.slane %v9878_v40, 4  ;;  %v11450_v40 = vrot.slane %v8857_v6, 9 }
 0x756   : > { %v9853_v0 = vsel %vm12141_vm8, %v9848_v31, %v16174_v52  ;;  %v10249_v33 = vsel %vm12401_vm14, %v11567_v55, %v10248_v42  ;;  %v9010_v52 = vrot.slane %v16089_v37, 5 }
 0x757   : > { %11435 = vmatmul.msk.bf16.gmra.mxu3 %vm7159_vm5, %v8670_v27  ;;  %v7851_v38 = vpop.f32.mrf.mxu2  ;;  %v11964_v27 = vld [vmem:[#allocation3 + $0x20] sm:$0x1]  ;;  %v10360_v42 = vunpack.c.l.b16 %v10249_v33 }
 0x758   : > { %v16199_v5 = vadd.f32 %v7851_v38, %v16816_v22  ;;  %v10251_v24 = vrot.slane %v11964_v27, 5  ;;  %v9985_v38 = vunpack.c.l.b16 %v9863_v50  ;;  %v9868_v22 = vshll.u32 %v9564_v49, 16  ;;  %v16224_v49 = vpop.f32.mrf.mxu0 }
 0x759   : > { %v9867_v50 = vrot.slane %v9865_v32, 4  ;;  %v11965_v32 = vld [vmem:[#allocation3 + $0xb0] sm:$0x1] }
 0x75a   : > { %v8766_v8 = vpop.f32.mrf.mxu3  ;;  %v10252_v47 = vsel %vm12401_vm14, %v10250_v10, %v10251_v24  ;;  %v8172_v10 = vadd.f32 %v16820_v9, %v15933_v53  ;;  %v9008_v53 = vsel %vm12401_vm14, %v11450_v40, %v9007_v56  ;;  %v16823_v9 = vld [vmem:[#allocation35_spill] sm:$0xff]  ;;  %v9014_v40 = vrot.slane %v16114_v7, 5 }
 0x75b   : > { %v16204_v13 = vadd.f32 %v8766_v8, %v8171_v20  ;;  %11466 = vmatmul.msk.bf16.gmra.mxu1 %vm7159_vm5, %v9066_v4  ;;  %v16214_v20 = vrot.slane %v9874_v28, 5  ;;  %v16819_v4 = vld [vmem:[#allocation16_spill] sm:$0xff]  ;;  %v9984_v8 = vunpack.c.l.b16 %v9853_v0  ;;  %v10361_v31 = vunpack.c.l.b16 %v10252_v47 }
 0x75c   : > { %v11698_v28 = vld [vmem:[#allocation3 + $0x54] sm:$0xff]  ;;  %v9884_v47 = vshll.u32 %v11965_v32, 16  ;;  %v9049_v33 = vunpack.c.l.b16 %v9008_v53 }
 0x75d   : > { %16818 = vst [vmem:[#allocation21_spill] sm:$0xff] %v16204_v13  ;;  %v10005_v24 = vpack.c.b16 %v9985_v38, %v9984_v8  ;;  %v9881_v37 = vor.u32 %v9880_v54, %v16214_v20  ;;  %v10392_v55 = vpack.c.b16 %v10361_v31, %v10360_v42  ;;  %v11966_v38 = vld [vmem:[#allocation3 + $0x28] sm:$0xf]  ;;  %v16822_v54 = vld [vmem:[#allocation31_spill] sm:$0xff] }
 0x75e   : > { %v10255_v6 = vrot.slane %v11966_v38, 5  ;;  %v9886_v56 = vrot.slane %v9884_v47, 5 }
 0x75f   : > { %v7853_v16 = vpop.f32.mrf.mxu2  ;;  %v9882_v8 = vrot.slane %v9881_v37, 4  ;;  %v16825_v37 = vld [vmem:[#allocation6_spill] sm:$0xff] }
 0x760   : > { %v16217_v12 = vadd.f32 %v7853_v16, %v16819_v4  ;;  %v9011_v16 = vsel %vm12401_vm14, %v9009_v45, %v9010_v52  ;;  %v9870_v4 = vrot.slane %v9868_v22, 5  ;;  %v9898_v53 = vshll.u32 %v16825_v37, 16 }
 0x761   : > { %v9050_v0 = vunpack.c.l.b16 %v9011_v16  ;;  %v9567_v16 = vld [vmem:[#allocation3 + $0xb4] sm:$0xf]  ;;  %v9887_v42 = vsel %vm12141_vm8, %v9882_v8, %v9886_v56  ;;  %v9016_v8 = vrot.slane %v9014_v40, 4  ;;  %v16826_v56 = vld [vmem:[#allocation26_spill] sm:$0xff] }
 0x762   : > { %v8768_v27 = vpop.f32.mrf.mxu3  ;;  %v9871_v45 = vor.u32 %v9870_v4, %v9867_v50  ;;  %v10183_v4 = vld [vmem:[#allocation3 + $0x24] sm:$0xe]  ;;  %v9889_v47 = vshrl.u32 %v9567_v16, 16  ;;  %v9892_v38 = vshll.u32 %v9567_v16, 16 }
 0x763   : > { %v16228_v13 = vadd.f32 %v8768_v27, %v8172_v10  ;;  %11562 = vmatmul.msk.bf16.gmra.mxu0 %vm7159_vm5, %v10005_v24  ;;  %v8173_v10 = vadd.f32 %v16823_v9, %v15975_v48  ;;  %v9067_v27 = vpack.c.b16 %v9050_v0, %v9049_v33  ;;  %v9902_v48 = vshrl.u32 %v16825_v37, 16  ;;  %v11967_v0 = vld [vmem:[#allocation3 + $0x2c] sm:$0x1]  ;;  %v8858_v9 = vld [vmem:[#allocation3 + $0xc0] sm:$0xe] }
 0x764   : > { %11539 = vmatmul.msk.bf16.gmra.mxu2 %vm7159_vm5, %v11698_v28  ;;  %v10257_v28 = vrot.slane %v10255_v6, 4  ;;  %v9872_v24 = vrot.slane %v9871_v45, 4  ;;  %v10258_v32 = vrot.slane %v11967_v0, 5  ;;  %v11568_v45 = vrot.slane %v10183_v4, 9 }
 0x765   : > { %16821 = vst [vmem:[#allocation4_spill] sm:$0xff] %v16228_v13  ;;  %v9987_v33 = vunpack.c.l.b16 %v9887_v42  ;;  %v9894_v42 = vrot.slane %v9892_v38, 5  ;;  %v16828_v38 = vld [vmem:[#allocation11_spill] sm:$0xff] }
 0x766   : > { %v9877_v7 = vsel %vm12141_vm8, %v9872_v24, %v16214_v20  ;;  %v10256_v37 = vsel %vm12401_vm14, %v11568_v45, %v10255_v6  ;;  %v9017_v20 = vrot.slane %v16147_v11, 5  ;;  %v16827_v24 = vld [vmem:[#allocation18_spill] sm:$0xff]  ;;  %v9908_v45 = vshll.u32 %v16828_v38, 16  ;;  %v16831_v38 = vld [vmem:[#allocation7_spill] sm:$0xff] }
 0x767   : > { %11584 = vmatmul.msk.bf16.vlgmr.msra.gmra.mxu3 %vm7159_vm5, %v10392_v55  ;;  %v7856_v22 = vpop.f32.mrf.mxu2  ;;  %v16249_v55 = vpop.f32.mrf.mxu0  ;;  %v9986_v0 = vunpack.c.l.b16 %v9877_v7  ;;  %v8174_v16 = vadd.f32 %v16827_v24, %v16003_v21 }
 0x768   : > { %v16237_v52 = vadd.f32 %v7856_v22, %v16822_v54  ;;  %v10259_v22 = vsel %vm12401_vm14, %v10257_v28, %v10258_v32  ;;  %v9891_v28 = vrot.slane %v9889_v47, 4 }
 0x769   : > { %v10363_v4 = vunpack.c.l.b16 %v10259_v22  ;;  %v10006_v13 = vpack.c.b16 %v9987_v33, %v9986_v0 }
 0x76a   : > { %v8771_v31 = vpop.f32.mrf.mxu3  ;;  %v9895_v47 = vor.u32 %v9894_v42, %v9891_v28  ;;  %v9571_v28 = vld [vmem:[#allocation3 + $0xc4] sm:$0xf]  ;;  %v9570_v42 = vld [vmem:[#allocation3 + $0xc0] sm:$0xf] }
 0x76b   : > { %v16242_v50 = vadd.f32 %v8771_v31, %v8173_v10  ;;  %11467 = vmatmul.msk.bf16.gmra.mxu1 %vm7159_vm5, %v9067_v27  ;;  %v9900_v10 = vrot.slane %v9898_v53, 5  ;;  %v9904_v27 = vrot.slane %v9902_v48, 4  ;;  %v11451_v53 = vrot.slane %v8858_v9, 9 }
 0x76c   : > { %v9018_v48 = vsel %vm12401_vm14, %v9016_v8, %v9017_v20  ;;  %v9910_v20 = vrot.slane %v9908_v45, 5 }
 0x76d   : > { %16824 = vst [vmem:[#allocation28_spill] sm:$0xff] %v16242_v50  ;;  %v11699_v50 = vld [vmem:[#allocation3 + $0x60] sm:$0xff]  ;;  %v9905_v6 = vor.u32 %v9904_v27, %v9900_v10  ;;  %v9015_v21 = vsel %vm12401_vm14, %v11451_v53, %v9014_v40  ;;  %v9052_v7 = vunpack.c.l.b16 %v9018_v48  ;;  %v16829_v27 = vld [vmem:[#allocation32_spill] sm:$0xff]  ;;  %v9896_v40 = vrot.slane %v9895_v47, 4 }
 0x76e   : > { %v9051_v8 = vunpack.c.l.b16 %v9015_v21  ;;  %v9926_v53 = vshrl.u32 %v9571_v28, 16  ;;  %v9916_v21 = vshll.u32 %v9570_v42, 16 }
 0x76f   : > { %v7858_v54 = vpop.f32.mrf.mxu2  ;;  %v16273_v22 = vpop.f32.mrf.mxu0  ;;  %v9906_v9 = vrot.slane %v9905_v6, 4  ;;  %v9901_v48 = vsel %vm12141_vm8, %v9896_v40, %v9900_v10  ;;  %v9913_v6 = vshrl.u32 %v9570_v42, 16  ;;  %v16833_v42 = vld [vmem:[#allocation29_spill] sm:$0xff] }
 0x770   : > { %v16257_v31 = vadd.f32 %v7858_v54, %v16826_v56  ;;  %v10362_v56 = vunpack.c.l.b16 %v10256_v37  ;;  %v9068_v0 = vpack.c.b16 %v9052_v7, %v9051_v8  ;;  %v9928_v7 = vrot.slane %v9926_v53, 4  ;;  %v16832_v8 = vld [vmem:[#allocation38_spill] sm:$0xff] }
 0x771   : > { %v9915_v40 = vrot.slane %v9913_v6, 4 }
 0x772   : > { %v8773_v32 = vpop.f32.mrf.mxu3  ;;  %v10393_v11 = vpack.c.b16 %v10363_v4, %v10362_v56  ;;  %v9911_v4 = vsel %vm12141_vm8, %v9906_v9, %v9910_v20  ;;  %v8176_v9 = vadd.f32 %v16832_v8, %v16068_v58  ;;  %v9918_v20 = vrot.slane %v9916_v21, 5 }
 0x773   : > { %v16266_v54 = vadd.f32 %v8773_v32, %v8174_v16  ;;  %11563 = vmatmul.msk.bf16.gmra.mxu0 %vm7159_vm5, %v10006_v13  ;;  %v16830_v13 = vld [vmem:[#allocation37_spill] sm:$0xff]  ;;  %v9922_v32 = vshll.u32 %v9571_v28, 16  ;;  %v9989_v56 = vunpack.c.l.b16 %v9911_v4 }
 0x774   : > { %11540 = vmatmul.msk.bf16.gmra.mxu2 %vm7159_vm5, %v11699_v50  ;;  %v8175_v50 = vadd.f32 %v16830_v13, %v16036_v14  ;;  %v11700_v13 = vld [vmem:[#allocation3 + $0x6c] sm:$0xff]  ;;  %v9919_v53 = vor.u32 %v9918_v20, %v9915_v40  ;;  %v16836_v40 = vld [vmem:[#allocation20_spill] sm:$0xff] }
 0x776   : > { %v9920_v8 = vrot.slane %v9919_v53, 4 }
 0x777   : > { %11585 = vmatmul.msk.bf16.gmra.mxu3 %vm7159_vm5, %v10393_v11  ;;  %v7861_v33 = vpop.f32.mrf.mxu2  ;;  %v9924_v11 = vrot.slane %v9922_v32, 5  ;;  %v16288_v47 = vpop.f32.mrf.mxu0 }
 0x778   : > { %v16277_v37 = vadd.f32 %v7861_v33, %v16829_v27  ;;  %v9988_v33 = vunpack.c.l.b16 %v9901_v48  ;;  %v16834_v48 = vld [vmem:[#allocation19_spill] sm:$0xff] }
 0x77a   : > { %v8776_v24 = vpop.f32.mrf.mxu3 }
 0x77b   : > { %v16281_v16 = vadd.f32 %v8776_v24, %v8175_v50  ;;  %11468 = vmatmul.msk.bf16.gmra.mxu1 %vm7159_vm5, %v9068_v0  ;;  %v10007_v50 = vpack.c.b16 %v9989_v56, %v9988_v33  ;;  %v9572_v0 = vld [vmem:[#allocation3 + $0xc8] sm:$0x1]  ;;  %v9929_v24 = vor.u32 %v9928_v7, %v9924_v11  ;;  %v16835_v56 = vld [vmem:[#allocation24_spill] sm:$0xff] }
 0x77c   : > { %v9932_v4 = vshll.u32 %v9572_v0, 16 }
 0x77d   : > { %v9930_v58 = vrot.slane %v9929_v24, 4 }
 0x77e   : > { %v9934_v6 = vrot.slane %v9932_v4, 5 }
 0x77f   : > { %v7863_v14 = vpop.f32.mrf.mxu2  ;;  %v16306_v21 = vpop.f32.mrf.mxu0 }
 0x780   : > { %v16291_v45 = vadd.f32 %v7863_v14, %v16831_v38  ;;  %v8177_v38 = vadd.f32 %v16835_v56, %v16096_v57  ;;  %v16837_v57 = vld [vmem:[#allocation27_spill] sm:$0xff] }
 0x781   : > { %v8178_v4 = vadd.f32 %v16837_v57, %v16125_v35  ;;  %v16839_v35 = vld [vmem:[#allocation14_spill] sm:$0xff] }
 0x782   : > { %v8778_v27 = vpop.f32.mrf.mxu3 }
 0x783   : > { %v16295_v10 = vadd.f32 %v8778_v27, %v8176_v9  ;;  %11564 = vmatmul.msk.bf16.gmra.mxu0 %vm7159_vm5, %v10007_v50  ;;  %v9935_v9 = vsel %vm12141_vm8, %v9930_v58, %v9934_v6  ;;  %v9925_v27 = vsel %vm12141_vm8, %v9920_v8, %v9924_v11  ;;  %v10196_v11 = vld [vmem:[#allocation3 + $0xc0] sm:$0xe]  ;;  %v11968_v58 = vld [vmem:[#allocation3 + $0x4c] sm:$0xf]  ;;  %v10346_v8 = vrot.slane %v9571_v28, 5 }
 0x784   : > { %11541 = vmatmul.msk.bf16.gmra.mxu2 %vm7159_vm5, %v11700_v13  ;;  %v9991_v13 = vunpack.c.l.b16 %v9935_v9  ;;  %v9990_v24 = vunpack.c.l.b16 %v9925_v27  ;;  %v16838_v6 = vld [vmem:[#allocation22_spill] sm:$0xff]  ;;  %v8179_v9 = vadd.f32 %v16839_v35, %v16155_v17 }
 0x787   : > { %11586 = vmatmul.msk.bf16.gmra.mxu3 %vm7159_vm5, %v16833_v42  ;;  %v7866_v32 = vpop.f32.mrf.mxu2  ;;  %v16321_v53 = vpop.f32.mrf.mxu0 }
 0x788   : > { %v16302_v14 = vadd.f32 %v7866_v32, %v16834_v48  ;;  %v11701_v32 = vld [vmem:[#allocation3 + $0x78] sm:$0xff]  ;;  %v10008_v48 = vpack.c.b16 %v9991_v13, %v9990_v24  ;;  %v10349_v24 = vrot.slane %v9572_v0, 5  ;;  %v16840_v0 = vld [vmem:[#allocation39_spill] sm:$0xff] }
 0x78a   : > { %v8781_v7 = vpop.f32.mrf.mxu3 }
 0x78b   : > { %v16308_v33 = vadd.f32 %v8781_v7, %v8177_v38  ;;  %v10276_v38 = vrot.slane %v11968_v58, 5  ;;  %v11581_v7 = vrot.slane %v10196_v11, 9 }
 0x78d   : > { %v10278_v13 = vrot.slane %v10276_v38, 4 }
 0x78f   : > { %v7868_v50 = vpop.f32.mrf.mxu2 }
 0x790   : > { %v16315_v20 = vadd.f32 %v7868_v50, %v16836_v40  ;;  %v10347_v50 = vsel %vm12401_vm14, %v11581_v7, %v10346_v8  ;;  %v10348_v40 = vrot.slane %v10346_v8, 4  ;;  %v8180_v8 = vadd.f32 %v16840_v0, %v16177_v30 }
 0x791   : > { %v10388_v11 = vunpack.c.l.b16 %v10347_v50 }
 0x792   : > { %v8783_v42 = vpop.f32.mrf.mxu3 }
 0x793   : > { %v16319_v56 = vadd.f32 %v8783_v42, %v8178_v4  ;;  %11565 = vmatmul.msk.bf16.gmra.mxu0 %vm7159_vm5, %v10008_v48  ;;  %v10186_v4 = vld [vmem:[#allocation3 + $0x48] sm:$0xe]  ;;  %v11969_v42 = vld [vmem:[#allocation3 + $0x50] sm:$0x1]  ;;  %v10350_v48 = vsel %vm12401_vm14, %v10348_v40, %v10349_v24 }
 0x794   : > { %11542 = vmatmul.msk.bf16.gmra.mxu2 %vm7159_vm5, %v11701_v32  ;;  %v10279_v32 = vrot.slane %v11969_v42, 5  ;;  %v10389_v28 = vunpack.c.l.b16 %v10350_v48  ;;  %v11571_v58 = vrot.slane %v10186_v4, 9 }
 0x796   : > { %v10280_v17 = vsel %vm12401_vm14, %v10278_v13, %v10279_v32  ;;  %v10277_v7 = vsel %vm12401_vm14, %v11571_v58, %v10276_v38  ;;  %v11970_v13 = vld [vmem:[#allocation3 + $0x58] sm:$0xf]  ;;  %v8181_v38 = vadd.f32 %v15954_v19, %v16199_v5 }
 0x797   : > { %11587 = vmatmul.msk.bf16.gmra.mxu3 %vm7159_vm5, %v16838_v6  ;;  %v16337_v6 = vpack.c.b16 %v10389_v28, %v10388_v11  ;;  %v10369_v35 = vunpack.c.l.b16 %v10280_v17  ;;  %v10368_v40 = vunpack.c.l.b16 %v10277_v7  ;;  %v16345_v50 = vpop.f32.mrf.mxu2  ;;  %v10283_v4 = vrot.slane %v11970_v13, 5  ;;  %v10187_v11 = vld [vmem:[#allocation3 + $0x54] sm:$0xe]  ;;  %v11971_v28 = vld [vmem:[#allocation3 + $0x5c] sm:$0x1] }
 0x798   : > { %v10286_v58 = vrot.slane %v11971_v28, 5  ;;  %v11572_v7 = vrot.slane %v10187_v11, 9  ;;  %v11972_v13 = vld [vmem:[#allocation3 + $0x64] sm:$0xf]  ;;  %v10188_v11 = vld [vmem:[#allocation3 + $0x60] sm:$0xe] }
 0x799   : > { %v10396_v24 = vpack.c.b16 %v10369_v35, %v10368_v40  ;;  %v10285_v30 = vrot.slane %v10283_v4, 4  ;;  %v8182_v35 = vadd.f32 %v15994_v2, %v16217_v12  ;;  %v11973_v28 = vld [vmem:[#allocation3 + $0x68] sm:$0x1] }
 0x79a   : > { %v8786_v27 = vpop.f32.mrf.mxu3 }
 0x79b   : > { %v16331_v57 = vadd.f32 %v8786_v27, %v8179_v9  ;;  %v11702_v27 = vld [vmem:[#allocation3 + $0x84] sm:$0xff]  ;;  %v10287_v0 = vsel %vm12401_vm14, %v10285_v30, %v10286_v58  ;;  %v10293_v58 = vrot.slane %v11973_v28, 5 }
 0x79c   : > { %v10371_v19 = vunpack.c.l.b16 %v10287_v0 }
 0x79f   : > { %v16353_v17 = vpop.f32.mrf.mxu2 }
 0x7a2   : > { %v8788_v9 = vpop.f32.mrf.mxu3 }
 0x7a3   : > { %v16343_v42 = vadd.f32 %v8788_v9, %v8180_v8  ;;  %v10284_v8 = vsel %vm12401_vm14, %v11572_v7, %v10283_v4  ;;  %v11703_v9 = vld [vmem:[#allocation3 + $0x90] sm:$0xff]  ;;  %v8183_v4 = vadd.f32 %v16033_v15, %v16237_v52  ;;  %v11573_v7 = vrot.slane %v10188_v11, 9  ;;  %v11704_v52 = vld [vmem:[#allocation3 + $0x9c] sm:$0xff] }
 0x7a4   : > { %11543 = vmatmul.msk.bf16.gmra.mxu2 %vm7159_vm5, %v11702_v27  ;;  %v10370_v40 = vunpack.c.l.b16 %v10284_v8 }
 0x7a7   : > { %11588 = vmatmul.msk.bf16.gmra.mxu3 %vm7159_vm5, %v10396_v24  ;;  %v10397_v24 = vpack.c.b16 %v10371_v19, %v10370_v40 }
 0x7aa   : > { %v8791_v32 = vpop.f32.mrf.mxu3 }
 0x7ab   : > { %v16351_v48 = vadd.f32 %v8791_v32, %v8181_v38  ;;  %v10290_v38 = vrot.slane %v11972_v13, 5  ;;  %v16365_v32 = vpop.f32.mrf.mxu2  ;;  %v11974_v13 = vld [vmem:[#allocation3 + $0x70] sm:$0xf] }
 0x7ad   : > { %v10292_v2 = vrot.slane %v10290_v38, 4  ;;  %v10291_v8 = vsel %vm12401_vm14, %v11573_v7, %v10290_v38  ;;  %v8185_v38 = vadd.f32 %v16117_v59, %v16277_v37 }
 0x7ae   : > { %v10372_v40 = vunpack.c.l.b16 %v10291_v8 }
 0x7af   : > { %v10294_v0 = vsel %vm12401_vm14, %v10292_v2, %v10293_v58  ;;  %v11975_v58 = vld [vmem:[#allocation3 + $0x74] sm:$0x1] }
 0x7b0   : > { %v10373_v19 = vunpack.c.l.b16 %v10294_v0  ;;  %v10300_v7 = vrot.slane %v11975_v58, 5 }
 0x7b2   : > { %v8793_v5 = vpop.f32.mrf.mxu3 }
 0x7b3   : > { %v16361_v27 = vadd.f32 %v8793_v5, %v8182_v35  ;;  %v8184_v35 = vadd.f32 %v16078_v39, %v16257_v31  ;;  %v16377_v5 = vpop.f32.mrf.mxu2 }
 0x7b4   : > { %11544 = vmatmul.msk.bf16.gmra.mxu2 %vm7159_vm5, %v11703_v9  ;;  %v9499_v18 = vadd.f32 %v16377_v5, %v16013_v51 }
 0x7b7   : > { %11589 = vmatmul.msk.bf16.gmra.mxu3 %vm7159_vm5, %v10397_v24  ;;  %v10398_v24 = vpack.c.b16 %v10373_v19, %v10372_v40  ;;  %v11705_v19 = vld [vmem:[#allocation3 + $0xa8] sm:$0xff] }
 0x7ba   : > { %v8796_v30 = vpop.f32.mrf.mxu3 }
 0x7bb   : > { %v16369_v12 = vadd.f32 %v8796_v30, %v8183_v4  ;;  %v10297_v4 = vrot.slane %v11974_v13, 5  ;;  %v10189_v30 = vld [vmem:[#allocation3 + $0x6c] sm:$0xe]  ;;  %v16387_v11 = vpop.f32.mrf.mxu2  ;;  %v11976_v13 = vld [vmem:[#allocation3 + $0x7c] sm:$0xf] }
 0x7bc   : > { %v11574_v28 = vrot.slane %v10189_v30, 9  ;;  %v9500_v51 = vadd.f32 %v16387_v11, %v16041_v61 }
 0x7bd   : > { %v10299_v31 = vrot.slane %v10297_v4, 4 }
 0x7be   : > { %v10298_v8 = vsel %vm12401_vm14, %v11574_v28, %v10297_v4  ;;  %v8187_v4 = vadd.f32 %v16170_v60, %v16302_v14  ;;  %v8188_v60 = vadd.f32 %v16196_v26, %v16315_v20  ;;  %v10191_v20 = vld [vmem:[#allocation3 + $0x84] sm:$0xe] }
 0x7bf   : > { %v10301_v0 = vsel %vm12401_vm14, %v10299_v31, %v10300_v7  ;;  %v10307_v31 = vrot.slane %v16015_v34, 5  ;;  %v16844_v34 = vld [vmem:[#allocation15_spill] sm:$0xff] }
 0x7c0   : > { %v10375_v59 = vunpack.c.l.b16 %v10301_v0 }
 0x7c2   : > { %v8798_v15 = vpop.f32.mrf.mxu3 }
 0x7c3   : > { %v16379_v9 = vadd.f32 %v8798_v15, %v8184_v35  ;;  %v8186_v35 = vadd.f32 %v16150_v29, %v16291_v45 }
 0x7c4   : > { %11545 = vmatmul.msk.bf16.gmra.mxu2 %vm7159_vm5, %v11704_v52  ;;  %v10374_v52 = vunpack.c.l.b16 %v10298_v8 }
 0x7c6   : > { %v10399_v40 = vpack.c.b16 %v10375_v59, %v10374_v52 }
 0x7c7   : > { %11590 = vmatmul.msk.bf16.gmra.mxu3 %vm7159_vm5, %v10398_v24  ;;  %v16398_v24 = vpop.f32.mrf.mxu2 }
 0x7ca   : > { %v8801_v39 = vpop.f32.mrf.mxu3 }
 0x7cb   : > { %v16385_v2 = vadd.f32 %v8801_v39, %v8185_v38  ;;  %v10304_v38 = vrot.slane %v11976_v13, 5  ;;  %v10190_v39 = vld [vmem:[#allocation3 + $0x78] sm:$0xe]  ;;  %v16420_v13 = vpop.f32.mrf.mxu0 }
 0x7cc   : > { %v11575_v28 = vrot.slane %v10190_v39, 9  ;;  %v9497_v39 = vadd.f32 %v16353_v17, %v15943_v62 }
 0x7cd   : > { %v10306_v29 = vrot.slane %v10304_v38, 4 }
 0x7ce   : > { %v10305_v0 = vsel %vm12401_vm14, %v11575_v28, %v10304_v38  ;;  %v16439_v28 = vld [vmem:[#allocation3 + $0xd0] sm:$0xf] }
 0x7cf   : > { %v10308_v58 = vsel %vm12401_vm14, %v10306_v29, %v10307_v31  ;;  %v16408_v7 = vpop.f32.mrf.mxu2  ;;  %v11576_v29 = vrot.slane %v10191_v20, 9  ;;  %v9573_v31 = vld [vmem:[#allocation3 + $0xcc] sm:$0xf]  ;;  %v16451_v20 = vpop.f32.mrf.mxu1 }
 0x7d0   : > { %v10377_v14 = vunpack.c.l.b16 %v10308_v58  ;;  %v16441_v58 = vld [vmem:[#allocation3 + $0xd4] sm:$0x1] }
 0x7d2   : > { %v8803_v37 = vpop.f32.mrf.mxu3 }
 0x7d3   : > { %v16395_v15 = vadd.f32 %v8803_v37, %v8186_v35  ;;  %v11706_v35 = vld [vmem:[#allocation3 + $0xb4] sm:$0xff]  ;;  %v10376_v37 = vunpack.c.l.b16 %v10305_v0  ;;  %v9937_v0 = vshrl.u32 %v9573_v31, 16 }
 0x7d4   : > { %11546 = vmatmul.msk.bf16.gmra.mxu2 %vm7159_vm5, %v11705_v19  ;;  %v9496_v19 = vadd.f32 %v16345_v50, %v16844_v34 }
 0x7d5   : > { %16841 = vst [vmem:[#allocation34_spill] sm:$0xff] %v16395_v15  ;;  %v10400_v52 = vpack.c.b16 %v10377_v14, %v10376_v37  ;;  %v9946_v14 = vshll.u32 %v16439_v28, 16  ;;  %v9939_v17 = vrot.slane %v9937_v0, 4 }
 0x7d6   : > { %v10150_v26 = vadd.f32 %v16224_v49, %v9496_v19  ;;  %v10151_v19 = vadd.f32 %v16249_v55, %v9497_v39 }
 0x7d7   : > { %11591 = vmatmul.msk.bf16.gmra.mxu3 %vm7159_vm5, %v10399_v40  ;;  %v10311_v40 = vrot.slane %v16028_v1, 5  ;;  %v10314_v1 = vrot.slane %v16070_v36, 5  ;;  %v9950_v36 = vshrl.u32 %v16439_v28, 16  ;;  %v9948_v34 = vrot.slane %v9946_v14, 5 }
 0x7d9   : > { %v10313_v38 = vrot.slane %v10311_v40, 4  ;;  %v10312_v62 = vsel %vm12401_vm14, %v11576_v29, %v10311_v40  ;;  %v9498_v29 = vadd.f32 %v16365_v32, %v15984_v41  ;;  %v10192_v41 = vld [vmem:[#allocation3 + $0x90] sm:$0xe] }
 0x7da   : > { %v8806_v30 = vpop.f32.mrf.mxu3 }
 0x7db   : > { %v16403_v45 = vadd.f32 %v8806_v30, %v8187_v4  ;;  %v16425_v4 = vpop.f32.mrf.mxu2  ;;  %v10315_v49 = vsel %vm12401_vm14, %v10313_v38, %v10314_v1 }
 0x7dd   : > { %16842 = vst [vmem:[#allocation13_spill] sm:$0xff] %v16403_v45 }
 0x7e2   : > { %v8808_v8 = vpop.f32.mrf.mxu3 }
 0x7e3   : > { %v16414_v59 = vadd.f32 %v8808_v8, %v8188_v60  ;;  %v9940_v60 = vshll.u32 %v9573_v31, 16  ;;  %v9956_v8 = vshll.u32 %v16441_v58, 16  ;;  %v10378_v31 = vunpack.c.l.b16 %v10312_v62  ;;  %v16453_v15 = vpop.f32.mrf.mxu2 }
 0x7e4   : > { %11547 = vmatmul.msk.bf16.gmra.mxu2 %vm7159_vm5, %v11706_v35  ;;  %v16446_v35 = vpop.f32.mrf.mxu0 }
 0x7e5   : > { %16843 = vst [vmem:[#allocation36_spill] sm:$0xff] %v16414_v59  ;;  %v9942_v37 = vrot.slane %v9940_v60, 5  ;;  %v9958_v45 = vrot.slane %v9956_v8, 5  ;;  %v10152_v8 = vadd.f32 %v16273_v22, %v9498_v29 }
 0x7e7   : > { %11592 = vmatmul.msk.bf16.gmra.mxu3 %vm7159_vm5, %v10400_v52  ;;  %v10379_v52 = vunpack.c.l.b16 %v10315_v49  ;;  %v10318_v49 = vrot.slane %v16093_v46, 5  ;;  %v9151_v46 = vpop.f32.mrf.mxu1 }
 0x7e9   : > { %v10401_v55 = vpack.c.b16 %v10379_v52, %v10378_v31 }
 0x7ea   : > { %v10468_v50 = vpop.f32.mrf.mxu3 }
 0x7eb   : > { %v10548_v30 = vadd.f32 %v10468_v50, %v10150_v26  ;;  %v9952_v26 = vrot.slane %v9950_v36, 4  ;;  %v11707_v50 = vld [vmem:[#allocation3 + $0xc0] sm:$0xff] }
 0x7ec   : > { %v10090_v32 = vpop.f32.mrf.mxu0 }
 0x7ed   : > { %10580 = vst.msk [vmem:[%s16430_s7] sm:$0xff] %vm1195_vm1, %v10548_v30  ;;  %v9943_v30 = vor.u32 %v9942_v37, %v9939_v17  ;;  %v9953_v59 = vor.u32 %v9952_v26, %v9948_v34  ;;  %v10320_v17 = vrot.slane %v10318_v49, 4  ;;  %v11708_v26 = vld [vmem:[#allocation3 + $0xcc] sm:$0xff] }
 0x7ef   : > { %v9944_v40 = vrot.slane %v9943_v30, 4  ;;  %v9954_v39 = vrot.slane %v9953_v59, 4 }
 0x7f1   : > { %v9949_v0 = vsel %vm12141_vm8, %v9944_v40, %v9948_v34  ;;  %v9959_v60 = vsel %vm12141_vm8, %v9954_v39, %v9958_v45  ;;  %v10321_v34 = vrot.slane %v16139_v44, 5  ;;  %v9438_v45 = vpop.f32.mrf.mxu2  ;;  %v9154_v40 = vpop.f32.mrf.mxu1 }
 0x7f2   : > { %v10470_v38 = vpop.f32.mrf.mxu3  ;;  %v9992_v14 = vunpack.c.l.b16 %v9949_v0  ;;  %v9993_v36 = vunpack.c.l.b16 %v9959_v60 }
 0x7f3   : > { %v10549_v1 = vadd.f32 %v10470_v38, %v10151_v19  ;;  %v11577_v19 = vrot.slane %v10192_v41, 9  ;;  %v10322_v22 = vsel %vm12401_vm14, %v10320_v17, %v10321_v34  ;;  %v10153_v38 = vadd.f32 %v16288_v47, %v9499_v18  ;;  %v16846_v41 = vld [vmem:[#allocation10_spill] sm:$0xff] }
 0x7f4   : > { %11548 = vmatmul.msk.bf16.gmra.mxu2 %vm7159_vm5, %v11707_v50  ;;  %v10009_v59 = vpack.c.b16 %v9993_v36, %v9992_v14  ;;  %v10381_v50 = vunpack.c.l.b16 %v10322_v22  ;;  %v10092_v31 = vpop.f32.mrf.mxu0  ;;  %v10154_v47 = vadd.f32 %v16306_v21, %v9500_v51  ;;  %v16847_v21 = vld [vmem:[#allocation25_spill] sm:$0xff] }
 0x7f5   : > { %10581 = vst.msk [vmem:[%s16430_s7 + $0x8] sm:$0xff] %vm1195_vm1, %v10549_v1  ;;  %v10319_v52 = vsel %vm12401_vm14, %v11577_v19, %v10318_v49  ;;  %v16845_v49 = vld [vmem:[#allocation8_spill] sm:$0xff] }
 0x7f6   : > { %11566 = vmatmul.msk.bf16.gmra.mxu0 %vm7159_vm5, %v10009_v59  ;;  %v10380_v1 = vunpack.c.l.b16 %v10319_v52  ;;  %v9501_v0 = vadd.f32 %v16398_v24, %v16845_v49  ;;  %v16848_v52 = vld [vmem:[#allocation23_spill] sm:$0xff]  ;;  %v16851_v49 = vld [vmem:[#allocation12_spill] sm:$0xff] }
 0x7f7   : > { %11593 = vmatmul.msk.bf16.gmra.mxu3 %vm7159_vm5, %v10401_v55 }
 0x7f8   : > { %v10402_v5 = vpack.c.b16 %v10381_v50, %v10380_v1  ;;  %v10155_v11 = vadd.f32 %v16321_v53, %v9501_v0  ;;  %v9503_v53 = vadd.f32 %v16425_v4, %v16133_v25  ;;  %v9219_v0 = vadd.f32 %v9154_v40, %v16851_v49 }
 0x7f9   : > { %v9441_v29 = vpop.f32.mrf.mxu2  ;;  %v9156_v61 = vpop.f32.mrf.mxu1 }
 0x7fa   : > { %v10473_v62 = vpop.f32.mrf.mxu3 }
 0x7fb   : > { %v10550_v37 = vadd.f32 %v10473_v62, %v10152_v8  ;;  %v9502_v62 = vadd.f32 %v16408_v7, %v16846_v41  ;;  %v10157_v7 = vadd.f32 %v16446_v35, %v9503_v53  ;;  %v16850_v35 = vld [vmem:[#allocation9_spill] sm:$0xff] }
 0x7fc   : > { %v10095_v60 = vpop.f32.mrf.mxu0  ;;  %v9218_v1 = vadd.f32 %v9151_v46, %v16850_v35 }
 0x7fd   : > { %10582 = vst.msk [vmem:[%s16430_s7 + $0x10] sm:$0xff] %vm1195_vm1, %v10550_v37  ;;  %v10156_v17 = vadd.f32 %v16420_v13, %v9502_v62 }
 0x801   : > { %v9443_v14 = vpop.f32.mrf.mxu2  ;;  %v9159_v59 = vpop.f32.mrf.mxu1 }
 0x802   : > { %v10475_v44 = vpop.f32.mrf.mxu3  ;;  %v9221_v53 = vadd.f32 %v9159_v59, %v16163_v63 }
 0x803   : > { %v10551_v30 = vadd.f32 %v10475_v44, %v10153_v38 }
 0x804   : > { %11549 = vmatmul.msk.bf16.gmra.mxu2 %vm7159_vm5, %v11708_v26  ;;  %v10097_v24 = vpop.f32.mrf.mxu0  ;;  %v9217_v26 = vadd.f32 %v16451_v20, %v16848_v52  ;;  %v10353_v52 = vrot.slane %v16439_v28, 5 }
 0x805   : > { %10583 = vst.msk [vmem:[%s16430_s7 + $0x18] sm:$0xff] %vm1195_vm1, %v10551_v30  ;;  %v16849_v30 = vld [vmem:[#allocation30_spill] sm:$0xff] }
 0x806   : > { %v9504_v13 = vadd.f32 %v16453_v15, %v9217_v26  ;;  %v10197_v26 = vld [vmem:[#allocation3 + $0xcc] sm:$0xe] }
 0x807   : > { %11594 = vmatmul.msk.bf16.gmra.mxu3 %vm7159_vm5, %v10402_v5 }
 0x808   : > { %v10158_v25 = vadd.f32 %v10090_v32, %v9504_v13 }
 0x809   : > { %v9446_v34 = vpop.f32.mrf.mxu2  ;;  %v9161_v50 = vpop.f32.mrf.mxu1 }
 0x80a   : > { %v10478_v55 = vpop.f32.mrf.mxu3  ;;  %v9222_v63 = vadd.f32 %v9161_v50, %v16187_v43 }
 0x80b   : > { %v10552_v39 = vadd.f32 %v10478_v55, %v10154_v47  ;;  %v9505_v47 = vadd.f32 %v9438_v45, %v9218_v1  ;;  %v16853_v1 = vld [vmem:[#allocation21_spill] sm:$0xff] }
 0x80c   : > { %v10100_v18 = vpop.f32.mrf.mxu0 }
 0x80d   : > { %10584 = vst.msk [vmem:[%s16430_s7 + $0x20] sm:$0xff] %vm1195_vm1, %v10552_v39  ;;  %v10159_v15 = vadd.f32 %v10092_v31, %v9505_v47 }
 0x811   : > { %v9448_v44 = vpop.f32.mrf.mxu2  ;;  %v9164_v20 = vpop.f32.mrf.mxu1 }
 0x812   : > { %v10480_v36 = vpop.f32.mrf.mxu3  ;;  %v9223_v43 = vadd.f32 %v9164_v20, %v16853_v1 }
 0x813   : > { %v10553_v8 = vadd.f32 %v10480_v36, %v10155_v11  ;;  %v9506_v36 = vadd.f32 %v9441_v29, %v9219_v0  ;;  %v16854_v0 = vld [vmem:[#allocation4_spill] sm:$0xff] }
 0x814   : > { %v10102_v5 = vpop.f32.mrf.mxu0 }
 0x815   : > { %10585 = vst.msk [vmem:[%s16430_s7 + $0x28] sm:$0xff] %vm1195_vm1, %v10553_v8  ;;  %v16852_v8 = vld [vmem:[#allocation17_spill] sm:$0xff]  ;;  %v10160_v41 = vadd.f32 %v10095_v60, %v9506_v36  ;;  %v9508_v60 = vadd.f32 %v9446_v34, %v9221_v53 }
 0x817   : > { %11595 = vmatmul.msk.bf16.gmra.mxu3 %vm7159_vm5, %v16847_v21  ;;  %v9220_v21 = vadd.f32 %v9156_v61, %v16141_v3  ;;  %v11582_v3 = vrot.slane %v10197_v26, 9  ;;  %v10355_v61 = vrot.slane %v10353_v52, 4 }
 0x819   : > { %v9451_v55 = vpop.f32.mrf.mxu2  ;;  %v9166_v46 = vpop.f32.mrf.mxu1  ;;  %v9507_v31 = vadd.f32 %v9443_v14, %v9220_v21  ;;  %v10356_v14 = vrot.slane %v16441_v58, 5  ;;  %v10354_v34 = vsel %vm12401_vm14, %v11582_v3, %v10353_v52  ;;  %v16855_v21 = vld [vmem:[#allocation28_spill] sm:$0xff] }
 0x81a   : > { %v10483_v37 = vpop.f32.mrf.mxu3 }
 0x81b   : > { %v10554_v19 = vadd.f32 %v10483_v37, %v10156_v17  ;;  %v10161_v37 = vadd.f32 %v10097_v24, %v9507_v31  ;;  %v10162_v24 = vadd.f32 %v10100_v18, %v9508_v60 }
 0x81c   : > { %v10105_v32 = vpop.f32.mrf.mxu0 }
 0x81d   : > { %10586 = vst.msk [vmem:[%s16430_s7 + $0x30] sm:$0xff] %vm1195_vm1, %v10554_v19 }
 0x821   : > { %v9453_v45 = vpop.f32.mrf.mxu2  ;;  %v9169_v29 = vpop.f32.mrf.mxu1 }
 0x822   : > { %v10485_v22 = vpop.f32.mrf.mxu3 }
 0x823   : > { %v10555_v38 = vadd.f32 %v10485_v22, %v10157_v7 }
 0x824   : > { %v10107_v40 = vpop.f32.mrf.mxu0 }
 0x825   : > { %10587 = vst.msk [vmem:[%s16430_s7 + $0x38] sm:$0xff] %vm1195_vm1, %v10555_v38 }
 0x827   : > { %11596 = vmatmul.msk.bf16.gmra.mxu3 %vm7159_vm5, %v16849_v30  ;;  %v10357_v30 = vsel %vm12401_vm14, %v10355_v61, %v10356_v14 }
 0x828   : > { %v10391_v58 = vunpack.c.l.b16 %v10357_v30 }
 0x829   : > { %v9456_v22 = vpop.f32.mrf.mxu2  ;;  %v9171_v28 = vpop.f32.mrf.mxu1 }
 0x82a   : > { %v10488_v4 = vpop.f32.mrf.mxu3 }
 0x82b   : > { %v10556_v51 = vadd.f32 %v10488_v4, %v10158_v25  ;;  %v9509_v25 = vadd.f32 %v9448_v44, %v9222_v63  ;;  %v10390_v4 = vunpack.c.l.b16 %v10354_v34 }
 0x82c   : > { %v10110_v38 = vpop.f32.mrf.mxu0 }
 0x82d   : > { %10588 = vst.msk [vmem:[%s16430_s7 + $0x40] sm:$0xff] %vm1195_vm1, %v10556_v51  ;;  %v10163_v18 = vadd.f32 %v10102_v5, %v9509_v25  ;;  %v10407_v51 = vpack.c.b16 %v10391_v58, %v10390_v4 }
 0x832   : > { %v10490_v39 = vpop.f32.mrf.mxu3 }
 0x833   : > { %v10557_v11 = vadd.f32 %v10490_v39, %v10159_v15  ;;  %v9510_v15 = vadd.f32 %v9451_v55, %v9223_v43  ;;  %v9174_v39 = vpop.f32.mrf.mxu1 }
 0x834   : > { %v10112_v47 = vpop.f32.mrf.mxu0 }
 0x835   : > { %10589 = vst.msk [vmem:[%s16430_s7 + $0x48] sm:$0xff] %vm1195_vm1, %v10557_v11  ;;  %v10164_v44 = vadd.f32 %v10105_v32, %v9510_v15  ;;  %v9224_v11 = vadd.f32 %v9166_v46, %v16854_v0 }
 0x837   : > { %11597 = vmatmul.msk.bf16.gmra.mxu3 %vm7159_vm5, %v16852_v8  ;;  %v9511_v36 = vadd.f32 %v9453_v45, %v9224_v11  ;;  %v9226_v45 = vadd.f32 %v9171_v28, %v16266_v54 }
 0x83a   : > { %v10493_v62 = vpop.f32.mrf.mxu3 }
 0x83b   : > { %v10558_v17 = vadd.f32 %v10493_v62, %v10160_v41  ;;  %v9176_v8 = vpop.f32.mrf.mxu1  ;;  %v10165_v41 = vadd.f32 %v10107_v40, %v9511_v36 }
 0x83c   : > { %v10115_v20 = vpop.f32.mrf.mxu0 }
 0x83d   : > { %10590 = vst.msk [vmem:[%s16430_s7 + $0x50] sm:$0xff] %vm1195_vm1, %v10558_v17  ;;  %v9225_v17 = vadd.f32 %v9169_v29, %v16855_v21 }
 0x842   : > { %v10495_v19 = vpop.f32.mrf.mxu3 }
 0x843   : > { %v10559_v7 = vadd.f32 %v10495_v19, %v10161_v37  ;;  %v9512_v37 = vadd.f32 %v9456_v22, %v9225_v17  ;;  %v9179_v46 = vpop.f32.mrf.mxu1  ;;  %v9227_v22 = vadd.f32 %v9174_v39, %v16281_v16 }
 0x844   : > { %v10117_v32 = vpop.f32.mrf.mxu0 }
 0x845   : > { %10591 = vst.msk [vmem:[%s16430_s7 + $0x58] sm:$0xff] %vm1195_vm1, %v10559_v7  ;;  %v10166_v19 = vadd.f32 %v10110_v38, %v9512_v37 }
 0x847   : > { %11598 = vmatmul.msk.bf16.gmra.mxu3 %vm7159_vm5, %v16337_v6  ;;  %v9458_v6 = vpop.f32.mrf.mxu2 }
 0x848   : > { %v9513_v60 = vadd.f32 %v9458_v6, %v9226_v45  ;;  %v9229_v6 = vadd.f32 %v9179_v46, %v16308_v33 }
 0x84a   : > { %v10498_v13 = vpop.f32.mrf.mxu3  ;;  %v10167_v40 = vadd.f32 %v10112_v47, %v9513_v60 }
 0x84b   : > { %v10560_v59 = vadd.f32 %v10498_v13, %v10162_v24  ;;  %v9181_v61 = vpop.f32.mrf.mxu1  ;;  %v9228_v13 = vadd.f32 %v9176_v8, %v16295_v10 }
 0x84c   : > { %v10120_v26 = vpop.f32.mrf.mxu0 }
 0x84d   : > { %10592 = vst.msk [vmem:[%s16430_s7 + $0x60] sm:$0xff] %vm1195_vm1, %v10560_v59 }
 0x84f   : > { %v9461_v23 = vpop.f32.mrf.mxu2 }
 0x850   : > { %v9514_v14 = vadd.f32 %v9461_v23, %v9227_v22 }
 0x852   : > { %v10500_v35 = vpop.f32.mrf.mxu3  ;;  %v10168_v38 = vadd.f32 %v10115_v20, %v9514_v14 }
 0x853   : > { %v10561_v50 = vadd.f32 %v10500_v35, %v10163_v18  ;;  %v9184_v34 = vpop.f32.mrf.mxu1 }
 0x854   : > { %v10122_v59 = vpop.f32.mrf.mxu0 }
 0x855   : > { %10593 = vst.msk [vmem:[%s16430_s7 + $0x68] sm:$0xff] %vm1195_vm1, %v10561_v50  ;;  %v9230_v50 = vadd.f32 %v9181_v61, %v16319_v56 }
 0x857   : > { %11599 = vmatmul.msk.bf16.gmra.mxu3 %vm7159_vm5, %v10407_v51  ;;  %v9463_v55 = vpop.f32.mrf.mxu2 }
 0x858   : > { %v9515_v28 = vadd.f32 %v9463_v55, %v9228_v13 }
 0x85a   : > { %v10503_v49 = vpop.f32.mrf.mxu3  ;;  %v10169_v16 = vadd.f32 %v10117_v32, %v9515_v28 }
 0x85b   : > { %v10562_v5 = vadd.f32 %v10503_v49, %v10164_v44  ;;  %v9186_v35 = vpop.f32.mrf.mxu1  ;;  %v9231_v44 = vadd.f32 %v9184_v34, %v16331_v57 }
 0x85c   : > { %v10125_v18 = vpop.f32.mrf.mxu0  ;;  %v9232_v20 = vadd.f32 %v9186_v35, %v16343_v42 }
 0x85d   : > { %10594 = vst.msk [vmem:[%s16430_s7 + $0x70] sm:$0xff] %vm1195_vm1, %v10562_v5 }
 0x85f   : > { %v9466_v52 = vpop.f32.mrf.mxu2 }
 0x860   : > { %v9516_v58 = vadd.f32 %v9466_v52, %v9229_v6 }
 0x862   : > { %v10505_v62 = vpop.f32.mrf.mxu3  ;;  %v10170_v10 = vadd.f32 %v10120_v26, %v9516_v58 }
 0x863   : > { %v10563_v31 = vadd.f32 %v10505_v62, %v10165_v41  ;;  %v9189_v33 = vpop.f32.mrf.mxu1 }
 0x864   : > { %v10127_v15 = vpop.f32.mrf.mxu0  ;;  %v9233_v17 = vadd.f32 %v9189_v33, %v16351_v48 }
 0x865   : > { %10595 = vst.msk [vmem:[%s16430_s7 + $0x78] sm:$0xff] %vm1195_vm1, %v10563_v31 }
 0x867   : > { %v9468_v24 = vpop.f32.mrf.mxu2 }
 0x868   : > { %v9517_v47 = vadd.f32 %v9468_v24, %v9230_v50 }
 0x86a   : > { %v10508_v53 = vpop.f32.mrf.mxu3  ;;  %v10171_v39 = vadd.f32 %v10122_v59, %v9517_v47 }
 0x86b   : > { %v10564_v7 = vadd.f32 %v10508_v53, %v10166_v19  ;;  %v9191_v41 = vpop.f32.mrf.mxu1 }
 0x86c   : > { %v10130_v36 = vpop.f32.mrf.mxu0  ;;  %v9234_v45 = vadd.f32 %v9191_v41, %v16361_v27 }
 0x86d   : > { %10596 = vst.msk [vmem:[%s16430_s7 + $0x80] sm:$0xff] %vm1195_vm1, %v10564_v7 }
 0x86f   : > { %v9471_v30 = vpop.f32.mrf.mxu2 }
 0x870   : > { %v9518_v11 = vadd.f32 %v9471_v30, %v9231_v44 }
 0x872   : > { %v10510_v29 = vpop.f32.mrf.mxu3  ;;  %v10172_v5 = vadd.f32 %v10125_v18, %v9518_v11  ;;  %v16856_v18 = vld [vmem:[#allocation34_spill] sm:$0xff] }
 0x873   : > { %v10565_v3 = vadd.f32 %v10510_v29, %v10167_v40  ;;  %v9194_v19 = vpop.f32.mrf.mxu1 }
 0x874   : > { %v10132_v37 = vpop.f32.mrf.mxu0  ;;  %v9235_v22 = vadd.f32 %v9194_v19, %v16369_v12 }
 0x875   : > { %10597 = vst.msk [vmem:[%s16430_s7 + $0x88] sm:$0xff] %vm1195_vm1, %v10565_v3 }
 0x877   : > { %v9473_v1 = vpop.f32.mrf.mxu2 }
 0x878   : > { %v9519_v55 = vadd.f32 %v9473_v1, %v9232_v20 }
 0x87a   : > { %v10513_v54 = vpop.f32.mrf.mxu3  ;;  %v10173_v21 = vadd.f32 %v10127_v15, %v9519_v55  ;;  %v16857_v15 = vld [vmem:[#allocation13_spill] sm:$0xff] }
 0x87b   : > { %v10566_v63 = vadd.f32 %v10513_v54, %v10168_v38  ;;  %v9196_v40 = vpop.f32.mrf.mxu1 }
 0x87c   : > { %v10135_v60 = vpop.f32.mrf.mxu0  ;;  %v9236_v54 = vadd.f32 %v9196_v40, %v16379_v9 }
 0x87d   : > { %10598 = vst.msk [vmem:[%s16430_s7 + $0x90] sm:$0xff] %vm1195_vm1, %v10566_v63 }
 0x87f   : > { %v9476_v0 = vpop.f32.mrf.mxu2 }
 0x880   : > { %v9520_v32 = vadd.f32 %v9476_v0, %v9233_v17 }
 0x882   : > { %v10515_v25 = vpop.f32.mrf.mxu3  ;;  %v10174_v42 = vadd.f32 %v10130_v36, %v9520_v32  ;;  %v16858_v36 = vld [vmem:[#allocation36_spill] sm:$0xff] }
 0x883   : > { %v10567_v4 = vadd.f32 %v10515_v25, %v10169_v16  ;;  %v9199_v27 = vpop.f32.mrf.mxu1 }
 0x884   : > { %v10137_v14 = vpop.f32.mrf.mxu0  ;;  %v9237_v30 = vadd.f32 %v9199_v27, %v16385_v2 }
 0x885   : > { %10599 = vst.msk [vmem:[%s16430_s7 + $0x98] sm:$0xff] %vm1195_vm1, %v10567_v4 }
 0x887   : > { %v9478_v62 = vpop.f32.mrf.mxu2 }
 0x888   : > { %v9521_v52 = vadd.f32 %v9478_v62, %v9234_v45 }
 0x88a   : > { %v10518_v43 = vpop.f32.mrf.mxu3  ;;  %v10175_v48 = vadd.f32 %v10132_v37, %v9521_v52 }
 0x88b   : > { %v10568_v51 = vadd.f32 %v10518_v43, %v10170_v10  ;;  %v9201_v25 = vpop.f32.mrf.mxu1 }
 0x88c   : > { %v10140_v34 = vpop.f32.mrf.mxu0  ;;  %v9238_v35 = vadd.f32 %v9201_v25, %v16856_v18 }
 0x88d   : > { %10600 = vst.msk [vmem:[%s16430_s7 + $0xa0] sm:$0xff] %vm1195_vm1, %v10568_v51 }
 0x88f   : > { %v9481_v46 = vpop.f32.mrf.mxu2 }
 0x890   : > { %v9522_v61 = vadd.f32 %v9481_v46, %v9235_v22 }
 0x892   : > { %v10520_v23 = vpop.f32.mrf.mxu3  ;;  %v10176_v24 = vadd.f32 %v10135_v60, %v9522_v61 }
 0x893   : > { %v10569_v49 = vadd.f32 %v10520_v23, %v10171_v39  ;;  %v9204_v50 = vpop.f32.mrf.mxu1 }
 0x894   : > { %v10142_v1 = vpop.f32.mrf.mxu0  ;;  %v9239_v39 = vadd.f32 %v9204_v50, %v16857_v15 }
 0x895   : > { %10601 = vst.msk [vmem:[%s16430_s7 + $0xa8] sm:$0xff] %vm1195_vm1, %v10569_v49 }
 0x897   : > { %v9483_v26 = vpop.f32.mrf.mxu2 }
 0x898   : > { %v9523_v59 = vadd.f32 %v9483_v26, %v9236_v54 }
 0x89a   : > { %v10523_v56 = vpop.f32.mrf.mxu3  ;;  %v10177_v28 = vadd.f32 %v10137_v14, %v9523_v59 }
 0x89b   : > { %v10570_v8 = vadd.f32 %v10523_v56, %v10172_v5  ;;  %v9206_v49 = vpop.f32.mrf.mxu1 }
 0x89c   : > { %v10145_v23 = vpop.f32.mrf.mxu0  ;;  %v9240_v56 = vadd.f32 %v9206_v49, %v16858_v36 }
 0x89d   : > { %10602 = vst.msk [vmem:[%s16430_s7 + $0xb0] sm:$0xff] %vm1195_vm1, %v10570_v8 }
 0x89f   : > { %v9486_v63 = vpop.f32.mrf.mxu2 }
 0x8a0   : > { %v9524_v6 = vadd.f32 %v9486_v63, %v9237_v30 }
 0x8a2   : > { %v10525_v57 = vpop.f32.mrf.mxu3  ;;  %v10178_v58 = vadd.f32 %v10140_v34, %v9524_v6 }
 0x8a3   : > { %v10571_v31 = vadd.f32 %v10525_v57, %v10173_v21 }
 0x8a4   : > { %v10147_v41 = vpop.f32.mrf.mxu0 }
 0x8a5   : > { %10603 = vst.msk [vmem:[%s16430_s7 + $0xb8] sm:$0xff] %vm1195_vm1, %v10571_v31 }
 0x8a7   : > { %v9488_v4 = vpop.f32.mrf.mxu2 }
 0x8a8   : > { %v9525_v43 = vadd.f32 %v9488_v4, %v9238_v35 }
 0x8aa   : > { %v10528_v53 = vpop.f32.mrf.mxu3  ;;  %v10179_v2 = vadd.f32 %v10142_v1, %v9525_v43 }
 0x8ab   : > { %v10572_v7 = vadd.f32 %v10528_v53, %v10174_v42 }
 0x8ad   : > { %10604 = vst.msk [vmem:[%s16430_s7 + $0xc0] sm:$0xff] %vm1195_vm1, %v10572_v7 }
 0x8af   : > { %v9491_v51 = vpop.f32.mrf.mxu2 }
 0x8b0   : > { %v9526_v44 = vadd.f32 %v9491_v51, %v9239_v39 }
 0x8b2   : > { %v10530_v29 = vpop.f32.mrf.mxu3  ;;  %v10180_v0 = vadd.f32 %v10145_v23, %v9526_v44 }
 0x8b3   : > { %v10573_v3 = vadd.f32 %v10530_v29, %v10175_v48 }
 0x8b5   : > { %10605 = vst.msk [vmem:[%s16430_s7 + $0xc8] sm:$0xff] %vm1195_vm1, %v10573_v3 }
 0x8b7   : > { %v9493_v11 = vpop.f32.mrf.mxu2 }
 0x8b8   : > { %v9527_v8 = vadd.f32 %v9493_v11, %v9240_v56 }
 0x8ba   : > { %v10533_v38 = vpop.f32.mrf.mxu3  ;;  %v10181_v55 = vadd.f32 %v10147_v41, %v9527_v8 }
 0x8bb   : > { %v10574_v13 = vadd.f32 %v10533_v38, %v10176_v24 }
 0x8bd   : > { %10606 = vst.msk [vmem:[%s16430_s7 + $0xd0] sm:$0xff] %vm1195_vm1, %v10574_v13 }
 0x8c2   : > { %v10535_v12 = vpop.f32.mrf.mxu3 }
 0x8c3   : > { %v10575_v16 = vadd.f32 %v10535_v12, %v10177_v28 }
 0x8c5   : > { %10607 = vst.msk [vmem:[%s16430_s7 + $0xd8] sm:$0xff] %vm1195_vm1, %v10575_v16 }
 0x8ca   : > { %v10538_v9 = vpop.f32.mrf.mxu3 }
 0x8cb   : > { %v10576_v10 = vadd.f32 %v10538_v9, %v10178_v58 }
 0x8cd   : > { %10608 = vst.msk [vmem:[%s16430_s7 + $0xe0] sm:$0xff] %vm1195_vm1, %v10576_v10 }
 0x8d2   : > { %v10540_v47 = vpop.f32.mrf.mxu3 }
 0x8d3   : > { %v10577_v33 = vadd.f32 %v10540_v47, %v10179_v2 }
 0x8d5   : > { %10609 = vst.msk [vmem:[%s16430_s7 + $0xe8] sm:$0xff] %vm1195_vm1, %v10577_v33 }
 0x8da   : > { %v10543_v5 = vpop.f32.mrf.mxu3 }
 0x8db   : > { %v10578_v20 = vadd.f32 %v10543_v5, %v10180_v0 }
 0x8dd   : > { %10610 = vst.msk [vmem:[%s16430_s7 + $0xf0] sm:$0xff] %vm1195_vm1, %v10578_v20 }
 0x8e2   : > { %v10545_v62 = vpop.f32.mrf.mxu3 }
 0x8e3   : > { %v10579_v21 = vadd.f32 %v10545_v62, %v10181_v55 }
 0x8e5   : > { %10611 = vst.msk [vmem:[%s16430_s7 + $0xf8] sm:$0xff] %vm1195_vm1, %v10579_v21 }
 0x8e6 PF: > { %s13_s12 = sadd.s32 1, %s11983_s12  }
 0x8e7   : > { %p10_p4 = scmp.ge.s32.totalorder %s13_s12, 4  }
 0x8e9   :  { %12 = sbr.rel (!%p10_p4) target bundleno = 1 (0x1), region = 82 }

</bundles_post_ra>
